<compile_context>
chip_gen: v5e
topology: v5e:2x2
jax: 0.10.0
libtpu: 0.0.40
codegen_flags: <defaults>
</compile_context>

<pallas_src>
import functools

import jax
import jax.numpy as jnp
import numpy as np
from jax.experimental import pallas as pl
from jax.experimental.pallas import tpu as pltpu

SUB = 8  # output sub-chunks packed along the sublane axis per grid step


def _bayar_kernel(w_ref, x_ref, o_ref, *, cin, cout, ksize, wpad, chunk,
                  n_extra, n_groups):
    """Compute a (Cout, SUB, CHUNK) sublane+lane-dense slab of flattened output.

    w_ref: SMEM (Cout, Cin*K*K) f32   -- tap index t = (c*K + kh)*K + kw
    x_ref: VMEM (1, Cin, n_rows, CHUNK) -- zero-padded flat input (row = chunk)
    o_ref: VMEM (1, Cout, SUB, CHUNK)   -- flat output rows for this group
    """
    if n_groups == 1:
        r0 = 0
    else:
        r0 = pl.multiple_of(pl.program_id(1) * SUB, SUB)

    # One independent f32 accumulator per output channel (ILP = Cout).
    accs = [jnp.zeros((SUB, chunk), jnp.float32) for _ in range(cout)]

    for c in range(cin):
        # Sublane-packed window: SUB consecutive flat chunks plus their halo,
        # assembled from (n_extra + 1) aligned (SUB, CHUNK) VMEM loads.
        parts = [x_ref[0, c, pl.ds(r0 + j, SUB), :].astype(jnp.float32)
                 for j in range(n_extra + 1)]
        win = parts[0] if n_extra == 0 else jnp.concatenate(parts, axis=1)
        for kh in range(ksize):
            for kw in range(ksize):
                d = kh * wpad + kw                      # static lane offset
                tap = win[:, d:d + chunk]               # (SUB, CHUNK) lane shift
                t = (c * ksize + kh) * ksize + kw
                for co in range(cout):
                    # Scalar weight from SMEM: splat comes off the scalar
                    # path, no per-tap XLU broadcast.
                    accs[co] = accs[co] + w_ref[co, t] * tap

    for co in range(cout):
        o_ref[0, co, :, :] = accs[co].astype(o_ref.dtype)


def bayar_constraint(kernel_param, minus1, kernel_size):
    """Pure-JAX glue replicating BayarConv2d.bayarConstraint()."""
    in_ch, out_ch, _ = kernel_param.shape
    # Divide each (in, out) fiber by its sum over the K*K-1 taps (no clamp,
    # same behavior as the PyTorch original).
    k = kernel_param / jnp.sum(kernel_param, axis=2, keepdims=True)
    ctr = kernel_size ** 2 // 2
    real = jnp.concatenate([k[:, :, :ctr], minus1, k[:, :, ctr:]], axis=2)
    # NOTE: plain reshape (NOT a transpose) — intentionally reproduces the
    # PyTorch code's (in, out, K*K) -> (out, in, K, K) quirk.
    real = real.reshape(out_ch, in_ch, kernel_size, kernel_size)
    return real


def _round_up(v, m):
    return ((v + m - 1) // m) * m


def bayar_conv2d(x, kernel_param, minus1, kernel_size=5, stride=1, padding=0):
    """Forward pass of BayarConv2d. x: (N, Cin, H, W), NCHW."""
    K = kernel_size
    real_kernel = bayar_constraint(kernel_param, minus1, K)   # (Cout, Cin, K, K)
    out_ch, in_ch = real_kernel.shape[0], real_kernel.shape[1]

    if padding:
        # TODO(synk): fold zero-padding into in-kernel halo masking to avoid
        # this extra HBM pass for large images.
        x = jnp.pad(x, ((0, 0), (0, 0), (padding, padding), (padding, padding)))

    N, Cin, H, W = x.shape
    assert Cin == in_ch, "input channels must match in_channels"
    Ho, Wo = H - K + 1, W - K + 1
    assert Ho > 0 and Wo > 0

    # Flattened "valid output rows x full padded width" slab; the wrapped tail
    # columns (col >= Wo) of each row are garbage and dropped afterwards.
    M = Ho * W
    HALO = (K - 1) * (W + 1)                 # max tap offset kh*W + kw
    CHUNK = max(128, min(512, _round_up(pl.cdiv(M, SUB), 128)))
    n_groups = pl.cdiv(M, SUB * CHUNK)
    n_extra = pl.cdiv(HALO, CHUNK) if HALO else 0
    n_rows = n_groups * SUB + n_extra        # flat rows of width CHUNK
    Lp = n_rows * CHUNK                      # padded flat length, reads in-bounds

    # TODO(synk): for very large images, row-tile the input block (output rows
    # + K-1 halo rows per block) so VMEM stays bounded on v7x's 64 MiB.
    x_flat = x.reshape(N, Cin, H * W)
    x_flat = jnp.pad(x_flat, ((0, 0), (0, 0), (0, Lp - H * W)))
    x4 = x_flat.reshape(N, Cin, n_rows, CHUNK)

    T = Cin * K * K
    w2 = real_kernel.astype(jnp.float32).reshape(out_ch, T)  # t=(c*K+kh)*K+kw

    itemsize = x4.dtype.itemsize
    in_block = Cin * n_rows * CHUNK * itemsize
    out_block = out_ch * SUB * CHUNK * itemsize
    need = 2 * (in_block + out_block) + (8 << 20)   # double-buffered + headroom
    try:
        cap = int(pltpu.get_tpu_info().vmem_capacity_bytes)
    except Exception:
        cap = 64 << 20
    vmem_limit = int(min(max(need, 32 << 20), int(cap * 0.85)))

    kernel = functools.partial(
        _bayar_kernel, cin=Cin, cout=out_ch, ksize=K, wpad=W,
        chunk=CHUNK, n_extra=n_extra, n_groups=n_groups)

    out4 = pl.pallas_call(
        kernel,
        out_shape=jax.ShapeDtypeStruct((N, out_ch, n_groups * SUB, CHUNK), x.dtype),
        grid=(N, n_groups),
        in_specs=[
            # Tiny weight table lives in SMEM; read as scalars in-kernel.
            pl.BlockSpec(memory_space=pltpu.MemorySpace.SMEM),
            # Whole flat image per step; revisited across the group axis so it
            # is DMA'd only once per image.
            pl.BlockSpec((1, Cin, n_rows, CHUNK), lambda n, g: (n, 0, 0, 0)),
        ],
        out_specs=pl.BlockSpec((1, out_ch, SUB, CHUNK), lambda n, g: (n, 0, g, 0)),
        compiler_params=pltpu.CompilerParams(
            # Batch axis is the megacore axis (avoids duplicating the image
            # DMA across TensorCores); group axis stays sequential.
            dimension_semantics=("parallel", "arbitrary"),
            vmem_limit_bytes=vmem_limit),
    )(w2, x4)

    # Un-flatten: keep the Ho*W slab, drop the wrapped tail columns of each row.
    out = out4.reshape(N, out_ch, n_groups * SUB * CHUNK)[:, :, :M]
    out = out.reshape(N, out_ch, Ho, W)[:, :, :, :Wo]

    if stride != 1:
        # TODO(synk): fold stride into the kernel (strided tap bases) to skip
        # the stride**2 extra FLOPs and this subsampling pass.
        out = out[:, :, ::stride, ::stride]
    return out


if __name__ == "__main__":
    in_channels, out_channels, kernel_size = 3, 4, 5

    key = jax.random.PRNGKey(0)
    k_kernel, k_x = jax.random.split(key)

    # torch.rand -> uniform [0, 1); deterministic synthetic init
    kernel_param = jax.random.uniform(
        k_kernel, (in_channels, out_channels, kernel_size ** 2 - 1), dtype=jnp.float32)
    minus1 = -jnp.ones((in_channels, out_channels, 1), dtype=jnp.float32)

    x = jax.random.normal(k_x, (2, in_channels, 16, 16), dtype=jnp.float32)

    real_kernel = bayar_constraint(kernel_param, minus1, kernel_size)

    for stride, padding in [(1, 0), (2, 2)]:
        out = bayar_conv2d(x, kernel_param, minus1,
                           kernel_size=kernel_size, stride=stride, padding=padding)
        out = jax.block_until_ready(out)

        # Pure-JAX reference (same semantics as F.conv2d: cross-correlation).
        ref = jax.lax.conv_general_dilated(
            x, real_kernel,
            window_strides=(stride, stride),
            padding=[(padding, padding), (padding, padding)],
            dimension_numbers=("NCHW", "OIHW", "NCHW"))

        assert out.shape == ref.shape, (out.shape, ref.shape)
        np.testing.assert_allclose(np.asarray(out), np.asarray(ref),
                                   rtol=1e-4, atol=1e-4)

    print("KERNEL_OK")
</pallas_src>

<mosaic_0001>
module attributes {stable_mosaic.version = 11 : i64} {
  func.func @_bayar_kernel(%arg0: i32, %arg1: i32, %arg2: memref<4x75xf32, #tpu.memory_space<smem>>, %arg3: memref<1x3x9x128xf32, #tpu.memory_space<vmem>>, %arg4: memref<1x4x8x128xf32, #tpu.memory_space<vmem>>) attributes {dimension_semantics = [#tpu.dimension_semantics<parallel>, #tpu.dimension_semantics<arbitrary>], iteration_bounds = array<i64: 2, 1>, scalar_prefetch = 0 : i64, scratch_operands = 0 : i64, tpu.core_type = #tpu.core_type<tc>, window_params = [{transform_indices = @transform_0, window_bounds = array<i64: 4, 75>}, {transform_indices = @transform_1, window_bounds = array<i64: 1, 3, 9, 128>}, {transform_indices = @transform_2, window_bounds = array<i64: 1, 4, 8, 128>}]} {
    %cst = arith.constant 0.000000e+00 : f32
    %0 = vector.broadcast %cst : f32 to vector<8x128xf32>
    %cst_0 = arith.constant 0.000000e+00 : f32
    %1 = vector.broadcast %cst_0 : f32 to vector<8x128xf32>
    %cst_1 = arith.constant 0.000000e+00 : f32
    %2 = vector.broadcast %cst_1 : f32 to vector<8x128xf32>
    %cst_2 = arith.constant 0.000000e+00 : f32
    %3 = vector.broadcast %cst_2 : f32 to vector<8x128xf32>
    %c0 = arith.constant 0 : index
    %c0_3 = arith.constant 0 : index
    %c0_4 = arith.constant 0 : index
    %c0_5 = arith.constant 0 : index
    %4 = vector.load %arg3[%c0, %c0_3, %c0_4, %c0_5] : memref<1x3x9x128xf32, #tpu.memory_space<vmem>>, vector<1x1x8x128xf32>
    %5 = vector.shape_cast %4 : vector<1x1x8x128xf32> to vector<8x128xf32>
    %c0_6 = arith.constant 0 : index
    %c0_7 = arith.constant 0 : index
    %c1 = arith.constant 1 : index
    %c0_8 = arith.constant 0 : index
    %6 = vector.load %arg3[%c0_6, %c0_7, %c1, %c0_8] : memref<1x3x9x128xf32, #tpu.memory_space<vmem>>, vector<1x1x8x128xf32>
    %7 = vector.shape_cast %6 : vector<1x1x8x128xf32> to vector<8x128xf32>
    %8 = tpu.concatenate %5, %7 in 1 : vector<8x128xf32>, vector<8x128xf32> -> vector<8x256xf32>
    %9 = vector.extract_strided_slice %8 {offsets = [0, 0], sizes = [8, 128], strides = [1, 1]} : vector<8x256xf32> to vector<8x128xf32>
    %c0_9 = arith.constant 0 : index
    %c0_10 = arith.constant 0 : index
    %10 = memref.load %arg2[%c0_9, %c0_10] : memref<4x75xf32, #tpu.memory_space<smem>>
    %11 = vector.broadcast %10 : f32 to vector<8x128xf32>
    %12 = arith.mulf %11, %9 : vector<8x128xf32>
    %13 = arith.addf %0, %12 : vector<8x128xf32>
    %c1_11 = arith.constant 1 : index
    %c0_12 = arith.constant 0 : index
    %14 = memref.load %arg2[%c1_11, %c0_12] : memref<4x75xf32, #tpu.memory_space<smem>>
    %15 = vector.broadcast %14 : f32 to vector<8x128xf32>
    %16 = arith.mulf %15, %9 : vector<8x128xf32>
    %17 = arith.addf %1, %16 : vector<8x128xf32>
    %c2 = arith.constant 2 : index
    %c0_13 = arith.constant 0 : index
    %18 = memref.load %arg2[%c2, %c0_13] : memref<4x75xf32, #tpu.memory_space<smem>>
    %19 = vector.broadcast %18 : f32 to vector<8x128xf32>
    %20 = arith.mulf %19, %9 : vector<8x128xf32>
    %21 = arith.addf %2, %20 : vector<8x128xf32>
    %c3 = arith.constant 3 : index
    %c0_14 = arith.constant 0 : index
    %22 = memref.load %arg2[%c3, %c0_14] : memref<4x75xf32, #tpu.memory_space<smem>>
    %23 = vector.broadcast %22 : f32 to vector<8x128xf32>
    %24 = arith.mulf %23, %9 : vector<8x128xf32>
    %25 = arith.addf %3, %24 : vector<8x128xf32>
    %26 = vector.extract_strided_slice %8 {offsets = [0, 1], sizes = [8, 128], strides = [1, 1]} : vector<8x256xf32> to vector<8x128xf32>
    %c0_15 = arith.constant 0 : index
    %c1_16 = arith.constant 1 : index
    %27 = memref.load %arg2[%c0_15, %c1_16] : memref<4x75xf32, #tpu.memory_space<smem>>
    %28 = vector.broadcast %27 : f32 to vector<8x128xf32>
    %29 = arith.mulf %28, %26 : vector<8x128xf32>
    %30 = arith.addf %13, %29 : vector<8x128xf32>
    %c1_17 = arith.constant 1 : index
    %c1_18 = arith.constant 1 : index
    %31 = memref.load %arg2[%c1_17, %c1_18] : memref<4x75xf32, #tpu.memory_space<smem>>
    %32 = vector.broadcast %31 : f32 to vector<8x128xf32>
    %33 = arith.mulf %32, %26 : vector<8x128xf32>
    %34 = arith.addf %17, %33 : vector<8x128xf32>
    %c2_19 = arith.constant 2 : index
    %c1_20 = arith.constant 1 : index
    %35 = memref.load %arg2[%c2_19, %c1_20] : memref<4x75xf32, #tpu.memory_space<smem>>
    %36 = vector.broadcast %35 : f32 to vector<8x128xf32>
    %37 = arith.mulf %36, %26 : vector<8x128xf32>
    %38 = arith.addf %21, %37 : vector<8x128xf32>
    %c3_21 = arith.constant 3 : index
    %c1_22 = arith.constant 1 : index
    %39 = memref.load %arg2[%c3_21, %c1_22] : memref<4x75xf32, #tpu.memory_space<smem>>
    %40 = vector.broadcast %39 : f32 to vector<8x128xf32>
    %41 = arith.mulf %40, %26 : vector<8x128xf32>
    %42 = arith.addf %25, %41 : vector<8x128xf32>
    %43 = vector.extract_strided_slice %8 {offsets = [0, 2], sizes = [8, 128], strides = [1, 1]} : vector<8x256xf32> to vector<8x128xf32>
    %c0_23 = arith.constant 0 : index
    %c2_24 = arith.constant 2 : index
    %44 = memref.load %arg2[%c0_23, %c2_24] : memref<4x75xf32, #tpu.memory_space<smem>>
    %45 = vector.broadcast %44 : f32 to vector<8x128xf32>
    %46 = arith.mulf %45, %43 : vector<8x128xf32>
    %47 = arith.addf %30, %46 : vector<8x128xf32>
    %c1_25 = arith.constant 1 : index
    %c2_26 = arith.constant 2 : index
    %48 = memref.load %arg2[%c1_25, %c2_26] : memref<4x75xf32, #tpu.memory_space<smem>>
    %49 = vector.broadcast %48 : f32 to vector<8x128xf32>
    %50 = arith.mulf %49, %43 : vector<8x128xf32>
    %51 = arith.addf %34, %50 : vector<8x128xf32>
    %c2_27 = arith.constant 2 : index
    %c2_28 = arith.constant 2 : index
    %52 = memref.load %arg2[%c2_27, %c2_28] : memref<4x75xf32, #tpu.memory_space<smem>>
    %53 = vector.broadcast %52 : f32 to vector<8x128xf32>
    %54 = arith.mulf %53, %43 : vector<8x128xf32>
    %55 = arith.addf %38, %54 : vector<8x128xf32>
    %c3_29 = arith.constant 3 : index
    %c2_30 = arith.constant 2 : index
    %56 = memref.load %arg2[%c3_29, %c2_30] : memref<4x75xf32, #tpu.memory_space<smem>>
    %57 = vector.broadcast %56 : f32 to vector<8x128xf32>
    %58 = arith.mulf %57, %43 : vector<8x128xf32>
    %59 = arith.addf %42, %58 : vector<8x128xf32>
    %60 = vector.extract_strided_slice %8 {offsets = [0, 3], sizes = [8, 128], strides = [1, 1]} : vector<8x256xf32> to vector<8x128xf32>
    %c0_31 = arith.constant 0 : index
    %c3_32 = arith.constant 3 : index
    %61 = memref.load %arg2[%c0_31, %c3_32] : memref<4x75xf32, #tpu.memory_space<smem>>
    %62 = vector.broadcast %61 : f32 to vector<8x128xf32>
    %63 = arith.mulf %62, %60 : vector<8x128xf32>
    %64 = arith.addf %47, %63 : vector<8x128xf32>
    %c1_33 = arith.constant 1 : index
    %c3_34 = arith.constant 3 : index
    %65 = memref.load %arg2[%c1_33, %c3_34] : memref<4x75xf32, #tpu.memory_space<smem>>
    %66 = vector.broadcast %65 : f32 to vector<8x128xf32>
    %67 = arith.mulf %66, %60 : vector<8x128xf32>
    %68 = arith.addf %51, %67 : vector<8x128xf32>
    %c2_35 = arith.constant 2 : index
    %c3_36 = arith.constant 3 : index
    %69 = memref.load %arg2[%c2_35, %c3_36] : memref<4x75xf32, #tpu.memory_space<smem>>
    %70 = vector.broadcast %69 : f32 to vector<8x128xf32>
    %71 = arith.mulf %70, %60 : vector<8x128xf32>
    %72 = arith.addf %55, %71 : vector<8x128xf32>
    %c3_37 = arith.constant 3 : index
    %c3_38 = arith.constant 3 : index
    %73 = memref.load %arg2[%c3_37, %c3_38] : memref<4x75xf32, #tpu.memory_space<smem>>
    %74 = vector.broadcast %73 : f32 to vector<8x128xf32>
    %75 = arith.mulf %74, %60 : vector<8x128xf32>
    %76 = arith.addf %59, %75 : vector<8x128xf32>
    %77 = vector.extract_strided_slice %8 {offsets = [0, 4], sizes = [8, 128], strides = [1, 1]} : vector<8x256xf32> to vector<8x128xf32>
    %c0_39 = arith.constant 0 : index
    %c4 = arith.constant 4 : index
    %78 = memref.load %arg2[%c0_39, %c4] : memref<4x75xf32, #tpu.memory_space<smem>>
    %79 = vector.broadcast %78 : f32 to vector<8x128xf32>
    %80 = arith.mulf %79, %77 : vector<8x128xf32>
    %81 = arith.addf %64, %80 : vector<8x128xf32>
    %c1_40 = arith.constant 1 : index
    %c4_41 = arith.constant 4 : index
    %82 = memref.load %arg2[%c1_40, %c4_41] : memref<4x75xf32, #tpu.memory_space<smem>>
    %83 = vector.broadcast %82 : f32 to vector<8x128xf32>
    %84 = arith.mulf %83, %77 : vector<8x128xf32>
    %85 = arith.addf %68, %84 : vector<8x128xf32>
    %c2_42 = arith.constant 2 : index
    %c4_43 = arith.constant 4 : index
    %86 = memref.load %arg2[%c2_42, %c4_43] : memref<4x75xf32, #tpu.memory_space<smem>>
    %87 = vector.broadcast %86 : f32 to vector<8x128xf32>
    %88 = arith.mulf %87, %77 : vector<8x128xf32>
    %89 = arith.addf %72, %88 : vector<8x128xf32>
    %c3_44 = arith.constant 3 : index
    %c4_45 = arith.constant 4 : index
    %90 = memref.load %arg2[%c3_44, %c4_45] : memref<4x75xf32, #tpu.memory_space<smem>>
    %91 = vector.broadcast %90 : f32 to vector<8x128xf32>
    %92 = arith.mulf %91, %77 : vector<8x128xf32>
    %93 = arith.addf %76, %92 : vector<8x128xf32>
    %94 = vector.extract_strided_slice %8 {offsets = [0, 16], sizes = [8, 128], strides = [1, 1]} : vector<8x256xf32> to vector<8x128xf32>
    %c0_46 = arith.constant 0 : index
    %c5 = arith.constant 5 : index
    %95 = memref.load %arg2[%c0_46, %c5] : memref<4x75xf32, #tpu.memory_space<smem>>
    %96 = vector.broadcast %95 : f32 to vector<8x128xf32>
    %97 = arith.mulf %96, %94 : vector<8x128xf32>
    %98 = arith.addf %81, %97 : vector<8x128xf32>
    %c1_47 = arith.constant 1 : index
    %c5_48 = arith.constant 5 : index
    %99 = memref.load %arg2[%c1_47, %c5_48] : memref<4x75xf32, #tpu.memory_space<smem>>
    %100 = vector.broadcast %99 : f32 to vector<8x128xf32>
    %101 = arith.mulf %100, %94 : vector<8x128xf32>
    %102 = arith.addf %85, %101 : vector<8x128xf32>
    %c2_49 = arith.constant 2 : index
    %c5_50 = arith.constant 5 : index
    %103 = memref.load %arg2[%c2_49, %c5_50] : memref<4x75xf32, #tpu.memory_space<smem>>
    %104 = vector.broadcast %103 : f32 to vector<8x128xf32>
    %105 = arith.mulf %104, %94 : vector<8x128xf32>
    %106 = arith.addf %89, %105 : vector<8x128xf32>
    %c3_51 = arith.constant 3 : index
    %c5_52 = arith.constant 5 : index
    %107 = memref.load %arg2[%c3_51, %c5_52] : memref<4x75xf32, #tpu.memory_space<smem>>
    %108 = vector.broadcast %107 : f32 to vector<8x128xf32>
    %109 = arith.mulf %108, %94 : vector<8x128xf32>
    %110 = arith.addf %93, %109 : vector<8x128xf32>
    %111 = vector.extract_strided_slice %8 {offsets = [0, 17], sizes = [8, 128], strides = [1, 1]} : vector<8x256xf32> to vector<8x128xf32>
    %c0_53 = arith.constant 0 : index
    %c6 = arith.constant 6 : index
    %112 = memref.load %arg2[%c0_53, %c6] : memref<4x75xf32, #tpu.memory_space<smem>>
    %113 = vector.broadcast %112 : f32 to vector<8x128xf32>
    %114 = arith.mulf %113, %111 : vector<8x128xf32>
    %115 = arith.addf %98, %114 : vector<8x128xf32>
    %c1_54 = arith.constant 1 : index
    %c6_55 = arith.constant 6 : index
    %116 = memref.load %arg2[%c1_54, %c6_55] : memref<4x75xf32, #tpu.memory_space<smem>>
    %117 = vector.broadcast %116 : f32 to vector<8x128xf32>
    %118 = arith.mulf %117, %111 : vector<8x128xf32>
    %119 = arith.addf %102, %118 : vector<8x128xf32>
    %c2_56 = arith.constant 2 : index
    %c6_57 = arith.constant 6 : index
    %120 = memref.load %arg2[%c2_56, %c6_57] : memref<4x75xf32, #tpu.memory_space<smem>>
    %121 = vector.broadcast %120 : f32 to vector<8x128xf32>
    %122 = arith.mulf %121, %111 : vector<8x128xf32>
    %123 = arith.addf %106, %122 : vector<8x128xf32>
    %c3_58 = arith.constant 3 : index
    %c6_59 = arith.constant 6 : index
    %124 = memref.load %arg2[%c3_58, %c6_59] : memref<4x75xf32, #tpu.memory_space<smem>>
    %125 = vector.broadcast %124 : f32 to vector<8x128xf32>
    %126 = arith.mulf %125, %111 : vector<8x128xf32>
    %127 = arith.addf %110, %126 : vector<8x128xf32>
    %128 = vector.extract_strided_slice %8 {offsets = [0, 18], sizes = [8, 128], strides = [1, 1]} : vector<8x256xf32> to vector<8x128xf32>
    %c0_60 = arith.constant 0 : index
    %c7 = arith.constant 7 : index
    %129 = memref.load %arg2[%c0_60, %c7] : memref<4x75xf32, #tpu.memory_space<smem>>
    %130 = vector.broadcast %129 : f32 to vector<8x128xf32>
    %131 = arith.mulf %130, %128 : vector<8x128xf32>
    %132 = arith.addf %115, %131 : vector<8x128xf32>
    %c1_61 = arith.constant 1 : index
    %c7_62 = arith.constant 7 : index
    %133 = memref.load %arg2[%c1_61, %c7_62] : memref<4x75xf32, #tpu.memory_space<smem>>
    %134 = vector.broadcast %133 : f32 to vector<8x128xf32>
    %135 = arith.mulf %134, %128 : vector<8x128xf32>
    %136 = arith.addf %119, %135 : vector<8x128xf32>
    %c2_63 = arith.constant 2 : index
    %c7_64 = arith.constant 7 : index
    %137 = memref.load %arg2[%c2_63, %c7_64] : memref<4x75xf32, #tpu.memory_space<smem>>
    %138 = vector.broadcast %137 : f32 to vector<8x128xf32>
    %139 = arith.mulf %138, %128 : vector<8x128xf32>
    %140 = arith.addf %123, %139 : vector<8x128xf32>
    %c3_65 = arith.constant 3 : index
    %c7_66 = arith.constant 7 : index
    %141 = memref.load %arg2[%c3_65, %c7_66] : memref<4x75xf32, #tpu.memory_space<smem>>
    %142 = vector.broadcast %141 : f32 to vector<8x128xf32>
    %143 = arith.mulf %142, %128 : vector<8x128xf32>
    %144 = arith.addf %127, %143 : vector<8x128xf32>
    %145 = vector.extract_strided_slice %8 {offsets = [0, 19], sizes = [8, 128], strides = [1, 1]} : vector<8x256xf32> to vector<8x128xf32>
    %c0_67 = arith.constant 0 : index
    %c8 = arith.constant 8 : index
    %146 = memref.load %arg2[%c0_67, %c8] : memref<4x75xf32, #tpu.memory_space<smem>>
    %147 = vector.broadcast %146 : f32 to vector<8x128xf32>
    %148 = arith.mulf %147, %145 : vector<8x128xf32>
    %149 = arith.addf %132, %148 : vector<8x128xf32>
    %c1_68 = arith.constant 1 : index
    %c8_69 = arith.constant 8 : index
    %150 = memref.load %arg2[%c1_68, %c8_69] : memref<4x75xf32, #tpu.memory_space<smem>>
    %151 = vector.broadcast %150 : f32 to vector<8x128xf32>
    %152 = arith.mulf %151, %145 : vector<8x128xf32>
    %153 = arith.addf %136, %152 : vector<8x128xf32>
    %c2_70 = arith.constant 2 : index
    %c8_71 = arith.constant 8 : index
    %154 = memref.load %arg2[%c2_70, %c8_71] : memref<4x75xf32, #tpu.memory_space<smem>>
    %155 = vector.broadcast %154 : f32 to vector<8x128xf32>
    %156 = arith.mulf %155, %145 : vector<8x128xf32>
    %157 = arith.addf %140, %156 : vector<8x128xf32>
    %c3_72 = arith.constant 3 : index
    %c8_73 = arith.constant 8 : index
    %158 = memref.load %arg2[%c3_72, %c8_73] : memref<4x75xf32, #tpu.memory_space<smem>>
    %159 = vector.broadcast %158 : f32 to vector<8x128xf32>
    %160 = arith.mulf %159, %145 : vector<8x128xf32>
    %161 = arith.addf %144, %160 : vector<8x128xf32>
    %162 = vector.extract_strided_slice %8 {offsets = [0, 20], sizes = [8, 128], strides = [1, 1]} : vector<8x256xf32> to vector<8x128xf32>
    %c0_74 = arith.constant 0 : index
    %c9 = arith.constant 9 : index
    %163 = memref.load %arg2[%c0_74, %c9] : memref<4x75xf32, #tpu.memory_space<smem>>
    %164 = vector.broadcast %163 : f32 to vector<8x128xf32>
    %165 = arith.mulf %164, %162 : vector<8x128xf32>
    %166 = arith.addf %149, %165 : vector<8x128xf32>
    %c1_75 = arith.constant 1 : index
    %c9_76 = arith.constant 9 : index
    %167 = memref.load %arg2[%c1_75, %c9_76] : memref<4x75xf32, #tpu.memory_space<smem>>
    %168 = vector.broadcast %167 : f32 to vector<8x128xf32>
    %169 = arith.mulf %168, %162 : vector<8x128xf32>
    %170 = arith.addf %153, %169 : vector<8x128xf32>
    %c2_77 = arith.constant 2 : index
    %c9_78 = arith.constant 9 : index
    %171 = memref.load %arg2[%c2_77, %c9_78] : memref<4x75xf32, #tpu.memory_space<smem>>
    %172 = vector.broadcast %171 : f32 to vector<8x128xf32>
    %173 = arith.mulf %172, %162 : vector<8x128xf32>
    %174 = arith.addf %157, %173 : vector<8x128xf32>
    %c3_79 = arith.constant 3 : index
    %c9_80 = arith.constant 9 : index
    %175 = memref.load %arg2[%c3_79, %c9_80] : memref<4x75xf32, #tpu.memory_space<smem>>
    %176 = vector.broadcast %175 : f32 to vector<8x128xf32>
    %177 = arith.mulf %176, %162 : vector<8x128xf32>
    %178 = arith.addf %161, %177 : vector<8x128xf32>
    %179 = vector.extract_strided_slice %8 {offsets = [0, 32], sizes = [8, 128], strides = [1, 1]} : vector<8x256xf32> to vector<8x128xf32>
    %c0_81 = arith.constant 0 : index
    %c10 = arith.constant 10 : index
    %180 = memref.load %arg2[%c0_81, %c10] : memref<4x75xf32, #tpu.memory_space<smem>>
    %181 = vector.broadcast %180 : f32 to vector<8x128xf32>
    %182 = arith.mulf %181, %179 : vector<8x128xf32>
    %183 = arith.addf %166, %182 : vector<8x128xf32>
    %c1_82 = arith.constant 1 : index
    %c10_83 = arith.constant 10 : index
    %184 = memref.load %arg2[%c1_82, %c10_83] : memref<4x75xf32, #tpu.memory_space<smem>>
    %185 = vector.broadcast %184 : f32 to vector<8x128xf32>
    %186 = arith.mulf %185, %179 : vector<8x128xf32>
    %187 = arith.addf %170, %186 : vector<8x128xf32>
    %c2_84 = arith.constant 2 : index
    %c10_85 = arith.constant 10 : index
    %188 = memref.load %arg2[%c2_84, %c10_85] : memref<4x75xf32, #tpu.memory_space<smem>>
    %189 = vector.broadcast %188 : f32 to vector<8x128xf32>
    %190 = arith.mulf %189, %179 : vector<8x128xf32>
    %191 = arith.addf %174, %190 : vector<8x128xf32>
    %c3_86 = arith.constant 3 : index
    %c10_87 = arith.constant 10 : index
    %192 = memref.load %arg2[%c3_86, %c10_87] : memref<4x75xf32, #tpu.memory_space<smem>>
    %193 = vector.broadcast %192 : f32 to vector<8x128xf32>
    %194 = arith.mulf %193, %179 : vector<8x128xf32>
    %195 = arith.addf %178, %194 : vector<8x128xf32>
    %196 = vector.extract_strided_slice %8 {offsets = [0, 33], sizes = [8, 128], strides = [1, 1]} : vector<8x256xf32> to vector<8x128xf32>
    %c0_88 = arith.constant 0 : index
    %c11 = arith.constant 11 : index
    %197 = memref.load %arg2[%c0_88, %c11] : memref<4x75xf32, #tpu.memory_space<smem>>
    %198 = vector.broadcast %197 : f32 to vector<8x128xf32>
    %199 = arith.mulf %198, %196 : vector<8x128xf32>
    %200 = arith.addf %183, %199 : vector<8x128xf32>
    %c1_89 = arith.constant 1 : index
    %c11_90 = arith.constant 11 : index
    %201 = memref.load %arg2[%c1_89, %c11_90] : memref<4x75xf32, #tpu.memory_space<smem>>
    %202 = vector.broadcast %201 : f32 to vector<8x128xf32>
    %203 = arith.mulf %202, %196 : vector<8x128xf32>
    %204 = arith.addf %187, %203 : vector<8x128xf32>
    %c2_91 = arith.constant 2 : index
    %c11_92 = arith.constant 11 : index
    %205 = memref.load %arg2[%c2_91, %c11_92] : memref<4x75xf32, #tpu.memory_space<smem>>
    %206 = vector.broadcast %205 : f32 to vector<8x128xf32>
    %207 = arith.mulf %206, %196 : vector<8x128xf32>
    %208 = arith.addf %191, %207 : vector<8x128xf32>
    %c3_93 = arith.constant 3 : index
    %c11_94 = arith.constant 11 : index
    %209 = memref.load %arg2[%c3_93, %c11_94] : memref<4x75xf32, #tpu.memory_space<smem>>
    %210 = vector.broadcast %209 : f32 to vector<8x128xf32>
    %211 = arith.mulf %210, %196 : vector<8x128xf32>
    %212 = arith.addf %195, %211 : vector<8x128xf32>
    %213 = vector.extract_strided_slice %8 {offsets = [0, 34], sizes = [8, 128], strides = [1, 1]} : vector<8x256xf32> to vector<8x128xf32>
    %c0_95 = arith.constant 0 : index
    %c12 = arith.constant 12 : index
    %214 = memref.load %arg2[%c0_95, %c12] : memref<4x75xf32, #tpu.memory_space<smem>>
    %215 = vector.broadcast %214 : f32 to vector<8x128xf32>
    %216 = arith.mulf %215, %213 : vector<8x128xf32>
    %217 = arith.addf %200, %216 : vector<8x128xf32>
    %c1_96 = arith.constant 1 : index
    %c12_97 = arith.constant 12 : index
    %218 = memref.load %arg2[%c1_96, %c12_97] : memref<4x75xf32, #tpu.memory_space<smem>>
    %219 = vector.broadcast %218 : f32 to vector<8x128xf32>
    %220 = arith.mulf %219, %213 : vector<8x128xf32>
    %221 = arith.addf %204, %220 : vector<8x128xf32>
    %c2_98 = arith.constant 2 : index
    %c12_99 = arith.constant 12 : index
    %222 = memref.load %arg2[%c2_98, %c12_99] : memref<4x75xf32, #tpu.memory_space<smem>>
    %223 = vector.broadcast %222 : f32 to vector<8x128xf32>
    %224 = arith.mulf %223, %213 : vector<8x128xf32>
    %225 = arith.addf %208, %224 : vector<8x128xf32>
    %c3_100 = arith.constant 3 : index
    %c12_101 = arith.constant 12 : index
    %226 = memref.load %arg2[%c3_100, %c12_101] : memref<4x75xf32, #tpu.memory_space<smem>>
    %227 = vector.broadcast %226 : f32 to vector<8x128xf32>
    %228 = arith.mulf %227, %213 : vector<8x128xf32>
    %229 = arith.addf %212, %228 : vector<8x128xf32>
    %230 = vector.extract_strided_slice %8 {offsets = [0, 35], sizes = [8, 128], strides = [1, 1]} : vector<8x256xf32> to vector<8x128xf32>
    %c0_102 = arith.constant 0 : index
    %c13 = arith.constant 13 : index
    %231 = memref.load %arg2[%c0_102, %c13] : memref<4x75xf32, #tpu.memory_space<smem>>
    %232 = vector.broadcast %231 : f32 to vector<8x128xf32>
    %233 = arith.mulf %232, %230 : vector<8x128xf32>
    %234 = arith.addf %217, %233 : vector<8x128xf32>
    %c1_103 = arith.constant 1 : index
    %c13_104 = arith.constant 13 : index
    %235 = memref.load %arg2[%c1_103, %c13_104] : memref<4x75xf32, #tpu.memory_space<smem>>
    %236 = vector.broadcast %235 : f32 to vector<8x128xf32>
    %237 = arith.mulf %236, %230 : vector<8x128xf32>
    %238 = arith.addf %221, %237 : vector<8x128xf32>
    %c2_105 = arith.constant 2 : index
    %c13_106 = arith.constant 13 : index
    %239 = memref.load %arg2[%c2_105, %c13_106] : memref<4x75xf32, #tpu.memory_space<smem>>
    %240 = vector.broadcast %239 : f32 to vector<8x128xf32>
    %241 = arith.mulf %240, %230 : vector<8x128xf32>
    %242 = arith.addf %225, %241 : vector<8x128xf32>
    %c3_107 = arith.constant 3 : index
    %c13_108 = arith.constant 13 : index
    %243 = memref.load %arg2[%c3_107, %c13_108] : memref<4x75xf32, #tpu.memory_space<smem>>
    %244 = vector.broadcast %243 : f32 to vector<8x128xf32>
    %245 = arith.mulf %244, %230 : vector<8x128xf32>
    %246 = arith.addf %229, %245 : vector<8x128xf32>
    %247 = vector.extract_strided_slice %8 {offsets = [0, 36], sizes = [8, 128], strides = [1, 1]} : vector<8x256xf32> to vector<8x128xf32>
    %c0_109 = arith.constant 0 : index
    %c14 = arith.constant 14 : index
    %248 = memref.load %arg2[%c0_109, %c14] : memref<4x75xf32, #tpu.memory_space<smem>>
    %249 = vector.broadcast %248 : f32 to vector<8x128xf32>
    %250 = arith.mulf %249, %247 : vector<8x128xf32>
    %251 = arith.addf %234, %250 : vector<8x128xf32>
    %c1_110 = arith.constant 1 : index
    %c14_111 = arith.constant 14 : index
    %252 = memref.load %arg2[%c1_110, %c14_111] : memref<4x75xf32, #tpu.memory_space<smem>>
    %253 = vector.broadcast %252 : f32 to vector<8x128xf32>
    %254 = arith.mulf %253, %247 : vector<8x128xf32>
    %255 = arith.addf %238, %254 : vector<8x128xf32>
    %c2_112 = arith.constant 2 : index
    %c14_113 = arith.constant 14 : index
    %256 = memref.load %arg2[%c2_112, %c14_113] : memref<4x75xf32, #tpu.memory_space<smem>>
    %257 = vector.broadcast %256 : f32 to vector<8x128xf32>
    %258 = arith.mulf %257, %247 : vector<8x128xf32>
    %259 = arith.addf %242, %258 : vector<8x128xf32>
    %c3_114 = arith.constant 3 : index
    %c14_115 = arith.constant 14 : index
    %260 = memref.load %arg2[%c3_114, %c14_115] : memref<4x75xf32, #tpu.memory_space<smem>>
    %261 = vector.broadcast %260 : f32 to vector<8x128xf32>
    %262 = arith.mulf %261, %247 : vector<8x128xf32>
    %263 = arith.addf %246, %262 : vector<8x128xf32>
    %264 = vector.extract_strided_slice %8 {offsets = [0, 48], sizes = [8, 128], strides = [1, 1]} : vector<8x256xf32> to vector<8x128xf32>
    %c0_116 = arith.constant 0 : index
    %c15 = arith.constant 15 : index
    %265 = memref.load %arg2[%c0_116, %c15] : memref<4x75xf32, #tpu.memory_space<smem>>
    %266 = vector.broadcast %265 : f32 to vector<8x128xf32>
    %267 = arith.mulf %266, %264 : vector<8x128xf32>
    %268 = arith.addf %251, %267 : vector<8x128xf32>
    %c1_117 = arith.constant 1 : index
    %c15_118 = arith.constant 15 : index
    %269 = memref.load %arg2[%c1_117, %c15_118] : memref<4x75xf32, #tpu.memory_space<smem>>
    %270 = vector.broadcast %269 : f32 to vector<8x128xf32>
    %271 = arith.mulf %270, %264 : vector<8x128xf32>
    %272 = arith.addf %255, %271 : vector<8x128xf32>
    %c2_119 = arith.constant 2 : index
    %c15_120 = arith.constant 15 : index
    %273 = memref.load %arg2[%c2_119, %c15_120] : memref<4x75xf32, #tpu.memory_space<smem>>
    %274 = vector.broadcast %273 : f32 to vector<8x128xf32>
    %275 = arith.mulf %274, %264 : vector<8x128xf32>
    %276 = arith.addf %259, %275 : vector<8x128xf32>
    %c3_121 = arith.constant 3 : index
    %c15_122 = arith.constant 15 : index
    %277 = memref.load %arg2[%c3_121, %c15_122] : memref<4x75xf32, #tpu.memory_space<smem>>
    %278 = vector.broadcast %277 : f32 to vector<8x128xf32>
    %279 = arith.mulf %278, %264 : vector<8x128xf32>
    %280 = arith.addf %263, %279 : vector<8x128xf32>
    %281 = vector.extract_strided_slice %8 {offsets = [0, 49], sizes = [8, 128], strides = [1, 1]} : vector<8x256xf32> to vector<8x128xf32>
    %c0_123 = arith.constant 0 : index
    %c16 = arith.constant 16 : index
    %282 = memref.load %arg2[%c0_123, %c16] : memref<4x75xf32, #tpu.memory_space<smem>>
    %283 = vector.broadcast %282 : f32 to vector<8x128xf32>
    %284 = arith.mulf %283, %281 : vector<8x128xf32>
    %285 = arith.addf %268, %284 : vector<8x128xf32>
    %c1_124 = arith.constant 1 : index
    %c16_125 = arith.constant 16 : index
    %286 = memref.load %arg2[%c1_124, %c16_125] : memref<4x75xf32, #tpu.memory_space<smem>>
    %287 = vector.broadcast %286 : f32 to vector<8x128xf32>
    %288 = arith.mulf %287, %281 : vector<8x128xf32>
    %289 = arith.addf %272, %288 : vector<8x128xf32>
    %c2_126 = arith.constant 2 : index
    %c16_127 = arith.constant 16 : index
    %290 = memref.load %arg2[%c2_126, %c16_127] : memref<4x75xf32, #tpu.memory_space<smem>>
    %291 = vector.broadcast %290 : f32 to vector<8x128xf32>
    %292 = arith.mulf %291, %281 : vector<8x128xf32>
    %293 = arith.addf %276, %292 : vector<8x128xf32>
    %c3_128 = arith.constant 3 : index
    %c16_129 = arith.constant 16 : index
    %294 = memref.load %arg2[%c3_128, %c16_129] : memref<4x75xf32, #tpu.memory_space<smem>>
    %295 = vector.broadcast %294 : f32 to vector<8x128xf32>
    %296 = arith.mulf %295, %281 : vector<8x128xf32>
    %297 = arith.addf %280, %296 : vector<8x128xf32>
    %298 = vector.extract_strided_slice %8 {offsets = [0, 50], sizes = [8, 128], strides = [1, 1]} : vector<8x256xf32> to vector<8x128xf32>
    %c0_130 = arith.constant 0 : index
    %c17 = arith.constant 17 : index
    %299 = memref.load %arg2[%c0_130, %c17] : memref<4x75xf32, #tpu.memory_space<smem>>
    %300 = vector.broadcast %299 : f32 to vector<8x128xf32>
    %301 = arith.mulf %300, %298 : vector<8x128xf32>
    %302 = arith.addf %285, %301 : vector<8x128xf32>
    %c1_131 = arith.constant 1 : index
    %c17_132 = arith.constant 17 : index
    %303 = memref.load %arg2[%c1_131, %c17_132] : memref<4x75xf32, #tpu.memory_space<smem>>
    %304 = vector.broadcast %303 : f32 to vector<8x128xf32>
    %305 = arith.mulf %304, %298 : vector<8x128xf32>
    %306 = arith.addf %289, %305 : vector<8x128xf32>
    %c2_133 = arith.constant 2 : index
    %c17_134 = arith.constant 17 : index
    %307 = memref.load %arg2[%c2_133, %c17_134] : memref<4x75xf32, #tpu.memory_space<smem>>
    %308 = vector.broadcast %307 : f32 to vector<8x128xf32>
    %309 = arith.mulf %308, %298 : vector<8x128xf32>
    %310 = arith.addf %293, %309 : vector<8x128xf32>
    %c3_135 = arith.constant 3 : index
    %c17_136 = arith.constant 17 : index
    %311 = memref.load %arg2[%c3_135, %c17_136] : memref<4x75xf32, #tpu.memory_space<smem>>
    %312 = vector.broadcast %311 : f32 to vector<8x128xf32>
    %313 = arith.mulf %312, %298 : vector<8x128xf32>
    %314 = arith.addf %297, %313 : vector<8x128xf32>
    %315 = vector.extract_strided_slice %8 {offsets = [0, 51], sizes = [8, 128], strides = [1, 1]} : vector<8x256xf32> to vector<8x128xf32>
    %c0_137 = arith.constant 0 : index
    %c18 = arith.constant 18 : index
    %316 = memref.load %arg2[%c0_137, %c18] : memref<4x75xf32, #tpu.memory_space<smem>>
    %317 = vector.broadcast %316 : f32 to vector<8x128xf32>
    %318 = arith.mulf %317, %315 : vector<8x128xf32>
    %319 = arith.addf %302, %318 : vector<8x128xf32>
    %c1_138 = arith.constant 1 : index
    %c18_139 = arith.constant 18 : index
    %320 = memref.load %arg2[%c1_138, %c18_139] : memref<4x75xf32, #tpu.memory_space<smem>>
    %321 = vector.broadcast %320 : f32 to vector<8x128xf32>
    %322 = arith.mulf %321, %315 : vector<8x128xf32>
    %323 = arith.addf %306, %322 : vector<8x128xf32>
    %c2_140 = arith.constant 2 : index
    %c18_141 = arith.constant 18 : index
    %324 = memref.load %arg2[%c2_140, %c18_141] : memref<4x75xf32, #tpu.memory_space<smem>>
    %325 = vector.broadcast %324 : f32 to vector<8x128xf32>
    %326 = arith.mulf %325, %315 : vector<8x128xf32>
    %327 = arith.addf %310, %326 : vector<8x128xf32>
    %c3_142 = arith.constant 3 : index
    %c18_143 = arith.constant 18 : index
    %328 = memref.load %arg2[%c3_142, %c18_143] : memref<4x75xf32, #tpu.memory_space<smem>>
    %329 = vector.broadcast %328 : f32 to vector<8x128xf32>
    %330 = arith.mulf %329, %315 : vector<8x128xf32>
    %331 = arith.addf %314, %330 : vector<8x128xf32>
    %332 = vector.extract_strided_slice %8 {offsets = [0, 52], sizes = [8, 128], strides = [1, 1]} : vector<8x256xf32> to vector<8x128xf32>
    %c0_144 = arith.constant 0 : index
    %c19 = arith.constant 19 : index
    %333 = memref.load %arg2[%c0_144, %c19] : memref<4x75xf32, #tpu.memory_space<smem>>
    %334 = vector.broadcast %333 : f32 to vector<8x128xf32>
    %335 = arith.mulf %334, %332 : vector<8x128xf32>
    %336 = arith.addf %319, %335 : vector<8x128xf32>
    %c1_145 = arith.constant 1 : index
    %c19_146 = arith.constant 19 : index
    %337 = memref.load %arg2[%c1_145, %c19_146] : memref<4x75xf32, #tpu.memory_space<smem>>
    %338 = vector.broadcast %337 : f32 to vector<8x128xf32>
    %339 = arith.mulf %338, %332 : vector<8x128xf32>
    %340 = arith.addf %323, %339 : vector<8x128xf32>
    %c2_147 = arith.constant 2 : index
    %c19_148 = arith.constant 19 : index
    %341 = memref.load %arg2[%c2_147, %c19_148] : memref<4x75xf32, #tpu.memory_space<smem>>
    %342 = vector.broadcast %341 : f32 to vector<8x128xf32>
    %343 = arith.mulf %342, %332 : vector<8x128xf32>
    %344 = arith.addf %327, %343 : vector<8x128xf32>
    %c3_149 = arith.constant 3 : index
    %c19_150 = arith.constant 19 : index
    %345 = memref.load %arg2[%c3_149, %c19_150] : memref<4x75xf32, #tpu.memory_space<smem>>
    %346 = vector.broadcast %345 : f32 to vector<8x128xf32>
    %347 = arith.mulf %346, %332 : vector<8x128xf32>
    %348 = arith.addf %331, %347 : vector<8x128xf32>
    %349 = vector.extract_strided_slice %8 {offsets = [0, 64], sizes = [8, 128], strides = [1, 1]} : vector<8x256xf32> to vector<8x128xf32>
    %c0_151 = arith.constant 0 : index
    %c20 = arith.constant 20 : index
    %350 = memref.load %arg2[%c0_151, %c20] : memref<4x75xf32, #tpu.memory_space<smem>>
    %351 = vector.broadcast %350 : f32 to vector<8x128xf32>
    %352 = arith.mulf %351, %349 : vector<8x128xf32>
    %353 = arith.addf %336, %352 : vector<8x128xf32>
    %c1_152 = arith.constant 1 : index
    %c20_153 = arith.constant 20 : index
    %354 = memref.load %arg2[%c1_152, %c20_153] : memref<4x75xf32, #tpu.memory_space<smem>>
    %355 = vector.broadcast %354 : f32 to vector<8x128xf32>
    %356 = arith.mulf %355, %349 : vector<8x128xf32>
    %357 = arith.addf %340, %356 : vector<8x128xf32>
    %c2_154 = arith.constant 2 : index
    %c20_155 = arith.constant 20 : index
    %358 = memref.load %arg2[%c2_154, %c20_155] : memref<4x75xf32, #tpu.memory_space<smem>>
    %359 = vector.broadcast %358 : f32 to vector<8x128xf32>
    %360 = arith.mulf %359, %349 : vector<8x128xf32>
    %361 = arith.addf %344, %360 : vector<8x128xf32>
    %c3_156 = arith.constant 3 : index
    %c20_157 = arith.constant 20 : index
    %362 = memref.load %arg2[%c3_156, %c20_157] : memref<4x75xf32, #tpu.memory_space<smem>>
    %363 = vector.broadcast %362 : f32 to vector<8x128xf32>
    %364 = arith.mulf %363, %349 : vector<8x128xf32>
    %365 = arith.addf %348, %364 : vector<8x128xf32>
    %366 = vector.extract_strided_slice %8 {offsets = [0, 65], sizes = [8, 128], strides = [1, 1]} : vector<8x256xf32> to vector<8x128xf32>
    %c0_158 = arith.constant 0 : index
    %c21 = arith.constant 21 : index
    %367 = memref.load %arg2[%c0_158, %c21] : memref<4x75xf32, #tpu.memory_space<smem>>
    %368 = vector.broadcast %367 : f32 to vector<8x128xf32>
    %369 = arith.mulf %368, %366 : vector<8x128xf32>
    %370 = arith.addf %353, %369 : vector<8x128xf32>
    %c1_159 = arith.constant 1 : index
    %c21_160 = arith.constant 21 : index
    %371 = memref.load %arg2[%c1_159, %c21_160] : memref<4x75xf32, #tpu.memory_space<smem>>
    %372 = vector.broadcast %371 : f32 to vector<8x128xf32>
    %373 = arith.mulf %372, %366 : vector<8x128xf32>
    %374 = arith.addf %357, %373 : vector<8x128xf32>
    %c2_161 = arith.constant 2 : index
    %c21_162 = arith.constant 21 : index
    %375 = memref.load %arg2[%c2_161, %c21_162] : memref<4x75xf32, #tpu.memory_space<smem>>
    %376 = vector.broadcast %375 : f32 to vector<8x128xf32>
    %377 = arith.mulf %376, %366 : vector<8x128xf32>
    %378 = arith.addf %361, %377 : vector<8x128xf32>
    %c3_163 = arith.constant 3 : index
    %c21_164 = arith.constant 21 : index
    %379 = memref.load %arg2[%c3_163, %c21_164] : memref<4x75xf32, #tpu.memory_space<smem>>
    %380 = vector.broadcast %379 : f32 to vector<8x128xf32>
    %381 = arith.mulf %380, %366 : vector<8x128xf32>
    %382 = arith.addf %365, %381 : vector<8x128xf32>
    %383 = vector.extract_strided_slice %8 {offsets = [0, 66], sizes = [8, 128], strides = [1, 1]} : vector<8x256xf32> to vector<8x128xf32>
    %c0_165 = arith.constant 0 : index
    %c22 = arith.constant 22 : index
    %384 = memref.load %arg2[%c0_165, %c22] : memref<4x75xf32, #tpu.memory_space<smem>>
    %385 = vector.broadcast %384 : f32 to vector<8x128xf32>
    %386 = arith.mulf %385, %383 : vector<8x128xf32>
    %387 = arith.addf %370, %386 : vector<8x128xf32>
    %c1_166 = arith.constant 1 : index
    %c22_167 = arith.constant 22 : index
    %388 = memref.load %arg2[%c1_166, %c22_167] : memref<4x75xf32, #tpu.memory_space<smem>>
    %389 = vector.broadcast %388 : f32 to vector<8x128xf32>
    %390 = arith.mulf %389, %383 : vector<8x128xf32>
    %391 = arith.addf %374, %390 : vector<8x128xf32>
    %c2_168 = arith.constant 2 : index
    %c22_169 = arith.constant 22 : index
    %392 = memref.load %arg2[%c2_168, %c22_169] : memref<4x75xf32, #tpu.memory_space<smem>>
    %393 = vector.broadcast %392 : f32 to vector<8x128xf32>
    %394 = arith.mulf %393, %383 : vector<8x128xf32>
    %395 = arith.addf %378, %394 : vector<8x128xf32>
    %c3_170 = arith.constant 3 : index
    %c22_171 = arith.constant 22 : index
    %396 = memref.load %arg2[%c3_170, %c22_171] : memref<4x75xf32, #tpu.memory_space<smem>>
    %397 = vector.broadcast %396 : f32 to vector<8x128xf32>
    %398 = arith.mulf %397, %383 : vector<8x128xf32>
    %399 = arith.addf %382, %398 : vector<8x128xf32>
    %400 = vector.extract_strided_slice %8 {offsets = [0, 67], sizes = [8, 128], strides = [1, 1]} : vector<8x256xf32> to vector<8x128xf32>
    %c0_172 = arith.constant 0 : index
    %c23 = arith.constant 23 : index
    %401 = memref.load %arg2[%c0_172, %c23] : memref<4x75xf32, #tpu.memory_space<smem>>
    %402 = vector.broadcast %401 : f32 to vector<8x128xf32>
    %403 = arith.mulf %402, %400 : vector<8x128xf32>
    %404 = arith.addf %387, %403 : vector<8x128xf32>
    %c1_173 = arith.constant 1 : index
    %c23_174 = arith.constant 23 : index
    %405 = memref.load %arg2[%c1_173, %c23_174] : memref<4x75xf32, #tpu.memory_space<smem>>
    %406 = vector.broadcast %405 : f32 to vector<8x128xf32>
    %407 = arith.mulf %406, %400 : vector<8x128xf32>
    %408 = arith.addf %391, %407 : vector<8x128xf32>
    %c2_175 = arith.constant 2 : index
    %c23_176 = arith.constant 23 : index
    %409 = memref.load %arg2[%c2_175, %c23_176] : memref<4x75xf32, #tpu.memory_space<smem>>
    %410 = vector.broadcast %409 : f32 to vector<8x128xf32>
    %411 = arith.mulf %410, %400 : vector<8x128xf32>
    %412 = arith.addf %395, %411 : vector<8x128xf32>
    %c3_177 = arith.constant 3 : index
    %c23_178 = arith.constant 23 : index
    %413 = memref.load %arg2[%c3_177, %c23_178] : memref<4x75xf32, #tpu.memory_space<smem>>
    %414 = vector.broadcast %413 : f32 to vector<8x128xf32>
    %415 = arith.mulf %414, %400 : vector<8x128xf32>
    %416 = arith.addf %399, %415 : vector<8x128xf32>
    %417 = vector.extract_strided_slice %8 {offsets = [0, 68], sizes = [8, 128], strides = [1, 1]} : vector<8x256xf32> to vector<8x128xf32>
    %c0_179 = arith.constant 0 : index
    %c24 = arith.constant 24 : index
    %418 = memref.load %arg2[%c0_179, %c24] : memref<4x75xf32, #tpu.memory_space<smem>>
    %419 = vector.broadcast %418 : f32 to vector<8x128xf32>
    %420 = arith.mulf %419, %417 : vector<8x128xf32>
    %421 = arith.addf %404, %420 : vector<8x128xf32>
    %c1_180 = arith.constant 1 : index
    %c24_181 = arith.constant 24 : index
    %422 = memref.load %arg2[%c1_180, %c24_181] : memref<4x75xf32, #tpu.memory_space<smem>>
    %423 = vector.broadcast %422 : f32 to vector<8x128xf32>
    %424 = arith.mulf %423, %417 : vector<8x128xf32>
    %425 = arith.addf %408, %424 : vector<8x128xf32>
    %c2_182 = arith.constant 2 : index
    %c24_183 = arith.constant 24 : index
    %426 = memref.load %arg2[%c2_182, %c24_183] : memref<4x75xf32, #tpu.memory_space<smem>>
    %427 = vector.broadcast %426 : f32 to vector<8x128xf32>
    %428 = arith.mulf %427, %417 : vector<8x128xf32>
    %429 = arith.addf %412, %428 : vector<8x128xf32>
    %c3_184 = arith.constant 3 : index
    %c24_185 = arith.constant 24 : index
    %430 = memref.load %arg2[%c3_184, %c24_185] : memref<4x75xf32, #tpu.memory_space<smem>>
    %431 = vector.broadcast %430 : f32 to vector<8x128xf32>
    %432 = arith.mulf %431, %417 : vector<8x128xf32>
    %433 = arith.addf %416, %432 : vector<8x128xf32>
    %c0_186 = arith.constant 0 : index
    %c1_187 = arith.constant 1 : index
    %c0_188 = arith.constant 0 : index
    %c0_189 = arith.constant 0 : index
    %434 = vector.load %arg3[%c0_186, %c1_187, %c0_188, %c0_189] : memref<1x3x9x128xf32, #tpu.memory_space<vmem>>, vector<1x1x8x128xf32>
    %435 = vector.shape_cast %434 : vector<1x1x8x128xf32> to vector<8x128xf32>
    %c0_190 = arith.constant 0 : index
    %c1_191 = arith.constant 1 : index
    %c1_192 = arith.constant 1 : index
    %c0_193 = arith.constant 0 : index
    %436 = vector.load %arg3[%c0_190, %c1_191, %c1_192, %c0_193] : memref<1x3x9x128xf32, #tpu.memory_space<vmem>>, vector<1x1x8x128xf32>
    %437 = vector.shape_cast %436 : vector<1x1x8x128xf32> to vector<8x128xf32>
    %438 = tpu.concatenate %435, %437 in 1 : vector<8x128xf32>, vector<8x128xf32> -> vector<8x256xf32>
    %439 = vector.extract_strided_slice %438 {offsets = [0, 0], sizes = [8, 128], strides = [1, 1]} : vector<8x256xf32> to vector<8x128xf32>
    %c0_194 = arith.constant 0 : index
    %c25 = arith.constant 25 : index
    %440 = memref.load %arg2[%c0_194, %c25] : memref<4x75xf32, #tpu.memory_space<smem>>
    %441 = vector.broadcast %440 : f32 to vector<8x128xf32>
    %442 = arith.mulf %441, %439 : vector<8x128xf32>
    %443 = arith.addf %421, %442 : vector<8x128xf32>
    %c1_195 = arith.constant 1 : index
    %c25_196 = arith.constant 25 : index
    %444 = memref.load %arg2[%c1_195, %c25_196] : memref<4x75xf32, #tpu.memory_space<smem>>
    %445 = vector.broadcast %444 : f32 to vector<8x128xf32>
    %446 = arith.mulf %445, %439 : vector<8x128xf32>
    %447 = arith.addf %425, %446 : vector<8x128xf32>
    %c2_197 = arith.constant 2 : index
    %c25_198 = arith.constant 25 : index
    %448 = memref.load %arg2[%c2_197, %c25_198] : memref<4x75xf32, #tpu.memory_space<smem>>
    %449 = vector.broadcast %448 : f32 to vector<8x128xf32>
    %450 = arith.mulf %449, %439 : vector<8x128xf32>
    %451 = arith.addf %429, %450 : vector<8x128xf32>
    %c3_199 = arith.constant 3 : index
    %c25_200 = arith.constant 25 : index
    %452 = memref.load %arg2[%c3_199, %c25_200] : memref<4x75xf32, #tpu.memory_space<smem>>
    %453 = vector.broadcast %452 : f32 to vector<8x128xf32>
    %454 = arith.mulf %453, %439 : vector<8x128xf32>
    %455 = arith.addf %433, %454 : vector<8x128xf32>
    %456 = vector.extract_strided_slice %438 {offsets = [0, 1], sizes = [8, 128], strides = [1, 1]} : vector<8x256xf32> to vector<8x128xf32>
    %c0_201 = arith.constant 0 : index
    %c26 = arith.constant 26 : index
    %457 = memref.load %arg2[%c0_201, %c26] : memref<4x75xf32, #tpu.memory_space<smem>>
    %458 = vector.broadcast %457 : f32 to vector<8x128xf32>
    %459 = arith.mulf %458, %456 : vector<8x128xf32>
    %460 = arith.addf %443, %459 : vector<8x128xf32>
    %c1_202 = arith.constant 1 : index
    %c26_203 = arith.constant 26 : index
    %461 = memref.load %arg2[%c1_202, %c26_203] : memref<4x75xf32, #tpu.memory_space<smem>>
    %462 = vector.broadcast %461 : f32 to vector<8x128xf32>
    %463 = arith.mulf %462, %456 : vector<8x128xf32>
    %464 = arith.addf %447, %463 : vector<8x128xf32>
    %c2_204 = arith.constant 2 : index
    %c26_205 = arith.constant 26 : index
    %465 = memref.load %arg2[%c2_204, %c26_205] : memref<4x75xf32, #tpu.memory_space<smem>>
    %466 = vector.broadcast %465 : f32 to vector<8x128xf32>
    %467 = arith.mulf %466, %456 : vector<8x128xf32>
    %468 = arith.addf %451, %467 : vector<8x128xf32>
    %c3_206 = arith.constant 3 : index
    %c26_207 = arith.constant 26 : index
    %469 = memref.load %arg2[%c3_206, %c26_207] : memref<4x75xf32, #tpu.memory_space<smem>>
    %470 = vector.broadcast %469 : f32 to vector<8x128xf32>
    %471 = arith.mulf %470, %456 : vector<8x128xf32>
    %472 = arith.addf %455, %471 : vector<8x128xf32>
    %473 = vector.extract_strided_slice %438 {offsets = [0, 2], sizes = [8, 128], strides = [1, 1]} : vector<8x256xf32> to vector<8x128xf32>
    %c0_208 = arith.constant 0 : index
    %c27 = arith.constant 27 : index
    %474 = memref.load %arg2[%c0_208, %c27] : memref<4x75xf32, #tpu.memory_space<smem>>
    %475 = vector.broadcast %474 : f32 to vector<8x128xf32>
    %476 = arith.mulf %475, %473 : vector<8x128xf32>
    %477 = arith.addf %460, %476 : vector<8x128xf32>
    %c1_209 = arith.constant 1 : index
    %c27_210 = arith.constant 27 : index
    %478 = memref.load %arg2[%c1_209, %c27_210] : memref<4x75xf32, #tpu.memory_space<smem>>
    %479 = vector.broadcast %478 : f32 to vector<8x128xf32>
    %480 = arith.mulf %479, %473 : vector<8x128xf32>
    %481 = arith.addf %464, %480 : vector<8x128xf32>
    %c2_211 = arith.constant 2 : index
    %c27_212 = arith.constant 27 : index
    %482 = memref.load %arg2[%c2_211, %c27_212] : memref<4x75xf32, #tpu.memory_space<smem>>
    %483 = vector.broadcast %482 : f32 to vector<8x128xf32>
    %484 = arith.mulf %483, %473 : vector<8x128xf32>
    %485 = arith.addf %468, %484 : vector<8x128xf32>
    %c3_213 = arith.constant 3 : index
    %c27_214 = arith.constant 27 : index
    %486 = memref.load %arg2[%c3_213, %c27_214] : memref<4x75xf32, #tpu.memory_space<smem>>
    %487 = vector.broadcast %486 : f32 to vector<8x128xf32>
    %488 = arith.mulf %487, %473 : vector<8x128xf32>
    %489 = arith.addf %472, %488 : vector<8x128xf32>
    %490 = vector.extract_strided_slice %438 {offsets = [0, 3], sizes = [8, 128], strides = [1, 1]} : vector<8x256xf32> to vector<8x128xf32>
    %c0_215 = arith.constant 0 : index
    %c28 = arith.constant 28 : index
    %491 = memref.load %arg2[%c0_215, %c28] : memref<4x75xf32, #tpu.memory_space<smem>>
    %492 = vector.broadcast %491 : f32 to vector<8x128xf32>
    %493 = arith.mulf %492, %490 : vector<8x128xf32>
    %494 = arith.addf %477, %493 : vector<8x128xf32>
    %c1_216 = arith.constant 1 : index
    %c28_217 = arith.constant 28 : index
    %495 = memref.load %arg2[%c1_216, %c28_217] : memref<4x75xf32, #tpu.memory_space<smem>>
    %496 = vector.broadcast %495 : f32 to vector<8x128xf32>
    %497 = arith.mulf %496, %490 : vector<8x128xf32>
    %498 = arith.addf %481, %497 : vector<8x128xf32>
    %c2_218 = arith.constant 2 : index
    %c28_219 = arith.constant 28 : index
    %499 = memref.load %arg2[%c2_218, %c28_219] : memref<4x75xf32, #tpu.memory_space<smem>>
    %500 = vector.broadcast %499 : f32 to vector<8x128xf32>
    %501 = arith.mulf %500, %490 : vector<8x128xf32>
    %502 = arith.addf %485, %501 : vector<8x128xf32>
    %c3_220 = arith.constant 3 : index
    %c28_221 = arith.constant 28 : index
    %503 = memref.load %arg2[%c3_220, %c28_221] : memref<4x75xf32, #tpu.memory_space<smem>>
    %504 = vector.broadcast %503 : f32 to vector<8x128xf32>
    %505 = arith.mulf %504, %490 : vector<8x128xf32>
    %506 = arith.addf %489, %505 : vector<8x128xf32>
    %507 = vector.extract_strided_slice %438 {offsets = [0, 4], sizes = [8, 128], strides = [1, 1]} : vector<8x256xf32> to vector<8x128xf32>
    %c0_222 = arith.constant 0 : index
    %c29 = arith.constant 29 : index
    %508 = memref.load %arg2[%c0_222, %c29] : memref<4x75xf32, #tpu.memory_space<smem>>
    %509 = vector.broadcast %508 : f32 to vector<8x128xf32>
    %510 = arith.mulf %509, %507 : vector<8x128xf32>
    %511 = arith.addf %494, %510 : vector<8x128xf32>
    %c1_223 = arith.constant 1 : index
    %c29_224 = arith.constant 29 : index
    %512 = memref.load %arg2[%c1_223, %c29_224] : memref<4x75xf32, #tpu.memory_space<smem>>
    %513 = vector.broadcast %512 : f32 to vector<8x128xf32>
    %514 = arith.mulf %513, %507 : vector<8x128xf32>
    %515 = arith.addf %498, %514 : vector<8x128xf32>
    %c2_225 = arith.constant 2 : index
    %c29_226 = arith.constant 29 : index
    %516 = memref.load %arg2[%c2_225, %c29_226] : memref<4x75xf32, #tpu.memory_space<smem>>
    %517 = vector.broadcast %516 : f32 to vector<8x128xf32>
    %518 = arith.mulf %517, %507 : vector<8x128xf32>
    %519 = arith.addf %502, %518 : vector<8x128xf32>
    %c3_227 = arith.constant 3 : index
    %c29_228 = arith.constant 29 : index
    %520 = memref.load %arg2[%c3_227, %c29_228] : memref<4x75xf32, #tpu.memory_space<smem>>
    %521 = vector.broadcast %520 : f32 to vector<8x128xf32>
    %522 = arith.mulf %521, %507 : vector<8x128xf32>
    %523 = arith.addf %506, %522 : vector<8x128xf32>
    %524 = vector.extract_strided_slice %438 {offsets = [0, 16], sizes = [8, 128], strides = [1, 1]} : vector<8x256xf32> to vector<8x128xf32>
    %c0_229 = arith.constant 0 : index
    %c30 = arith.constant 30 : index
    %525 = memref.load %arg2[%c0_229, %c30] : memref<4x75xf32, #tpu.memory_space<smem>>
    %526 = vector.broadcast %525 : f32 to vector<8x128xf32>
    %527 = arith.mulf %526, %524 : vector<8x128xf32>
    %528 = arith.addf %511, %527 : vector<8x128xf32>
    %c1_230 = arith.constant 1 : index
    %c30_231 = arith.constant 30 : index
    %529 = memref.load %arg2[%c1_230, %c30_231] : memref<4x75xf32, #tpu.memory_space<smem>>
    %530 = vector.broadcast %529 : f32 to vector<8x128xf32>
    %531 = arith.mulf %530, %524 : vector<8x128xf32>
    %532 = arith.addf %515, %531 : vector<8x128xf32>
    %c2_232 = arith.constant 2 : index
    %c30_233 = arith.constant 30 : index
    %533 = memref.load %arg2[%c2_232, %c30_233] : memref<4x75xf32, #tpu.memory_space<smem>>
    %534 = vector.broadcast %533 : f32 to vector<8x128xf32>
    %535 = arith.mulf %534, %524 : vector<8x128xf32>
    %536 = arith.addf %519, %535 : vector<8x128xf32>
    %c3_234 = arith.constant 3 : index
    %c30_235 = arith.constant 30 : index
    %537 = memref.load %arg2[%c3_234, %c30_235] : memref<4x75xf32, #tpu.memory_space<smem>>
    %538 = vector.broadcast %537 : f32 to vector<8x128xf32>
    %539 = arith.mulf %538, %524 : vector<8x128xf32>
    %540 = arith.addf %523, %539 : vector<8x128xf32>
    %541 = vector.extract_strided_slice %438 {offsets = [0, 17], sizes = [8, 128], strides = [1, 1]} : vector<8x256xf32> to vector<8x128xf32>
    %c0_236 = arith.constant 0 : index
    %c31 = arith.constant 31 : index
    %542 = memref.load %arg2[%c0_236, %c31] : memref<4x75xf32, #tpu.memory_space<smem>>
    %543 = vector.broadcast %542 : f32 to vector<8x128xf32>
    %544 = arith.mulf %543, %541 : vector<8x128xf32>
    %545 = arith.addf %528, %544 : vector<8x128xf32>
    %c1_237 = arith.constant 1 : index
    %c31_238 = arith.constant 31 : index
    %546 = memref.load %arg2[%c1_237, %c31_238] : memref<4x75xf32, #tpu.memory_space<smem>>
    %547 = vector.broadcast %546 : f32 to vector<8x128xf32>
    %548 = arith.mulf %547, %541 : vector<8x128xf32>
    %549 = arith.addf %532, %548 : vector<8x128xf32>
    %c2_239 = arith.constant 2 : index
    %c31_240 = arith.constant 31 : index
    %550 = memref.load %arg2[%c2_239, %c31_240] : memref<4x75xf32, #tpu.memory_space<smem>>
    %551 = vector.broadcast %550 : f32 to vector<8x128xf32>
    %552 = arith.mulf %551, %541 : vector<8x128xf32>
    %553 = arith.addf %536, %552 : vector<8x128xf32>
    %c3_241 = arith.constant 3 : index
    %c31_242 = arith.constant 31 : index
    %554 = memref.load %arg2[%c3_241, %c31_242] : memref<4x75xf32, #tpu.memory_space<smem>>
    %555 = vector.broadcast %554 : f32 to vector<8x128xf32>
    %556 = arith.mulf %555, %541 : vector<8x128xf32>
    %557 = arith.addf %540, %556 : vector<8x128xf32>
    %558 = vector.extract_strided_slice %438 {offsets = [0, 18], sizes = [8, 128], strides = [1, 1]} : vector<8x256xf32> to vector<8x128xf32>
    %c0_243 = arith.constant 0 : index
    %c32 = arith.constant 32 : index
    %559 = memref.load %arg2[%c0_243, %c32] : memref<4x75xf32, #tpu.memory_space<smem>>
    %560 = vector.broadcast %559 : f32 to vector<8x128xf32>
    %561 = arith.mulf %560, %558 : vector<8x128xf32>
    %562 = arith.addf %545, %561 : vector<8x128xf32>
    %c1_244 = arith.constant 1 : index
    %c32_245 = arith.constant 32 : index
    %563 = memref.load %arg2[%c1_244, %c32_245] : memref<4x75xf32, #tpu.memory_space<smem>>
    %564 = vector.broadcast %563 : f32 to vector<8x128xf32>
    %565 = arith.mulf %564, %558 : vector<8x128xf32>
    %566 = arith.addf %549, %565 : vector<8x128xf32>
    %c2_246 = arith.constant 2 : index
    %c32_247 = arith.constant 32 : index
    %567 = memref.load %arg2[%c2_246, %c32_247] : memref<4x75xf32, #tpu.memory_space<smem>>
    %568 = vector.broadcast %567 : f32 to vector<8x128xf32>
    %569 = arith.mulf %568, %558 : vector<8x128xf32>
    %570 = arith.addf %553, %569 : vector<8x128xf32>
    %c3_248 = arith.constant 3 : index
    %c32_249 = arith.constant 32 : index
    %571 = memref.load %arg2[%c3_248, %c32_249] : memref<4x75xf32, #tpu.memory_space<smem>>
    %572 = vector.broadcast %571 : f32 to vector<8x128xf32>
    %573 = arith.mulf %572, %558 : vector<8x128xf32>
    %574 = arith.addf %557, %573 : vector<8x128xf32>
    %575 = vector.extract_strided_slice %438 {offsets = [0, 19], sizes = [8, 128], strides = [1, 1]} : vector<8x256xf32> to vector<8x128xf32>
    %c0_250 = arith.constant 0 : index
    %c33 = arith.constant 33 : index
    %576 = memref.load %arg2[%c0_250, %c33] : memref<4x75xf32, #tpu.memory_space<smem>>
    %577 = vector.broadcast %576 : f32 to vector<8x128xf32>
    %578 = arith.mulf %577, %575 : vector<8x128xf32>
    %579 = arith.addf %562, %578 : vector<8x128xf32>
    %c1_251 = arith.constant 1 : index
    %c33_252 = arith.constant 33 : index
    %580 = memref.load %arg2[%c1_251, %c33_252] : memref<4x75xf32, #tpu.memory_space<smem>>
    %581 = vector.broadcast %580 : f32 to vector<8x128xf32>
    %582 = arith.mulf %581, %575 : vector<8x128xf32>
    %583 = arith.addf %566, %582 : vector<8x128xf32>
    %c2_253 = arith.constant 2 : index
    %c33_254 = arith.constant 33 : index
    %584 = memref.load %arg2[%c2_253, %c33_254] : memref<4x75xf32, #tpu.memory_space<smem>>
    %585 = vector.broadcast %584 : f32 to vector<8x128xf32>
    %586 = arith.mulf %585, %575 : vector<8x128xf32>
    %587 = arith.addf %570, %586 : vector<8x128xf32>
    %c3_255 = arith.constant 3 : index
    %c33_256 = arith.constant 33 : index
    %588 = memref.load %arg2[%c3_255, %c33_256] : memref<4x75xf32, #tpu.memory_space<smem>>
    %589 = vector.broadcast %588 : f32 to vector<8x128xf32>
    %590 = arith.mulf %589, %575 : vector<8x128xf32>
    %591 = arith.addf %574, %590 : vector<8x128xf32>
    %592 = vector.extract_strided_slice %438 {offsets = [0, 20], sizes = [8, 128], strides = [1, 1]} : vector<8x256xf32> to vector<8x128xf32>
    %c0_257 = arith.constant 0 : index
    %c34 = arith.constant 34 : index
    %593 = memref.load %arg2[%c0_257, %c34] : memref<4x75xf32, #tpu.memory_space<smem>>
    %594 = vector.broadcast %593 : f32 to vector<8x128xf32>
    %595 = arith.mulf %594, %592 : vector<8x128xf32>
    %596 = arith.addf %579, %595 : vector<8x128xf32>
    %c1_258 = arith.constant 1 : index
    %c34_259 = arith.constant 34 : index
    %597 = memref.load %arg2[%c1_258, %c34_259] : memref<4x75xf32, #tpu.memory_space<smem>>
    %598 = vector.broadcast %597 : f32 to vector<8x128xf32>
    %599 = arith.mulf %598, %592 : vector<8x128xf32>
    %600 = arith.addf %583, %599 : vector<8x128xf32>
    %c2_260 = arith.constant 2 : index
    %c34_261 = arith.constant 34 : index
    %601 = memref.load %arg2[%c2_260, %c34_261] : memref<4x75xf32, #tpu.memory_space<smem>>
    %602 = vector.broadcast %601 : f32 to vector<8x128xf32>
    %603 = arith.mulf %602, %592 : vector<8x128xf32>
    %604 = arith.addf %587, %603 : vector<8x128xf32>
    %c3_262 = arith.constant 3 : index
    %c34_263 = arith.constant 34 : index
    %605 = memref.load %arg2[%c3_262, %c34_263] : memref<4x75xf32, #tpu.memory_space<smem>>
    %606 = vector.broadcast %605 : f32 to vector<8x128xf32>
    %607 = arith.mulf %606, %592 : vector<8x128xf32>
    %608 = arith.addf %591, %607 : vector<8x128xf32>
    %609 = vector.extract_strided_slice %438 {offsets = [0, 32], sizes = [8, 128], strides = [1, 1]} : vector<8x256xf32> to vector<8x128xf32>
    %c0_264 = arith.constant 0 : index
    %c35 = arith.constant 35 : index
    %610 = memref.load %arg2[%c0_264, %c35] : memref<4x75xf32, #tpu.memory_space<smem>>
    %611 = vector.broadcast %610 : f32 to vector<8x128xf32>
    %612 = arith.mulf %611, %609 : vector<8x128xf32>
    %613 = arith.addf %596, %612 : vector<8x128xf32>
    %c1_265 = arith.constant 1 : index
    %c35_266 = arith.constant 35 : index
    %614 = memref.load %arg2[%c1_265, %c35_266] : memref<4x75xf32, #tpu.memory_space<smem>>
    %615 = vector.broadcast %614 : f32 to vector<8x128xf32>
    %616 = arith.mulf %615, %609 : vector<8x128xf32>
    %617 = arith.addf %600, %616 : vector<8x128xf32>
    %c2_267 = arith.constant 2 : index
    %c35_268 = arith.constant 35 : index
    %618 = memref.load %arg2[%c2_267, %c35_268] : memref<4x75xf32, #tpu.memory_space<smem>>
    %619 = vector.broadcast %618 : f32 to vector<8x128xf32>
    %620 = arith.mulf %619, %609 : vector<8x128xf32>
    %621 = arith.addf %604, %620 : vector<8x128xf32>
    %c3_269 = arith.constant 3 : index
    %c35_270 = arith.constant 35 : index
    %622 = memref.load %arg2[%c3_269, %c35_270] : memref<4x75xf32, #tpu.memory_space<smem>>
    %623 = vector.broadcast %622 : f32 to vector<8x128xf32>
    %624 = arith.mulf %623, %609 : vector<8x128xf32>
    %625 = arith.addf %608, %624 : vector<8x128xf32>
    %626 = vector.extract_strided_slice %438 {offsets = [0, 33], sizes = [8, 128], strides = [1, 1]} : vector<8x256xf32> to vector<8x128xf32>
    %c0_271 = arith.constant 0 : index
    %c36 = arith.constant 36 : index
    %627 = memref.load %arg2[%c0_271, %c36] : memref<4x75xf32, #tpu.memory_space<smem>>
    %628 = vector.broadcast %627 : f32 to vector<8x128xf32>
    %629 = arith.mulf %628, %626 : vector<8x128xf32>
    %630 = arith.addf %613, %629 : vector<8x128xf32>
    %c1_272 = arith.constant 1 : index
    %c36_273 = arith.constant 36 : index
    %631 = memref.load %arg2[%c1_272, %c36_273] : memref<4x75xf32, #tpu.memory_space<smem>>
    %632 = vector.broadcast %631 : f32 to vector<8x128xf32>
    %633 = arith.mulf %632, %626 : vector<8x128xf32>
    %634 = arith.addf %617, %633 : vector<8x128xf32>
    %c2_274 = arith.constant 2 : index
    %c36_275 = arith.constant 36 : index
    %635 = memref.load %arg2[%c2_274, %c36_275] : memref<4x75xf32, #tpu.memory_space<smem>>
    %636 = vector.broadcast %635 : f32 to vector<8x128xf32>
    %637 = arith.mulf %636, %626 : vector<8x128xf32>
    %638 = arith.addf %621, %637 : vector<8x128xf32>
    %c3_276 = arith.constant 3 : index
    %c36_277 = arith.constant 36 : index
    %639 = memref.load %arg2[%c3_276, %c36_277] : memref<4x75xf32, #tpu.memory_space<smem>>
    %640 = vector.broadcast %639 : f32 to vector<8x128xf32>
    %641 = arith.mulf %640, %626 : vector<8x128xf32>
    %642 = arith.addf %625, %641 : vector<8x128xf32>
    %643 = vector.extract_strided_slice %438 {offsets = [0, 34], sizes = [8, 128], strides = [1, 1]} : vector<8x256xf32> to vector<8x128xf32>
    %c0_278 = arith.constant 0 : index
    %c37 = arith.constant 37 : index
    %644 = memref.load %arg2[%c0_278, %c37] : memref<4x75xf32, #tpu.memory_space<smem>>
    %645 = vector.broadcast %644 : f32 to vector<8x128xf32>
    %646 = arith.mulf %645, %643 : vector<8x128xf32>
    %647 = arith.addf %630, %646 : vector<8x128xf32>
    %c1_279 = arith.constant 1 : index
    %c37_280 = arith.constant 37 : index
    %648 = memref.load %arg2[%c1_279, %c37_280] : memref<4x75xf32, #tpu.memory_space<smem>>
    %649 = vector.broadcast %648 : f32 to vector<8x128xf32>
    %650 = arith.mulf %649, %643 : vector<8x128xf32>
    %651 = arith.addf %634, %650 : vector<8x128xf32>
    %c2_281 = arith.constant 2 : index
    %c37_282 = arith.constant 37 : index
    %652 = memref.load %arg2[%c2_281, %c37_282] : memref<4x75xf32, #tpu.memory_space<smem>>
    %653 = vector.broadcast %652 : f32 to vector<8x128xf32>
    %654 = arith.mulf %653, %643 : vector<8x128xf32>
    %655 = arith.addf %638, %654 : vector<8x128xf32>
    %c3_283 = arith.constant 3 : index
    %c37_284 = arith.constant 37 : index
    %656 = memref.load %arg2[%c3_283, %c37_284] : memref<4x75xf32, #tpu.memory_space<smem>>
    %657 = vector.broadcast %656 : f32 to vector<8x128xf32>
    %658 = arith.mulf %657, %643 : vector<8x128xf32>
    %659 = arith.addf %642, %658 : vector<8x128xf32>
    %660 = vector.extract_strided_slice %438 {offsets = [0, 35], sizes = [8, 128], strides = [1, 1]} : vector<8x256xf32> to vector<8x128xf32>
    %c0_285 = arith.constant 0 : index
    %c38 = arith.constant 38 : index
    %661 = memref.load %arg2[%c0_285, %c38] : memref<4x75xf32, #tpu.memory_space<smem>>
    %662 = vector.broadcast %661 : f32 to vector<8x128xf32>
    %663 = arith.mulf %662, %660 : vector<8x128xf32>
    %664 = arith.addf %647, %663 : vector<8x128xf32>
    %c1_286 = arith.constant 1 : index
    %c38_287 = arith.constant 38 : index
    %665 = memref.load %arg2[%c1_286, %c38_287] : memref<4x75xf32, #tpu.memory_space<smem>>
    %666 = vector.broadcast %665 : f32 to vector<8x128xf32>
    %667 = arith.mulf %666, %660 : vector<8x128xf32>
    %668 = arith.addf %651, %667 : vector<8x128xf32>
    %c2_288 = arith.constant 2 : index
    %c38_289 = arith.constant 38 : index
    %669 = memref.load %arg2[%c2_288, %c38_289] : memref<4x75xf32, #tpu.memory_space<smem>>
    %670 = vector.broadcast %669 : f32 to vector<8x128xf32>
    %671 = arith.mulf %670, %660 : vector<8x128xf32>
    %672 = arith.addf %655, %671 : vector<8x128xf32>
    %c3_290 = arith.constant 3 : index
    %c38_291 = arith.constant 38 : index
    %673 = memref.load %arg2[%c3_290, %c38_291] : memref<4x75xf32, #tpu.memory_space<smem>>
    %674 = vector.broadcast %673 : f32 to vector<8x128xf32>
    %675 = arith.mulf %674, %660 : vector<8x128xf32>
    %676 = arith.addf %659, %675 : vector<8x128xf32>
    %677 = vector.extract_strided_slice %438 {offsets = [0, 36], sizes = [8, 128], strides = [1, 1]} : vector<8x256xf32> to vector<8x128xf32>
    %c0_292 = arith.constant 0 : index
    %c39 = arith.constant 39 : index
    %678 = memref.load %arg2[%c0_292, %c39] : memref<4x75xf32, #tpu.memory_space<smem>>
    %679 = vector.broadcast %678 : f32 to vector<8x128xf32>
    %680 = arith.mulf %679, %677 : vector<8x128xf32>
    %681 = arith.addf %664, %680 : vector<8x128xf32>
    %c1_293 = arith.constant 1 : index
    %c39_294 = arith.constant 39 : index
    %682 = memref.load %arg2[%c1_293, %c39_294] : memref<4x75xf32, #tpu.memory_space<smem>>
    %683 = vector.broadcast %682 : f32 to vector<8x128xf32>
    %684 = arith.mulf %683, %677 : vector<8x128xf32>
    %685 = arith.addf %668, %684 : vector<8x128xf32>
    %c2_295 = arith.constant 2 : index
    %c39_296 = arith.constant 39 : index
    %686 = memref.load %arg2[%c2_295, %c39_296] : memref<4x75xf32, #tpu.memory_space<smem>>
    %687 = vector.broadcast %686 : f32 to vector<8x128xf32>
    %688 = arith.mulf %687, %677 : vector<8x128xf32>
    %689 = arith.addf %672, %688 : vector<8x128xf32>
    %c3_297 = arith.constant 3 : index
    %c39_298 = arith.constant 39 : index
    %690 = memref.load %arg2[%c3_297, %c39_298] : memref<4x75xf32, #tpu.memory_space<smem>>
    %691 = vector.broadcast %690 : f32 to vector<8x128xf32>
    %692 = arith.mulf %691, %677 : vector<8x128xf32>
    %693 = arith.addf %676, %692 : vector<8x128xf32>
    %694 = vector.extract_strided_slice %438 {offsets = [0, 48], sizes = [8, 128], strides = [1, 1]} : vector<8x256xf32> to vector<8x128xf32>
    %c0_299 = arith.constant 0 : index
    %c40 = arith.constant 40 : index
    %695 = memref.load %arg2[%c0_299, %c40] : memref<4x75xf32, #tpu.memory_space<smem>>
    %696 = vector.broadcast %695 : f32 to vector<8x128xf32>
    %697 = arith.mulf %696, %694 : vector<8x128xf32>
    %698 = arith.addf %681, %697 : vector<8x128xf32>
    %c1_300 = arith.constant 1 : index
    %c40_301 = arith.constant 40 : index
    %699 = memref.load %arg2[%c1_300, %c40_301] : memref<4x75xf32, #tpu.memory_space<smem>>
    %700 = vector.broadcast %699 : f32 to vector<8x128xf32>
    %701 = arith.mulf %700, %694 : vector<8x128xf32>
    %702 = arith.addf %685, %701 : vector<8x128xf32>
    %c2_302 = arith.constant 2 : index
    %c40_303 = arith.constant 40 : index
    %703 = memref.load %arg2[%c2_302, %c40_303] : memref<4x75xf32, #tpu.memory_space<smem>>
    %704 = vector.broadcast %703 : f32 to vector<8x128xf32>
    %705 = arith.mulf %704, %694 : vector<8x128xf32>
    %706 = arith.addf %689, %705 : vector<8x128xf32>
    %c3_304 = arith.constant 3 : index
    %c40_305 = arith.constant 40 : index
    %707 = memref.load %arg2[%c3_304, %c40_305] : memref<4x75xf32, #tpu.memory_space<smem>>
    %708 = vector.broadcast %707 : f32 to vector<8x128xf32>
    %709 = arith.mulf %708, %694 : vector<8x128xf32>
    %710 = arith.addf %693, %709 : vector<8x128xf32>
    %711 = vector.extract_strided_slice %438 {offsets = [0, 49], sizes = [8, 128], strides = [1, 1]} : vector<8x256xf32> to vector<8x128xf32>
    %c0_306 = arith.constant 0 : index
    %c41 = arith.constant 41 : index
    %712 = memref.load %arg2[%c0_306, %c41] : memref<4x75xf32, #tpu.memory_space<smem>>
    %713 = vector.broadcast %712 : f32 to vector<8x128xf32>
    %714 = arith.mulf %713, %711 : vector<8x128xf32>
    %715 = arith.addf %698, %714 : vector<8x128xf32>
    %c1_307 = arith.constant 1 : index
    %c41_308 = arith.constant 41 : index
    %716 = memref.load %arg2[%c1_307, %c41_308] : memref<4x75xf32, #tpu.memory_space<smem>>
    %717 = vector.broadcast %716 : f32 to vector<8x128xf32>
    %718 = arith.mulf %717, %711 : vector<8x128xf32>
    %719 = arith.addf %702, %718 : vector<8x128xf32>
    %c2_309 = arith.constant 2 : index
    %c41_310 = arith.constant 41 : index
    %720 = memref.load %arg2[%c2_309, %c41_310] : memref<4x75xf32, #tpu.memory_space<smem>>
    %721 = vector.broadcast %720 : f32 to vector<8x128xf32>
    %722 = arith.mulf %721, %711 : vector<8x128xf32>
    %723 = arith.addf %706, %722 : vector<8x128xf32>
    %c3_311 = arith.constant 3 : index
    %c41_312 = arith.constant 41 : index
    %724 = memref.load %arg2[%c3_311, %c41_312] : memref<4x75xf32, #tpu.memory_space<smem>>
    %725 = vector.broadcast %724 : f32 to vector<8x128xf32>
    %726 = arith.mulf %725, %711 : vector<8x128xf32>
    %727 = arith.addf %710, %726 : vector<8x128xf32>
    %728 = vector.extract_strided_slice %438 {offsets = [0, 50], sizes = [8, 128], strides = [1, 1]} : vector<8x256xf32> to vector<8x128xf32>
    %c0_313 = arith.constant 0 : index
    %c42 = arith.constant 42 : index
    %729 = memref.load %arg2[%c0_313, %c42] : memref<4x75xf32, #tpu.memory_space<smem>>
    %730 = vector.broadcast %729 : f32 to vector<8x128xf32>
    %731 = arith.mulf %730, %728 : vector<8x128xf32>
    %732 = arith.addf %715, %731 : vector<8x128xf32>
    %c1_314 = arith.constant 1 : index
    %c42_315 = arith.constant 42 : index
    %733 = memref.load %arg2[%c1_314, %c42_315] : memref<4x75xf32, #tpu.memory_space<smem>>
    %734 = vector.broadcast %733 : f32 to vector<8x128xf32>
    %735 = arith.mulf %734, %728 : vector<8x128xf32>
    %736 = arith.addf %719, %735 : vector<8x128xf32>
    %c2_316 = arith.constant 2 : index
    %c42_317 = arith.constant 42 : index
    %737 = memref.load %arg2[%c2_316, %c42_317] : memref<4x75xf32, #tpu.memory_space<smem>>
    %738 = vector.broadcast %737 : f32 to vector<8x128xf32>
    %739 = arith.mulf %738, %728 : vector<8x128xf32>
    %740 = arith.addf %723, %739 : vector<8x128xf32>
    %c3_318 = arith.constant 3 : index
    %c42_319 = arith.constant 42 : index
    %741 = memref.load %arg2[%c3_318, %c42_319] : memref<4x75xf32, #tpu.memory_space<smem>>
    %742 = vector.broadcast %741 : f32 to vector<8x128xf32>
    %743 = arith.mulf %742, %728 : vector<8x128xf32>
    %744 = arith.addf %727, %743 : vector<8x128xf32>
    %745 = vector.extract_strided_slice %438 {offsets = [0, 51], sizes = [8, 128], strides = [1, 1]} : vector<8x256xf32> to vector<8x128xf32>
    %c0_320 = arith.constant 0 : index
    %c43 = arith.constant 43 : index
    %746 = memref.load %arg2[%c0_320, %c43] : memref<4x75xf32, #tpu.memory_space<smem>>
    %747 = vector.broadcast %746 : f32 to vector<8x128xf32>
    %748 = arith.mulf %747, %745 : vector<8x128xf32>
    %749 = arith.addf %732, %748 : vector<8x128xf32>
    %c1_321 = arith.constant 1 : index
    %c43_322 = arith.constant 43 : index
    %750 = memref.load %arg2[%c1_321, %c43_322] : memref<4x75xf32, #tpu.memory_space<smem>>
    %751 = vector.broadcast %750 : f32 to vector<8x128xf32>
    %752 = arith.mulf %751, %745 : vector<8x128xf32>
    %753 = arith.addf %736, %752 : vector<8x128xf32>
    %c2_323 = arith.constant 2 : index
    %c43_324 = arith.constant 43 : index
    %754 = memref.load %arg2[%c2_323, %c43_324] : memref<4x75xf32, #tpu.memory_space<smem>>
    %755 = vector.broadcast %754 : f32 to vector<8x128xf32>
    %756 = arith.mulf %755, %745 : vector<8x128xf32>
    %757 = arith.addf %740, %756 : vector<8x128xf32>
    %c3_325 = arith.constant 3 : index
    %c43_326 = arith.constant 43 : index
    %758 = memref.load %arg2[%c3_325, %c43_326] : memref<4x75xf32, #tpu.memory_space<smem>>
    %759 = vector.broadcast %758 : f32 to vector<8x128xf32>
    %760 = arith.mulf %759, %745 : vector<8x128xf32>
    %761 = arith.addf %744, %760 : vector<8x128xf32>
    %762 = vector.extract_strided_slice %438 {offsets = [0, 52], sizes = [8, 128], strides = [1, 1]} : vector<8x256xf32> to vector<8x128xf32>
    %c0_327 = arith.constant 0 : index
    %c44 = arith.constant 44 : index
    %763 = memref.load %arg2[%c0_327, %c44] : memref<4x75xf32, #tpu.memory_space<smem>>
    %764 = vector.broadcast %763 : f32 to vector<8x128xf32>
    %765 = arith.mulf %764, %762 : vector<8x128xf32>
    %766 = arith.addf %749, %765 : vector<8x128xf32>
    %c1_328 = arith.constant 1 : index
    %c44_329 = arith.constant 44 : index
    %767 = memref.load %arg2[%c1_328, %c44_329] : memref<4x75xf32, #tpu.memory_space<smem>>
    %768 = vector.broadcast %767 : f32 to vector<8x128xf32>
    %769 = arith.mulf %768, %762 : vector<8x128xf32>
    %770 = arith.addf %753, %769 : vector<8x128xf32>
    %c2_330 = arith.constant 2 : index
    %c44_331 = arith.constant 44 : index
    %771 = memref.load %arg2[%c2_330, %c44_331] : memref<4x75xf32, #tpu.memory_space<smem>>
    %772 = vector.broadcast %771 : f32 to vector<8x128xf32>
    %773 = arith.mulf %772, %762 : vector<8x128xf32>
    %774 = arith.addf %757, %773 : vector<8x128xf32>
    %c3_332 = arith.constant 3 : index
    %c44_333 = arith.constant 44 : index
    %775 = memref.load %arg2[%c3_332, %c44_333] : memref<4x75xf32, #tpu.memory_space<smem>>
    %776 = vector.broadcast %775 : f32 to vector<8x128xf32>
    %777 = arith.mulf %776, %762 : vector<8x128xf32>
    %778 = arith.addf %761, %777 : vector<8x128xf32>
    %779 = vector.extract_strided_slice %438 {offsets = [0, 64], sizes = [8, 128], strides = [1, 1]} : vector<8x256xf32> to vector<8x128xf32>
    %c0_334 = arith.constant 0 : index
    %c45 = arith.constant 45 : index
    %780 = memref.load %arg2[%c0_334, %c45] : memref<4x75xf32, #tpu.memory_space<smem>>
    %781 = vector.broadcast %780 : f32 to vector<8x128xf32>
    %782 = arith.mulf %781, %779 : vector<8x128xf32>
    %783 = arith.addf %766, %782 : vector<8x128xf32>
    %c1_335 = arith.constant 1 : index
    %c45_336 = arith.constant 45 : index
    %784 = memref.load %arg2[%c1_335, %c45_336] : memref<4x75xf32, #tpu.memory_space<smem>>
    %785 = vector.broadcast %784 : f32 to vector<8x128xf32>
    %786 = arith.mulf %785, %779 : vector<8x128xf32>
    %787 = arith.addf %770, %786 : vector<8x128xf32>
    %c2_337 = arith.constant 2 : index
    %c45_338 = arith.constant 45 : index
    %788 = memref.load %arg2[%c2_337, %c45_338] : memref<4x75xf32, #tpu.memory_space<smem>>
    %789 = vector.broadcast %788 : f32 to vector<8x128xf32>
    %790 = arith.mulf %789, %779 : vector<8x128xf32>
    %791 = arith.addf %774, %790 : vector<8x128xf32>
    %c3_339 = arith.constant 3 : index
    %c45_340 = arith.constant 45 : index
    %792 = memref.load %arg2[%c3_339, %c45_340] : memref<4x75xf32, #tpu.memory_space<smem>>
    %793 = vector.broadcast %792 : f32 to vector<8x128xf32>
    %794 = arith.mulf %793, %779 : vector<8x128xf32>
    %795 = arith.addf %778, %794 : vector<8x128xf32>
    %796 = vector.extract_strided_slice %438 {offsets = [0, 65], sizes = [8, 128], strides = [1, 1]} : vector<8x256xf32> to vector<8x128xf32>
    %c0_341 = arith.constant 0 : index
    %c46 = arith.constant 46 : index
    %797 = memref.load %arg2[%c0_341, %c46] : memref<4x75xf32, #tpu.memory_space<smem>>
    %798 = vector.broadcast %797 : f32 to vector<8x128xf32>
    %799 = arith.mulf %798, %796 : vector<8x128xf32>
    %800 = arith.addf %783, %799 : vector<8x128xf32>
    %c1_342 = arith.constant 1 : index
    %c46_343 = arith.constant 46 : index
    %801 = memref.load %arg2[%c1_342, %c46_343] : memref<4x75xf32, #tpu.memory_space<smem>>
    %802 = vector.broadcast %801 : f32 to vector<8x128xf32>
    %803 = arith.mulf %802, %796 : vector<8x128xf32>
    %804 = arith.addf %787, %803 : vector<8x128xf32>
    %c2_344 = arith.constant 2 : index
    %c46_345 = arith.constant 46 : index
    %805 = memref.load %arg2[%c2_344, %c46_345] : memref<4x75xf32, #tpu.memory_space<smem>>
    %806 = vector.broadcast %805 : f32 to vector<8x128xf32>
    %807 = arith.mulf %806, %796 : vector<8x128xf32>
    %808 = arith.addf %791, %807 : vector<8x128xf32>
    %c3_346 = arith.constant 3 : index
    %c46_347 = arith.constant 46 : index
    %809 = memref.load %arg2[%c3_346, %c46_347] : memref<4x75xf32, #tpu.memory_space<smem>>
    %810 = vector.broadcast %809 : f32 to vector<8x128xf32>
    %811 = arith.mulf %810, %796 : vector<8x128xf32>
    %812 = arith.addf %795, %811 : vector<8x128xf32>
    %813 = vector.extract_strided_slice %438 {offsets = [0, 66], sizes = [8, 128], strides = [1, 1]} : vector<8x256xf32> to vector<8x128xf32>
    %c0_348 = arith.constant 0 : index
    %c47 = arith.constant 47 : index
    %814 = memref.load %arg2[%c0_348, %c47] : memref<4x75xf32, #tpu.memory_space<smem>>
    %815 = vector.broadcast %814 : f32 to vector<8x128xf32>
    %816 = arith.mulf %815, %813 : vector<8x128xf32>
    %817 = arith.addf %800, %816 : vector<8x128xf32>
    %c1_349 = arith.constant 1 : index
    %c47_350 = arith.constant 47 : index
    %818 = memref.load %arg2[%c1_349, %c47_350] : memref<4x75xf32, #tpu.memory_space<smem>>
    %819 = vector.broadcast %818 : f32 to vector<8x128xf32>
    %820 = arith.mulf %819, %813 : vector<8x128xf32>
    %821 = arith.addf %804, %820 : vector<8x128xf32>
    %c2_351 = arith.constant 2 : index
    %c47_352 = arith.constant 47 : index
    %822 = memref.load %arg2[%c2_351, %c47_352] : memref<4x75xf32, #tpu.memory_space<smem>>
    %823 = vector.broadcast %822 : f32 to vector<8x128xf32>
    %824 = arith.mulf %823, %813 : vector<8x128xf32>
    %825 = arith.addf %808, %824 : vector<8x128xf32>
    %c3_353 = arith.constant 3 : index
    %c47_354 = arith.constant 47 : index
    %826 = memref.load %arg2[%c3_353, %c47_354] : memref<4x75xf32, #tpu.memory_space<smem>>
    %827 = vector.broadcast %826 : f32 to vector<8x128xf32>
    %828 = arith.mulf %827, %813 : vector<8x128xf32>
    %829 = arith.addf %812, %828 : vector<8x128xf32>
    %830 = vector.extract_strided_slice %438 {offsets = [0, 67], sizes = [8, 128], strides = [1, 1]} : vector<8x256xf32> to vector<8x128xf32>
    %c0_355 = arith.constant 0 : index
    %c48 = arith.constant 48 : index
    %831 = memref.load %arg2[%c0_355, %c48] : memref<4x75xf32, #tpu.memory_space<smem>>
    %832 = vector.broadcast %831 : f32 to vector<8x128xf32>
    %833 = arith.mulf %832, %830 : vector<8x128xf32>
    %834 = arith.addf %817, %833 : vector<8x128xf32>
    %c1_356 = arith.constant 1 : index
    %c48_357 = arith.constant 48 : index
    %835 = memref.load %arg2[%c1_356, %c48_357] : memref<4x75xf32, #tpu.memory_space<smem>>
    %836 = vector.broadcast %835 : f32 to vector<8x128xf32>
    %837 = arith.mulf %836, %830 : vector<8x128xf32>
    %838 = arith.addf %821, %837 : vector<8x128xf32>
    %c2_358 = arith.constant 2 : index
    %c48_359 = arith.constant 48 : index
    %839 = memref.load %arg2[%c2_358, %c48_359] : memref<4x75xf32, #tpu.memory_space<smem>>
    %840 = vector.broadcast %839 : f32 to vector<8x128xf32>
    %841 = arith.mulf %840, %830 : vector<8x128xf32>
    %842 = arith.addf %825, %841 : vector<8x128xf32>
    %c3_360 = arith.constant 3 : index
    %c48_361 = arith.constant 48 : index
    %843 = memref.load %arg2[%c3_360, %c48_361] : memref<4x75xf32, #tpu.memory_space<smem>>
    %844 = vector.broadcast %843 : f32 to vector<8x128xf32>
    %845 = arith.mulf %844, %830 : vector<8x128xf32>
    %846 = arith.addf %829, %845 : vector<8x128xf32>
    %847 = vector.extract_strided_slice %438 {offsets = [0, 68], sizes = [8, 128], strides = [1, 1]} : vector<8x256xf32> to vector<8x128xf32>
    %c0_362 = arith.constant 0 : index
    %c49 = arith.constant 49 : index
    %848 = memref.load %arg2[%c0_362, %c49] : memref<4x75xf32, #tpu.memory_space<smem>>
    %849 = vector.broadcast %848 : f32 to vector<8x128xf32>
    %850 = arith.mulf %849, %847 : vector<8x128xf32>
    %851 = arith.addf %834, %850 : vector<8x128xf32>
    %c1_363 = arith.constant 1 : index
    %c49_364 = arith.constant 49 : index
    %852 = memref.load %arg2[%c1_363, %c49_364] : memref<4x75xf32, #tpu.memory_space<smem>>
    %853 = vector.broadcast %852 : f32 to vector<8x128xf32>
    %854 = arith.mulf %853, %847 : vector<8x128xf32>
    %855 = arith.addf %838, %854 : vector<8x128xf32>
    %c2_365 = arith.constant 2 : index
    %c49_366 = arith.constant 49 : index
    %856 = memref.load %arg2[%c2_365, %c49_366] : memref<4x75xf32, #tpu.memory_space<smem>>
    %857 = vector.broadcast %856 : f32 to vector<8x128xf32>
    %858 = arith.mulf %857, %847 : vector<8x128xf32>
    %859 = arith.addf %842, %858 : vector<8x128xf32>
    %c3_367 = arith.constant 3 : index
    %c49_368 = arith.constant 49 : index
    %860 = memref.load %arg2[%c3_367, %c49_368] : memref<4x75xf32, #tpu.memory_space<smem>>
    %861 = vector.broadcast %860 : f32 to vector<8x128xf32>
    %862 = arith.mulf %861, %847 : vector<8x128xf32>
    %863 = arith.addf %846, %862 : vector<8x128xf32>
    %c0_369 = arith.constant 0 : index
    %c2_370 = arith.constant 2 : index
    %c0_371 = arith.constant 0 : index
    %c0_372 = arith.constant 0 : index
    %864 = vector.load %arg3[%c0_369, %c2_370, %c0_371, %c0_372] : memref<1x3x9x128xf32, #tpu.memory_space<vmem>>, vector<1x1x8x128xf32>
    %865 = vector.shape_cast %864 : vector<1x1x8x128xf32> to vector<8x128xf32>
    %c0_373 = arith.constant 0 : index
    %c2_374 = arith.constant 2 : index
    %c1_375 = arith.constant 1 : index
    %c0_376 = arith.constant 0 : index
    %866 = vector.load %arg3[%c0_373, %c2_374, %c1_375, %c0_376] : memref<1x3x9x128xf32, #tpu.memory_space<vmem>>, vector<1x1x8x128xf32>
    %867 = vector.shape_cast %866 : vector<1x1x8x128xf32> to vector<8x128xf32>
    %868 = tpu.concatenate %865, %867 in 1 : vector<8x128xf32>, vector<8x128xf32> -> vector<8x256xf32>
    %869 = vector.extract_strided_slice %868 {offsets = [0, 0], sizes = [8, 128], strides = [1, 1]} : vector<8x256xf32> to vector<8x128xf32>
    %c0_377 = arith.constant 0 : index
    %c50 = arith.constant 50 : index
    %870 = memref.load %arg2[%c0_377, %c50] : memref<4x75xf32, #tpu.memory_space<smem>>
    %871 = vector.broadcast %870 : f32 to vector<8x128xf32>
    %872 = arith.mulf %871, %869 : vector<8x128xf32>
    %873 = arith.addf %851, %872 : vector<8x128xf32>
    %c1_378 = arith.constant 1 : index
    %c50_379 = arith.constant 50 : index
    %874 = memref.load %arg2[%c1_378, %c50_379] : memref<4x75xf32, #tpu.memory_space<smem>>
    %875 = vector.broadcast %874 : f32 to vector<8x128xf32>
    %876 = arith.mulf %875, %869 : vector<8x128xf32>
    %877 = arith.addf %855, %876 : vector<8x128xf32>
    %c2_380 = arith.constant 2 : index
    %c50_381 = arith.constant 50 : index
    %878 = memref.load %arg2[%c2_380, %c50_381] : memref<4x75xf32, #tpu.memory_space<smem>>
    %879 = vector.broadcast %878 : f32 to vector<8x128xf32>
    %880 = arith.mulf %879, %869 : vector<8x128xf32>
    %881 = arith.addf %859, %880 : vector<8x128xf32>
    %c3_382 = arith.constant 3 : index
    %c50_383 = arith.constant 50 : index
    %882 = memref.load %arg2[%c3_382, %c50_383] : memref<4x75xf32, #tpu.memory_space<smem>>
    %883 = vector.broadcast %882 : f32 to vector<8x128xf32>
    %884 = arith.mulf %883, %869 : vector<8x128xf32>
    %885 = arith.addf %863, %884 : vector<8x128xf32>
    %886 = vector.extract_strided_slice %868 {offsets = [0, 1], sizes = [8, 128], strides = [1, 1]} : vector<8x256xf32> to vector<8x128xf32>
    %c0_384 = arith.constant 0 : index
    %c51 = arith.constant 51 : index
    %887 = memref.load %arg2[%c0_384, %c51] : memref<4x75xf32, #tpu.memory_space<smem>>
    %888 = vector.broadcast %887 : f32 to vector<8x128xf32>
    %889 = arith.mulf %888, %886 : vector<8x128xf32>
    %890 = arith.addf %873, %889 : vector<8x128xf32>
    %c1_385 = arith.constant 1 : index
    %c51_386 = arith.constant 51 : index
    %891 = memref.load %arg2[%c1_385, %c51_386] : memref<4x75xf32, #tpu.memory_space<smem>>
    %892 = vector.broadcast %891 : f32 to vector<8x128xf32>
    %893 = arith.mulf %892, %886 : vector<8x128xf32>
    %894 = arith.addf %877, %893 : vector<8x128xf32>
    %c2_387 = arith.constant 2 : index
    %c51_388 = arith.constant 51 : index
    %895 = memref.load %arg2[%c2_387, %c51_388] : memref<4x75xf32, #tpu.memory_space<smem>>
    %896 = vector.broadcast %895 : f32 to vector<8x128xf32>
    %897 = arith.mulf %896, %886 : vector<8x128xf32>
    %898 = arith.addf %881, %897 : vector<8x128xf32>
    %c3_389 = arith.constant 3 : index
    %c51_390 = arith.constant 51 : index
    %899 = memref.load %arg2[%c3_389, %c51_390] : memref<4x75xf32, #tpu.memory_space<smem>>
    %900 = vector.broadcast %899 : f32 to vector<8x128xf32>
    %901 = arith.mulf %900, %886 : vector<8x128xf32>
    %902 = arith.addf %885, %901 : vector<8x128xf32>
    %903 = vector.extract_strided_slice %868 {offsets = [0, 2], sizes = [8, 128], strides = [1, 1]} : vector<8x256xf32> to vector<8x128xf32>
    %c0_391 = arith.constant 0 : index
    %c52 = arith.constant 52 : index
    %904 = memref.load %arg2[%c0_391, %c52] : memref<4x75xf32, #tpu.memory_space<smem>>
    %905 = vector.broadcast %904 : f32 to vector<8x128xf32>
    %906 = arith.mulf %905, %903 : vector<8x128xf32>
    %907 = arith.addf %890, %906 : vector<8x128xf32>
    %c1_392 = arith.constant 1 : index
    %c52_393 = arith.constant 52 : index
    %908 = memref.load %arg2[%c1_392, %c52_393] : memref<4x75xf32, #tpu.memory_space<smem>>
    %909 = vector.broadcast %908 : f32 to vector<8x128xf32>
    %910 = arith.mulf %909, %903 : vector<8x128xf32>
    %911 = arith.addf %894, %910 : vector<8x128xf32>
    %c2_394 = arith.constant 2 : index
    %c52_395 = arith.constant 52 : index
    %912 = memref.load %arg2[%c2_394, %c52_395] : memref<4x75xf32, #tpu.memory_space<smem>>
    %913 = vector.broadcast %912 : f32 to vector<8x128xf32>
    %914 = arith.mulf %913, %903 : vector<8x128xf32>
    %915 = arith.addf %898, %914 : vector<8x128xf32>
    %c3_396 = arith.constant 3 : index
    %c52_397 = arith.constant 52 : index
    %916 = memref.load %arg2[%c3_396, %c52_397] : memref<4x75xf32, #tpu.memory_space<smem>>
    %917 = vector.broadcast %916 : f32 to vector<8x128xf32>
    %918 = arith.mulf %917, %903 : vector<8x128xf32>
    %919 = arith.addf %902, %918 : vector<8x128xf32>
    %920 = vector.extract_strided_slice %868 {offsets = [0, 3], sizes = [8, 128], strides = [1, 1]} : vector<8x256xf32> to vector<8x128xf32>
    %c0_398 = arith.constant 0 : index
    %c53 = arith.constant 53 : index
    %921 = memref.load %arg2[%c0_398, %c53] : memref<4x75xf32, #tpu.memory_space<smem>>
    %922 = vector.broadcast %921 : f32 to vector<8x128xf32>
    %923 = arith.mulf %922, %920 : vector<8x128xf32>
    %924 = arith.addf %907, %923 : vector<8x128xf32>
    %c1_399 = arith.constant 1 : index
    %c53_400 = arith.constant 53 : index
    %925 = memref.load %arg2[%c1_399, %c53_400] : memref<4x75xf32, #tpu.memory_space<smem>>
    %926 = vector.broadcast %925 : f32 to vector<8x128xf32>
    %927 = arith.mulf %926, %920 : vector<8x128xf32>
    %928 = arith.addf %911, %927 : vector<8x128xf32>
    %c2_401 = arith.constant 2 : index
    %c53_402 = arith.constant 53 : index
    %929 = memref.load %arg2[%c2_401, %c53_402] : memref<4x75xf32, #tpu.memory_space<smem>>
    %930 = vector.broadcast %929 : f32 to vector<8x128xf32>
    %931 = arith.mulf %930, %920 : vector<8x128xf32>
    %932 = arith.addf %915, %931 : vector<8x128xf32>
    %c3_403 = arith.constant 3 : index
    %c53_404 = arith.constant 53 : index
    %933 = memref.load %arg2[%c3_403, %c53_404] : memref<4x75xf32, #tpu.memory_space<smem>>
    %934 = vector.broadcast %933 : f32 to vector<8x128xf32>
    %935 = arith.mulf %934, %920 : vector<8x128xf32>
    %936 = arith.addf %919, %935 : vector<8x128xf32>
    %937 = vector.extract_strided_slice %868 {offsets = [0, 4], sizes = [8, 128], strides = [1, 1]} : vector<8x256xf32> to vector<8x128xf32>
    %c0_405 = arith.constant 0 : index
    %c54 = arith.constant 54 : index
    %938 = memref.load %arg2[%c0_405, %c54] : memref<4x75xf32, #tpu.memory_space<smem>>
    %939 = vector.broadcast %938 : f32 to vector<8x128xf32>
    %940 = arith.mulf %939, %937 : vector<8x128xf32>
    %941 = arith.addf %924, %940 : vector<8x128xf32>
    %c1_406 = arith.constant 1 : index
    %c54_407 = arith.constant 54 : index
    %942 = memref.load %arg2[%c1_406, %c54_407] : memref<4x75xf32, #tpu.memory_space<smem>>
    %943 = vector.broadcast %942 : f32 to vector<8x128xf32>
    %944 = arith.mulf %943, %937 : vector<8x128xf32>
    %945 = arith.addf %928, %944 : vector<8x128xf32>
    %c2_408 = arith.constant 2 : index
    %c54_409 = arith.constant 54 : index
    %946 = memref.load %arg2[%c2_408, %c54_409] : memref<4x75xf32, #tpu.memory_space<smem>>
    %947 = vector.broadcast %946 : f32 to vector<8x128xf32>
    %948 = arith.mulf %947, %937 : vector<8x128xf32>
    %949 = arith.addf %932, %948 : vector<8x128xf32>
    %c3_410 = arith.constant 3 : index
    %c54_411 = arith.constant 54 : index
    %950 = memref.load %arg2[%c3_410, %c54_411] : memref<4x75xf32, #tpu.memory_space<smem>>
    %951 = vector.broadcast %950 : f32 to vector<8x128xf32>
    %952 = arith.mulf %951, %937 : vector<8x128xf32>
    %953 = arith.addf %936, %952 : vector<8x128xf32>
    %954 = vector.extract_strided_slice %868 {offsets = [0, 16], sizes = [8, 128], strides = [1, 1]} : vector<8x256xf32> to vector<8x128xf32>
    %c0_412 = arith.constant 0 : index
    %c55 = arith.constant 55 : index
    %955 = memref.load %arg2[%c0_412, %c55] : memref<4x75xf32, #tpu.memory_space<smem>>
    %956 = vector.broadcast %955 : f32 to vector<8x128xf32>
    %957 = arith.mulf %956, %954 : vector<8x128xf32>
    %958 = arith.addf %941, %957 : vector<8x128xf32>
    %c1_413 = arith.constant 1 : index
    %c55_414 = arith.constant 55 : index
    %959 = memref.load %arg2[%c1_413, %c55_414] : memref<4x75xf32, #tpu.memory_space<smem>>
    %960 = vector.broadcast %959 : f32 to vector<8x128xf32>
    %961 = arith.mulf %960, %954 : vector<8x128xf32>
    %962 = arith.addf %945, %961 : vector<8x128xf32>
    %c2_415 = arith.constant 2 : index
    %c55_416 = arith.constant 55 : index
    %963 = memref.load %arg2[%c2_415, %c55_416] : memref<4x75xf32, #tpu.memory_space<smem>>
    %964 = vector.broadcast %963 : f32 to vector<8x128xf32>
    %965 = arith.mulf %964, %954 : vector<8x128xf32>
    %966 = arith.addf %949, %965 : vector<8x128xf32>
    %c3_417 = arith.constant 3 : index
    %c55_418 = arith.constant 55 : index
    %967 = memref.load %arg2[%c3_417, %c55_418] : memref<4x75xf32, #tpu.memory_space<smem>>
    %968 = vector.broadcast %967 : f32 to vector<8x128xf32>
    %969 = arith.mulf %968, %954 : vector<8x128xf32>
    %970 = arith.addf %953, %969 : vector<8x128xf32>
    %971 = vector.extract_strided_slice %868 {offsets = [0, 17], sizes = [8, 128], strides = [1, 1]} : vector<8x256xf32> to vector<8x128xf32>
    %c0_419 = arith.constant 0 : index
    %c56 = arith.constant 56 : index
    %972 = memref.load %arg2[%c0_419, %c56] : memref<4x75xf32, #tpu.memory_space<smem>>
    %973 = vector.broadcast %972 : f32 to vector<8x128xf32>
    %974 = arith.mulf %973, %971 : vector<8x128xf32>
    %975 = arith.addf %958, %974 : vector<8x128xf32>
    %c1_420 = arith.constant 1 : index
    %c56_421 = arith.constant 56 : index
    %976 = memref.load %arg2[%c1_420, %c56_421] : memref<4x75xf32, #tpu.memory_space<smem>>
    %977 = vector.broadcast %976 : f32 to vector<8x128xf32>
    %978 = arith.mulf %977, %971 : vector<8x128xf32>
    %979 = arith.addf %962, %978 : vector<8x128xf32>
    %c2_422 = arith.constant 2 : index
    %c56_423 = arith.constant 56 : index
    %980 = memref.load %arg2[%c2_422, %c56_423] : memref<4x75xf32, #tpu.memory_space<smem>>
    %981 = vector.broadcast %980 : f32 to vector<8x128xf32>
    %982 = arith.mulf %981, %971 : vector<8x128xf32>
    %983 = arith.addf %966, %982 : vector<8x128xf32>
    %c3_424 = arith.constant 3 : index
    %c56_425 = arith.constant 56 : index
    %984 = memref.load %arg2[%c3_424, %c56_425] : memref<4x75xf32, #tpu.memory_space<smem>>
    %985 = vector.broadcast %984 : f32 to vector<8x128xf32>
    %986 = arith.mulf %985, %971 : vector<8x128xf32>
    %987 = arith.addf %970, %986 : vector<8x128xf32>
    %988 = vector.extract_strided_slice %868 {offsets = [0, 18], sizes = [8, 128], strides = [1, 1]} : vector<8x256xf32> to vector<8x128xf32>
    %c0_426 = arith.constant 0 : index
    %c57 = arith.constant 57 : index
    %989 = memref.load %arg2[%c0_426, %c57] : memref<4x75xf32, #tpu.memory_space<smem>>
    %990 = vector.broadcast %989 : f32 to vector<8x128xf32>
    %991 = arith.mulf %990, %988 : vector<8x128xf32>
    %992 = arith.addf %975, %991 : vector<8x128xf32>
    %c1_427 = arith.constant 1 : index
    %c57_428 = arith.constant 57 : index
    %993 = memref.load %arg2[%c1_427, %c57_428] : memref<4x75xf32, #tpu.memory_space<smem>>
    %994 = vector.broadcast %993 : f32 to vector<8x128xf32>
    %995 = arith.mulf %994, %988 : vector<8x128xf32>
    %996 = arith.addf %979, %995 : vector<8x128xf32>
    %c2_429 = arith.constant 2 : index
    %c57_430 = arith.constant 57 : index
    %997 = memref.load %arg2[%c2_429, %c57_430] : memref<4x75xf32, #tpu.memory_space<smem>>
    %998 = vector.broadcast %997 : f32 to vector<8x128xf32>
    %999 = arith.mulf %998, %988 : vector<8x128xf32>
    %1000 = arith.addf %983, %999 : vector<8x128xf32>
    %c3_431 = arith.constant 3 : index
    %c57_432 = arith.constant 57 : index
    %1001 = memref.load %arg2[%c3_431, %c57_432] : memref<4x75xf32, #tpu.memory_space<smem>>
    %1002 = vector.broadcast %1001 : f32 to vector<8x128xf32>
    %1003 = arith.mulf %1002, %988 : vector<8x128xf32>
    %1004 = arith.addf %987, %1003 : vector<8x128xf32>
    %1005 = vector.extract_strided_slice %868 {offsets = [0, 19], sizes = [8, 128], strides = [1, 1]} : vector<8x256xf32> to vector<8x128xf32>
    %c0_433 = arith.constant 0 : index
    %c58 = arith.constant 58 : index
    %1006 = memref.load %arg2[%c0_433, %c58] : memref<4x75xf32, #tpu.memory_space<smem>>
    %1007 = vector.broadcast %1006 : f32 to vector<8x128xf32>
    %1008 = arith.mulf %1007, %1005 : vector<8x128xf32>
    %1009 = arith.addf %992, %1008 : vector<8x128xf32>
    %c1_434 = arith.constant 1 : index
    %c58_435 = arith.constant 58 : index
    %1010 = memref.load %arg2[%c1_434, %c58_435] : memref<4x75xf32, #tpu.memory_space<smem>>
    %1011 = vector.broadcast %1010 : f32 to vector<8x128xf32>
    %1012 = arith.mulf %1011, %1005 : vector<8x128xf32>
    %1013 = arith.addf %996, %1012 : vector<8x128xf32>
    %c2_436 = arith.constant 2 : index
    %c58_437 = arith.constant 58 : index
    %1014 = memref.load %arg2[%c2_436, %c58_437] : memref<4x75xf32, #tpu.memory_space<smem>>
    %1015 = vector.broadcast %1014 : f32 to vector<8x128xf32>
    %1016 = arith.mulf %1015, %1005 : vector<8x128xf32>
    %1017 = arith.addf %1000, %1016 : vector<8x128xf32>
    %c3_438 = arith.constant 3 : index
    %c58_439 = arith.constant 58 : index
    %1018 = memref.load %arg2[%c3_438, %c58_439] : memref<4x75xf32, #tpu.memory_space<smem>>
    %1019 = vector.broadcast %1018 : f32 to vector<8x128xf32>
    %1020 = arith.mulf %1019, %1005 : vector<8x128xf32>
    %1021 = arith.addf %1004, %1020 : vector<8x128xf32>
    %1022 = vector.extract_strided_slice %868 {offsets = [0, 20], sizes = [8, 128], strides = [1, 1]} : vector<8x256xf32> to vector<8x128xf32>
    %c0_440 = arith.constant 0 : index
    %c59 = arith.constant 59 : index
    %1023 = memref.load %arg2[%c0_440, %c59] : memref<4x75xf32, #tpu.memory_space<smem>>
    %1024 = vector.broadcast %1023 : f32 to vector<8x128xf32>
    %1025 = arith.mulf %1024, %1022 : vector<8x128xf32>
    %1026 = arith.addf %1009, %1025 : vector<8x128xf32>
    %c1_441 = arith.constant 1 : index
    %c59_442 = arith.constant 59 : index
    %1027 = memref.load %arg2[%c1_441, %c59_442] : memref<4x75xf32, #tpu.memory_space<smem>>
    %1028 = vector.broadcast %1027 : f32 to vector<8x128xf32>
    %1029 = arith.mulf %1028, %1022 : vector<8x128xf32>
    %1030 = arith.addf %1013, %1029 : vector<8x128xf32>
    %c2_443 = arith.constant 2 : index
    %c59_444 = arith.constant 59 : index
    %1031 = memref.load %arg2[%c2_443, %c59_444] : memref<4x75xf32, #tpu.memory_space<smem>>
    %1032 = vector.broadcast %1031 : f32 to vector<8x128xf32>
    %1033 = arith.mulf %1032, %1022 : vector<8x128xf32>
    %1034 = arith.addf %1017, %1033 : vector<8x128xf32>
    %c3_445 = arith.constant 3 : index
    %c59_446 = arith.constant 59 : index
    %1035 = memref.load %arg2[%c3_445, %c59_446] : memref<4x75xf32, #tpu.memory_space<smem>>
    %1036 = vector.broadcast %1035 : f32 to vector<8x128xf32>
    %1037 = arith.mulf %1036, %1022 : vector<8x128xf32>
    %1038 = arith.addf %1021, %1037 : vector<8x128xf32>
    %1039 = vector.extract_strided_slice %868 {offsets = [0, 32], sizes = [8, 128], strides = [1, 1]} : vector<8x256xf32> to vector<8x128xf32>
    %c0_447 = arith.constant 0 : index
    %c60 = arith.constant 60 : index
    %1040 = memref.load %arg2[%c0_447, %c60] : memref<4x75xf32, #tpu.memory_space<smem>>
    %1041 = vector.broadcast %1040 : f32 to vector<8x128xf32>
    %1042 = arith.mulf %1041, %1039 : vector<8x128xf32>
    %1043 = arith.addf %1026, %1042 : vector<8x128xf32>
    %c1_448 = arith.constant 1 : index
    %c60_449 = arith.constant 60 : index
    %1044 = memref.load %arg2[%c1_448, %c60_449] : memref<4x75xf32, #tpu.memory_space<smem>>
    %1045 = vector.broadcast %1044 : f32 to vector<8x128xf32>
    %1046 = arith.mulf %1045, %1039 : vector<8x128xf32>
    %1047 = arith.addf %1030, %1046 : vector<8x128xf32>
    %c2_450 = arith.constant 2 : index
    %c60_451 = arith.constant 60 : index
    %1048 = memref.load %arg2[%c2_450, %c60_451] : memref<4x75xf32, #tpu.memory_space<smem>>
    %1049 = vector.broadcast %1048 : f32 to vector<8x128xf32>
    %1050 = arith.mulf %1049, %1039 : vector<8x128xf32>
    %1051 = arith.addf %1034, %1050 : vector<8x128xf32>
    %c3_452 = arith.constant 3 : index
    %c60_453 = arith.constant 60 : index
    %1052 = memref.load %arg2[%c3_452, %c60_453] : memref<4x75xf32, #tpu.memory_space<smem>>
    %1053 = vector.broadcast %1052 : f32 to vector<8x128xf32>
    %1054 = arith.mulf %1053, %1039 : vector<8x128xf32>
    %1055 = arith.addf %1038, %1054 : vector<8x128xf32>
    %1056 = vector.extract_strided_slice %868 {offsets = [0, 33], sizes = [8, 128], strides = [1, 1]} : vector<8x256xf32> to vector<8x128xf32>
    %c0_454 = arith.constant 0 : index
    %c61 = arith.constant 61 : index
    %1057 = memref.load %arg2[%c0_454, %c61] : memref<4x75xf32, #tpu.memory_space<smem>>
    %1058 = vector.broadcast %1057 : f32 to vector<8x128xf32>
    %1059 = arith.mulf %1058, %1056 : vector<8x128xf32>
    %1060 = arith.addf %1043, %1059 : vector<8x128xf32>
    %c1_455 = arith.constant 1 : index
    %c61_456 = arith.constant 61 : index
    %1061 = memref.load %arg2[%c1_455, %c61_456] : memref<4x75xf32, #tpu.memory_space<smem>>
    %1062 = vector.broadcast %1061 : f32 to vector<8x128xf32>
    %1063 = arith.mulf %1062, %1056 : vector<8x128xf32>
    %1064 = arith.addf %1047, %1063 : vector<8x128xf32>
    %c2_457 = arith.constant 2 : index
    %c61_458 = arith.constant 61 : index
    %1065 = memref.load %arg2[%c2_457, %c61_458] : memref<4x75xf32, #tpu.memory_space<smem>>
    %1066 = vector.broadcast %1065 : f32 to vector<8x128xf32>
    %1067 = arith.mulf %1066, %1056 : vector<8x128xf32>
    %1068 = arith.addf %1051, %1067 : vector<8x128xf32>
    %c3_459 = arith.constant 3 : index
    %c61_460 = arith.constant 61 : index
    %1069 = memref.load %arg2[%c3_459, %c61_460] : memref<4x75xf32, #tpu.memory_space<smem>>
    %1070 = vector.broadcast %1069 : f32 to vector<8x128xf32>
    %1071 = arith.mulf %1070, %1056 : vector<8x128xf32>
    %1072 = arith.addf %1055, %1071 : vector<8x128xf32>
    %1073 = vector.extract_strided_slice %868 {offsets = [0, 34], sizes = [8, 128], strides = [1, 1]} : vector<8x256xf32> to vector<8x128xf32>
    %c0_461 = arith.constant 0 : index
    %c62 = arith.constant 62 : index
    %1074 = memref.load %arg2[%c0_461, %c62] : memref<4x75xf32, #tpu.memory_space<smem>>
    %1075 = vector.broadcast %1074 : f32 to vector<8x128xf32>
    %1076 = arith.mulf %1075, %1073 : vector<8x128xf32>
    %1077 = arith.addf %1060, %1076 : vector<8x128xf32>
    %c1_462 = arith.constant 1 : index
    %c62_463 = arith.constant 62 : index
    %1078 = memref.load %arg2[%c1_462, %c62_463] : memref<4x75xf32, #tpu.memory_space<smem>>
    %1079 = vector.broadcast %1078 : f32 to vector<8x128xf32>
    %1080 = arith.mulf %1079, %1073 : vector<8x128xf32>
    %1081 = arith.addf %1064, %1080 : vector<8x128xf32>
    %c2_464 = arith.constant 2 : index
    %c62_465 = arith.constant 62 : index
    %1082 = memref.load %arg2[%c2_464, %c62_465] : memref<4x75xf32, #tpu.memory_space<smem>>
    %1083 = vector.broadcast %1082 : f32 to vector<8x128xf32>
    %1084 = arith.mulf %1083, %1073 : vector<8x128xf32>
    %1085 = arith.addf %1068, %1084 : vector<8x128xf32>
    %c3_466 = arith.constant 3 : index
    %c62_467 = arith.constant 62 : index
    %1086 = memref.load %arg2[%c3_466, %c62_467] : memref<4x75xf32, #tpu.memory_space<smem>>
    %1087 = vector.broadcast %1086 : f32 to vector<8x128xf32>
    %1088 = arith.mulf %1087, %1073 : vector<8x128xf32>
    %1089 = arith.addf %1072, %1088 : vector<8x128xf32>
    %1090 = vector.extract_strided_slice %868 {offsets = [0, 35], sizes = [8, 128], strides = [1, 1]} : vector<8x256xf32> to vector<8x128xf32>
    %c0_468 = arith.constant 0 : index
    %c63 = arith.constant 63 : index
    %1091 = memref.load %arg2[%c0_468, %c63] : memref<4x75xf32, #tpu.memory_space<smem>>
    %1092 = vector.broadcast %1091 : f32 to vector<8x128xf32>
    %1093 = arith.mulf %1092, %1090 : vector<8x128xf32>
    %1094 = arith.addf %1077, %1093 : vector<8x128xf32>
    %c1_469 = arith.constant 1 : index
    %c63_470 = arith.constant 63 : index
    %1095 = memref.load %arg2[%c1_469, %c63_470] : memref<4x75xf32, #tpu.memory_space<smem>>
    %1096 = vector.broadcast %1095 : f32 to vector<8x128xf32>
    %1097 = arith.mulf %1096, %1090 : vector<8x128xf32>
    %1098 = arith.addf %1081, %1097 : vector<8x128xf32>
    %c2_471 = arith.constant 2 : index
    %c63_472 = arith.constant 63 : index
    %1099 = memref.load %arg2[%c2_471, %c63_472] : memref<4x75xf32, #tpu.memory_space<smem>>
    %1100 = vector.broadcast %1099 : f32 to vector<8x128xf32>
    %1101 = arith.mulf %1100, %1090 : vector<8x128xf32>
    %1102 = arith.addf %1085, %1101 : vector<8x128xf32>
    %c3_473 = arith.constant 3 : index
    %c63_474 = arith.constant 63 : index
    %1103 = memref.load %arg2[%c3_473, %c63_474] : memref<4x75xf32, #tpu.memory_space<smem>>
    %1104 = vector.broadcast %1103 : f32 to vector<8x128xf32>
    %1105 = arith.mulf %1104, %1090 : vector<8x128xf32>
    %1106 = arith.addf %1089, %1105 : vector<8x128xf32>
    %1107 = vector.extract_strided_slice %868 {offsets = [0, 36], sizes = [8, 128], strides = [1, 1]} : vector<8x256xf32> to vector<8x128xf32>
    %c0_475 = arith.constant 0 : index
    %c64 = arith.constant 64 : index
    %1108 = memref.load %arg2[%c0_475, %c64] : memref<4x75xf32, #tpu.memory_space<smem>>
    %1109 = vector.broadcast %1108 : f32 to vector<8x128xf32>
    %1110 = arith.mulf %1109, %1107 : vector<8x128xf32>
    %1111 = arith.addf %1094, %1110 : vector<8x128xf32>
    %c1_476 = arith.constant 1 : index
    %c64_477 = arith.constant 64 : index
    %1112 = memref.load %arg2[%c1_476, %c64_477] : memref<4x75xf32, #tpu.memory_space<smem>>
    %1113 = vector.broadcast %1112 : f32 to vector<8x128xf32>
    %1114 = arith.mulf %1113, %1107 : vector<8x128xf32>
    %1115 = arith.addf %1098, %1114 : vector<8x128xf32>
    %c2_478 = arith.constant 2 : index
    %c64_479 = arith.constant 64 : index
    %1116 = memref.load %arg2[%c2_478, %c64_479] : memref<4x75xf32, #tpu.memory_space<smem>>
    %1117 = vector.broadcast %1116 : f32 to vector<8x128xf32>
    %1118 = arith.mulf %1117, %1107 : vector<8x128xf32>
    %1119 = arith.addf %1102, %1118 : vector<8x128xf32>
    %c3_480 = arith.constant 3 : index
    %c64_481 = arith.constant 64 : index
    %1120 = memref.load %arg2[%c3_480, %c64_481] : memref<4x75xf32, #tpu.memory_space<smem>>
    %1121 = vector.broadcast %1120 : f32 to vector<8x128xf32>
    %1122 = arith.mulf %1121, %1107 : vector<8x128xf32>
    %1123 = arith.addf %1106, %1122 : vector<8x128xf32>
    %1124 = vector.extract_strided_slice %868 {offsets = [0, 48], sizes = [8, 128], strides = [1, 1]} : vector<8x256xf32> to vector<8x128xf32>
    %c0_482 = arith.constant 0 : index
    %c65 = arith.constant 65 : index
    %1125 = memref.load %arg2[%c0_482, %c65] : memref<4x75xf32, #tpu.memory_space<smem>>
    %1126 = vector.broadcast %1125 : f32 to vector<8x128xf32>
    %1127 = arith.mulf %1126, %1124 : vector<8x128xf32>
    %1128 = arith.addf %1111, %1127 : vector<8x128xf32>
    %c1_483 = arith.constant 1 : index
    %c65_484 = arith.constant 65 : index
    %1129 = memref.load %arg2[%c1_483, %c65_484] : memref<4x75xf32, #tpu.memory_space<smem>>
    %1130 = vector.broadcast %1129 : f32 to vector<8x128xf32>
    %1131 = arith.mulf %1130, %1124 : vector<8x128xf32>
    %1132 = arith.addf %1115, %1131 : vector<8x128xf32>
    %c2_485 = arith.constant 2 : index
    %c65_486 = arith.constant 65 : index
    %1133 = memref.load %arg2[%c2_485, %c65_486] : memref<4x75xf32, #tpu.memory_space<smem>>
    %1134 = vector.broadcast %1133 : f32 to vector<8x128xf32>
    %1135 = arith.mulf %1134, %1124 : vector<8x128xf32>
    %1136 = arith.addf %1119, %1135 : vector<8x128xf32>
    %c3_487 = arith.constant 3 : index
    %c65_488 = arith.constant 65 : index
    %1137 = memref.load %arg2[%c3_487, %c65_488] : memref<4x75xf32, #tpu.memory_space<smem>>
    %1138 = vector.broadcast %1137 : f32 to vector<8x128xf32>
    %1139 = arith.mulf %1138, %1124 : vector<8x128xf32>
    %1140 = arith.addf %1123, %1139 : vector<8x128xf32>
    %1141 = vector.extract_strided_slice %868 {offsets = [0, 49], sizes = [8, 128], strides = [1, 1]} : vector<8x256xf32> to vector<8x128xf32>
    %c0_489 = arith.constant 0 : index
    %c66 = arith.constant 66 : index
    %1142 = memref.load %arg2[%c0_489, %c66] : memref<4x75xf32, #tpu.memory_space<smem>>
    %1143 = vector.broadcast %1142 : f32 to vector<8x128xf32>
    %1144 = arith.mulf %1143, %1141 : vector<8x128xf32>
    %1145 = arith.addf %1128, %1144 : vector<8x128xf32>
    %c1_490 = arith.constant 1 : index
    %c66_491 = arith.constant 66 : index
    %1146 = memref.load %arg2[%c1_490, %c66_491] : memref<4x75xf32, #tpu.memory_space<smem>>
    %1147 = vector.broadcast %1146 : f32 to vector<8x128xf32>
    %1148 = arith.mulf %1147, %1141 : vector<8x128xf32>
    %1149 = arith.addf %1132, %1148 : vector<8x128xf32>
    %c2_492 = arith.constant 2 : index
    %c66_493 = arith.constant 66 : index
    %1150 = memref.load %arg2[%c2_492, %c66_493] : memref<4x75xf32, #tpu.memory_space<smem>>
    %1151 = vector.broadcast %1150 : f32 to vector<8x128xf32>
    %1152 = arith.mulf %1151, %1141 : vector<8x128xf32>
    %1153 = arith.addf %1136, %1152 : vector<8x128xf32>
    %c3_494 = arith.constant 3 : index
    %c66_495 = arith.constant 66 : index
    %1154 = memref.load %arg2[%c3_494, %c66_495] : memref<4x75xf32, #tpu.memory_space<smem>>
    %1155 = vector.broadcast %1154 : f32 to vector<8x128xf32>
    %1156 = arith.mulf %1155, %1141 : vector<8x128xf32>
    %1157 = arith.addf %1140, %1156 : vector<8x128xf32>
    %1158 = vector.extract_strided_slice %868 {offsets = [0, 50], sizes = [8, 128], strides = [1, 1]} : vector<8x256xf32> to vector<8x128xf32>
    %c0_496 = arith.constant 0 : index
    %c67 = arith.constant 67 : index
    %1159 = memref.load %arg2[%c0_496, %c67] : memref<4x75xf32, #tpu.memory_space<smem>>
    %1160 = vector.broadcast %1159 : f32 to vector<8x128xf32>
    %1161 = arith.mulf %1160, %1158 : vector<8x128xf32>
    %1162 = arith.addf %1145, %1161 : vector<8x128xf32>
    %c1_497 = arith.constant 1 : index
    %c67_498 = arith.constant 67 : index
    %1163 = memref.load %arg2[%c1_497, %c67_498] : memref<4x75xf32, #tpu.memory_space<smem>>
    %1164 = vector.broadcast %1163 : f32 to vector<8x128xf32>
    %1165 = arith.mulf %1164, %1158 : vector<8x128xf32>
    %1166 = arith.addf %1149, %1165 : vector<8x128xf32>
    %c2_499 = arith.constant 2 : index
    %c67_500 = arith.constant 67 : index
    %1167 = memref.load %arg2[%c2_499, %c67_500] : memref<4x75xf32, #tpu.memory_space<smem>>
    %1168 = vector.broadcast %1167 : f32 to vector<8x128xf32>
    %1169 = arith.mulf %1168, %1158 : vector<8x128xf32>
    %1170 = arith.addf %1153, %1169 : vector<8x128xf32>
    %c3_501 = arith.constant 3 : index
    %c67_502 = arith.constant 67 : index
    %1171 = memref.load %arg2[%c3_501, %c67_502] : memref<4x75xf32, #tpu.memory_space<smem>>
    %1172 = vector.broadcast %1171 : f32 to vector<8x128xf32>
    %1173 = arith.mulf %1172, %1158 : vector<8x128xf32>
    %1174 = arith.addf %1157, %1173 : vector<8x128xf32>
    %1175 = vector.extract_strided_slice %868 {offsets = [0, 51], sizes = [8, 128], strides = [1, 1]} : vector<8x256xf32> to vector<8x128xf32>
    %c0_503 = arith.constant 0 : index
    %c68 = arith.constant 68 : index
    %1176 = memref.load %arg2[%c0_503, %c68] : memref<4x75xf32, #tpu.memory_space<smem>>
    %1177 = vector.broadcast %1176 : f32 to vector<8x128xf32>
    %1178 = arith.mulf %1177, %1175 : vector<8x128xf32>
    %1179 = arith.addf %1162, %1178 : vector<8x128xf32>
    %c1_504 = arith.constant 1 : index
    %c68_505 = arith.constant 68 : index
    %1180 = memref.load %arg2[%c1_504, %c68_505] : memref<4x75xf32, #tpu.memory_space<smem>>
    %1181 = vector.broadcast %1180 : f32 to vector<8x128xf32>
    %1182 = arith.mulf %1181, %1175 : vector<8x128xf32>
    %1183 = arith.addf %1166, %1182 : vector<8x128xf32>
    %c2_506 = arith.constant 2 : index
    %c68_507 = arith.constant 68 : index
    %1184 = memref.load %arg2[%c2_506, %c68_507] : memref<4x75xf32, #tpu.memory_space<smem>>
    %1185 = vector.broadcast %1184 : f32 to vector<8x128xf32>
    %1186 = arith.mulf %1185, %1175 : vector<8x128xf32>
    %1187 = arith.addf %1170, %1186 : vector<8x128xf32>
    %c3_508 = arith.constant 3 : index
    %c68_509 = arith.constant 68 : index
    %1188 = memref.load %arg2[%c3_508, %c68_509] : memref<4x75xf32, #tpu.memory_space<smem>>
    %1189 = vector.broadcast %1188 : f32 to vector<8x128xf32>
    %1190 = arith.mulf %1189, %1175 : vector<8x128xf32>
    %1191 = arith.addf %1174, %1190 : vector<8x128xf32>
    %1192 = vector.extract_strided_slice %868 {offsets = [0, 52], sizes = [8, 128], strides = [1, 1]} : vector<8x256xf32> to vector<8x128xf32>
    %c0_510 = arith.constant 0 : index
    %c69 = arith.constant 69 : index
    %1193 = memref.load %arg2[%c0_510, %c69] : memref<4x75xf32, #tpu.memory_space<smem>>
    %1194 = vector.broadcast %1193 : f32 to vector<8x128xf32>
    %1195 = arith.mulf %1194, %1192 : vector<8x128xf32>
    %1196 = arith.addf %1179, %1195 : vector<8x128xf32>
    %c1_511 = arith.constant 1 : index
    %c69_512 = arith.constant 69 : index
    %1197 = memref.load %arg2[%c1_511, %c69_512] : memref<4x75xf32, #tpu.memory_space<smem>>
    %1198 = vector.broadcast %1197 : f32 to vector<8x128xf32>
    %1199 = arith.mulf %1198, %1192 : vector<8x128xf32>
    %1200 = arith.addf %1183, %1199 : vector<8x128xf32>
    %c2_513 = arith.constant 2 : index
    %c69_514 = arith.constant 69 : index
    %1201 = memref.load %arg2[%c2_513, %c69_514] : memref<4x75xf32, #tpu.memory_space<smem>>
    %1202 = vector.broadcast %1201 : f32 to vector<8x128xf32>
    %1203 = arith.mulf %1202, %1192 : vector<8x128xf32>
    %1204 = arith.addf %1187, %1203 : vector<8x128xf32>
    %c3_515 = arith.constant 3 : index
    %c69_516 = arith.constant 69 : index
    %1205 = memref.load %arg2[%c3_515, %c69_516] : memref<4x75xf32, #tpu.memory_space<smem>>
    %1206 = vector.broadcast %1205 : f32 to vector<8x128xf32>
    %1207 = arith.mulf %1206, %1192 : vector<8x128xf32>
    %1208 = arith.addf %1191, %1207 : vector<8x128xf32>
    %1209 = vector.extract_strided_slice %868 {offsets = [0, 64], sizes = [8, 128], strides = [1, 1]} : vector<8x256xf32> to vector<8x128xf32>
    %c0_517 = arith.constant 0 : index
    %c70 = arith.constant 70 : index
    %1210 = memref.load %arg2[%c0_517, %c70] : memref<4x75xf32, #tpu.memory_space<smem>>
    %1211 = vector.broadcast %1210 : f32 to vector<8x128xf32>
    %1212 = arith.mulf %1211, %1209 : vector<8x128xf32>
    %1213 = arith.addf %1196, %1212 : vector<8x128xf32>
    %c1_518 = arith.constant 1 : index
    %c70_519 = arith.constant 70 : index
    %1214 = memref.load %arg2[%c1_518, %c70_519] : memref<4x75xf32, #tpu.memory_space<smem>>
    %1215 = vector.broadcast %1214 : f32 to vector<8x128xf32>
    %1216 = arith.mulf %1215, %1209 : vector<8x128xf32>
    %1217 = arith.addf %1200, %1216 : vector<8x128xf32>
    %c2_520 = arith.constant 2 : index
    %c70_521 = arith.constant 70 : index
    %1218 = memref.load %arg2[%c2_520, %c70_521] : memref<4x75xf32, #tpu.memory_space<smem>>
    %1219 = vector.broadcast %1218 : f32 to vector<8x128xf32>
    %1220 = arith.mulf %1219, %1209 : vector<8x128xf32>
    %1221 = arith.addf %1204, %1220 : vector<8x128xf32>
    %c3_522 = arith.constant 3 : index
    %c70_523 = arith.constant 70 : index
    %1222 = memref.load %arg2[%c3_522, %c70_523] : memref<4x75xf32, #tpu.memory_space<smem>>
    %1223 = vector.broadcast %1222 : f32 to vector<8x128xf32>
    %1224 = arith.mulf %1223, %1209 : vector<8x128xf32>
    %1225 = arith.addf %1208, %1224 : vector<8x128xf32>
    %1226 = vector.extract_strided_slice %868 {offsets = [0, 65], sizes = [8, 128], strides = [1, 1]} : vector<8x256xf32> to vector<8x128xf32>
    %c0_524 = arith.constant 0 : index
    %c71 = arith.constant 71 : index
    %1227 = memref.load %arg2[%c0_524, %c71] : memref<4x75xf32, #tpu.memory_space<smem>>
    %1228 = vector.broadcast %1227 : f32 to vector<8x128xf32>
    %1229 = arith.mulf %1228, %1226 : vector<8x128xf32>
    %1230 = arith.addf %1213, %1229 : vector<8x128xf32>
    %c1_525 = arith.constant 1 : index
    %c71_526 = arith.constant 71 : index
    %1231 = memref.load %arg2[%c1_525, %c71_526] : memref<4x75xf32, #tpu.memory_space<smem>>
    %1232 = vector.broadcast %1231 : f32 to vector<8x128xf32>
    %1233 = arith.mulf %1232, %1226 : vector<8x128xf32>
    %1234 = arith.addf %1217, %1233 : vector<8x128xf32>
    %c2_527 = arith.constant 2 : index
    %c71_528 = arith.constant 71 : index
    %1235 = memref.load %arg2[%c2_527, %c71_528] : memref<4x75xf32, #tpu.memory_space<smem>>
    %1236 = vector.broadcast %1235 : f32 to vector<8x128xf32>
    %1237 = arith.mulf %1236, %1226 : vector<8x128xf32>
    %1238 = arith.addf %1221, %1237 : vector<8x128xf32>
    %c3_529 = arith.constant 3 : index
    %c71_530 = arith.constant 71 : index
    %1239 = memref.load %arg2[%c3_529, %c71_530] : memref<4x75xf32, #tpu.memory_space<smem>>
    %1240 = vector.broadcast %1239 : f32 to vector<8x128xf32>
    %1241 = arith.mulf %1240, %1226 : vector<8x128xf32>
    %1242 = arith.addf %1225, %1241 : vector<8x128xf32>
    %1243 = vector.extract_strided_slice %868 {offsets = [0, 66], sizes = [8, 128], strides = [1, 1]} : vector<8x256xf32> to vector<8x128xf32>
    %c0_531 = arith.constant 0 : index
    %c72 = arith.constant 72 : index
    %1244 = memref.load %arg2[%c0_531, %c72] : memref<4x75xf32, #tpu.memory_space<smem>>
    %1245 = vector.broadcast %1244 : f32 to vector<8x128xf32>
    %1246 = arith.mulf %1245, %1243 : vector<8x128xf32>
    %1247 = arith.addf %1230, %1246 : vector<8x128xf32>
    %c1_532 = arith.constant 1 : index
    %c72_533 = arith.constant 72 : index
    %1248 = memref.load %arg2[%c1_532, %c72_533] : memref<4x75xf32, #tpu.memory_space<smem>>
    %1249 = vector.broadcast %1248 : f32 to vector<8x128xf32>
    %1250 = arith.mulf %1249, %1243 : vector<8x128xf32>
    %1251 = arith.addf %1234, %1250 : vector<8x128xf32>
    %c2_534 = arith.constant 2 : index
    %c72_535 = arith.constant 72 : index
    %1252 = memref.load %arg2[%c2_534, %c72_535] : memref<4x75xf32, #tpu.memory_space<smem>>
    %1253 = vector.broadcast %1252 : f32 to vector<8x128xf32>
    %1254 = arith.mulf %1253, %1243 : vector<8x128xf32>
    %1255 = arith.addf %1238, %1254 : vector<8x128xf32>
    %c3_536 = arith.constant 3 : index
    %c72_537 = arith.constant 72 : index
    %1256 = memref.load %arg2[%c3_536, %c72_537] : memref<4x75xf32, #tpu.memory_space<smem>>
    %1257 = vector.broadcast %1256 : f32 to vector<8x128xf32>
    %1258 = arith.mulf %1257, %1243 : vector<8x128xf32>
    %1259 = arith.addf %1242, %1258 : vector<8x128xf32>
    %1260 = vector.extract_strided_slice %868 {offsets = [0, 67], sizes = [8, 128], strides = [1, 1]} : vector<8x256xf32> to vector<8x128xf32>
    %c0_538 = arith.constant 0 : index
    %c73 = arith.constant 73 : index
    %1261 = memref.load %arg2[%c0_538, %c73] : memref<4x75xf32, #tpu.memory_space<smem>>
    %1262 = vector.broadcast %1261 : f32 to vector<8x128xf32>
    %1263 = arith.mulf %1262, %1260 : vector<8x128xf32>
    %1264 = arith.addf %1247, %1263 : vector<8x128xf32>
    %c1_539 = arith.constant 1 : index
    %c73_540 = arith.constant 73 : index
    %1265 = memref.load %arg2[%c1_539, %c73_540] : memref<4x75xf32, #tpu.memory_space<smem>>
    %1266 = vector.broadcast %1265 : f32 to vector<8x128xf32>
    %1267 = arith.mulf %1266, %1260 : vector<8x128xf32>
    %1268 = arith.addf %1251, %1267 : vector<8x128xf32>
    %c2_541 = arith.constant 2 : index
    %c73_542 = arith.constant 73 : index
    %1269 = memref.load %arg2[%c2_541, %c73_542] : memref<4x75xf32, #tpu.memory_space<smem>>
    %1270 = vector.broadcast %1269 : f32 to vector<8x128xf32>
    %1271 = arith.mulf %1270, %1260 : vector<8x128xf32>
    %1272 = arith.addf %1255, %1271 : vector<8x128xf32>
    %c3_543 = arith.constant 3 : index
    %c73_544 = arith.constant 73 : index
    %1273 = memref.load %arg2[%c3_543, %c73_544] : memref<4x75xf32, #tpu.memory_space<smem>>
    %1274 = vector.broadcast %1273 : f32 to vector<8x128xf32>
    %1275 = arith.mulf %1274, %1260 : vector<8x128xf32>
    %1276 = arith.addf %1259, %1275 : vector<8x128xf32>
    %1277 = vector.extract_strided_slice %868 {offsets = [0, 68], sizes = [8, 128], strides = [1, 1]} : vector<8x256xf32> to vector<8x128xf32>
    %c0_545 = arith.constant 0 : index
    %c74 = arith.constant 74 : index
    %1278 = memref.load %arg2[%c0_545, %c74] : memref<4x75xf32, #tpu.memory_space<smem>>
    %1279 = vector.broadcast %1278 : f32 to vector<8x128xf32>
    %1280 = arith.mulf %1279, %1277 : vector<8x128xf32>
    %1281 = arith.addf %1264, %1280 : vector<8x128xf32>
    %c1_546 = arith.constant 1 : index
    %c74_547 = arith.constant 74 : index
    %1282 = memref.load %arg2[%c1_546, %c74_547] : memref<4x75xf32, #tpu.memory_space<smem>>
    %1283 = vector.broadcast %1282 : f32 to vector<8x128xf32>
    %1284 = arith.mulf %1283, %1277 : vector<8x128xf32>
    %1285 = arith.addf %1268, %1284 : vector<8x128xf32>
    %c2_548 = arith.constant 2 : index
    %c74_549 = arith.constant 74 : index
    %1286 = memref.load %arg2[%c2_548, %c74_549] : memref<4x75xf32, #tpu.memory_space<smem>>
    %1287 = vector.broadcast %1286 : f32 to vector<8x128xf32>
    %1288 = arith.mulf %1287, %1277 : vector<8x128xf32>
    %1289 = arith.addf %1272, %1288 : vector<8x128xf32>
    %c3_550 = arith.constant 3 : index
    %c74_551 = arith.constant 74 : index
    %1290 = memref.load %arg2[%c3_550, %c74_551] : memref<4x75xf32, #tpu.memory_space<smem>>
    %1291 = vector.broadcast %1290 : f32 to vector<8x128xf32>
    %1292 = arith.mulf %1291, %1277 : vector<8x128xf32>
    %1293 = arith.addf %1276, %1292 : vector<8x128xf32>
    %c0_552 = arith.constant 0 : index
    %c0_553 = arith.constant 0 : index
    %c0_554 = arith.constant 0 : index
    %c0_555 = arith.constant 0 : index
    %1294 = vector.load %arg4[%c0_552, %c0_553, %c0_554, %c0_555] : memref<1x4x8x128xf32, #tpu.memory_space<vmem>>, vector<1x1x8x128xf32>
    %1295 = vector.shape_cast %1294 : vector<1x1x8x128xf32> to vector<8x128xf32>
    %1296 = vector.shape_cast %1281 : vector<8x128xf32> to vector<1x1x8x128xf32>
    tpu.vector_store %arg4[%c0_552, %c0_553, %c0_554, %c0_555], %1296 {strides = array<i32>} : memref<1x4x8x128xf32, #tpu.memory_space<vmem>>, vector<1x1x8x128xf32>,
    %c0_556 = arith.constant 0 : index
    %c1_557 = arith.constant 1 : index
    %c0_558 = arith.constant 0 : index
    %c0_559 = arith.constant 0 : index
    %1297 = vector.load %arg4[%c0_556, %c1_557, %c0_558, %c0_559] : memref<1x4x8x128xf32, #tpu.memory_space<vmem>>, vector<1x1x8x128xf32>
    %1298 = vector.shape_cast %1297 : vector<1x1x8x128xf32> to vector<8x128xf32>
    %1299 = vector.shape_cast %1285 : vector<8x128xf32> to vector<1x1x8x128xf32>
    tpu.vector_store %arg4[%c0_556, %c1_557, %c0_558, %c0_559], %1299 {strides = array<i32>} : memref<1x4x8x128xf32, #tpu.memory_space<vmem>>, vector<1x1x8x128xf32>,
    %c0_560 = arith.constant 0 : index
    %c2_561 = arith.constant 2 : index
    %c0_562 = arith.constant 0 : index
    %c0_563 = arith.constant 0 : index
    %1300 = vector.load %arg4[%c0_560, %c2_561, %c0_562, %c0_563] : memref<1x4x8x128xf32, #tpu.memory_space<vmem>>, vector<1x1x8x128xf32>
    %1301 = vector.shape_cast %1300 : vector<1x1x8x128xf32> to vector<8x128xf32>
    %1302 = vector.shape_cast %1289 : vector<8x128xf32> to vector<1x1x8x128xf32>
    tpu.vector_store %arg4[%c0_560, %c2_561, %c0_562, %c0_563], %1302 {strides = array<i32>} : memref<1x4x8x128xf32, #tpu.memory_space<vmem>>, vector<1x1x8x128xf32>,
    %c0_564 = arith.constant 0 : index
    %c3_565 = arith.constant 3 : index
    %c0_566 = arith.constant 0 : index
    %c0_567 = arith.constant 0 : index
    %1303 = vector.load %arg4[%c0_564, %c3_565, %c0_566, %c0_567] : memref<1x4x8x128xf32, #tpu.memory_space<vmem>>, vector<1x1x8x128xf32>
    %1304 = vector.shape_cast %1303 : vector<1x1x8x128xf32> to vector<8x128xf32>
    %1305 = vector.shape_cast %1293 : vector<8x128xf32> to vector<1x1x8x128xf32>
    tpu.vector_store %arg4[%c0_564, %c3_565, %c0_566, %c0_567], %1305 {strides = array<i32>} : memref<1x4x8x128xf32, #tpu.memory_space<vmem>>, vector<1x1x8x128xf32>,
    return
  }
  func.func @transform_0(%arg0: i32, %arg1: i32) -> (i32, i32) {
    %c0_i32 = arith.constant 0 : i32
    %c0_i32_0 = arith.constant 0 : i32
    %c0_i32_1 = arith.constant 0 : i32
    return %c0_i32, %c0_i32_0 : i32, i32
  }
  func.func @transform_1(%arg0: i32, %arg1: i32) -> (i32, i32, i32, i32) {
    %c0_i32 = arith.constant 0 : i32
    %c0_i32_0 = arith.constant 0 : i32
    %c0_i32_1 = arith.constant 0 : i32
    %c0_i32_2 = arith.constant 0 : i32
    return %arg0, %c0_i32, %c0_i32_0, %c0_i32_1 : i32, i32, i32, i32
  }
  func.func @transform_2(%arg0: i32, %arg1: i32) -> (i32, i32, i32, i32) {
    %c0_i32 = arith.constant 0 : i32
    %c0_i32_0 = arith.constant 0 : i32
    %c0_i32_1 = arith.constant 0 : i32
    return %arg0, %c0_i32, %arg1, %c0_i32_0 : i32, i32, i32, i32
  }
}

</mosaic_0001>

<bundles_post_ra>
// kernel: tpu_custom_call.1
= control target key start
LH: loop header
LB: loop body
LE: loop exit
PB: predicated region body
PF: predicated region fallthrough
CT: control target
= control target key end

     0   :  { %s7702_s0 = inlined_call_operand.vmem [shape: f32[4,75], index: 0, kind: input, shape index: {}]   ;;  %s7703_s1 = inlined_call_operand.vmem [shape: f32[2,3,9,128], index: 1, kind: input, shape index: {}]   ;;  %s7704_s2 = inlined_call_operand.hbm [shape: f32[2,4,8,128], index: 2, kind: output, shape index: {}]  }
   0x1   :  { %7761 = sst [smem:[#allocation349_spill]] %s7702_s0 }
   0x2   :  { %7762 = sst [smem:[#allocation350_spill]] %s7703_s1 }
   0x3   :  { %7 = vsyncpa [#allocation4], 0 }
   0x4   :  { %8 = vsyncpa [#allocation3], 0 }
   0x5   :  { %10 = vsyncpa [#allocation3 + $0x1], 0  ;;  %s4667_s9 = smov 0   ;;  %s4669_s10 = smov 0  }
   0x6   :  { %s4671_s11 = smov 0   ;;  %s4673_s12 = smov 0  }
   0x7   :  { %s4675_s13 = smov 0   ;;  %s4677_s14 = smov 0  }
   0x8 LB: > { %s4102_s15 = sadd.s32 4294967295, %s4623_s14   ;;  %s4103_s16 = sadd.s32 4294967294, %s4623_s14   ;;  %s4623_s14 = sphi %s4677_s14, %s16_s14   ;;  %s4619_s13 = sphi %s4675_s13, %s8573_s13   ;;  %s4615_s12 = sphi %s4673_s12, %s8572_s12   ;;  %s4611_s11 = sphi %s4671_s11, %s8571_s11   ;;  %s4607_s10 = sphi %s4669_s10, %s8570_s10   ;;  %s4603_s9 = sphi %s4667_s9, %s8569_s9  }
   0x9   : > { %s28_s17 = sadd.s32 1, %s4619_s13  ;;  %s84_s18 = sadd.s32 1, %s4611_s11 }
   0xa   : > { %p30_p0 = scmp.ge.s32.totalorder %s28_s17, 2  ;;  %p94_p1 = scmp.ne.s32.totalorder %s4611_s11, %s4607_s10 }
   0xb   : > { %p95_p2 = scmp.eq.s32.totalorder %s4102_s15, 1  ;;  %p100_p3 = scmp.ne.s32.totalorder %s4607_s10, %s4603_s9 }
   0xc   : > { %s8575_s17 = smov (%p30_p0, %s28_s17), 0  ;;  %p101_p5 = scmp.eq.s32.totalorder %s4103_s16, 1 }
   0xd   : > { %p4707_p4 = por %p95_p2, %p94_p1  ;;  %s79_s20 = ssub.s32 %s4619_s13, %s8575_s17 }
   0xe   : > { %p4104_p6 = scmp.ge.s32.totalorder %s4623_s14, 1  ;;  %p82_p7 = scmp.eq.s32.totalorder %s79_s20, 0 }
   0xf   : > { %p4714_p8 = por %p101_p5, %p100_p3  ;;  %p108_p9 = scmp.lt.s32.totalorder %s4623_s14, 3 }
  0x10   : > { %s4720_s22 = scalar_select %p82_p7, %s4611_s11, %s84_s18  }
  0x11   : > { %p109_p10 = pnand %p4104_p6, %p108_p9  ;;  %p4438_p11 = scmp.eq.s32.totalorder %s4102_s15, 0 }
  0x12   : > { %s7765_s0 = sld [smem:[#allocation349_spill]]  ;;  %s4625_s26 = smov [#allocation2]  }
  0x13   : > { %p4430_p12 = pneg %p109_p10 }
  0x15   : > { %p4431_p13 = pnand %p4438_p11, %p4430_p12  ;;  %141 = sbr.rel (%p109_p10) target bundleno = 1694 (0x69e), region = 28 }
  0x18   : > { %s120_s25 = sshll.u32 %s7765_s0, 4  ;;  %s121_s25 = int_to_ptr.vmem [resolvable:$true] %s120_s25 }
  0x19   : > { %4433 = dma.vmem_to_smem (!%p4431_p13), %s121_s25, 64, %s4625_s26, [#allocation4]  }
  0x1a   : > { %4594 = dma.done.wait (%p4438_p11), [#allocation4], 64  }
  0x1b   : > { %4596 = vsyncadd (%p4438_p11), [#allocation4], 4294967232 }
  0x1c   : > { %148 = sfence }
  0x1d   : > { %p165_p0 = scmp.lt.s32.totalorder %s4615_s12, 1  ;;  %s4115_s27 = sld [smem:[#allocation2 + $0x81]]  ;;  %vm198_vm0 = vcmask 1039360   ;;  %vm251_vm1 = vcmask 1031168   ;;  %vm304_vm2 = vcmask 1022976   ;;  %vm357_vm3 = vcmask 1014784  }
  0x1e   : > { %s4114_s29 = sld [smem:[#allocation2 + $0x1]]  ;;  %s4626_s7 = smov 127   ;;  %vm410_vm4 = vcmask 916480   ;;  %vm463_vm5 = vcmask 908288   ;;  %vm516_vm6 = vcmask 900096   ;;  %vm569_vm7 = vcmask 891904  }
  0x1f   : > { %s166_s28 = scalar_select %p165_p0, %s4615_s12, 1  ;;  %vm622_vm8 = vcmask 883712   ;;  %vm7759_vm9 = vcmask 785408   ;;  %vm7757_vm10 = vcmask 777216   ;;  %vm7758_vm11 = vcmask 769024  }
  0x20   : > { %s4116_s3 = sld [smem:[#allocation2 + $0x101]]  ;;  %s4627_s20 = smov 126   ;;  %vm7760_vm12 = vcmask 760832   ;;  %vm7749_vm13 = vcmask 752640   ;;  %vm7750_vm14 = vcmask 654336   ;;  %vm7751_vm15 = vcmask 646144  }
  0x21   : > { %s4423_s30 = smul.u32 48, %s166_s28  ;;  %s7766_s1 = sld [smem:[#allocation350_spill]] }
  0x22   : > { %s4117_s8 = sld [smem:[#allocation2 + $0x181]]  ;;  %s7741_s4 = smov 124  }
  0x23   : > { %v203_v1 = vstv %s4115_s27  ;;  %s4118_s15 = sld [smem:[#allocation2 + $0x2]]  ;;  %s7743_s27 = smov 125  }
  0x24   : > { %v189_v3 = vstv %s4114_s29  ;;  %s4119_s16 = sld [smem:[#allocation2 + $0x82]]  ;;  %s8118_s0 = smov 111  }
  0x25   : > { %s4120_s18 = sld [smem:[#allocation2 + $0x102]] }
  0x26   : > { %v216_v5 = vstv %s4116_s3  ;;  %s4121_s23 = sld [smem:[#allocation2 + $0x182]] }
  0x27   : > { %s4730_s6 = scalar_lea.vmem %s7766_s1, %s4423_s30  ;;  %s4122_s24 = sld [smem:[#allocation2 + $0x3]] }
  0x28   : > { %v4733_v0 = vld [vmem:[%s4730_s6] sm:$0xff]  ;;  %v229_v11 = vstv %s4117_s8  ;;  %s4123_s25 = sld [smem:[#allocation2 + $0x83]] }
  0x29   : > { %v204_v2 = vmul.f32 %v203_v1, %v4733_v0  ;;  %v190_v4 = vmul.f32 %v189_v3, %v4733_v0  ;;  %v4739_v6 = vld [vmem:[%s4730_s6 + $0x1] sm:$0xff]  ;;  %v217_v7 = vmul.f32 %v216_v5, %v4733_v0  ;;  %v230_v13 = vmul.f32 %v229_v11, %v4733_v0  ;;  %s4124_s26 = sld [smem:[#allocation2 + $0x103]] }
  0x2a   : > { %v205_v8 = vmul.f32 %v203_v1, %v4739_v6  ;;  %v191_v9 = vmul.f32 %v189_v3, %v4739_v6  ;;  %v218_v10 = vmul.f32 %v216_v5, %v4739_v6  ;;  %v231_v12 = vmul.f32 %v229_v11, %v4739_v6  ;;  %s4125_s28 = sld [smem:[#allocation2 + $0x183]] }
  0x2b   : > { %208 = vrot.lane.b32.xlu1 %v204_v2, %s4626_s7  ;;  %194 = vrot.lane.b32.xlu0 %v190_v4, %s4626_s7  ;;  %v242_v14 = vstv %s4118_s15  ;;  %v256_v16 = vstv %s4119_s16  ;;  %s4126_s29 = sld [smem:[#allocation2 + $0x4]] }
  0x2c   : > { %221 = vrot.lane.b32.xlu2 %v217_v7, %s4626_s7  ;;  %v243_v15 = vmul.f32 %v242_v14, %v4733_v0  ;;  %v257_v17 = vmul.f32 %v256_v16, %v4733_v0  ;;  %v244_v18 = vmul.f32 %v242_v14, %v4739_v6  ;;  %v258_v19 = vmul.f32 %v256_v16, %v4739_v6  ;;  %s4127_s30 = sld [smem:[#allocation2 + $0x84]] }
  0x2d   : > { %v269_v20 = vstv %s4120_s18  ;;  %v282_v23 = vstv %s4121_s23  ;;  %v295_v25 = vstv %s4122_s24  ;;  %s4128_s3 = sld [smem:[#allocation2 + $0x104]]  ;;  %s7739_s18 = smov 112  }
  0x2e   : > { %v271_v21 = vmul.f32 %v269_v20, %v4739_v6  ;;  %v270_v22 = vmul.f32 %v269_v20, %v4733_v0  ;;  %v283_v24 = vmul.f32 %v282_v23, %v4733_v0  ;;  %v296_v26 = vmul.f32 %v295_v25, %v4733_v0  ;;  %s4129_s5 = sld [smem:[#allocation2 + $0x184]] }
  0x2f   : > { %v284_v27 = vmul.f32 %v282_v23, %v4739_v6  ;;  %v297_v28 = vmul.f32 %v295_v25, %v4739_v6  ;;  %v309_v29 = vstv %s4123_s25  ;;  %v322_v32 = vstv %s4124_s26  ;;  %s4130_s8 = sld [smem:[#allocation2 + $0x5]] }
  0x30   : > { %v311_v30 = vmul.f32 %v309_v29, %v4739_v6  ;;  %v310_v31 = vmul.f32 %v309_v29, %v4733_v0  ;;  %v323_v33 = vmul.f32 %v322_v32, %v4733_v0  ;;  %v335_v34 = vstv %s4125_s28  ;;  %s4131_s15 = sld [smem:[#allocation2 + $0x85]]  ;;  %s7737_s28 = smov 111  }
  0x31   : > { %v336_v35 = vmul.f32 %v335_v34, %v4733_v0  ;;  %v324_v36 = vmul.f32 %v322_v32, %v4739_v6  ;;  %v337_v37 = vmul.f32 %v335_v34, %v4739_v6  ;;  %v348_v38 = vstv %s4126_s29  ;;  %s4132_s16 = sld [smem:[#allocation2 + $0x105]] }
  0x32   : > { %v350_v39 = vmul.f32 %v348_v38, %v4739_v6  ;;  %v349_v40 = vmul.f32 %v348_v38, %v4733_v0  ;;  %v362_v41 = vstv %s4127_s30  ;;  %s4133_s23 = sld [smem:[#allocation2 + $0x185]] }
  0x33   : > { %210 = vrot.lane.b32.xlu1 %v205_v8, %s4626_s7  ;;  %196 = vrot.lane.b32.xlu0 %v191_v9, %s4626_s7  ;;  %v363_v42 = vmul.f32 %v362_v41, %v4733_v0  ;;  %v375_v43 = vstv %s4128_s3  ;;  %v364_v45 = vmul.f32 %v362_v41, %v4739_v6  ;;  %s4134_s24 = sld [smem:[#allocation2 + $0x6]] }
  0x34   : > { %223 = vrot.lane.b32.xlu2 %v218_v10, %s4626_s7  ;;  %v376_v44 = vmul.f32 %v375_v43, %v4733_v0  ;;  %v377_v46 = vmul.f32 %v375_v43, %v4739_v6  ;;  %v388_v47 = vstv %s4129_s5  ;;  %s4135_s25 = sld [smem:[#allocation2 + $0x86]] }
  0x35   : > { %v390_v48 = vmul.f32 %v388_v47, %v4739_v6  ;;  %v389_v49 = vmul.f32 %v388_v47, %v4733_v0  ;;  %v401_v50 = vstv %s4130_s8  ;;  %s4136_s26 = sld [smem:[#allocation2 + $0x106]]  ;;  %s7735_s8 = smov 110  }
  0x36   : > { %v402_v51 = vmul.f32 %v401_v50, %v4733_v0  ;;  %v415_v52 = vstv %s4131_s15  ;;  %v403_v54 = vmul.f32 %v401_v50, %v4739_v6  ;;  %s4137_s29 = sld [smem:[#allocation2 + $0x186]] }
  0x37   : > { %v416_v53 = vmul.f32 %v415_v52, %v4733_v0  ;;  %v417_v55 = vmul.f32 %v415_v52, %v4739_v6  ;;  %v428_v56 = vstv %s4132_s16  ;;  %s4138_s30 = sld [smem:[#allocation2 + $0x7]] }
  0x38   : > { %v430_v57 = vmul.f32 %v428_v56, %v4739_v6  ;;  %v429_v59 = vmul.f32 %v428_v56, %v4733_v0  ;;  %v441_v60 = vstv %s4133_s23  ;;  %s4139_s3 = sld [smem:[#allocation2 + $0x87]] }
  0x39   : > { %v442_v61 = vmul.f32 %v441_v60, %v4733_v0  ;;  %v454_v62 = vstv %s4134_s24  ;;  %v443_v2 = vmul.f32 %v441_v60, %v4739_v6  ;;  %s4140_s5 = sld [smem:[#allocation2 + $0x107]] }
  0x3a   : > { %v455_v63 = vmul.f32 %v454_v62, %v4733_v0  ;;  %v456_v3 = vmul.f32 %v454_v62, %v4739_v6  ;;  %v468_v4 = vstv %s4135_s25  ;;  %s4141_s15 = sld [smem:[#allocation2 + $0x187]]  ;;  %s7733_s25 = smov 109  }
  0x3b   : > { %236 = vrot.lane.b32.xlu1 %v231_v12, %s4626_s7  ;;  %234 = vrot.lane.b32.xlu0 %v230_v13, %s4626_s7  ;;  %v470_v5 = vmul.f32 %v468_v4, %v4739_v6  ;;  %v469_v8 = vmul.f32 %v468_v4, %v4733_v0  ;;  %v481_v9 = vstv %s4136_s26  ;;  %s4142_s16 = sld [smem:[#allocation2 + $0x8]] }
  0x3c   : > { %247 = vrot.lane.b32.xlu2 %v243_v15, %s4627_s20  ;;  %v482_v10 = vmul.f32 %v481_v9, %v4733_v0  ;;  %v494_v11 = vstv %s4137_s29  ;;  %v483_v16 = vmul.f32 %v481_v9, %v4739_v6  ;;  %s4143_s23 = sld [smem:[#allocation2 + $0x88]] }
  0x3d   : > { %v495_v14 = vmul.f32 %v494_v11, %v4733_v0  ;;  %s4144_s24 = sld [smem:[#allocation2 + $0x108]] }
  0x3e   : > { %s4145_s26 = sld [smem:[#allocation2 + $0x188]] }
  0x3f   : > { %s4146_s29 = sld [smem:[#allocation2 + $0x9]] }
  0x40   : > { %s6382_s1 = sld [smem:[#allocation2 + $0x1b8]] }
  0x42   : > { %v574_v41 = vstv %s4143_s23  ;;  %s4151_s23 = sld [smem:[#allocation2 + $0x8a]] }
  0x43   : > { %261 = vrot.lane.b32.xlu1 %v257_v17, %s4627_s20  ;;  %249 = vrot.lane.b32.xlu0 %v244_v18, %s4627_s20  ;;  %v496_v17 = vmul.f32 %v494_v11, %v4739_v6  ;;  %v507_v18 = vstv %s4138_s30  ;;  %v576_v47 = vmul.f32 %v574_v41, %v4739_v6  ;;  %s4147_s30 = sld [smem:[#allocation2 + $0x89]] }
  0x44   : > { %263 = vrot.lane.b32.xlu2 %v258_v19, %s4627_s20  ;;  %v508_v23 = vmul.f32 %v507_v18, %v4733_v0 }
  0x45   : > { %v613_v56 = vstv %s4146_s29  ;;  %s4153_s29 = sld [smem:[#allocation2 + $0x18a]] }
  0x46   : > { %v614_v60 = vmul.f32 %v613_v56, %v4733_v0 }
  0x4b   : > { %276 = vrot.lane.b32.xlu1 %v271_v21, %s4627_s20  ;;  %274 = vrot.lane.b32.xlu0 %v270_v22, %s4627_s20  ;;  %v509_v21 = vmul.f32 %v507_v18, %v4739_v6 }
  0x4c   : > { %287 = vrot.lane.b32.xlu2 %v283_v24, %s4627_s20  ;;  %v521_v24 = vstv %s4139_s3  ;;  %s4148_s3 = sld [smem:[#allocation2 + $0x109]] }
  0x4d   : > { %v522_v25 = vmul.f32 %v521_v24, %v4733_v0 }
  0x53   : > { %300 = vrot.lane.b32.xlu1 %v296_v26, %s7743_s27  ;;  %289 = vrot.lane.b32.xlu0 %v284_v27, %s4627_s20  ;;  %v534_v26 = vstv %s4140_s5  ;;  %s7731_s5 = smov 108  }
  0x54   : > { %302 = vrot.lane.b32.xlu2 %v297_v28, %s7743_s27  ;;  %v535_v29 = vmul.f32 %v534_v26, %v4733_v0  ;;  %v536_v32 = vmul.f32 %v534_v26, %v4739_v6 }
  0x5b   : > { %316 = vrot.lane.b32.xlu1 %v311_v30, %s7743_s27  ;;  %314 = vrot.lane.b32.xlu0 %v310_v31, %s7743_s27  ;;  %v523_v31 = vmul.f32 %v521_v24, %v4739_v6 }
  0x5c   : > { %327 = vrot.lane.b32.xlu2 %v323_v33, %s7743_s27  ;;  %v547_v33 = vstv %s4141_s15  ;;  %s4149_s15 = sld [smem:[#allocation2 + $0x189]] }
  0x5d   : > { %v548_v38 = vmul.f32 %v547_v33, %v4733_v0 }
  0x63   : > { %340 = vrot.lane.b32.xlu1 %v336_v35, %s7743_s27  ;;  %329 = vrot.lane.b32.xlu0 %v324_v36, %s7743_s27  ;;  %v549_v36 = vmul.f32 %v547_v33, %v4739_v6 }
  0x64   : > { %342 = vrot.lane.b32.xlu2 %v337_v37, %s7743_s27 }
  0x6b   : > { %355 = vrot.lane.b32.xlu1 %v350_v39, %s7741_s4  ;;  %353 = vrot.lane.b32.xlu0 %v349_v40, %s7741_s4  ;;  %v560_v39 = vstv %s4142_s16  ;;  %s4150_s16 = sld [smem:[#allocation2 + $0xa]] }
  0x6c   : > { %367 = vrot.lane.b32.xlu2 %v363_v42, %s7741_s4  ;;  %v561_v40 = vmul.f32 %v560_v39, %v4733_v0 }
  0x73   : > { %380 = vrot.lane.b32.xlu1 %v376_v44, %s7741_s4  ;;  %369 = vrot.lane.b32.xlu0 %v364_v45, %s7741_s4  ;;  %v575_v44 = vmul.f32 %v574_v41, %v4733_v0 }
  0x74   : > { %382 = vrot.lane.b32.xlu2 %v377_v46, %s7741_s4  ;;  %v562_v46 = vmul.f32 %v560_v39, %v4739_v6 }
  0x7b   : > { %395 = vrot.lane.b32.xlu1 %v390_v48, %s7741_s4  ;;  %393 = vrot.lane.b32.xlu0 %v389_v49, %s7741_s4  ;;  %v587_v48 = vstv %s4144_s24  ;;  %s4152_s24 = sld [smem:[#allocation2 + $0x10a]] }
  0x7c   : > { %406 = vrot.lane.b32.xlu2 %v402_v51, %s7739_s18  ;;  %v589_v51 = vmul.f32 %v587_v48, %v4739_v6 }
  0x81   : > { %v693_v39 = vstv %s4152_s24  ;;  %s4158_s24 = sld [smem:[#allocation2 + $0xc]] }
  0x83   : > { %420 = vrot.lane.b32.xlu1 %v416_v53, %s7739_s18  ;;  %408 = vrot.lane.b32.xlu0 %v403_v54, %s7739_s18  ;;  %v588_v53 = vmul.f32 %v587_v48, %v4733_v0  ;;  %v600_v54 = vstv %s4145_s26  ;;  %s7729_s26 = smov 96   ;;  %v695_v48 = vmul.f32 %v693_v39, %v4739_v6 }
  0x84   : > { %422 = vrot.lane.b32.xlu2 %v417_v55, %s7739_s18  ;;  %v601_v55 = vmul.f32 %v600_v54, %v4733_v0  ;;  %v602_v62 = vmul.f32 %v600_v54, %v4739_v6 }
  0x86   : > { %v4811_v58 = vpop.permute.xlu2 %221 }
  0x8b   : > { %435 = vrot.lane.b32.xlu1 %v430_v57, %s7739_s18  ;;  %433 = vrot.lane.b32.xlu0 %v429_v59, %s7739_s18 }
  0x8c   : > { %446 = vrot.lane.b32.xlu2 %v442_v61, %s7739_s18 }
  0x8e   : > { %v4819_v1 = vpop.permute.xlu2 %223 }
  0x93   : > { %459 = vrot.lane.b32.xlu1 %v455_v63, %s7737_s28  ;;  %448 = vrot.lane.b32.xlu0 %v443_v2, %s7739_s18  ;;  %v615_v63 = vmul.f32 %v613_v56, %v4739_v6  ;;  %v627_v2 = vstv %s4147_s30  ;;  %s4154_s30 = sld [smem:[#allocation2 + $0xb]] }
  0x94   : > { %461 = vrot.lane.b32.xlu2 %v456_v3, %s7737_s28  ;;  %v628_v9 = vmul.f32 %v627_v2, %v4733_v0 }
  0x96   : > { %v4827_v7 = vpop.permute.xlu2 %247 }
  0x9b   : > { %475 = vrot.lane.b32.xlu1 %v470_v5, %s7737_s28  ;;  %473 = vrot.lane.b32.xlu0 %v469_v8, %s7737_s28  ;;  %v629_v5 = vmul.f32 %v627_v2, %v4739_v6 }
  0x9c   : > { %486 = vrot.lane.b32.xlu2 %v482_v10, %s7737_s28  ;;  %v640_v10 = vstv %s4148_s3  ;;  %s4155_s3 = sld [smem:[#allocation2 + $0x8b]] }
  0x9d   : > { %v4833_v12 = vpop.permute.xlu1 %208  ;;  %v4836_v13 = vpop.permute.xlu0 %194  ;;  %v641_v11 = vmul.f32 %v640_v10, %v4733_v0 }
  0x9e   : > { %v4839_v15 = vpop.permute.xlu2 %263 }
  0xa2   : > { %v733_v2 = vstv %s4155_s3  ;;  %s7727_s3 = smov 94  }
  0xa3   : > { %499 = vrot.lane.b32.xlu1 %v495_v14, %s7737_s28  ;;  %488 = vrot.lane.b32.xlu0 %v483_v16, %s7737_s28  ;;  %v653_v14 = vstv %s4149_s15  ;;  %s4156_s15 = sld [smem:[#allocation2 + $0x10b]] }
  0xa4   : > { %501 = vrot.lane.b32.xlu2 %v496_v17, %s7737_s28  ;;  %v654_v18 = vmul.f32 %v653_v14, %v4733_v0  ;;  %v655_v24 = vmul.f32 %v653_v14, %v4739_v6 }
  0xa5   : > { %v4845_v19 = vpop.permute.xlu1 %210  ;;  %v4848_v20 = vpop.permute.xlu0 %196 }
  0xa6   : > { %v4851_v22 = vpop.permute.xlu2 %287 }
  0xab   : > { %514 = vrot.lane.b32.xlu1 %v509_v21, %s7735_s8  ;;  %512 = vrot.lane.b32.xlu0 %v508_v23, %s7735_s8  ;;  %v642_v23 = vmul.f32 %v640_v10, %v4739_v6  ;;  %v734_v10 = vmul.f32 %v733_v2, %v4733_v0 }
  0xac   : > { %526 = vrot.lane.b32.xlu2 %v522_v25, %s7735_s8  ;;  %v666_v25 = vstv %s4150_s16  ;;  %s7725_s16 = smov 95  }
  0xad   : > { %v4857_v27 = vpop.permute.xlu1 %236  ;;  %v4860_v28 = vpop.permute.xlu0 %234  ;;  %v667_v33 = vmul.f32 %v666_v25, %v4733_v0 }
  0xae   : > { %v4863_v30 = vpop.permute.xlu2 %302 }
  0xb3   : > { %539 = vrot.lane.b32.xlu1 %v535_v29, %s7735_s8  ;;  %528 = vrot.lane.b32.xlu0 %v523_v31, %s7735_s8  ;;  %v668_v31 = vmul.f32 %v666_v25, %v4739_v6 }
  0xb4   : > { %541 = vrot.lane.b32.xlu2 %v536_v32, %s7735_s8 }
  0xb5   : > { %v4869_v34 = vpop.permute.xlu1 %261  ;;  %v4872_v35 = vpop.permute.xlu0 %249 }
  0xb6   : > { %v4875_v37 = vpop.permute.xlu2 %327 }
  0xbb   : > { %554 = vrot.lane.b32.xlu1 %v549_v36, %s7735_s8  ;;  %552 = vrot.lane.b32.xlu0 %v548_v38, %s7735_s8  ;;  %v680_v36 = vstv %s4151_s23  ;;  %s4157_s23 = sld [smem:[#allocation2 + $0x18b]] }
  0xbc   : > { %565 = vrot.lane.b32.xlu2 %v561_v40, %s7733_s25  ;;  %v681_v38 = vmul.f32 %v680_v36, %v4733_v0 }
  0xbd   : > { %v4881_v42 = vpop.permute.xlu1 %276  ;;  %v4884_v43 = vpop.permute.xlu0 %274 }
  0xbe   : > { %v4887_v45 = vpop.permute.xlu2 %342 }
  0xc3   : > { %579 = vrot.lane.b32.xlu1 %v575_v44, %s7733_s25  ;;  %567 = vrot.lane.b32.xlu0 %v562_v46, %s7733_s25  ;;  %v694_v44 = vmul.f32 %v693_v39, %v4733_v0 }
  0xc4   : > { %581 = vrot.lane.b32.xlu2 %v576_v47, %s7733_s25  ;;  %v682_v47 = vmul.f32 %v680_v36, %v4739_v6 }
  0xc5   : > { %v4893_v49 = vpop.permute.xlu1 %300  ;;  %v4896_v50 = vpop.permute.xlu0 %289 }
  0xc6   : > { %v4899_v52 = vpop.permute.xlu2 %367 }
  0xcb   : > { %594 = vrot.lane.b32.xlu1 %v589_v51, %s7733_s25  ;;  %592 = vrot.lane.b32.xlu0 %v588_v53, %s7733_s25  ;;  %v706_v51 = vstv %s4153_s29  ;;  %s4159_s29 = sld [smem:[#allocation2 + $0x8c]] }
  0xcc   : > { %605 = vrot.lane.b32.xlu2 %v601_v55, %s7733_s25  ;;  %v708_v55 = vmul.f32 %v706_v51, %v4739_v6 }
  0xcd   : > { %v4905_v57 = vpop.permute.xlu1 %316  ;;  %v4908_v59 = vpop.permute.xlu0 %314 }
  0xce   : > { %v4911_v61 = vpop.permute.xlu2 %382 }
  0xd3   : > { %618 = vrot.lane.b32.xlu1 %v614_v60, %s7731_s5  ;;  %607 = vrot.lane.b32.xlu0 %v602_v62, %s7733_s25  ;;  %v707_v60 = vmul.f32 %v706_v51, %v4733_v0  ;;  %v719_v62 = vstv %s4154_s30  ;;  %s4160_s30 = sld [smem:[#allocation2 + $0x10c]] }
  0xd4   : > { %620 = vrot.lane.b32.xlu2 %v615_v63, %s7731_s5  ;;  %v720_v63 = vmul.f32 %v719_v62, %v4733_v0  ;;  %v721_v14 = vmul.f32 %v719_v62, %v4739_v6 }
  0xd5   : > { %v4917_v3 = vpop.permute.xlu1 %340  ;;  %v4920_v4 = vpop.permute.xlu0 %329 }
  0xd6   : > { %v4923_v8 = vpop.permute.xlu2 %406 }
  0xdb   : > { %634 = vrot.lane.b32.xlu1 %v629_v5, %s7731_s5  ;;  %632 = vrot.lane.b32.xlu0 %v628_v9, %s7731_s5 }
  0xdc   : > { %645 = vrot.lane.b32.xlu2 %v641_v11, %s7731_s5 }
  0xdd   : > { %v4929_v16 = vpop.permute.xlu1 %355  ;;  %v4932_v17 = vpop.permute.xlu0 %353 }
  0xde   : > { %v4935_v21 = vpop.permute.xlu2 %422 }
  0xe3   : > { %658 = vrot.lane.b32.xlu1 %v654_v18, %s7731_s5  ;;  %647 = vrot.lane.b32.xlu0 %v642_v23, %s7731_s5  ;;  %v735_v18 = vmul.f32 %v733_v2, %v4739_v6  ;;  %v746_v23 = vstv %s4156_s15  ;;  %s4161_s15 = sld [smem:[#allocation2 + $0x18c]] }
  0xe4   : > { %660 = vrot.lane.b32.xlu2 %v655_v24, %s7731_s5  ;;  %v747_v36 = vmul.f32 %v746_v23, %v4733_v0 }
  0xe5   : > { %v4941_v26 = vpop.permute.xlu1 %380  ;;  %v4944_v29 = vpop.permute.xlu0 %369 }
  0xe6   : > { %v4947_v32 = vpop.permute.xlu2 %446 }
  0xeb   : > { %673 = vrot.lane.b32.xlu1 %v668_v31, %s7729_s26  ;;  %671 = vrot.lane.b32.xlu0 %v667_v33, %s7729_s26  ;;  %v748_v31 = vmul.f32 %v746_v23, %v4739_v6 }
  0xec   : > { %685 = vrot.lane.b32.xlu2 %v681_v38, %s7729_s26  ;;  %v759_v38 = vstv %s4157_s23  ;;  %s4162_s23 = sld [smem:[#allocation2 + $0xd]] }
  0xed   : > { %v4953_v40 = vpop.permute.xlu1 %395  ;;  %v4956_v41 = vpop.permute.xlu0 %393  ;;  %v760_v39 = vmul.f32 %v759_v38, %v4733_v0 }
  0xee   : > { %v4959_v46 = vpop.permute.xlu2 %461 }
  0xf3   : > { %698 = vrot.lane.b32.xlu1 %v694_v44, %s7729_s26  ;;  %687 = vrot.lane.b32.xlu0 %v682_v47, %s7729_s26  ;;  %v772_v44 = vstv %s4158_s24  ;;  %s4163_s24 = sld [smem:[#allocation2 + $0x8d]] }
  0xf4   : > { %700 = vrot.lane.b32.xlu2 %v695_v48, %s7729_s26  ;;  %v773_v51 = vmul.f32 %v772_v44, %v4733_v0  ;;  %v774_v62 = vmul.f32 %v772_v44, %v4739_v6 }
  0xf5   : > { %v4965_v53 = vpop.permute.xlu1 %420  ;;  %v4968_v54 = vpop.permute.xlu0 %408 }
  0xf6   : > { %v4971_v56 = vpop.permute.xlu2 %486 }
  0xf7   : > { %7767 = vst [vmem:[#allocation8_spill] sm:$0xff] %v4971_v56  ;;  %v3046_v56 = vstv %s6382_s1  ;;  %s6435_s1 = sld [smem:[#allocation2 + $0xb9]] }
  0xfb   : > { %713 = vrot.lane.b32.xlu1 %v708_v55, %s7729_s26  ;;  %711 = vrot.lane.b32.xlu0 %v707_v60, %s7729_s26  ;;  %v761_v60 = vmul.f32 %v759_v38, %v4739_v6  ;;  %v812_v38 = vstv %s4161_s15  ;;  %s4165_s15 = sld [smem:[#allocation2 + $0x18d]] }
  0xfc   : > { %724 = vrot.lane.b32.xlu2 %v720_v63, %s7725_s16  ;;  %v786_v63 = vstv %s4159_s29  ;;  %s4164_s29 = sld [smem:[#allocation2 + $0x10d]] }
  0xfd   : > { %v4977_v5 = vpop.permute.xlu1 %435  ;;  %v4980_v9 = vpop.permute.xlu0 %433  ;;  %v787_v23 = vmul.f32 %v786_v63, %v4733_v0 }
  0xfe   : > { %v4983_v11 = vpop.permute.xlu2 %501 }
 0x103   : > { %738 = vrot.lane.b32.xlu1 %v734_v10, %s7725_s16  ;;  %726 = vrot.lane.b32.xlu0 %v721_v14, %s7725_s16  ;;  %v788_v14 = vmul.f32 %v786_v63, %v4739_v6  ;;  %v814_v63 = vmul.f32 %v812_v38, %v4739_v6 }
 0x104   : > { %740 = vrot.lane.b32.xlu2 %v735_v18, %s7725_s16 }
 0x105   : > { %v4989_v24 = vpop.permute.xlu1 %459  ;;  %v4992_v25 = vpop.permute.xlu0 %448 }
 0x106   : > { %v4995_v33 = vpop.permute.xlu2 %526 }
 0x107   : > { %7768 = vst [vmem:[#allocation9_spill] sm:$0xff] %v4995_v33  ;;  %v839_v33 = vstv %s4163_s24  ;;  %s4167_s24 = sld [smem:[#allocation2 + $0x8e]] }
 0x10b   : > { %753 = vrot.lane.b32.xlu1 %v748_v31, %s7725_s16  ;;  %751 = vrot.lane.b32.xlu0 %v747_v36, %s7725_s16  ;;  %v799_v31 = vstv %s4160_s30  ;;  %s7705_s30 = smov 93  }
 0x10c   : > { %764 = vrot.lane.b32.xlu2 %v760_v39, %s7725_s16  ;;  %v800_v36 = vmul.f32 %v799_v31, %v4733_v0 }
 0x10d   : > { %v5001_v47 = vpop.permute.xlu1 %475  ;;  %v5004_v48 = vpop.permute.xlu0 %473 }
 0x10e   : > { %v5007_v55 = vpop.permute.xlu2 %541 }
 0x10f   : > { %7769 = vst [vmem:[#allocation10_spill] sm:$0xff] %v5007_v55 }
 0x113   : > { %777 = vrot.lane.b32.xlu1 %v773_v51, %s7727_s3  ;;  %766 = vrot.lane.b32.xlu0 %v761_v60, %s7725_s16  ;;  %v813_v51 = vmul.f32 %v812_v38, %v4733_v0  ;;  %v840_v38 = vmul.f32 %v839_v33, %v4733_v0 }
 0x114   : > { %779 = vrot.lane.b32.xlu2 %v774_v62, %s7727_s3  ;;  %v801_v62 = vmul.f32 %v799_v31, %v4739_v6 }
 0x115   : > { %v5013_v2 = vpop.permute.xlu1 %499  ;;  %v5016_v10 = vpop.permute.xlu0 %488 }
 0x116   : > { %7770 = vst [vmem:[#allocation11_spill] sm:$0xff] %v5016_v10  ;;  %v5019_v18 = vpop.permute.xlu2 %565 }
 0x117   : > { %7771 = vst [vmem:[#allocation12_spill] sm:$0xff] %v5019_v18 }
 0x11b   : > { %793 = vrot.lane.b32.xlu1 %v788_v14, %s7727_s3  ;;  %791 = vrot.lane.b32.xlu0 %v787_v23, %s7727_s3  ;;  %v825_v14 = vstv %s4162_s23  ;;  %s4166_s23 = sld [smem:[#allocation2 + $0xe]] }
 0x11c   : > { %804 = vrot.lane.b32.xlu2 %v800_v36, %s7727_s3  ;;  %v827_v18 = vmul.f32 %v825_v14, %v4739_v6  ;;  %v826_v31 = vmul.f32 %v825_v14, %v4733_v0  ;;  %v841_v14 = vmul.f32 %v839_v33, %v4739_v6 }
 0x11d   : > { %v5025_v39 = vpop.permute.xlu1 %514  ;;  %v5028_v44 = vpop.permute.xlu0 %512 }
 0x11e   : > { %7772 = vst [vmem:[#allocation13_spill] sm:$0xff] %v5025_v39  ;;  %v5031_v60 = vpop.permute.xlu2 %581 }
 0x11f   : > { %7773 = vst [vmem:[#allocation14_spill] sm:$0xff] %v5028_v44 }
 0x120   : > { %7774 = vst [vmem:[#allocation15_spill] sm:$0xff] %v5031_v60 }
 0x123   : > { %817 = vrot.lane.b32.xlu1 %v813_v51, %s7727_s3  ;;  %806 = vrot.lane.b32.xlu0 %v801_v62, %s7727_s3  ;;  %v852_v51 = vstv %s4164_s29  ;;  %s4168_s29 = sld [smem:[#allocation2 + $0x10e]] }
 0x124   : > { %819 = vrot.lane.b32.xlu2 %v814_v63, %s7727_s3 }
 0x125   : > { %v5037_v23 = vpop.permute.xlu1 %539  ;;  %v5040_v36 = vpop.permute.xlu0 %528 }
 0x126   : > { %7775 = vst [vmem:[#allocation16_spill] sm:$0xff] %v5037_v23  ;;  %v5043_v60 = vpop.permute.xlu2 %605  ;;  %v854_v23 = vmul.f32 %v852_v51, %v4739_v6 }
 0x127   : > { %7776 = vst [vmem:[#allocation17_spill] sm:$0xff] %v5040_v36 }
 0x128   : > { %7777 = vst [vmem:[#allocation18_spill] sm:$0xff] %v5043_v60  ;;  %v853_v60 = vmul.f32 %v852_v51, %v4733_v0 }
 0x12b   : > { %832 = vrot.lane.b32.xlu1 %v827_v18, %s7705_s30  ;;  %830 = vrot.lane.b32.xlu0 %v826_v31, %s7705_s30  ;;  %v865_v18 = vstv %s4165_s15  ;;  %s7707_s15 = smov 92  }
 0x12c   : > { %844 = vrot.lane.b32.xlu2 %v840_v38, %s7705_s30  ;;  %v866_v33 = vmul.f32 %v865_v18, %v4733_v0 }
 0x12d   : > { %v5049_v62 = vpop.permute.xlu1 %554  ;;  %v5052_v63 = vpop.permute.xlu0 %552 }
 0x12e   : > { %7778 = vst [vmem:[#allocation19_spill] sm:$0xff] %v5049_v62  ;;  %v5055_v36 = vpop.permute.xlu2 %620  ;;  %v878_v62 = vstv %s4166_s23  ;;  %s4169_s23 = sld [smem:[#allocation2 + $0x18e]] }
 0x12f   : > { %7779 = vst [vmem:[#allocation20_spill] sm:$0xff] %v5052_v63  ;;  %v867_v63 = vmul.f32 %v865_v18, %v4739_v6  ;;  %v879_v51 = vmul.f32 %v878_v62, %v4733_v0  ;;  %v880_v18 = vmul.f32 %v878_v62, %v4739_v6 }
 0x130   : > { %7780 = vst [vmem:[#allocation21_spill] sm:$0xff] %v5055_v36 }
 0x133   : > { %857 = vrot.lane.b32.xlu1 %v853_v60, %s7705_s30  ;;  %846 = vrot.lane.b32.xlu0 %v841_v14, %s7705_s30  ;;  %v892_v60 = vstv %s4167_s24  ;;  %s4170_s24 = sld [smem:[#allocation2 + $0xf]] }
 0x134   : > { %859 = vrot.lane.b32.xlu2 %v854_v23, %s7705_s30 }
 0x135   : > { %v5061_v31 = vpop.permute.xlu1 %579  ;;  %v5064_v38 = vpop.permute.xlu0 %567 }
 0x136   : > { %7781 = vst [vmem:[#allocation22_spill] sm:$0xff] %v5061_v31  ;;  %v5067_v36 = vpop.permute.xlu2 %645  ;;  %v905_v31 = vstv %s4168_s29  ;;  %s4171_s29 = sld [smem:[#allocation2 + $0x8f]] }
 0x137   : > { %7782 = vst [vmem:[#allocation23_spill] sm:$0xff] %v5064_v38  ;;  %v906_v62 = vmul.f32 %v905_v31, %v4733_v0 }
 0x138   : > { %7783 = vst [vmem:[#allocation24_spill] sm:$0xff] %v5067_v36  ;;  %v893_v36 = vmul.f32 %v892_v60, %v4733_v0 }
 0x13b   : > { %872 = vrot.lane.b32.xlu1 %v867_v63, %s7705_s30  ;;  %870 = vrot.lane.b32.xlu0 %v866_v33, %s7705_s30  ;;  %v894_v63 = vmul.f32 %v892_v60, %v4739_v6  ;;  %s7709_s30 = smov 80  }
 0x13c   : > { %883 = vrot.lane.b32.xlu2 %v879_v51, %s7707_s15 }
 0x13d   : > { %v5073_v14 = vpop.permute.xlu1 %594  ;;  %v5076_v23 = vpop.permute.xlu0 %592 }
 0x13e   : > { %7784 = vst [vmem:[#allocation25_spill] sm:$0xff] %v5073_v14  ;;  %v5079_v38 = vpop.permute.xlu2 %660  ;;  %v918_v14 = vstv %s4169_s23  ;;  %s4172_s23 = sld [smem:[#allocation2 + $0x10f]] }
 0x13f   : > { %7785 = vst [vmem:[#allocation26_spill] sm:$0xff] %v5076_v23  ;;  %v907_v23 = vmul.f32 %v905_v31, %v4739_v6  ;;  %v919_v60 = vmul.f32 %v918_v14, %v4733_v0  ;;  %v920_v31 = vmul.f32 %v918_v14, %v4739_v6 }
 0x140   : > { %7786 = vst [vmem:[#allocation27_spill] sm:$0xff] %v5079_v38 }
 0x143   : > { %897 = vrot.lane.b32.xlu1 %v893_v36, %s7707_s15  ;;  %885 = vrot.lane.b32.xlu0 %v880_v18, %s7707_s15  ;;  %v931_v36 = vstv %s4170_s24  ;;  %s4173_s24 = sld [smem:[#allocation2 + $0x18f]] }
 0x144   : > { %899 = vrot.lane.b32.xlu2 %v894_v63, %s7707_s15 }
 0x145   : > { %v5085_v33 = vpop.permute.xlu1 %618  ;;  %v5088_v51 = vpop.permute.xlu0 %607 }
 0x146   : > { %7787 = vst [vmem:[#allocation28_spill] sm:$0xff] %v5085_v33  ;;  %v5091_v38 = vpop.permute.xlu2 %685  ;;  %v932_v33 = vmul.f32 %v931_v36, %v4733_v0 }
 0x147   : > { %7788 = vst [vmem:[#allocation29_spill] sm:$0xff] %v5088_v51  ;;  %v933_v51 = vmul.f32 %v931_v36, %v4739_v6  ;;  %v958_v36 = vstv %s4172_s23  ;;  %s4175_s23 = sld [smem:[#allocation2 + $0x90]] }
 0x148   : > { %7789 = vst [vmem:[#allocation30_spill] sm:$0xff] %v5091_v38 }
 0x14b   : > { %912 = vrot.lane.b32.xlu1 %v907_v23, %s7707_s15  ;;  %910 = vrot.lane.b32.xlu0 %v906_v62, %s7707_s15  ;;  %v945_v23 = vstv %s4171_s29  ;;  %s4174_s29 = sld [smem:[#allocation2 + $0x10]] }
 0x14c   : > { %923 = vrot.lane.b32.xlu2 %v919_v60, %s7707_s15  ;;  %v946_v14 = vmul.f32 %v945_v23, %v4733_v0 }
 0x14d   : > { %v5097_v18 = vpop.permute.xlu1 %634  ;;  %v5100_v63 = vpop.permute.xlu0 %632 }
 0x14e   : > { %7790 = vst [vmem:[#allocation31_spill] sm:$0xff] %v5097_v18  ;;  %v5103_v38 = vpop.permute.xlu2 %700  ;;  %v959_v18 = vmul.f32 %v958_v36, %v4733_v0 }
 0x14f   : > { %7791 = vst [vmem:[#allocation32_spill] sm:$0xff] %v5100_v63 }
 0x150   : > { %7792 = vst [vmem:[#allocation33_spill] sm:$0xff] %v5103_v38  ;;  %v947_v38 = vmul.f32 %v945_v23, %v4739_v6  ;;  %v960_v23 = vmul.f32 %v958_v36, %v4739_v6 }
 0x153   : > { %936 = vrot.lane.b32.xlu1 %v932_v33, %s7709_s30  ;;  %925 = vrot.lane.b32.xlu0 %v920_v31, %s7707_s15  ;;  %v971_v33 = vstv %s4173_s24  ;;  %s4176_s24 = sld [smem:[#allocation2 + $0x110]]  ;;  %s7711_s15 = smov 79  }
 0x154   : > { %938 = vrot.lane.b32.xlu2 %v933_v51, %s7709_s30 }
 0x155   : > { %v5109_v62 = vpop.permute.xlu1 %658  ;;  %v5112_v60 = vpop.permute.xlu0 %647 }
 0x156   : > { %7793 = vst [vmem:[#allocation34_spill] sm:$0xff] %v5109_v62  ;;  %v5115_v63 = vpop.permute.xlu2 %724  ;;  %v973_v62 = vmul.f32 %v971_v33, %v4739_v6 }
 0x157   : > { %7794 = vst [vmem:[#allocation35_spill] sm:$0xff] %v5112_v60  ;;  %v972_v60 = vmul.f32 %v971_v33, %v4733_v0 }
 0x158   : > { %7795 = vst [vmem:[#allocation36_spill] sm:$0xff] %v5115_v63 }
 0x15b   : > { %952 = vrot.lane.b32.xlu1 %v947_v38, %s7709_s30  ;;  %950 = vrot.lane.b32.xlu0 %v946_v14, %s7709_s30  ;;  %v984_v38 = vstv %s4174_s29  ;;  %s4177_s29 = sld [smem:[#allocation2 + $0x190]] }
 0x15c   : > { %963 = vrot.lane.b32.xlu2 %v959_v18, %s7709_s30  ;;  %v985_v36 = vmul.f32 %v984_v38, %v4733_v0 }
 0x15d   : > { %v5121_v31 = vpop.permute.xlu1 %673  ;;  %v5124_v51 = vpop.permute.xlu0 %671 }
 0x15e   : > { %7796 = vst [vmem:[#allocation37_spill] sm:$0xff] %v5121_v31  ;;  %v5127_v63 = vpop.permute.xlu2 %740  ;;  %v998_v31 = vstv %s4175_s23  ;;  %s4178_s23 = sld [smem:[#allocation2 + $0x11]] }
 0x15f   : > { %7797 = vst [vmem:[#allocation38_spill] sm:$0xff] %v5124_v51  ;;  %v986_v51 = vmul.f32 %v984_v38, %v4739_v6  ;;  %v999_v33 = vmul.f32 %v998_v31, %v4733_v0  ;;  %v1000_v38 = vmul.f32 %v998_v31, %v4739_v6 }
 0x160   : > { %7798 = vst [vmem:[#allocation39_spill] sm:$0xff] %v5127_v63 }
 0x163   : > { %976 = vrot.lane.b32.xlu1 %v972_v60, %s7709_s30  ;;  %965 = vrot.lane.b32.xlu0 %v960_v23, %s7709_s30  ;;  %v1011_v60 = vstv %s4176_s24  ;;  %s4179_s24 = sld [smem:[#allocation2 + $0x91]] }
 0x164   : > { %978 = vrot.lane.b32.xlu2 %v973_v62, %s7709_s30  ;;  %s7713_s30 = smov 78  }
 0x165   : > { %v5133_v14 = vpop.permute.xlu1 %698  ;;  %v5136_v18 = vpop.permute.xlu0 %687 }
 0x166   : > { %7799 = vst [vmem:[#allocation40_spill] sm:$0xff] %v5133_v14  ;;  %v5139_v63 = vpop.permute.xlu2 %764  ;;  %v1013_v14 = vmul.f32 %v1011_v60, %v4739_v6 }
 0x167   : > { %7800 = vst [vmem:[#allocation41_spill] sm:$0xff] %v5136_v18 }
 0x168   : > { %7801 = vst [vmem:[#allocation42_spill] sm:$0xff] %v5139_v63  ;;  %v1012_v63 = vmul.f32 %v1011_v60, %v4733_v0 }
 0x16b   : > { %991 = vrot.lane.b32.xlu1 %v986_v51, %s7711_s15  ;;  %989 = vrot.lane.b32.xlu0 %v985_v36, %s7711_s15  ;;  %v1024_v51 = vstv %s4177_s29  ;;  %s4180_s29 = sld [smem:[#allocation2 + $0x111]] }
 0x16c   : > { %1003 = vrot.lane.b32.xlu2 %v999_v33, %s7711_s15  ;;  %v1025_v31 = vmul.f32 %v1024_v51, %v4733_v0 }
 0x16d   : > { %v5145_v23 = vpop.permute.xlu1 %713  ;;  %v5148_v62 = vpop.permute.xlu0 %711 }
 0x16e   : > { %7802 = vst [vmem:[#allocation43_spill] sm:$0xff] %v5145_v23  ;;  %v5151_v18 = vpop.permute.xlu2 %779  ;;  %v1037_v23 = vstv %s4178_s23  ;;  %s4181_s23 = sld [smem:[#allocation2 + $0x191]] }
 0x16f   : > { %7803 = vst [vmem:[#allocation44_spill] sm:$0xff] %v5148_v62  ;;  %v1026_v62 = vmul.f32 %v1024_v51, %v4739_v6  ;;  %v1038_v60 = vmul.f32 %v1037_v23, %v4733_v0 }
 0x170   : > { %7804 = vst [vmem:[#allocation45_spill] sm:$0xff] %v5151_v18 }
 0x173   : > { %1016 = vrot.lane.b32.xlu1 %v1012_v63, %s7711_s15  ;;  %1005 = vrot.lane.b32.xlu0 %v1000_v38, %s7711_s15  ;;  %v1051_v63 = vstv %s4179_s24  ;;  %s4182_s24 = sld [smem:[#allocation2 + $0x12]] }
 0x174   : > { %1018 = vrot.lane.b32.xlu2 %v1013_v14, %s7711_s15 }
 0x175   : > { %v5157_v36 = vpop.permute.xlu1 %738  ;;  %v5160_v33 = vpop.permute.xlu0 %726 }
 0x176   : > { %7805 = vst [vmem:[#allocation46_spill] sm:$0xff] %v5157_v36  ;;  %v5163_v18 = vpop.permute.xlu2 %804  ;;  %v5191_v36 = vld [vmem:[%s4730_s6] sm:$0xff] }
 0x177   : > { %7806 = vst [vmem:[#allocation47_spill] sm:$0xff] %v5160_v33  ;;  %v1039_v33 = vmul.f32 %v1037_v23, %v4739_v6 }
 0x178   : > { %7807 = vst [vmem:[#allocation48_spill] sm:$0xff] %v5163_v18  ;;  %v1052_v18 = vmul.f32 %v1051_v63, %v4733_v0 }
 0x17b   : > { %1031 = vrot.lane.b32.xlu1 %v1026_v62, %s7711_s15  ;;  %1029 = vrot.lane.b32.xlu0 %v1025_v31, %s7711_s15  ;;  %v1053_v62 = vmul.f32 %v1051_v63, %v4739_v6  ;;  %v1064_v31 = vstv %s4180_s29  ;;  %v1077_v63 = vstv %s4181_s23  ;;  %s4183_s29 = sld [smem:[#allocation2 + $0x92]] }
 0x17c   : > { %1042 = vrot.lane.b32.xlu2 %v1038_v60, %s7713_s30  ;;  %v1065_v23 = vmul.f32 %v1064_v31, %v4733_v0  ;;  %s4184_s23 = sld [smem:[#allocation2 + $0x112]] }
 0x17d   : > { %v5169_v38 = vpop.permute.xlu1 %753  ;;  %v5172_v14 = vpop.permute.xlu0 %751  ;;  %s4185_s15 = sld [smem:[#allocation2 + $0x192]] }
 0x17e   : > { %7808 = vst [vmem:[#allocation49_spill] sm:$0xff] %v5169_v38  ;;  %v5175_v51 = vpop.permute.xlu2 %819 }
 0x17f   : > { %7809 = vst [vmem:[#allocation50_spill] sm:$0xff] %v5172_v14 }
 0x180   : > { %7810 = vst [vmem:[#allocation51_spill] sm:$0xff] %v5175_v51  ;;  %v1066_v51 = vmul.f32 %v1064_v31, %v4739_v6  ;;  %v5205_v31 = vld [vmem:[%s4730_s6 + $0x1] sm:$0xff] }
 0x183   : > { %1056 = vrot.lane.b32.xlu1 %v1052_v18, %s7713_s30  ;;  %1044 = vrot.lane.b32.xlu0 %v1039_v33, %s7713_s30  ;;  %v1078_v18 = vmul.f32 %v5191_v36, %v1077_v63  ;;  %v1090_v33 = vstv %s4182_s24  ;;  %s7715_s24 = smov 77  }
 0x184   : > { %1058 = vrot.lane.b32.xlu2 %v1053_v62, %s7713_s30 }
 0x185   : > { %v5181_v38 = vpop.permute.xlu1 %777  ;;  %v5184_v60 = vpop.permute.xlu0 %766 }
 0x186   : > { %7811 = vst [vmem:[#allocation52_spill] sm:$0xff] %v5181_v38  ;;  %v5187_v14 = vpop.permute.xlu2 %844  ;;  %v1079_v38 = vmul.f32 %v5205_v31, %v1077_v63 }
 0x187   : > { %7812 = vst [vmem:[#allocation53_spill] sm:$0xff] %v5184_v60 }
 0x188   : > { %7813 = vst [vmem:[#allocation54_spill] sm:$0xff] %v5187_v14  ;;  %v1091_v14 = vmul.f32 %v5191_v36, %v1090_v33 }
 0x18b   : > { %1071 = vrot.lane.b32.xlu1 %v1066_v51, %s7713_s30  ;;  %1069 = vrot.lane.b32.xlu0 %v1065_v23, %s7713_s30  ;;  %v1092_v51 = vmul.f32 %v5205_v31, %v1090_v33  ;;  %v1104_v23 = vstv %s4183_s29  ;;  %v1117_v33 = vstv %s4184_s23  ;;  %s4186_s29 = sld [smem:[#allocation2 + $0x13]] }
 0x18c   : > { %1082 = vrot.lane.b32.xlu2 %v1078_v18, %s7713_s30  ;;  %v1105_v63 = vmul.f32 %v5191_v36, %v1104_v23  ;;  %v1118_v60 = vmul.f32 %v5191_v36, %v1117_v33  ;;  %s4187_s23 = sld [smem:[#allocation2 + $0x93]] }
 0x18d   : > { %v5196_v62 = vpop.permute.xlu1 %793  ;;  %v5199_v6 = vpop.permute.xlu0 %791 }
 0x18e   : > { %7814 = vst [vmem:[#allocation55_spill] sm:$0xff] %v5196_v62  ;;  %v5202_v0 = vpop.permute.xlu2 %859 }
 0x18f   : > { %7815 = vst [vmem:[#allocation56_spill] sm:$0xff] %v5199_v6 }
 0x190   : > { %7816 = vst [vmem:[#allocation57_spill] sm:$0xff] %v5202_v0  ;;  %v1106_v0 = vmul.f32 %v5205_v31, %v1104_v23  ;;  %v1119_v23 = vmul.f32 %v5205_v31, %v1117_v33 }
 0x193   : > { %1095 = vrot.lane.b32.xlu1 %v1091_v14, %s7715_s24  ;;  %1084 = vrot.lane.b32.xlu0 %v1079_v38, %s7713_s30  ;;  %v1130_v14 = vstv %s4185_s15  ;;  %s4188_s15 = sld [smem:[#allocation2 + $0x113]]  ;;  %s7717_s30 = smov 76  }
 0x194   : > { %1097 = vrot.lane.b32.xlu2 %v1092_v51, %s7715_s24 }
 0x195   : > { %v5211_v18 = vpop.permute.xlu1 %817  ;;  %v5214_v6 = vpop.permute.xlu0 %806 }
 0x196   : > { %7817 = vst [vmem:[#allocation58_spill] sm:$0xff] %v5211_v18  ;;  %v5217_v62 = vpop.permute.xlu2 %883  ;;  %v1132_v18 = vmul.f32 %v5205_v31, %v1130_v14 }
 0x197   : > { %7818 = vst [vmem:[#allocation59_spill] sm:$0xff] %v5214_v6  ;;  %v1131_v6 = vmul.f32 %v5191_v36, %v1130_v14 }
 0x198   : > { %7819 = vst [vmem:[#allocation60_spill] sm:$0xff] %v5217_v62 }
 0x19b   : > { %1111 = vrot.lane.b32.xlu1 %v1106_v0, %s7715_s24  ;;  %1109 = vrot.lane.b32.xlu0 %v1105_v63, %s7715_s24  ;;  %v1143_v0 = vstv %s4186_s29  ;;  %s4189_s29 = sld [smem:[#allocation2 + $0x193]] }
 0x19c   : > { %1122 = vrot.lane.b32.xlu2 %v1118_v60, %s7715_s24  ;;  %v1144_v33 = vmul.f32 %v5191_v36, %v1143_v0 }
 0x19d   : > { %v5223_v38 = vpop.permute.xlu1 %832  ;;  %v5226_v51 = vpop.permute.xlu0 %830 }
 0x19e   : > { %7820 = vst [vmem:[#allocation61_spill] sm:$0xff] %v5223_v38  ;;  %v5229_v62 = vpop.permute.xlu2 %899  ;;  %v1157_v38 = vstv %s4187_s23  ;;  %s4190_s23 = sld [smem:[#allocation2 + $0x14]] }
 0x19f   : > { %7821 = vst [vmem:[#allocation62_spill] sm:$0xff] %v5226_v51  ;;  %v1145_v51 = vmul.f32 %v5205_v31, %v1143_v0  ;;  %v1158_v14 = vmul.f32 %v5191_v36, %v1157_v38  ;;  %v1159_v0 = vmul.f32 %v5205_v31, %v1157_v38 }
 0x1a0   : > { %7822 = vst [vmem:[#allocation63_spill] sm:$0xff] %v5229_v62 }
 0x1a3   : > { %1135 = vrot.lane.b32.xlu1 %v1131_v6, %s7715_s24  ;;  %1124 = vrot.lane.b32.xlu0 %v1119_v23, %s7715_s24  ;;  %v1170_v6 = vstv %s4188_s15  ;;  %s4191_s15 = sld [smem:[#allocation2 + $0x94]] }
 0x1a4   : > { %1137 = vrot.lane.b32.xlu2 %v1132_v18, %s7715_s24  ;;  %s7719_s24 = smov 64  }
 0x1a5   : > { %v5235_v63 = vpop.permute.xlu1 %857  ;;  %v5238_v60 = vpop.permute.xlu0 %846 }
 0x1a6   : > { %7823 = vst [vmem:[#allocation64_spill] sm:$0xff] %v5235_v63  ;;  %v5241_v62 = vpop.permute.xlu2 %923 }
 0x1a7   : > { %7824 = vst [vmem:[#allocation65_spill] sm:$0xff] %v5238_v60  ;;  %v1172_v60 = vmul.f32 %v5205_v31, %v1170_v6 }
 0x1a8   : > { %7825 = vst [vmem:[#allocation66_spill] sm:$0xff] %v5241_v62  ;;  %v1171_v62 = vmul.f32 %v5191_v36, %v1170_v6 }
 0x1ab   : > { %1150 = vrot.lane.b32.xlu1 %v1145_v51, %s7717_s30  ;;  %1148 = vrot.lane.b32.xlu0 %v1144_v33, %s7717_s30  ;;  %v1183_v51 = vstv %s4189_s29  ;;  %s4192_s29 = sld [smem:[#allocation2 + $0x114]] }
 0x1ac   : > { %1162 = vrot.lane.b32.xlu2 %v1158_v14, %s7717_s30  ;;  %v1184_v38 = vmul.f32 %v5191_v36, %v1183_v51 }
 0x1ad   : > { %v5247_v23 = vpop.permute.xlu1 %872  ;;  %v5250_v18 = vpop.permute.xlu0 %870 }
 0x1ae   : > { %7826 = vst [vmem:[#allocation67_spill] sm:$0xff] %v5247_v23  ;;  %v5253_v63 = vpop.permute.xlu2 %938  ;;  %v1196_v23 = vstv %s4190_s23  ;;  %s4193_s23 = sld [smem:[#allocation2 + $0x194]] }
 0x1af   : > { %7827 = vst [vmem:[#allocation68_spill] sm:$0xff] %v5250_v18  ;;  %v1185_v18 = vmul.f32 %v5205_v31, %v1183_v51  ;;  %v1197_v6 = vmul.f32 %v5191_v36, %v1196_v23  ;;  %v1198_v51 = vmul.f32 %v5205_v31, %v1196_v23 }
 0x1b0   : > { %7828 = vst [vmem:[#allocation69_spill] sm:$0xff] %v5253_v63 }
 0x1b3   : > { %1175 = vrot.lane.b32.xlu1 %v1171_v62, %s7717_s30  ;;  %1164 = vrot.lane.b32.xlu0 %v1159_v0, %s7717_s30  ;;  %v1210_v62 = vstv %s4191_s15  ;;  %s4194_s15 = sld [smem:[#allocation2 + $0x15]] }
 0x1b4   : > { %1177 = vrot.lane.b32.xlu2 %v1172_v60, %s7717_s30 }
 0x1b5   : > { %v5259_v33 = vpop.permute.xlu1 %897  ;;  %v5262_v14 = vpop.permute.xlu0 %885 }
 0x1b6   : > { %7829 = vst [vmem:[#allocation70_spill] sm:$0xff] %v5259_v33  ;;  %v5265_v63 = vpop.permute.xlu2 %963  ;;  %v1223_v33 = vstv %s4192_s29  ;;  %s4195_s29 = sld [smem:[#allocation2 + $0x95]] }
 0x1b7   : > { %7830 = vst [vmem:[#allocation71_spill] sm:$0xff] %v5262_v14  ;;  %v1224_v23 = vmul.f32 %v5191_v36, %v1223_v33 }
 0x1b8   : > { %7831 = vst [vmem:[#allocation72_spill] sm:$0xff] %v5265_v63  ;;  %v1211_v63 = vmul.f32 %v5191_v36, %v1210_v62 }
 0x1bb   : > { %1190 = vrot.lane.b32.xlu1 %v1185_v18, %s7717_s30  ;;  %1188 = vrot.lane.b32.xlu0 %v1184_v38, %s7717_s30  ;;  %v1212_v18 = vmul.f32 %v5205_v31, %v1210_v62  ;;  %s7721_s30 = smov 63  }
 0x1bc   : > { %1201 = vrot.lane.b32.xlu2 %v1197_v6, %s7719_s24 }
 0x1bd   : > { %v5271_v0 = vpop.permute.xlu1 %912  ;;  %v5274_v60 = vpop.permute.xlu0 %910 }
 0x1be   : > { %7832 = vst [vmem:[#allocation73_spill] sm:$0xff] %v5271_v0  ;;  %v5277_v14 = vpop.permute.xlu2 %978  ;;  %v1236_v0 = vstv %s4193_s23  ;;  %s4196_s23 = sld [smem:[#allocation2 + $0x115]] }
 0x1bf   : > { %7833 = vst [vmem:[#allocation74_spill] sm:$0xff] %v5274_v60  ;;  %v1225_v60 = vmul.f32 %v5205_v31, %v1223_v33  ;;  %v1237_v62 = vmul.f32 %v5191_v36, %v1236_v0  ;;  %v1238_v33 = vmul.f32 %v5205_v31, %v1236_v0 }
 0x1c0   : > { %7834 = vst [vmem:[#allocation75_spill] sm:$0xff] %v5277_v14 }
 0x1c3   : > { %1215 = vrot.lane.b32.xlu1 %v1211_v63, %s7719_s24  ;;  %1203 = vrot.lane.b32.xlu0 %v1198_v51, %s7719_s24  ;;  %v1249_v63 = vstv %s4194_s15  ;;  %s4197_s15 = sld [smem:[#allocation2 + $0x195]] }
 0x1c4   : > { %1217 = vrot.lane.b32.xlu2 %v1212_v18, %s7719_s24 }
 0x1c5   : > { %v5283_v38 = vpop.permute.xlu1 %936  ;;  %v5286_v6 = vpop.permute.xlu0 %925 }
 0x1c6   : > { %7835 = vst [vmem:[#allocation76_spill] sm:$0xff] %v5283_v38  ;;  %v5289_v14 = vpop.permute.xlu2 %1003  ;;  %v1250_v38 = vmul.f32 %v5191_v36, %v1249_v63 }
 0x1c7   : > { %7836 = vst [vmem:[#allocation77_spill] sm:$0xff] %v5286_v6  ;;  %v1251_v6 = vmul.f32 %v5205_v31, %v1249_v63  ;;  %v1276_v63 = vstv %s4196_s23  ;;  %s4199_s23 = sld [smem:[#allocation2 + $0x96]] }
 0x1c8   : > { %7837 = vst [vmem:[#allocation78_spill] sm:$0xff] %v5289_v14 }
 0x1cb   : > { %1230 = vrot.lane.b32.xlu1 %v1225_v60, %s7719_s24  ;;  %1228 = vrot.lane.b32.xlu0 %v1224_v23, %s7719_s24  ;;  %v1263_v60 = vstv %s4195_s29  ;;  %s4198_s29 = sld [smem:[#allocation2 + $0x16]] }
 0x1cc   : > { %1241 = vrot.lane.b32.xlu2 %v1237_v62, %s7719_s24  ;;  %v1264_v0 = vmul.f32 %v5191_v36, %v1263_v60 }
 0x1cd   : > { %v5295_v51 = vpop.permute.xlu1 %952  ;;  %v5298_v18 = vpop.permute.xlu0 %950 }
 0x1ce   : > { %7838 = vst [vmem:[#allocation79_spill] sm:$0xff] %v5295_v51  ;;  %v5301_v14 = vpop.permute.xlu2 %1018  ;;  %v1277_v51 = vmul.f32 %v5191_v36, %v1276_v63 }
 0x1cf   : > { %7839 = vst [vmem:[#allocation80_spill] sm:$0xff] %v5298_v18 }
 0x1d0   : > { %7840 = vst [vmem:[#allocation81_spill] sm:$0xff] %v5301_v14  ;;  %v1265_v14 = vmul.f32 %v5205_v31, %v1263_v60  ;;  %v1278_v60 = vmul.f32 %v5205_v31, %v1276_v63 }
 0x1d3   : > { %1254 = vrot.lane.b32.xlu1 %v1250_v38, %s7721_s30  ;;  %1243 = vrot.lane.b32.xlu0 %v1238_v33, %s7719_s24  ;;  %v1289_v38 = vstv %s4197_s15  ;;  %s4200_s15 = sld [smem:[#allocation2 + $0x116]]  ;;  %s7723_s24 = smov 62  }
 0x1d4   : > { %1256 = vrot.lane.b32.xlu2 %v1251_v6, %s7721_s30 }
 0x1d5   : > { %v5307_v23 = vpop.permute.xlu1 %976  ;;  %v5310_v62 = vpop.permute.xlu0 %965 }
 0x1d6   : > { %7841 = vst [vmem:[#allocation82_spill] sm:$0xff] %v5307_v23  ;;  %v5313_v18 = vpop.permute.xlu2 %1042  ;;  %v1291_v23 = vmul.f32 %v5205_v31, %v1289_v38 }
 0x1d7   : > { %7842 = vst [vmem:[#allocation83_spill] sm:$0xff] %v5310_v62  ;;  %v1290_v62 = vmul.f32 %v5191_v36, %v1289_v38 }
 0x1d8   : > { %7843 = vst [vmem:[#allocation84_spill] sm:$0xff] %v5313_v18 }
 0x1db   : > { %1270 = vrot.lane.b32.xlu1 %v1265_v14, %s7721_s30  ;;  %1268 = vrot.lane.b32.xlu0 %v1264_v0, %s7721_s30  ;;  %v1302_v14 = vstv %s4198_s29  ;;  %s4201_s29 = sld [smem:[#allocation2 + $0x196]] }
 0x1dc   : > { %1281 = vrot.lane.b32.xlu2 %v1277_v51, %s7721_s30  ;;  %v1303_v63 = vmul.f32 %v5191_v36, %v1302_v14 }
 0x1dd   : > { %v5319_v33 = vpop.permute.xlu1 %991  ;;  %v5322_v6 = vpop.permute.xlu0 %989 }
 0x1de   : > { %7844 = vst [vmem:[#allocation85_spill] sm:$0xff] %v5319_v33  ;;  %v5325_v18 = vpop.permute.xlu2 %1058  ;;  %v1316_v33 = vstv %s4199_s23  ;;  %s4202_s23 = sld [smem:[#allocation2 + $0x17]] }
 0x1df   : > { %7845 = vst [vmem:[#allocation86_spill] sm:$0xff] %v5322_v6  ;;  %v1304_v6 = vmul.f32 %v5205_v31, %v1302_v14  ;;  %v1317_v38 = vmul.f32 %v5191_v36, %v1316_v33  ;;  %v1318_v14 = vmul.f32 %v5205_v31, %v1316_v33 }
 0x1e0   : > { %7846 = vst [vmem:[#allocation87_spill] sm:$0xff] %v5325_v18 }
 0x1e3   : > { %1294 = vrot.lane.b32.xlu1 %v1290_v62, %s7721_s30  ;;  %1283 = vrot.lane.b32.xlu0 %v1278_v60, %s7721_s30  ;;  %v1329_v62 = vstv %s4200_s15  ;;  %s4203_s15 = sld [smem:[#allocation2 + $0x97]] }
 0x1e4   : > { %1296 = vrot.lane.b32.xlu2 %v1291_v23, %s7721_s30  ;;  %s7747_s30 = smov 61  }
 0x1e5   : > { %v5331_v0 = vpop.permute.xlu1 %1016  ;;  %v5334_v51 = vpop.permute.xlu0 %1005 }
 0x1e6   : > { %7847 = vst [vmem:[#allocation88_spill] sm:$0xff] %v5331_v0  ;;  %v5337_v18 = vpop.permute.xlu2 %1082 }
 0x1e7   : > { %7848 = vst [vmem:[#allocation89_spill] sm:$0xff] %v5334_v51  ;;  %v1331_v51 = vmul.f32 %v5205_v31, %v1329_v62 }
 0x1e8   : > { %7849 = vst [vmem:[#allocation90_spill] sm:$0xff] %v5337_v18  ;;  %v1330_v18 = vmul.f32 %v5191_v36, %v1329_v62 }
 0x1eb   : > { %1309 = vrot.lane.b32.xlu1 %v1304_v6, %s7723_s24  ;;  %1307 = vrot.lane.b32.xlu0 %v1303_v63, %s7723_s24  ;;  %v1342_v6 = vstv %s4201_s29  ;;  %s4204_s29 = sld [smem:[#allocation2 + $0x117]] }
 0x1ec   : > { %1321 = vrot.lane.b32.xlu2 %v1317_v38, %s7723_s24  ;;  %v1343_v33 = vmul.f32 %v5191_v36, %v1342_v6 }
 0x1ed   : > { %v5343_v60 = vpop.permute.xlu1 %1031  ;;  %v5346_v23 = vpop.permute.xlu0 %1029 }
 0x1ee   : > { %7850 = vst [vmem:[#allocation91_spill] sm:$0xff] %v5343_v60  ;;  %v5349_v0 = vpop.permute.xlu2 %1097  ;;  %v1355_v60 = vstv %s4202_s23  ;;  %s4205_s23 = sld [smem:[#allocation2 + $0x197]] }
 0x1ef   : > { %7851 = vst [vmem:[#allocation92_spill] sm:$0xff] %v5346_v23  ;;  %v1344_v23 = vmul.f32 %v5205_v31, %v1342_v6  ;;  %v1356_v62 = vmul.f32 %v5191_v36, %v1355_v60  ;;  %v1357_v6 = vmul.f32 %v5205_v31, %v1355_v60 }
 0x1f0   : > { %7852 = vst [vmem:[#allocation93_spill] sm:$0xff] %v5349_v0 }
 0x1f3   : > { %1334 = vrot.lane.b32.xlu1 %v1330_v18, %s7723_s24  ;;  %1323 = vrot.lane.b32.xlu0 %v1318_v14, %s7723_s24  ;;  %v1369_v18 = vstv %s4203_s15  ;;  %s4206_s15 = sld [smem:[#allocation2 + $0x18]] }
 0x1f4   : > { %1336 = vrot.lane.b32.xlu2 %v1331_v51, %s7723_s24 }
 0x1f5   : > { %v5355_v63 = vpop.permute.xlu1 %1056  ;;  %v5358_v38 = vpop.permute.xlu0 %1044 }
 0x1f6   : > { %7853 = vst [vmem:[#allocation94_spill] sm:$0xff] %v5355_v63  ;;  %v5361_v0 = vpop.permute.xlu2 %1122 }
 0x1f7   : > { %7854 = vst [vmem:[#allocation95_spill] sm:$0xff] %v5358_v38  ;;  %v1382_v38 = vstv %s4204_s29  ;;  %s4207_s29 = sld [smem:[#allocation2 + $0x98]] }
 0x1f8   : > { %7855 = vst [vmem:[#allocation96_spill] sm:$0xff] %v5361_v0  ;;  %v1370_v0 = vmul.f32 %v5191_v36, %v1369_v18  ;;  %v1383_v60 = vmul.f32 %v5191_v36, %v1382_v38 }
 0x1fb   : > { %1349 = vrot.lane.b32.xlu1 %v1344_v23, %s7723_s24  ;;  %1347 = vrot.lane.b32.xlu0 %v1343_v33, %s7723_s24  ;;  %v1371_v23 = vmul.f32 %v5205_v31, %v1369_v18  ;;  %s7745_s24 = smov 60  }
 0x1fc   : > { %1360 = vrot.lane.b32.xlu2 %v1356_v62, %s7747_s30 }
 0x1fd   : > { %v5367_v14 = vpop.permute.xlu1 %1071  ;;  %v5370_v51 = vpop.permute.xlu0 %1069 }
 0x1fe   : > { %7856 = vst [vmem:[#allocation97_spill] sm:$0xff] %v5367_v14  ;;  %v5373_v63 = vpop.permute.xlu2 %1137  ;;  %v1395_v14 = vstv %s4205_s23  ;;  %s4208_s23 = sld [smem:[#allocation2 + $0x118]] }
 0x1ff   : > { %7857 = vst [vmem:[#allocation98_spill] sm:$0xff] %v5370_v51  ;;  %v1384_v51 = vmul.f32 %v5205_v31, %v1382_v38  ;;  %v1396_v18 = vmul.f32 %v5191_v36, %v1395_v14  ;;  %v1397_v38 = vmul.f32 %v5205_v31, %v1395_v14 }
 0x200   : > { %7858 = vst [vmem:[#allocation99_spill] sm:$0xff] %v5373_v63 }
 0x203   : > { %1374 = vrot.lane.b32.xlu1 %v1370_v0, %s7747_s30  ;;  %1362 = vrot.lane.b32.xlu0 %v1357_v6, %s7747_s30  ;;  %v1408_v0 = vstv %s4206_s15  ;;  %s4209_s15 = sld [smem:[#allocation2 + $0x198]] }
 0x204   : > { %1376 = vrot.lane.b32.xlu2 %v1371_v23, %s7747_s30 }
 0x205   : > { %v5379_v33 = vpop.permute.xlu1 %1095  ;;  %v5382_v62 = vpop.permute.xlu0 %1084 }
 0x206   : > { %7859 = vst [vmem:[#allocation100_spill] sm:$0xff] %v5379_v33  ;;  %v5385_v63 = vpop.permute.xlu2 %1162  ;;  %v1409_v33 = vmul.f32 %v5191_v36, %v1408_v0 }
 0x207   : > { %7860 = vst [vmem:[#allocation101_spill] sm:$0xff] %v5382_v62  ;;  %v1410_v62 = vmul.f32 %v5205_v31, %v1408_v0  ;;  %v1435_v0 = vstv %s4208_s23  ;;  %s4217_s23 = sld [smem:[#allocation2 + $0x9a]] }
 0x208   : > { %7861 = vst [vmem:[#allocation102_spill] sm:$0xff] %v5385_v63 }
 0x20b   : > { %1389 = vrot.lane.b32.xlu1 %v1384_v51, %s7747_s30  ;;  %1387 = vrot.lane.b32.xlu0 %v1383_v60, %s7747_s30  ;;  %v1422_v51 = vstv %s4207_s29  ;;  %s4216_s29 = sld [smem:[#allocation2 + $0x1a]] }
 0x20c   : > { %1400 = vrot.lane.b32.xlu2 %v1396_v18, %s7747_s30  ;;  %v1423_v14 = vmul.f32 %v5191_v36, %v1422_v51 }
 0x20d   : > { %v5391_v6 = vpop.permute.xlu1 %1111  ;;  %v5394_v23 = vpop.permute.xlu0 %1109 }
 0x20e   : > { %7862 = vst [vmem:[#allocation103_spill] sm:$0xff] %v5391_v6  ;;  %v5397_v63 = vpop.permute.xlu2 %1177  ;;  %v1448_v6 = vstv %s4209_s15  ;;  %s4218_s15 = sld [smem:[#allocation2 + $0x11a]] }
 0x20f   : > { %7863 = vst [vmem:[#allocation104_spill] sm:$0xff] %v5394_v23 }
 0x210   : > { %7864 = vst [vmem:[#allocation105_spill] sm:$0xff] %v5397_v63  ;;  %v1424_v63 = vmul.f32 %v5205_v31, %v1422_v51 }
 0x213   : > { %1413 = vrot.lane.b32.xlu1 %v1409_v33, %s7745_s24  ;;  %1402 = vrot.lane.b32.xlu0 %v1397_v38, %s7747_s30  ;;  %v1436_v33 = vmul.f32 %v5191_v36, %v1435_v0 }
 0x214   : > { %1415 = vrot.lane.b32.xlu2 %v1410_v62, %s7745_s24 }
 0x215   : > { %v5403_v60 = vpop.permute.xlu1 %1135  ;;  %v5406_v18 = vpop.permute.xlu0 %1124 }
 0x216   : > { %7865 = vst [vmem:[#allocation106_spill] sm:$0xff] %v5403_v60  ;;  %v5409_v23 = vpop.permute.xlu2 %1201  ;;  %v5427_v60 = vld [vmem:[%s4730_s6 + $0x11] sm:$0xff] }
 0x217   : > { %7866 = vst [vmem:[#allocation107_spill] sm:$0xff] %v5406_v18  ;;  %v1437_v18 = vmul.f32 %v5205_v31, %v1435_v0 }
 0x218   : > { %7867 = vst [vmem:[#allocation108_spill] sm:$0xff] %v5409_v23  ;;  %v1449_v23 = vmul.f32 %v5191_v36, %v1448_v6 }
 0x21b   : > { %1429 = vrot.lane.b32.xlu1 %v1424_v63, %s7745_s24  ;;  %1427 = vrot.lane.b32.xlu0 %v1423_v14, %s7745_s24  ;;  %v1450_v63 = vmul.f32 %v5205_v31, %v1448_v6  ;;  %v1480_v14 = vstv %s4216_s29  ;;  %v1493_v6 = vstv %s4217_s23  ;;  %s4219_s29 = sld [smem:[#allocation2 + $0x19a]] }
 0x21c   : > { %1440 = vrot.lane.b32.xlu2 %v1436_v33, %s7745_s24  ;;  %v1482_v0 = vmul.f32 %v5427_v60, %v1480_v14  ;;  %s4220_s23 = sld [smem:[#allocation2 + $0x1b]] }
 0x21d   : > { %v5415_v62 = vpop.permute.xlu1 %1150  ;;  %v5418_v38 = vpop.permute.xlu0 %1148 }
 0x21e   : > { %7868 = vst [vmem:[#allocation109_spill] sm:$0xff] %v5415_v62  ;;  %v5421_v51 = vpop.permute.xlu2 %1217 }
 0x21f   : > { %7869 = vst [vmem:[#allocation110_spill] sm:$0xff] %v5418_v38  ;;  %v5433_v38 = vld [vmem:[%s4730_s6 + $0x10] sm:$0xff] }
 0x220   : > { %7870 = vst [vmem:[#allocation111_spill] sm:$0xff] %v5421_v51  ;;  %v1481_v31 = vmul.f32 %v5433_v38, %v1480_v14  ;;  %v1495_v14 = vmul.f32 %v5427_v60, %v1493_v6 }
 0x223   : > { %1453 = vrot.lane.b32.xlu1 %v1449_v23, %s7745_s24  ;;  %1442 = vrot.lane.b32.xlu0 %v1437_v18, %s7745_s24  ;;  %v1494_v23 = vmul.f32 %v5433_v38, %v1493_v6  ;;  %v1506_v18 = vstv %s4218_s15  ;;  %s4221_s15 = sld [smem:[#allocation2 + $0x9b]] }
 0x224   : > { %1455 = vrot.lane.b32.xlu2 %v1450_v63, %s7745_s24  ;;  %v1508_v62 = vmul.f32 %v5427_v60, %v1506_v18 }
 0x225   : > { %v5430_v33 = vpop.permute.xlu1 %1175  ;;  %v5436_v36 = vpop.permute.xlu0 %1164 }
 0x226   : > { %7871 = vst [vmem:[#allocation112_spill] sm:$0xff] %v5430_v33  ;;  %v5439_v51 = vpop.permute.xlu2 %1241 }
 0x227   : > { %7872 = vst [vmem:[#allocation113_spill] sm:$0xff] %v5436_v36  ;;  %v1507_v36 = vmul.f32 %v5433_v38, %v1506_v18 }
 0x228   : > { %7873 = vst [vmem:[#allocation114_spill] sm:$0xff] %v5439_v51 }
 0x22b   : > { %1487 = vrot.lane.b32.xlu1 %v1482_v0, %s4626_s7  ;;  %1485 = vrot.lane.b32.xlu0 %v1481_v31, %s4626_s7  ;;  %v1519_v0 = vstv %s4219_s29  ;;  %s4222_s29 = sld [smem:[#allocation2 + $0x11b]] }
 0x22c   : > { %1498 = vrot.lane.b32.xlu2 %v1494_v23, %s4626_s7  ;;  %v1520_v6 = vmul.f32 %v5433_v38, %v1519_v0 }
 0x22d   : > { %v5445_v33 = vpop.permute.xlu1 %1190  ;;  %v5448_v63 = vpop.permute.xlu0 %1188 }
 0x22e   : > { %7874 = vst [vmem:[#allocation115_spill] sm:$0xff] %v5445_v33  ;;  %v5451_v51 = vpop.permute.xlu2 %1256  ;;  %v1532_v33 = vstv %s4220_s23  ;;  %s4223_s23 = sld [smem:[#allocation2 + $0x19b]] }
 0x22f   : > { %7875 = vst [vmem:[#allocation116_spill] sm:$0xff] %v5448_v63  ;;  %v1521_v63 = vmul.f32 %v5427_v60, %v1519_v0  ;;  %v1533_v18 = vmul.f32 %v5433_v38, %v1532_v33  ;;  %v1534_v0 = vmul.f32 %v5427_v60, %v1532_v33 }
 0x230   : > { %7876 = vst [vmem:[#allocation117_spill] sm:$0xff] %v5451_v51 }
 0x233   : > { %1511 = vrot.lane.b32.xlu1 %v1507_v36, %s4626_s7  ;;  %1500 = vrot.lane.b32.xlu0 %v1495_v14, %s4626_s7  ;;  %v1545_v36 = vstv %s4221_s15  ;;  %s4224_s15 = sld [smem:[#allocation2 + $0x1c]] }
 0x234   : > { %1513 = vrot.lane.b32.xlu2 %v1508_v62, %s4626_s7 }
 0x235   : > { %v5457_v31 = vpop.permute.xlu1 %1215  ;;  %v5460_v23 = vpop.permute.xlu0 %1203 }
 0x236   : > { %7877 = vst [vmem:[#allocation118_spill] sm:$0xff] %v5457_v31  ;;  %v5463_v51 = vpop.permute.xlu2 %1281  ;;  %v1547_v31 = vmul.f32 %v5427_v60, %v1545_v36 }
 0x237   : > { %7878 = vst [vmem:[#allocation119_spill] sm:$0xff] %v5460_v23  ;;  %v1546_v23 = vmul.f32 %v5433_v38, %v1545_v36 }
 0x238   : > { %7879 = vst [vmem:[#allocation120_spill] sm:$0xff] %v5463_v51 }
 0x23b   : > { %1526 = vrot.lane.b32.xlu1 %v1521_v63, %s4626_s7  ;;  %1524 = vrot.lane.b32.xlu0 %v1520_v6, %s4626_s7  ;;  %v1558_v63 = vstv %s4222_s29  ;;  %s4225_s29 = sld [smem:[#allocation2 + $0x9c]] }
 0x23c   : > { %1537 = vrot.lane.b32.xlu2 %v1533_v18, %s4627_s20  ;;  %v1559_v33 = vmul.f32 %v5433_v38, %v1558_v63 }
 0x23d   : > { %v5469_v14 = vpop.permute.xlu1 %1230  ;;  %v5472_v62 = vpop.permute.xlu0 %1228 }
 0x23e   : > { %7880 = vst [vmem:[#allocation121_spill] sm:$0xff] %v5469_v14  ;;  %v5475_v51 = vpop.permute.xlu2 %1296  ;;  %v1571_v14 = vstv %s4223_s23  ;;  %s4226_s23 = sld [smem:[#allocation2 + $0x11c]] }
 0x23f   : > { %7881 = vst [vmem:[#allocation122_spill] sm:$0xff] %v5472_v62  ;;  %v1560_v62 = vmul.f32 %v5427_v60, %v1558_v63  ;;  %v1572_v36 = vmul.f32 %v5433_v38, %v1571_v14  ;;  %v1573_v63 = vmul.f32 %v5427_v60, %v1571_v14 }
 0x240   : > { %7882 = vst [vmem:[#allocation123_spill] sm:$0xff] %v5475_v51 }
 0x243   : > { %1550 = vrot.lane.b32.xlu1 %v1546_v23, %s4627_s20  ;;  %1539 = vrot.lane.b32.xlu0 %v1534_v0, %s4627_s20  ;;  %v1584_v23 = vstv %s4224_s15  ;;  %s4227_s15 = sld [smem:[#allocation2 + $0x19c]] }
 0x244   : > { %1552 = vrot.lane.b32.xlu2 %v1547_v31, %s4627_s20 }
 0x245   : > { %v5481_v6 = vpop.permute.xlu1 %1254  ;;  %v5484_v18 = vpop.permute.xlu0 %1243 }
 0x246   : > { %7883 = vst [vmem:[#allocation124_spill] sm:$0xff] %v5481_v6  ;;  %v5487_v51 = vpop.permute.xlu2 %1321  ;;  %v1586_v6 = vmul.f32 %v5427_v60, %v1584_v23 }
 0x247   : > { %7884 = vst [vmem:[#allocation125_spill] sm:$0xff] %v5484_v18  ;;  %v1585_v18 = vmul.f32 %v5433_v38, %v1584_v23 }
 0x248   : > { %7885 = vst [vmem:[#allocation126_spill] sm:$0xff] %v5487_v51 }
 0x24b   : > { %1565 = vrot.lane.b32.xlu1 %v1560_v62, %s4627_s20  ;;  %1563 = vrot.lane.b32.xlu0 %v1559_v33, %s4627_s20  ;;  %v1597_v62 = vstv %s4225_s29  ;;  %s4228_s29 = sld [smem:[#allocation2 + $0x1d]] }
 0x24c   : > { %1576 = vrot.lane.b32.xlu2 %v1572_v36, %s4627_s20  ;;  %v1598_v14 = vmul.f32 %v5433_v38, %v1597_v62 }
 0x24d   : > { %v5493_v0 = vpop.permute.xlu1 %1270  ;;  %v5496_v31 = vpop.permute.xlu0 %1268 }
 0x24e   : > { %7886 = vst [vmem:[#allocation127_spill] sm:$0xff] %v5493_v0  ;;  %v5499_v51 = vpop.permute.xlu2 %1336  ;;  %v1610_v0 = vstv %s4226_s23  ;;  %s4229_s23 = sld [smem:[#allocation2 + $0x9d]] }
 0x24f   : > { %7887 = vst [vmem:[#allocation128_spill] sm:$0xff] %v5496_v31  ;;  %v1599_v31 = vmul.f32 %v5427_v60, %v1597_v62  ;;  %v1611_v23 = vmul.f32 %v5433_v38, %v1610_v0  ;;  %v1612_v62 = vmul.f32 %v5427_v60, %v1610_v0 }
 0x250   : > { %7888 = vst [vmem:[#allocation129_spill] sm:$0xff] %v5499_v51 }
 0x253   : > { %1589 = vrot.lane.b32.xlu1 %v1585_v18, %s7743_s27  ;;  %1578 = vrot.lane.b32.xlu0 %v1573_v63, %s4627_s20  ;;  %v1623_v18 = vstv %s4227_s15  ;;  %s4230_s15 = sld [smem:[#allocation2 + $0x11d]] }
 0x254   : > { %1591 = vrot.lane.b32.xlu2 %v1586_v6, %s7743_s27 }
 0x255   : > { %v5505_v33 = vpop.permute.xlu1 %1294  ;;  %v5508_v36 = vpop.permute.xlu0 %1283 }
 0x256   : > { %7889 = vst [vmem:[#allocation130_spill] sm:$0xff] %v5505_v33  ;;  %v5511_v51 = vpop.permute.xlu2 %1360  ;;  %v1625_v33 = vmul.f32 %v5427_v60, %v1623_v18 }
 0x257   : > { %7890 = vst [vmem:[#allocation131_spill] sm:$0xff] %v5508_v36  ;;  %v1624_v36 = vmul.f32 %v5433_v38, %v1623_v18 }
 0x258   : > { %7891 = vst [vmem:[#allocation132_spill] sm:$0xff] %v5511_v51 }
 0x25b   : > { %1604 = vrot.lane.b32.xlu1 %v1599_v31, %s7743_s27  ;;  %1602 = vrot.lane.b32.xlu0 %v1598_v14, %s7743_s27  ;;  %v1636_v31 = vstv %s4228_s29  ;;  %s4231_s29 = sld [smem:[#allocation2 + $0x19d]] }
 0x25c   : > { %1615 = vrot.lane.b32.xlu2 %v1611_v23, %s7743_s27  ;;  %v1637_v0 = vmul.f32 %v5433_v38, %v1636_v31 }
 0x25d   : > { %v5517_v63 = vpop.permute.xlu1 %1309  ;;  %v5520_v6 = vpop.permute.xlu0 %1307 }
 0x25e   : > { %7892 = vst [vmem:[#allocation133_spill] sm:$0xff] %v5517_v63  ;;  %v5523_v51 = vpop.permute.xlu2 %1376  ;;  %v1649_v63 = vstv %s4229_s23  ;;  %s4232_s23 = sld [smem:[#allocation2 + $0x1e]] }
 0x25f   : > { %7893 = vst [vmem:[#allocation134_spill] sm:$0xff] %v5520_v6  ;;  %v1638_v6 = vmul.f32 %v5427_v60, %v1636_v31  ;;  %v1650_v18 = vmul.f32 %v5433_v38, %v1649_v63  ;;  %v1651_v31 = vmul.f32 %v5427_v60, %v1649_v63 }
 0x260   : > { %7894 = vst [vmem:[#allocation135_spill] sm:$0xff] %v5523_v51 }
 0x263   : > { %1628 = vrot.lane.b32.xlu1 %v1624_v36, %s7743_s27  ;;  %1617 = vrot.lane.b32.xlu0 %v1612_v62, %s7743_s27  ;;  %v1662_v36 = vstv %s4230_s15  ;;  %s4233_s15 = sld [smem:[#allocation2 + $0x9e]] }
 0x264   : > { %1630 = vrot.lane.b32.xlu2 %v1625_v33, %s7743_s27  ;;  %s8051_s27 = smov 62  }
 0x265   : > { %v5529_v14 = vpop.permute.xlu1 %1334  ;;  %v5532_v23 = vpop.permute.xlu0 %1323 }
 0x266   : > { %7895 = vst [vmem:[#allocation136_spill] sm:$0xff] %v5529_v14  ;;  %v5535_v51 = vpop.permute.xlu2 %1400  ;;  %v1664_v14 = vmul.f32 %v5427_v60, %v1662_v36 }
 0x267   : > { %7896 = vst [vmem:[#allocation137_spill] sm:$0xff] %v5532_v23  ;;  %v1663_v23 = vmul.f32 %v5433_v38, %v1662_v36 }
 0x268   : > { %7897 = vst [vmem:[#allocation138_spill] sm:$0xff] %v5535_v51 }
 0x26b   : > { %1643 = vrot.lane.b32.xlu1 %v1638_v6, %s7741_s4  ;;  %1641 = vrot.lane.b32.xlu0 %v1637_v0, %s7741_s4  ;;  %v1675_v6 = vstv %s4231_s29  ;;  %s4234_s29 = sld [smem:[#allocation2 + $0x11e]] }
 0x26c   : > { %1654 = vrot.lane.b32.xlu2 %v1650_v18, %s7741_s4  ;;  %v1676_v63 = vmul.f32 %v5433_v38, %v1675_v6 }
 0x26d   : > { %v5541_v62 = vpop.permute.xlu1 %1349  ;;  %v5544_v33 = vpop.permute.xlu0 %1347 }
 0x26e   : > { %7898 = vst [vmem:[#allocation139_spill] sm:$0xff] %v5541_v62  ;;  %v5547_v51 = vpop.permute.xlu2 %1415  ;;  %v1688_v62 = vstv %s4232_s23  ;;  %s4235_s23 = sld [smem:[#allocation2 + $0x19e]] }
 0x26f   : > { %7899 = vst [vmem:[#allocation140_spill] sm:$0xff] %v5544_v33  ;;  %v1677_v33 = vmul.f32 %v5427_v60, %v1675_v6  ;;  %v1689_v36 = vmul.f32 %v5433_v38, %v1688_v62  ;;  %v1690_v6 = vmul.f32 %v5427_v60, %v1688_v62 }
 0x270   : > { %7900 = vst [vmem:[#allocation141_spill] sm:$0xff] %v5547_v51 }
 0x273   : > { %1667 = vrot.lane.b32.xlu1 %v1663_v23, %s7741_s4  ;;  %1656 = vrot.lane.b32.xlu0 %v1651_v31, %s7741_s4  ;;  %v1701_v23 = vstv %s4233_s15  ;;  %s4236_s15 = sld [smem:[#allocation2 + $0x1f]] }
 0x274   : > { %1669 = vrot.lane.b32.xlu2 %v1664_v14, %s7741_s4 }
 0x275   : > { %v5553_v0 = vpop.permute.xlu1 %1374  ;;  %v5556_v18 = vpop.permute.xlu0 %1362 }
 0x276   : > { %7901 = vst [vmem:[#allocation142_spill] sm:$0xff] %v5553_v0  ;;  %v5559_v51 = vpop.permute.xlu2 %1440  ;;  %v1702_v0 = vmul.f32 %v5433_v38, %v1701_v23 }
 0x277   : > { %7902 = vst [vmem:[#allocation143_spill] sm:$0xff] %v5556_v18  ;;  %v1703_v18 = vmul.f32 %v5427_v60, %v1701_v23 }
 0x278   : > { %7903 = vst [vmem:[#allocation144_spill] sm:$0xff] %v5559_v51 }
 0x27b   : > { %1682 = vrot.lane.b32.xlu1 %v1677_v33, %s7741_s4  ;;  %1680 = vrot.lane.b32.xlu0 %v1676_v63, %s7741_s4  ;;  %v1714_v33 = vstv %s4234_s29  ;;  %s4237_s29 = sld [smem:[#allocation2 + $0x9f]]  ;;  %s8041_s4 = smov 63  }
 0x27c   : > { %1693 = vrot.lane.b32.xlu2 %v1689_v36, %s7739_s18  ;;  %v1715_v62 = vmul.f32 %v5433_v38, %v1714_v33 }
 0x27d   : > { %v5565_v31 = vpop.permute.xlu1 %1389  ;;  %v5568_v14 = vpop.permute.xlu0 %1387 }
 0x27e   : > { %7904 = vst [vmem:[#allocation145_spill] sm:$0xff] %v5565_v31  ;;  %v5571_v51 = vpop.permute.xlu2 %1455  ;;  %v1727_v31 = vstv %s4235_s23  ;;  %s4238_s23 = sld [smem:[#allocation2 + $0x11f]] }
 0x27f   : > { %7905 = vst [vmem:[#allocation146_spill] sm:$0xff] %v5568_v14  ;;  %v1716_v14 = vmul.f32 %v5427_v60, %v1714_v33  ;;  %v1728_v23 = vmul.f32 %v5433_v38, %v1727_v31  ;;  %v1729_v33 = vmul.f32 %v5427_v60, %v1727_v31 }
 0x280   : > { %7906 = vst [vmem:[#allocation147_spill] sm:$0xff] %v5571_v51 }
 0x283   : > { %1706 = vrot.lane.b32.xlu1 %v1702_v0, %s7739_s18  ;;  %1695 = vrot.lane.b32.xlu0 %v1690_v6, %s7739_s18  ;;  %v1740_v0 = vstv %s4236_s15  ;;  %s4239_s15 = sld [smem:[#allocation2 + $0x19f]] }
 0x284   : > { %1708 = vrot.lane.b32.xlu2 %v1703_v18, %s7739_s18 }
 0x285   : > { %v5577_v63 = vpop.permute.xlu1 %1413  ;;  %v5580_v36 = vpop.permute.xlu0 %1402 }
 0x286   : > { %7907 = vst [vmem:[#allocation148_spill] sm:$0xff] %v5577_v63  ;;  %v5583_v51 = vpop.permute.xlu2 %1498  ;;  %v1742_v63 = vmul.f32 %v5427_v60, %v1740_v0 }
 0x287   : > { %7908 = vst [vmem:[#allocation149_spill] sm:$0xff] %v5580_v36  ;;  %v1741_v36 = vmul.f32 %v5433_v38, %v1740_v0 }
 0x288   : > { %7909 = vst [vmem:[#allocation150_spill] sm:$0xff] %v5583_v51 }
 0x28b   : > { %1721 = vrot.lane.b32.xlu1 %v1716_v14, %s7739_s18  ;;  %1719 = vrot.lane.b32.xlu0 %v1715_v62, %s7739_s18  ;;  %v1753_v14 = vstv %s4237_s29  ;;  %s4240_s29 = sld [smem:[#allocation2 + $0x20]] }
 0x28c   : > { %1732 = vrot.lane.b32.xlu2 %v1728_v23, %s7739_s18  ;;  %v1754_v31 = vmul.f32 %v5433_v38, %v1753_v14 }
 0x28d   : > { %v5589_v6 = vpop.permute.xlu1 %1429  ;;  %v5592_v18 = vpop.permute.xlu0 %1427 }
 0x28e   : > { %7910 = vst [vmem:[#allocation151_spill] sm:$0xff] %v5589_v6  ;;  %v5595_v51 = vpop.permute.xlu2 %1513  ;;  %v1766_v6 = vstv %s4238_s23  ;;  %s4241_s23 = sld [smem:[#allocation2 + $0xa0]] }
 0x28f   : > { %7911 = vst [vmem:[#allocation152_spill] sm:$0xff] %v5592_v18  ;;  %v1755_v18 = vmul.f32 %v5427_v60, %v1753_v14  ;;  %v1767_v0 = vmul.f32 %v5433_v38, %v1766_v6  ;;  %v1768_v14 = vmul.f32 %v5427_v60, %v1766_v6 }
 0x290   : > { %7912 = vst [vmem:[#allocation153_spill] sm:$0xff] %v5595_v51 }
 0x293   : > { %1745 = vrot.lane.b32.xlu1 %v1741_v36, %s7737_s28  ;;  %1734 = vrot.lane.b32.xlu0 %v1729_v33, %s7739_s18  ;;  %v1779_v36 = vstv %s4239_s15  ;;  %s4242_s15 = sld [smem:[#allocation2 + $0x120]]  ;;  %s8032_s18 = smov 64  }
 0x294   : > { %1747 = vrot.lane.b32.xlu2 %v1742_v63, %s7737_s28 }
 0x295   : > { %v5601_v62 = vpop.permute.xlu1 %1453  ;;  %v5604_v23 = vpop.permute.xlu0 %1442 }
 0x296   : > { %7913 = vst [vmem:[#allocation154_spill] sm:$0xff] %v5601_v62  ;;  %v5607_v51 = vpop.permute.xlu2 %1537  ;;  %v1780_v62 = vmul.f32 %v5433_v38, %v1779_v36 }
 0x297   : > { %7914 = vst [vmem:[#allocation155_spill] sm:$0xff] %v5604_v23  ;;  %v1781_v23 = vmul.f32 %v5427_v60, %v1779_v36 }
 0x298   : > { %7915 = vst [vmem:[#allocation156_spill] sm:$0xff] %v5607_v51 }
 0x29b   : > { %1760 = vrot.lane.b32.xlu1 %v1755_v18, %s7737_s28  ;;  %1758 = vrot.lane.b32.xlu0 %v1754_v31, %s7737_s28  ;;  %v1792_v18 = vstv %s4240_s29  ;;  %s4243_s29 = sld [smem:[#allocation2 + $0x1a0]] }
 0x29c   : > { %1771 = vrot.lane.b32.xlu2 %v1767_v0, %s7737_s28  ;;  %v1793_v6 = vmul.f32 %v5433_v38, %v1792_v18 }
 0x29d   : > { %v5613_v33 = vpop.permute.xlu1 %1487  ;;  %v5616_v63 = vpop.permute.xlu0 %1485 }
 0x29e   : > { %7916 = vst [vmem:[#allocation157_spill] sm:$0xff] %v5613_v33  ;;  %v5619_v51 = vpop.permute.xlu2 %1552  ;;  %v1805_v33 = vstv %s4241_s23  ;;  %s4244_s23 = sld [smem:[#allocation2 + $0x21]] }
 0x29f   : > { %7917 = vst [vmem:[#allocation158_spill] sm:$0xff] %v5616_v63  ;;  %v1794_v63 = vmul.f32 %v5427_v60, %v1792_v18  ;;  %v1806_v36 = vmul.f32 %v5433_v38, %v1805_v33  ;;  %v1807_v18 = vmul.f32 %v5427_v60, %v1805_v33 }
 0x2a0   : > { %7918 = vst [vmem:[#allocation159_spill] sm:$0xff] %v5619_v51 }
 0x2a3   : > { %1784 = vrot.lane.b32.xlu1 %v1780_v62, %s7737_s28  ;;  %1773 = vrot.lane.b32.xlu0 %v1768_v14, %s7737_s28  ;;  %v1818_v62 = vstv %s4242_s15  ;;  %s4245_s15 = sld [smem:[#allocation2 + $0xa1]] }
 0x2a4   : > { %1786 = vrot.lane.b32.xlu2 %v1781_v23, %s7737_s28  ;;  %s8024_s28 = smov 76  }
 0x2a5   : > { %v5625_v31 = vpop.permute.xlu1 %1511  ;;  %v5628_v0 = vpop.permute.xlu0 %1500 }
 0x2a6   : > { %7919 = vst [vmem:[#allocation160_spill] sm:$0xff] %v5625_v31  ;;  %v5631_v51 = vpop.permute.xlu2 %1576  ;;  %v1819_v31 = vmul.f32 %v5433_v38, %v1818_v62 }
 0x2a7   : > { %7920 = vst [vmem:[#allocation161_spill] sm:$0xff] %v5628_v0  ;;  %v1820_v0 = vmul.f32 %v5427_v60, %v1818_v62 }
 0x2a8   : > { %7921 = vst [vmem:[#allocation162_spill] sm:$0xff] %v5631_v51 }
 0x2ab   : > { %1799 = vrot.lane.b32.xlu1 %v1794_v63, %s7735_s8  ;;  %1797 = vrot.lane.b32.xlu0 %v1793_v6, %s7735_s8  ;;  %v1831_v63 = vstv %s4243_s29  ;;  %s4246_s29 = sld [smem:[#allocation2 + $0x121]] }
 0x2ac   : > { %1810 = vrot.lane.b32.xlu2 %v1806_v36, %s7735_s8  ;;  %v1832_v33 = vmul.f32 %v5433_v38, %v1831_v63 }
 0x2ad   : > { %v5637_v14 = vpop.permute.xlu1 %1526  ;;  %v5640_v23 = vpop.permute.xlu0 %1524 }
 0x2ae   : > { %7922 = vst [vmem:[#allocation163_spill] sm:$0xff] %v5637_v14  ;;  %v5643_v51 = vpop.permute.xlu2 %1591  ;;  %v1844_v14 = vstv %s4244_s23  ;;  %s4247_s23 = sld [smem:[#allocation2 + $0x1a1]] }
 0x2af   : > { %7923 = vst [vmem:[#allocation164_spill] sm:$0xff] %v5640_v23  ;;  %v1833_v23 = vmul.f32 %v5427_v60, %v1831_v63  ;;  %v1845_v62 = vmul.f32 %v5433_v38, %v1844_v14  ;;  %v1846_v63 = vmul.f32 %v5427_v60, %v1844_v14 }
 0x2b0   : > { %7924 = vst [vmem:[#allocation165_spill] sm:$0xff] %v5643_v51 }
 0x2b3   : > { %1823 = vrot.lane.b32.xlu1 %v1819_v31, %s7735_s8  ;;  %1812 = vrot.lane.b32.xlu0 %v1807_v18, %s7735_s8  ;;  %v1857_v31 = vstv %s4245_s15  ;;  %s4248_s15 = sld [smem:[#allocation2 + $0x22]] }
 0x2b4   : > { %1825 = vrot.lane.b32.xlu2 %v1820_v0, %s7735_s8 }
 0x2b5   : > { %v5649_v6 = vpop.permute.xlu1 %1550  ;;  %v5652_v36 = vpop.permute.xlu0 %1539 }
 0x2b6   : > { %7925 = vst [vmem:[#allocation166_spill] sm:$0xff] %v5649_v6  ;;  %v5655_v51 = vpop.permute.xlu2 %1615  ;;  %v1859_v6 = vmul.f32 %v5427_v60, %v1857_v31 }
 0x2b7   : > { %7926 = vst [vmem:[#allocation167_spill] sm:$0xff] %v5652_v36  ;;  %v1858_v36 = vmul.f32 %v5433_v38, %v1857_v31 }
 0x2b8   : > { %7927 = vst [vmem:[#allocation168_spill] sm:$0xff] %v5655_v51 }
 0x2bb   : > { %1838 = vrot.lane.b32.xlu1 %v1833_v23, %s7735_s8  ;;  %1836 = vrot.lane.b32.xlu0 %v1832_v33, %s7735_s8  ;;  %v1870_v23 = vstv %s4246_s29  ;;  %s4249_s29 = sld [smem:[#allocation2 + $0xa2]]  ;;  %s8014_s8 = smov 77  }
 0x2bc   : > { %1849 = vrot.lane.b32.xlu2 %v1845_v62, %s7733_s25  ;;  %v1871_v14 = vmul.f32 %v5433_v38, %v1870_v23 }
 0x2bd   : > { %v5661_v18 = vpop.permute.xlu1 %1565  ;;  %v5664_v0 = vpop.permute.xlu0 %1563 }
 0x2be   : > { %7928 = vst [vmem:[#allocation169_spill] sm:$0xff] %v5661_v18  ;;  %v5667_v51 = vpop.permute.xlu2 %1630  ;;  %v1883_v18 = vstv %s4247_s23  ;;  %s4250_s23 = sld [smem:[#allocation2 + $0x122]] }
 0x2bf   : > { %7929 = vst [vmem:[#allocation170_spill] sm:$0xff] %v5664_v0  ;;  %v1872_v0 = vmul.f32 %v5427_v60, %v1870_v23  ;;  %v1884_v31 = vmul.f32 %v5433_v38, %v1883_v18  ;;  %v1885_v23 = vmul.f32 %v5427_v60, %v1883_v18 }
 0x2c0   : > { %7930 = vst [vmem:[#allocation171_spill] sm:$0xff] %v5667_v51 }
 0x2c3   : > { %1862 = vrot.lane.b32.xlu1 %v1858_v36, %s7733_s25  ;;  %1851 = vrot.lane.b32.xlu0 %v1846_v63, %s7733_s25  ;;  %v1896_v36 = vstv %s4248_s15  ;;  %s4251_s15 = sld [smem:[#allocation2 + $0x1a2]] }
 0x2c4   : > { %1864 = vrot.lane.b32.xlu2 %v1859_v6, %s7733_s25 }
 0x2c5   : > { %v5673_v33 = vpop.permute.xlu1 %1589  ;;  %v5676_v62 = vpop.permute.xlu0 %1578 }
 0x2c6   : > { %7931 = vst [vmem:[#allocation172_spill] sm:$0xff] %v5673_v33  ;;  %v5679_v51 = vpop.permute.xlu2 %1654  ;;  %v1898_v33 = vmul.f32 %v5427_v60, %v1896_v36 }
 0x2c7   : > { %7932 = vst [vmem:[#allocation173_spill] sm:$0xff] %v5676_v62  ;;  %v1897_v62 = vmul.f32 %v5433_v38, %v1896_v36 }
 0x2c8   : > { %7933 = vst [vmem:[#allocation174_spill] sm:$0xff] %v5679_v51 }
 0x2cb   : > { %1877 = vrot.lane.b32.xlu1 %v1872_v0, %s7733_s25  ;;  %1875 = vrot.lane.b32.xlu0 %v1871_v14, %s7733_s25  ;;  %v1909_v0 = vstv %s4249_s29  ;;  %s4252_s29 = sld [smem:[#allocation2 + $0x23]] }
 0x2cc   : > { %1888 = vrot.lane.b32.xlu2 %v1884_v31, %s7733_s25  ;;  %v1910_v18 = vmul.f32 %v5433_v38, %v1909_v0 }
 0x2cd   : > { %v5685_v63 = vpop.permute.xlu1 %1604  ;;  %v5688_v6 = vpop.permute.xlu0 %1602 }
 0x2ce   : > { %7934 = vst [vmem:[#allocation175_spill] sm:$0xff] %v5685_v63  ;;  %v5691_v51 = vpop.permute.xlu2 %1669  ;;  %v1922_v63 = vstv %s4250_s23  ;;  %s4253_s23 = sld [smem:[#allocation2 + $0xa3]] }
 0x2cf   : > { %7935 = vst [vmem:[#allocation176_spill] sm:$0xff] %v5688_v6  ;;  %v1911_v6 = vmul.f32 %v5427_v60, %v1909_v0  ;;  %v1923_v36 = vmul.f32 %v5433_v38, %v1922_v63  ;;  %v1924_v0 = vmul.f32 %v5427_v60, %v1922_v63 }
 0x2d0   : > { %7936 = vst [vmem:[#allocation177_spill] sm:$0xff] %v5691_v51 }
 0x2d3   : > { %1901 = vrot.lane.b32.xlu1 %v1897_v62, %s7731_s5  ;;  %1890 = vrot.lane.b32.xlu0 %v1885_v23, %s7733_s25  ;;  %v1935_v62 = vstv %s4251_s15  ;;  %s4254_s15 = sld [smem:[#allocation2 + $0x123]]  ;;  %s8005_s25 = smov 78  }
 0x2d4   : > { %1903 = vrot.lane.b32.xlu2 %v1898_v33, %s7731_s5 }
 0x2d5   : > { %v5697_v14 = vpop.permute.xlu1 %1628  ;;  %v5700_v31 = vpop.permute.xlu0 %1617 }
 0x2d6   : > { %7937 = vst [vmem:[#allocation178_spill] sm:$0xff] %v5697_v14  ;;  %v5703_v51 = vpop.permute.xlu2 %1693  ;;  %v1936_v14 = vmul.f32 %v5433_v38, %v1935_v62 }
 0x2d7   : > { %7938 = vst [vmem:[#allocation179_spill] sm:$0xff] %v5700_v31  ;;  %v1937_v31 = vmul.f32 %v5427_v60, %v1935_v62 }
 0x2d8   : > { %7939 = vst [vmem:[#allocation180_spill] sm:$0xff] %v5703_v51 }
 0x2db   : > { %1916 = vrot.lane.b32.xlu1 %v1911_v6, %s7731_s5  ;;  %1914 = vrot.lane.b32.xlu0 %v1910_v18, %s7731_s5  ;;  %v1948_v6 = vstv %s4252_s29  ;;  %s4255_s29 = sld [smem:[#allocation2 + $0x1a3]] }
 0x2dc   : > { %1927 = vrot.lane.b32.xlu2 %v1923_v36, %s7731_s5  ;;  %v1949_v63 = vmul.f32 %v5433_v38, %v1948_v6 }
 0x2dd   : > { %v5709_v23 = vpop.permute.xlu1 %1643  ;;  %v5712_v33 = vpop.permute.xlu0 %1641 }
 0x2de   : > { %7940 = vst [vmem:[#allocation181_spill] sm:$0xff] %v5709_v23  ;;  %v5715_v51 = vpop.permute.xlu2 %1708  ;;  %v1961_v23 = vstv %s4253_s23  ;;  %s4256_s23 = sld [smem:[#allocation2 + $0x24]] }
 0x2df   : > { %7941 = vst [vmem:[#allocation182_spill] sm:$0xff] %v5712_v33  ;;  %v1950_v33 = vmul.f32 %v5427_v60, %v1948_v6  ;;  %v1962_v62 = vmul.f32 %v5433_v38, %v1961_v23  ;;  %v1963_v6 = vmul.f32 %v5427_v60, %v1961_v23 }
 0x2e0   : > { %7942 = vst [vmem:[#allocation183_spill] sm:$0xff] %v5715_v51 }
 0x2e3   : > { %1940 = vrot.lane.b32.xlu1 %v1936_v14, %s7731_s5  ;;  %1929 = vrot.lane.b32.xlu0 %v1924_v0, %s7731_s5  ;;  %v1974_v14 = vstv %s4254_s15  ;;  %s4257_s15 = sld [smem:[#allocation2 + $0xa4]] }
 0x2e4   : > { %1942 = vrot.lane.b32.xlu2 %v1937_v31, %s7731_s5  ;;  %s7997_s5 = smov 79  }
 0x2e5   : > { %v5721_v18 = vpop.permute.xlu1 %1667  ;;  %v5724_v36 = vpop.permute.xlu0 %1656 }
 0x2e6   : > { %7943 = vst [vmem:[#allocation184_spill] sm:$0xff] %v5721_v18  ;;  %v5727_v51 = vpop.permute.xlu2 %1732  ;;  %v1976_v18 = vmul.f32 %v5427_v60, %v1974_v14 }
 0x2e7   : > { %7944 = vst [vmem:[#allocation185_spill] sm:$0xff] %v5724_v36  ;;  %v1975_v36 = vmul.f32 %v5433_v38, %v1974_v14 }
 0x2e8   : > { %7945 = vst [vmem:[#allocation186_spill] sm:$0xff] %v5727_v51 }
 0x2eb   : > { %1955 = vrot.lane.b32.xlu1 %v1950_v33, %s7729_s26  ;;  %1953 = vrot.lane.b32.xlu0 %v1949_v63, %s7729_s26  ;;  %v1987_v33 = vstv %s4255_s29  ;;  %s4258_s29 = sld [smem:[#allocation2 + $0x124]] }
 0x2ec   : > { %1966 = vrot.lane.b32.xlu2 %v1962_v62, %s7729_s26  ;;  %v1988_v23 = vmul.f32 %v5433_v38, %v1987_v33 }
 0x2ed   : > { %v5733_v0 = vpop.permute.xlu1 %1682  ;;  %v5736_v31 = vpop.permute.xlu0 %1680 }
 0x2ee   : > { %7946 = vst [vmem:[#allocation187_spill] sm:$0xff] %v5733_v0  ;;  %v5739_v51 = vpop.permute.xlu2 %1747  ;;  %v2000_v0 = vstv %s4256_s23  ;;  %s4259_s23 = sld [smem:[#allocation2 + $0x1a4]] }
 0x2ef   : > { %7947 = vst [vmem:[#allocation188_spill] sm:$0xff] %v5736_v31  ;;  %v1989_v31 = vmul.f32 %v5427_v60, %v1987_v33  ;;  %v2001_v14 = vmul.f32 %v5433_v38, %v2000_v0  ;;  %v2002_v33 = vmul.f32 %v5427_v60, %v2000_v0 }
 0x2f0   : > { %7948 = vst [vmem:[#allocation189_spill] sm:$0xff] %v5739_v51 }
 0x2f3   : > { %1979 = vrot.lane.b32.xlu1 %v1975_v36, %s7729_s26  ;;  %1968 = vrot.lane.b32.xlu0 %v1963_v6, %s7729_s26  ;;  %v2013_v36 = vstv %s4257_s15  ;;  %s4260_s15 = sld [smem:[#allocation2 + $0x25]] }
 0x2f4   : > { %1981 = vrot.lane.b32.xlu2 %v1976_v18, %s7729_s26 }
 0x2f5   : > { %v5745_v63 = vpop.permute.xlu1 %1706  ;;  %v5748_v62 = vpop.permute.xlu0 %1695 }
 0x2f6   : > { %7949 = vst [vmem:[#allocation190_spill] sm:$0xff] %v5745_v63  ;;  %v5751_v51 = vpop.permute.xlu2 %1771  ;;  %v2014_v63 = vmul.f32 %v5433_v38, %v2013_v36 }
 0x2f7   : > { %7950 = vst [vmem:[#allocation191_spill] sm:$0xff] %v5748_v62  ;;  %v2015_v62 = vmul.f32 %v5427_v60, %v2013_v36 }
 0x2f8   : > { %7951 = vst [vmem:[#allocation192_spill] sm:$0xff] %v5751_v51 }
 0x2fb   : > { %1994 = vrot.lane.b32.xlu1 %v1989_v31, %s7729_s26  ;;  %1992 = vrot.lane.b32.xlu0 %v1988_v23, %s7729_s26  ;;  %v2026_v31 = vstv %s4258_s29  ;;  %s4261_s29 = sld [smem:[#allocation2 + $0xa5]]  ;;  %s7987_s26 = smov 80  }
 0x2fc   : > { %2005 = vrot.lane.b32.xlu2 %v2001_v14, %s7725_s16  ;;  %v2027_v0 = vmul.f32 %v5433_v38, %v2026_v31 }
 0x2fd   : > { %v5757_v6 = vpop.permute.xlu1 %1721  ;;  %v5760_v18 = vpop.permute.xlu0 %1719 }
 0x2fe   : > { %7952 = vst [vmem:[#allocation193_spill] sm:$0xff] %v5757_v6  ;;  %v5763_v51 = vpop.permute.xlu2 %1786  ;;  %v2039_v6 = vstv %s4259_s23  ;;  %s4262_s23 = sld [smem:[#allocation2 + $0x125]] }
 0x2ff   : > { %7953 = vst [vmem:[#allocation194_spill] sm:$0xff] %v5760_v18  ;;  %v2028_v18 = vmul.f32 %v5427_v60, %v2026_v31  ;;  %v2040_v36 = vmul.f32 %v5433_v38, %v2039_v6  ;;  %v2041_v31 = vmul.f32 %v5427_v60, %v2039_v6 }
 0x300   : > { %7954 = vst [vmem:[#allocation195_spill] sm:$0xff] %v5763_v51 }
 0x303   : > { %2018 = vrot.lane.b32.xlu1 %v2014_v63, %s7725_s16  ;;  %2007 = vrot.lane.b32.xlu0 %v2002_v33, %s7725_s16  ;;  %v2052_v63 = vstv %s4260_s15  ;;  %s4263_s15 = sld [smem:[#allocation2 + $0x1a5]] }
 0x304   : > { %2020 = vrot.lane.b32.xlu2 %v2015_v62, %s7725_s16 }
 0x305   : > { %v5769_v23 = vpop.permute.xlu1 %1745  ;;  %v5772_v14 = vpop.permute.xlu0 %1734 }
 0x306   : > { %7955 = vst [vmem:[#allocation196_spill] sm:$0xff] %v5769_v23  ;;  %v5775_v51 = vpop.permute.xlu2 %1810  ;;  %v2054_v23 = vmul.f32 %v5427_v60, %v2052_v63 }
 0x307   : > { %7956 = vst [vmem:[#allocation197_spill] sm:$0xff] %v5772_v14  ;;  %v2053_v14 = vmul.f32 %v5433_v38, %v2052_v63 }
 0x308   : > { %7957 = vst [vmem:[#allocation198_spill] sm:$0xff] %v5775_v51 }
 0x30b   : > { %2033 = vrot.lane.b32.xlu1 %v2028_v18, %s7725_s16  ;;  %2031 = vrot.lane.b32.xlu0 %v2027_v0, %s7725_s16  ;;  %v2065_v18 = vstv %s4261_s29  ;;  %s4264_s29 = sld [smem:[#allocation2 + $0x26]] }
 0x30c   : > { %2044 = vrot.lane.b32.xlu2 %v2040_v36, %s7725_s16  ;;  %v2066_v6 = vmul.f32 %v5433_v38, %v2065_v18 }
 0x30d   : > { %v5781_v33 = vpop.permute.xlu1 %1760  ;;  %v5784_v62 = vpop.permute.xlu0 %1758 }
 0x30e   : > { %7958 = vst [vmem:[#allocation199_spill] sm:$0xff] %v5781_v33  ;;  %v5787_v51 = vpop.permute.xlu2 %1825  ;;  %v2078_v33 = vstv %s4262_s23  ;;  %s4265_s23 = sld [smem:[#allocation2 + $0xa6]] }
 0x30f   : > { %7959 = vst [vmem:[#allocation200_spill] sm:$0xff] %v5784_v62  ;;  %v2067_v62 = vmul.f32 %v5427_v60, %v2065_v18  ;;  %v2079_v63 = vmul.f32 %v5433_v38, %v2078_v33  ;;  %v2080_v18 = vmul.f32 %v5427_v60, %v2078_v33 }
 0x310   : > { %7960 = vst [vmem:[#allocation201_spill] sm:$0xff] %v5787_v51 }
 0x313   : > { %2057 = vrot.lane.b32.xlu1 %v2053_v14, %s7727_s3  ;;  %2046 = vrot.lane.b32.xlu0 %v2041_v31, %s7725_s16  ;;  %v2091_v14 = vstv %s4263_s15  ;;  %s4266_s15 = sld [smem:[#allocation2 + $0x126]]  ;;  %s7970_s16 = smov 93  }
 0x314   : > { %2059 = vrot.lane.b32.xlu2 %v2054_v23, %s7727_s3 }
 0x315   : > { %v5793_v0 = vpop.permute.xlu1 %1784  ;;  %v5796_v36 = vpop.permute.xlu0 %1773 }
 0x316   : > { %7961 = vst [vmem:[#allocation202_spill] sm:$0xff] %v5793_v0  ;;  %v5799_v51 = vpop.permute.xlu2 %1849  ;;  %v2092_v0 = vmul.f32 %v5433_v38, %v2091_v14 }
 0x317   : > { %7962 = vst [vmem:[#allocation203_spill] sm:$0xff] %v5796_v36  ;;  %v2093_v36 = vmul.f32 %v5427_v60, %v2091_v14 }
 0x318   : > { %7963 = vst [vmem:[#allocation204_spill] sm:$0xff] %v5799_v51 }
 0x31b   : > { %2072 = vrot.lane.b32.xlu1 %v2067_v62, %s7727_s3  ;;  %2070 = vrot.lane.b32.xlu0 %v2066_v6, %s7727_s3  ;;  %v2104_v62 = vstv %s4264_s29  ;;  %s4267_s29 = sld [smem:[#allocation2 + $0x1a6]] }
 0x31c   : > { %2083 = vrot.lane.b32.xlu2 %v2079_v63, %s7727_s3  ;;  %v2105_v33 = vmul.f32 %v5433_v38, %v2104_v62 }
 0x31d   : > { %v5805_v31 = vpop.permute.xlu1 %1799  ;;  %v5808_v23 = vpop.permute.xlu0 %1797 }
 0x31e   : > { %7964 = vst [vmem:[#allocation205_spill] sm:$0xff] %v5805_v31  ;;  %v5811_v51 = vpop.permute.xlu2 %1864  ;;  %v2117_v31 = vstv %s4265_s23  ;;  %s4268_s23 = sld [smem:[#allocation2 + $0x27]] }
 0x31f   : > { %7965 = vst [vmem:[#allocation206_spill] sm:$0xff] %v5808_v23  ;;  %v2106_v23 = vmul.f32 %v5427_v60, %v2104_v62  ;;  %v2118_v14 = vmul.f32 %v5433_v38, %v2117_v31  ;;  %v2119_v62 = vmul.f32 %v5427_v60, %v2117_v31 }
 0x320   : > { %7966 = vst [vmem:[#allocation207_spill] sm:$0xff] %v5811_v51 }
 0x323   : > { %2096 = vrot.lane.b32.xlu1 %v2092_v0, %s7727_s3  ;;  %2085 = vrot.lane.b32.xlu0 %v2080_v18, %s7727_s3  ;;  %v2130_v0 = vstv %s4266_s15  ;;  %s4269_s15 = sld [smem:[#allocation2 + $0xa7]] }
 0x324   : > { %2098 = vrot.lane.b32.xlu2 %v2093_v36, %s7727_s3  ;;  %s7978_s3 = smov 92  }
 0x325   : > { %v5817_v6 = vpop.permute.xlu1 %1823  ;;  %v5820_v63 = vpop.permute.xlu0 %1812 }
 0x326   : > { %7967 = vst [vmem:[#allocation208_spill] sm:$0xff] %v5817_v6  ;;  %v5823_v51 = vpop.permute.xlu2 %1888  ;;  %v2132_v6 = vmul.f32 %v5427_v60, %v2130_v0 }
 0x327   : > { %7968 = vst [vmem:[#allocation209_spill] sm:$0xff] %v5820_v63  ;;  %v2131_v63 = vmul.f32 %v5433_v38, %v2130_v0 }
 0x328   : > { %7969 = vst [vmem:[#allocation210_spill] sm:$0xff] %v5823_v51 }
 0x32b   : > { %2111 = vrot.lane.b32.xlu1 %v2106_v23, %s7970_s16  ;;  %2109 = vrot.lane.b32.xlu0 %v2105_v33, %s7970_s16  ;;  %v2143_v23 = vstv %s4267_s29  ;;  %s4270_s29 = sld [smem:[#allocation2 + $0x127]] }
 0x32c   : > { %2122 = vrot.lane.b32.xlu2 %v2118_v14, %s7970_s16  ;;  %v2144_v31 = vmul.f32 %v5433_v38, %v2143_v23 }
 0x32d   : > { %v5829_v18 = vpop.permute.xlu1 %1838  ;;  %v5832_v36 = vpop.permute.xlu0 %1836 }
 0x32e   : > { %7971 = vst [vmem:[#allocation211_spill] sm:$0xff] %v5829_v18  ;;  %v5835_v51 = vpop.permute.xlu2 %1903  ;;  %v2156_v18 = vstv %s4268_s23  ;;  %s4271_s23 = sld [smem:[#allocation2 + $0x1a7]] }
 0x32f   : > { %7972 = vst [vmem:[#allocation212_spill] sm:$0xff] %v5832_v36  ;;  %v2145_v36 = vmul.f32 %v5427_v60, %v2143_v23  ;;  %v2157_v0 = vmul.f32 %v5433_v38, %v2156_v18  ;;  %v2158_v23 = vmul.f32 %v5427_v60, %v2156_v18 }
 0x330   : > { %7973 = vst [vmem:[#allocation213_spill] sm:$0xff] %v5835_v51 }
 0x333   : > { %2135 = vrot.lane.b32.xlu1 %v2131_v63, %s7970_s16  ;;  %2124 = vrot.lane.b32.xlu0 %v2119_v62, %s7970_s16  ;;  %v2169_v63 = vstv %s4269_s15  ;;  %s4272_s15 = sld [smem:[#allocation2 + $0x28]] }
 0x334   : > { %2137 = vrot.lane.b32.xlu2 %v2132_v6, %s7970_s16 }
 0x335   : > { %v5841_v33 = vpop.permute.xlu1 %1862  ;;  %v5844_v14 = vpop.permute.xlu0 %1851 }
 0x336   : > { %7974 = vst [vmem:[#allocation214_spill] sm:$0xff] %v5841_v33  ;;  %v5847_v51 = vpop.permute.xlu2 %1927  ;;  %v2170_v33 = vmul.f32 %v5433_v38, %v2169_v63 }
 0x337   : > { %7975 = vst [vmem:[#allocation215_spill] sm:$0xff] %v5844_v14  ;;  %v2171_v14 = vmul.f32 %v5427_v60, %v2169_v63 }
 0x338   : > { %7976 = vst [vmem:[#allocation216_spill] sm:$0xff] %v5847_v51 }
 0x33b   : > { %2150 = vrot.lane.b32.xlu1 %v2145_v36, %s7970_s16  ;;  %2148 = vrot.lane.b32.xlu0 %v2144_v31, %s7970_s16  ;;  %v2182_v36 = vstv %s4270_s29  ;;  %s4273_s29 = sld [smem:[#allocation2 + $0xa8]] }
 0x33c   : > { %2161 = vrot.lane.b32.xlu2 %v2157_v0, %s7978_s3  ;;  %v2183_v18 = vmul.f32 %v5433_v38, %v2182_v36 }
 0x33d   : > { %v5853_v62 = vpop.permute.xlu1 %1877  ;;  %v5856_v6 = vpop.permute.xlu0 %1875 }
 0x33e   : > { %7977 = vst [vmem:[#allocation217_spill] sm:$0xff] %v5853_v62  ;;  %v5859_v51 = vpop.permute.xlu2 %1942  ;;  %v2195_v62 = vstv %s4271_s23  ;;  %s4274_s23 = sld [smem:[#allocation2 + $0x128]] }
 0x33f   : > { %7979 = vst [vmem:[#allocation218_spill] sm:$0xff] %v5856_v6  ;;  %v2184_v6 = vmul.f32 %v5427_v60, %v2182_v36  ;;  %v2196_v63 = vmul.f32 %v5433_v38, %v2195_v62  ;;  %v2197_v36 = vmul.f32 %v5427_v60, %v2195_v62 }
 0x340   : > { %7980 = vst [vmem:[#allocation219_spill] sm:$0xff] %v5859_v51 }
 0x343   : > { %2174 = vrot.lane.b32.xlu1 %v2170_v33, %s7978_s3  ;;  %2163 = vrot.lane.b32.xlu0 %v2158_v23, %s7978_s3  ;;  %v2208_v33 = vstv %s4272_s15  ;;  %s4275_s15 = sld [smem:[#allocation2 + $0x1a8]] }
 0x344   : > { %2176 = vrot.lane.b32.xlu2 %v2171_v14, %s7978_s3 }
 0x345   : > { %v5865_v31 = vpop.permute.xlu1 %1901  ;;  %v5868_v0 = vpop.permute.xlu0 %1890 }
 0x346   : > { %7981 = vst [vmem:[#allocation220_spill] sm:$0xff] %v5865_v31  ;;  %v5871_v51 = vpop.permute.xlu2 %1966  ;;  %v2210_v31 = vmul.f32 %v5427_v60, %v2208_v33 }
 0x347   : > { %7982 = vst [vmem:[#allocation221_spill] sm:$0xff] %v5868_v0  ;;  %v2209_v0 = vmul.f32 %v5433_v38, %v2208_v33 }
 0x348   : > { %7983 = vst [vmem:[#allocation222_spill] sm:$0xff] %v5871_v51 }
 0x34b   : > { %2189 = vrot.lane.b32.xlu1 %v2184_v6, %s7978_s3  ;;  %2187 = vrot.lane.b32.xlu0 %v2183_v18, %s7978_s3  ;;  %v2221_v6 = vstv %s4273_s29  ;;  %s4276_s29 = sld [smem:[#allocation2 + $0x29]] }
 0x34c   : > { %2200 = vrot.lane.b32.xlu2 %v2196_v63, %s7978_s3  ;;  %v2222_v62 = vmul.f32 %v5433_v38, %v2221_v6 }
 0x34d   : > { %v5877_v23 = vpop.permute.xlu1 %1916  ;;  %v5880_v14 = vpop.permute.xlu0 %1914 }
 0x34e   : > { %7984 = vst [vmem:[#allocation223_spill] sm:$0xff] %v5877_v23  ;;  %v5883_v51 = vpop.permute.xlu2 %1981  ;;  %v2234_v23 = vstv %s4274_s23  ;;  %s4277_s23 = sld [smem:[#allocation2 + $0xa9]] }
 0x34f   : > { %7985 = vst [vmem:[#allocation224_spill] sm:$0xff] %v5880_v14  ;;  %v2223_v14 = vmul.f32 %v5427_v60, %v2221_v6  ;;  %v2235_v33 = vmul.f32 %v5433_v38, %v2234_v23  ;;  %v2236_v6 = vmul.f32 %v5427_v60, %v2234_v23 }
 0x350   : > { %7986 = vst [vmem:[#allocation225_spill] sm:$0xff] %v5883_v51 }
 0x353   : > { %2213 = vrot.lane.b32.xlu1 %v2209_v0, %s7987_s26  ;;  %2202 = vrot.lane.b32.xlu0 %v2197_v36, %s7978_s3  ;;  %v2247_v0 = vstv %s4275_s15  ;;  %s4278_s15 = sld [smem:[#allocation2 + $0x129]] }
 0x354   : > { %2215 = vrot.lane.b32.xlu2 %v2210_v31, %s7987_s26 }
 0x355   : > { %v5889_v18 = vpop.permute.xlu1 %1940  ;;  %v5892_v63 = vpop.permute.xlu0 %1929 }
 0x356   : > { %7988 = vst [vmem:[#allocation226_spill] sm:$0xff] %v5889_v18  ;;  %v5895_v51 = vpop.permute.xlu2 %2005  ;;  %v2248_v18 = vmul.f32 %v5433_v38, %v2247_v0 }
 0x357   : > { %7989 = vst [vmem:[#allocation227_spill] sm:$0xff] %v5892_v63  ;;  %v2249_v63 = vmul.f32 %v5427_v60, %v2247_v0 }
 0x358   : > { %7990 = vst [vmem:[#allocation228_spill] sm:$0xff] %v5895_v51 }
 0x35b   : > { %2228 = vrot.lane.b32.xlu1 %v2223_v14, %s7987_s26  ;;  %2226 = vrot.lane.b32.xlu0 %v2222_v62, %s7987_s26  ;;  %v2260_v14 = vstv %s4276_s29  ;;  %s4279_s29 = sld [smem:[#allocation2 + $0x1a9]] }
 0x35c   : > { %2239 = vrot.lane.b32.xlu2 %v2235_v33, %s7987_s26  ;;  %v2261_v23 = vmul.f32 %v5433_v38, %v2260_v14 }
 0x35d   : > { %v5901_v36 = vpop.permute.xlu1 %1955  ;;  %v5904_v31 = vpop.permute.xlu0 %1953 }
 0x35e   : > { %7991 = vst [vmem:[#allocation229_spill] sm:$0xff] %v5901_v36  ;;  %v5907_v51 = vpop.permute.xlu2 %2020  ;;  %v2273_v36 = vstv %s4277_s23  ;;  %s4280_s23 = sld [smem:[#allocation2 + $0x2a]] }
 0x35f   : > { %7992 = vst [vmem:[#allocation230_spill] sm:$0xff] %v5904_v31  ;;  %v2262_v31 = vmul.f32 %v5427_v60, %v2260_v14  ;;  %v2274_v0 = vmul.f32 %v5433_v38, %v2273_v36  ;;  %v2275_v14 = vmul.f32 %v5427_v60, %v2273_v36 }
 0x360   : > { %7993 = vst [vmem:[#allocation231_spill] sm:$0xff] %v5907_v51 }
 0x363   : > { %2252 = vrot.lane.b32.xlu1 %v2248_v18, %s7987_s26  ;;  %2241 = vrot.lane.b32.xlu0 %v2236_v6, %s7987_s26  ;;  %v2286_v18 = vstv %s4278_s15  ;;  %s4281_s15 = sld [smem:[#allocation2 + $0xaa]] }
 0x364   : > { %2254 = vrot.lane.b32.xlu2 %v2249_v63, %s7987_s26 }
 0x365   : > { %v5913_v62 = vpop.permute.xlu1 %1979  ;;  %v5916_v33 = vpop.permute.xlu0 %1968 }
 0x366   : > { %7994 = vst [vmem:[#allocation232_spill] sm:$0xff] %v5913_v62  ;;  %v5919_v51 = vpop.permute.xlu2 %2044  ;;  %v2299_v62 = vstv %s4279_s29  ;;  %s4282_s29 = sld [smem:[#allocation2 + $0x12a]] }
 0x367   : > { %7995 = vst [vmem:[#allocation233_spill] sm:$0xff] %v5916_v33 }
 0x368   : > { %7996 = vst [vmem:[#allocation234_spill] sm:$0xff] %v5919_v51  ;;  %v2287_v51 = vmul.f32 %v5433_v38, %v2286_v18 }
 0x36b   : > { %2267 = vrot.lane.b32.xlu1 %v2262_v31, %s7997_s5  ;;  %2265 = vrot.lane.b32.xlu0 %v2261_v23, %s7997_s5  ;;  %v2288_v31 = vmul.f32 %v5427_v60, %v2286_v18  ;;  %v2300_v60 = vmul.f32 %v5433_v38, %v2299_v62 }
 0x36c   : > { %2278 = vrot.lane.b32.xlu2 %v2274_v0, %s7997_s5 }
 0x36d   : > { %v5925_v6 = vpop.permute.xlu1 %1994  ;;  %v5928_v63 = vpop.permute.xlu0 %1992 }
 0x36e   : > { %7998 = vst [vmem:[#allocation235_spill] sm:$0xff] %v5925_v6  ;;  %v5931_v33 = vpop.permute.xlu2 %2059 }
 0x36f   : > { %7999 = vst [vmem:[#allocation236_spill] sm:$0xff] %v5928_v63  ;;  %v5943_v63 = vld [vmem:[%s4730_s6 + $0x11] sm:$0xff] }
 0x370   : > { %8000 = vst [vmem:[#allocation237_spill] sm:$0xff] %v5931_v33  ;;  %v2301_v36 = vmul.f32 %v5943_v63, %v2299_v62 }
 0x373   : > { %2291 = vrot.lane.b32.xlu1 %v2287_v51, %s7997_s5  ;;  %2280 = vrot.lane.b32.xlu0 %v2275_v14, %s7997_s5  ;;  %v2312_v51 = vstv %s4280_s23  ;;  %v2325_v14 = vstv %s4281_s15  ;;  %s4283_s23 = sld [smem:[#allocation2 + $0x1aa]] }
 0x374   : > { %2293 = vrot.lane.b32.xlu2 %v2288_v31, %s7997_s5  ;;  %v2313_v18 = vmul.f32 %v5433_v38, %v2312_v51  ;;  %v2314_v38 = vmul.f32 %v5943_v63, %v2312_v51  ;;  %s4284_s15 = sld [smem:[#allocation2 + $0x2b]] }
 0x375   : > { %v5937_v23 = vpop.permute.xlu1 %2018  ;;  %v5940_v0 = vpop.permute.xlu0 %2007 }
 0x376   : > { %8001 = vst [vmem:[#allocation238_spill] sm:$0xff] %v5937_v23  ;;  %v5946_v33 = vpop.permute.xlu2 %2083 }
 0x377   : > { %8002 = vst [vmem:[#allocation239_spill] sm:$0xff] %v5940_v0  ;;  %v5958_v0 = vld [vmem:[%s4730_s6 + $0x10] sm:$0xff] }
 0x378   : > { %8003 = vst [vmem:[#allocation240_spill] sm:$0xff] %v5946_v33  ;;  %v2326_v33 = vmul.f32 %v5958_v0, %v2325_v14 }
 0x37b   : > { %2306 = vrot.lane.b32.xlu1 %v2301_v36, %s7997_s5  ;;  %2304 = vrot.lane.b32.xlu0 %v2300_v60, %s7997_s5  ;;  %v2327_v36 = vmul.f32 %v5943_v63, %v2325_v14  ;;  %v2338_v60 = vstv %s4282_s29  ;;  %s4285_s29 = sld [smem:[#allocation2 + $0xab]] }
 0x37c   : > { %2317 = vrot.lane.b32.xlu2 %v2313_v18, %s8005_s25  ;;  %v2339_v51 = vmul.f32 %v5958_v0, %v2338_v60 }
 0x37d   : > { %v5952_v31 = vpop.permute.xlu1 %2033  ;;  %v5955_v23 = vpop.permute.xlu0 %2031 }
 0x37e   : > { %8004 = vst [vmem:[#allocation241_spill] sm:$0xff] %v5952_v31  ;;  %v5961_v62 = vpop.permute.xlu2 %2098  ;;  %v2351_v31 = vstv %s4283_s23  ;;  %s4286_s23 = sld [smem:[#allocation2 + $0x12b]] }
 0x37f   : > { %8006 = vst [vmem:[#allocation242_spill] sm:$0xff] %v5955_v23  ;;  %v2340_v23 = vmul.f32 %v5943_v63, %v2338_v60  ;;  %v2352_v14 = vmul.f32 %v5958_v0, %v2351_v31  ;;  %v2353_v60 = vmul.f32 %v5943_v63, %v2351_v31 }
 0x380   : > { %8007 = vst [vmem:[#allocation243_spill] sm:$0xff] %v5961_v62 }
 0x383   : > { %2330 = vrot.lane.b32.xlu1 %v2326_v33, %s8005_s25  ;;  %2319 = vrot.lane.b32.xlu0 %v2314_v38, %s8005_s25  ;;  %v2364_v33 = vstv %s4284_s15  ;;  %s4287_s15 = sld [smem:[#allocation2 + $0x1ab]] }
 0x384   : > { %2332 = vrot.lane.b32.xlu2 %v2327_v36, %s8005_s25 }
 0x385   : > { %v5967_v18 = vpop.permute.xlu1 %2057  ;;  %v5970_v6 = vpop.permute.xlu0 %2046 }
 0x386   : > { %8008 = vst [vmem:[#allocation244_spill] sm:$0xff] %v5967_v18  ;;  %v5973_v62 = vpop.permute.xlu2 %2122  ;;  %v2365_v18 = vmul.f32 %v5958_v0, %v2364_v33 }
 0x387   : > { %8009 = vst [vmem:[#allocation245_spill] sm:$0xff] %v5970_v6  ;;  %v2366_v6 = vmul.f32 %v5943_v63, %v2364_v33 }
 0x388   : > { %8010 = vst [vmem:[#allocation246_spill] sm:$0xff] %v5973_v62 }
 0x38b   : > { %2345 = vrot.lane.b32.xlu1 %v2340_v23, %s8005_s25  ;;  %2343 = vrot.lane.b32.xlu0 %v2339_v51, %s8005_s25  ;;  %v2377_v23 = vstv %s4285_s29  ;;  %s4288_s29 = sld [smem:[#allocation2 + $0x2c]] }
 0x38c   : > { %2356 = vrot.lane.b32.xlu2 %v2352_v14, %s8005_s25  ;;  %v2378_v31 = vmul.f32 %v5958_v0, %v2377_v23 }
 0x38d   : > { %v5979_v38 = vpop.permute.xlu1 %2072  ;;  %v5982_v36 = vpop.permute.xlu0 %2070 }
 0x38e   : > { %8011 = vst [vmem:[#allocation247_spill] sm:$0xff] %v5979_v38  ;;  %v5985_v62 = vpop.permute.xlu2 %2137 }
 0x38f   : > { %8012 = vst [vmem:[#allocation248_spill] sm:$0xff] %v5982_v36  ;;  %v2379_v36 = vmul.f32 %v5943_v63, %v2377_v23 }
 0x390   : > { %8013 = vst [vmem:[#allocation249_spill] sm:$0xff] %v5985_v62  ;;  %v2390_v62 = vstv %s4286_s23  ;;  %s4289_s23 = sld [smem:[#allocation2 + $0xac]] }
 0x391   : > { %v2391_v33 = vmul.f32 %v5958_v0, %v2390_v62  ;;  %v2392_v23 = vmul.f32 %v5943_v63, %v2390_v62 }
 0x393   : > { %2369 = vrot.lane.b32.xlu1 %v2365_v18, %s8014_s8  ;;  %2358 = vrot.lane.b32.xlu0 %v2353_v60, %s8005_s25  ;;  %v2403_v18 = vstv %s4287_s15  ;;  %s4290_s15 = sld [smem:[#allocation2 + $0x12c]] }
 0x394   : > { %2371 = vrot.lane.b32.xlu2 %v2366_v6, %s8014_s8 }
 0x395   : > { %v5991_v51 = vpop.permute.xlu1 %2096  ;;  %v5994_v14 = vpop.permute.xlu0 %2085 }
 0x396   : > { %8015 = vst [vmem:[#allocation250_spill] sm:$0xff] %v5991_v51  ;;  %v5997_v38 = vpop.permute.xlu2 %2161  ;;  %v2404_v51 = vmul.f32 %v5958_v0, %v2403_v18 }
 0x397   : > { %8016 = vst [vmem:[#allocation251_spill] sm:$0xff] %v5994_v14  ;;  %v2405_v14 = vmul.f32 %v5943_v63, %v2403_v18 }
 0x398   : > { %8017 = vst [vmem:[#allocation252_spill] sm:$0xff] %v5997_v38 }
 0x39b   : > { %2384 = vrot.lane.b32.xlu1 %v2379_v36, %s8014_s8  ;;  %2382 = vrot.lane.b32.xlu0 %v2378_v31, %s8014_s8  ;;  %v2416_v36 = vstv %s4288_s29  ;;  %s4291_s29 = sld [smem:[#allocation2 + $0x1ac]] }
 0x39c   : > { %2395 = vrot.lane.b32.xlu2 %v2391_v33, %s8014_s8  ;;  %v2417_v62 = vmul.f32 %v5958_v0, %v2416_v36 }
 0x39d   : > { %v6003_v60 = vpop.permute.xlu1 %2111  ;;  %v6006_v6 = vpop.permute.xlu0 %2109 }
 0x39e   : > { %8018 = vst [vmem:[#allocation253_spill] sm:$0xff] %v6003_v60  ;;  %v6009_v38 = vpop.permute.xlu2 %2176  ;;  %v2429_v60 = vstv %s4289_s23  ;;  %s4292_s23 = sld [smem:[#allocation2 + $0x2d]] }
 0x39f   : > { %8019 = vst [vmem:[#allocation254_spill] sm:$0xff] %v6006_v6  ;;  %v2418_v6 = vmul.f32 %v5943_v63, %v2416_v36  ;;  %v2430_v18 = vmul.f32 %v5958_v0, %v2429_v60  ;;  %v2431_v36 = vmul.f32 %v5943_v63, %v2429_v60 }
 0x3a0   : > { %8020 = vst [vmem:[#allocation255_spill] sm:$0xff] %v6009_v38 }
 0x3a3   : > { %2408 = vrot.lane.b32.xlu1 %v2404_v51, %s8014_s8  ;;  %2397 = vrot.lane.b32.xlu0 %v2392_v23, %s8014_s8  ;;  %v2442_v51 = vstv %s4290_s15  ;;  %s4293_s15 = sld [smem:[#allocation2 + $0xad]] }
 0x3a4   : > { %2410 = vrot.lane.b32.xlu2 %v2405_v14, %s8014_s8 }
 0x3a5   : > { %v6015_v31 = vpop.permute.xlu1 %2135  ;;  %v6018_v33 = vpop.permute.xlu0 %2124 }
 0x3a6   : > { %8021 = vst [vmem:[#allocation256_spill] sm:$0xff] %v6015_v31  ;;  %v6021_v38 = vpop.permute.xlu2 %2200  ;;  %v2444_v31 = vmul.f32 %v5943_v63, %v2442_v51 }
 0x3a7   : > { %8022 = vst [vmem:[#allocation257_spill] sm:$0xff] %v6018_v33  ;;  %v2443_v33 = vmul.f32 %v5958_v0, %v2442_v51 }
 0x3a8   : > { %8023 = vst [vmem:[#allocation258_spill] sm:$0xff] %v6021_v38 }
 0x3ab   : > { %2423 = vrot.lane.b32.xlu1 %v2418_v6, %s8024_s28  ;;  %2421 = vrot.lane.b32.xlu0 %v2417_v62, %s8024_s28  ;;  %v2455_v6 = vstv %s4291_s29  ;;  %s4294_s29 = sld [smem:[#allocation2 + $0x12d]] }
 0x3ac   : > { %2434 = vrot.lane.b32.xlu2 %v2430_v18, %s8024_s28  ;;  %v2456_v60 = vmul.f32 %v5958_v0, %v2455_v6 }
 0x3ad   : > { %v6027_v23 = vpop.permute.xlu1 %2150  ;;  %v6030_v14 = vpop.permute.xlu0 %2148 }
 0x3ae   : > { %8025 = vst [vmem:[#allocation259_spill] sm:$0xff] %v6027_v23  ;;  %v6033_v38 = vpop.permute.xlu2 %2215  ;;  %v2468_v23 = vstv %s4292_s23  ;;  %s4295_s23 = sld [smem:[#allocation2 + $0x1ad]] }
 0x3af   : > { %8026 = vst [vmem:[#allocation260_spill] sm:$0xff] %v6030_v14  ;;  %v2457_v14 = vmul.f32 %v5943_v63, %v2455_v6  ;;  %v2469_v51 = vmul.f32 %v5958_v0, %v2468_v23  ;;  %v2470_v6 = vmul.f32 %v5943_v63, %v2468_v23 }
 0x3b0   : > { %8027 = vst [vmem:[#allocation261_spill] sm:$0xff] %v6033_v38 }
 0x3b3   : > { %2447 = vrot.lane.b32.xlu1 %v2443_v33, %s8024_s28  ;;  %2436 = vrot.lane.b32.xlu0 %v2431_v36, %s8024_s28  ;;  %v2481_v33 = vstv %s4293_s15  ;;  %s4296_s15 = sld [smem:[#allocation2 + $0x2e]] }
 0x3b4   : > { %2449 = vrot.lane.b32.xlu2 %v2444_v31, %s8024_s28 }
 0x3b5   : > { %v6039_v62 = vpop.permute.xlu1 %2174  ;;  %v6042_v18 = vpop.permute.xlu0 %2163 }
 0x3b6   : > { %8028 = vst [vmem:[#allocation262_spill] sm:$0xff] %v6039_v62  ;;  %v6045_v38 = vpop.permute.xlu2 %2239  ;;  %v2482_v62 = vmul.f32 %v5958_v0, %v2481_v33 }
 0x3b7   : > { %8029 = vst [vmem:[#allocation263_spill] sm:$0xff] %v6042_v18 }
 0x3b8   : > { %8030 = vst [vmem:[#allocation264_spill] sm:$0xff] %v6045_v38  ;;  %v2483_v38 = vmul.f32 %v5943_v63, %v2481_v33 }
 0x3bb   : > { %2462 = vrot.lane.b32.xlu1 %v2457_v14, %s8024_s28  ;;  %2460 = vrot.lane.b32.xlu0 %v2456_v60, %s8024_s28  ;;  %v2494_v14 = vstv %s4294_s29  ;;  %s4297_s29 = sld [smem:[#allocation2 + $0xae]] }
 0x3bc   : > { %2473 = vrot.lane.b32.xlu2 %v2469_v51, %s8032_s18  ;;  %v2495_v23 = vmul.f32 %v5958_v0, %v2494_v14 }
 0x3bd   : > { %v6051_v36 = vpop.permute.xlu1 %2189  ;;  %v6054_v31 = vpop.permute.xlu0 %2187 }
 0x3be   : > { %8031 = vst [vmem:[#allocation265_spill] sm:$0xff] %v6051_v36  ;;  %v6057_v18 = vpop.permute.xlu2 %2254  ;;  %v2507_v36 = vstv %s4295_s23  ;;  %s4298_s23 = sld [smem:[#allocation2 + $0x12e]] }
 0x3bf   : > { %8033 = vst [vmem:[#allocation266_spill] sm:$0xff] %v6054_v31  ;;  %v2496_v31 = vmul.f32 %v5943_v63, %v2494_v14  ;;  %v2508_v33 = vmul.f32 %v5958_v0, %v2507_v36  ;;  %v2509_v14 = vmul.f32 %v5943_v63, %v2507_v36 }
 0x3c0   : > { %8034 = vst [vmem:[#allocation267_spill] sm:$0xff] %v6057_v18 }
 0x3c3   : > { %2486 = vrot.lane.b32.xlu1 %v2482_v62, %s8032_s18  ;;  %2475 = vrot.lane.b32.xlu0 %v2470_v6, %s8032_s18  ;;  %v2520_v62 = vstv %s4296_s15  ;;  %s4299_s15 = sld [smem:[#allocation2 + $0x1ae]] }
 0x3c4   : > { %2488 = vrot.lane.b32.xlu2 %v2483_v38, %s8032_s18 }
 0x3c5   : > { %v6063_v60 = vpop.permute.xlu1 %2213  ;;  %v6066_v51 = vpop.permute.xlu0 %2202 }
 0x3c6   : > { %8035 = vst [vmem:[#allocation268_spill] sm:$0xff] %v6063_v60  ;;  %v6069_v18 = vpop.permute.xlu2 %2278  ;;  %v2522_v60 = vmul.f32 %v5943_v63, %v2520_v62 }
 0x3c7   : > { %8036 = vst [vmem:[#allocation269_spill] sm:$0xff] %v6066_v51  ;;  %v2521_v51 = vmul.f32 %v5958_v0, %v2520_v62 }
 0x3c8   : > { %8037 = vst [vmem:[#allocation270_spill] sm:$0xff] %v6069_v18 }
 0x3cb   : > { %2501 = vrot.lane.b32.xlu1 %v2496_v31, %s8032_s18  ;;  %2499 = vrot.lane.b32.xlu0 %v2495_v23, %s8032_s18  ;;  %v2533_v31 = vstv %s4297_s29  ;;  %s4300_s29 = sld [smem:[#allocation2 + $0x2f]] }
 0x3cc   : > { %2512 = vrot.lane.b32.xlu2 %v2508_v33, %s8032_s18  ;;  %v2534_v36 = vmul.f32 %v5958_v0, %v2533_v31 }
 0x3cd   : > { %v6075_v6 = vpop.permute.xlu1 %2228  ;;  %v6078_v38 = vpop.permute.xlu0 %2226 }
 0x3ce   : > { %8038 = vst [vmem:[#allocation271_spill] sm:$0xff] %v6075_v6  ;;  %v6081_v18 = vpop.permute.xlu2 %2293 }
 0x3cf   : > { %8039 = vst [vmem:[#allocation272_spill] sm:$0xff] %v6078_v38  ;;  %v2535_v38 = vmul.f32 %v5943_v63, %v2533_v31 }
 0x3d0   : > { %8040 = vst [vmem:[#allocation273_spill] sm:$0xff] %v6081_v18  ;;  %v2546_v18 = vstv %s4298_s23  ;;  %s4301_s23 = sld [smem:[#allocation2 + $0xaf]] }
 0x3d1   : > { %v2547_v62 = vmul.f32 %v5958_v0, %v2546_v18  ;;  %v2548_v31 = vmul.f32 %v5943_v63, %v2546_v18 }
 0x3d3   : > { %2525 = vrot.lane.b32.xlu1 %v2521_v51, %s8041_s4  ;;  %2514 = vrot.lane.b32.xlu0 %v2509_v14, %s8032_s18  ;;  %v2559_v51 = vstv %s4299_s15  ;;  %s4302_s15 = sld [smem:[#allocation2 + $0x12f]] }
 0x3d4   : > { %2527 = vrot.lane.b32.xlu2 %v2522_v60, %s8041_s4 }
 0x3d5   : > { %v6087_v23 = vpop.permute.xlu1 %2252  ;;  %v6090_v33 = vpop.permute.xlu0 %2241 }
 0x3d6   : > { %8042 = vst [vmem:[#allocation274_spill] sm:$0xff] %v6087_v23  ;;  %v6093_v6 = vpop.permute.xlu2 %2317  ;;  %v2560_v23 = vmul.f32 %v5958_v0, %v2559_v51 }
 0x3d7   : > { %8043 = vst [vmem:[#allocation275_spill] sm:$0xff] %v6090_v33  ;;  %v2561_v33 = vmul.f32 %v5943_v63, %v2559_v51 }
 0x3d8   : > { %8044 = vst [vmem:[#allocation276_spill] sm:$0xff] %v6093_v6 }
 0x3db   : > { %2540 = vrot.lane.b32.xlu1 %v2535_v38, %s8041_s4  ;;  %2538 = vrot.lane.b32.xlu0 %v2534_v36, %s8041_s4  ;;  %v2572_v38 = vstv %s4300_s29  ;;  %s4303_s29 = sld [smem:[#allocation2 + $0x1af]] }
 0x3dc   : > { %2551 = vrot.lane.b32.xlu2 %v2547_v62, %s8041_s4  ;;  %v2573_v18 = vmul.f32 %v5958_v0, %v2572_v38 }
 0x3dd   : > { %v6099_v14 = vpop.permute.xlu1 %2267  ;;  %v6102_v60 = vpop.permute.xlu0 %2265 }
 0x3de   : > { %8045 = vst [vmem:[#allocation277_spill] sm:$0xff] %v6099_v14  ;;  %v6105_v6 = vpop.permute.xlu2 %2332  ;;  %v2585_v14 = vstv %s4301_s23  ;;  %s4304_s23 = sld [smem:[#allocation2 + $0x30]] }
 0x3df   : > { %8046 = vst [vmem:[#allocation278_spill] sm:$0xff] %v6102_v60  ;;  %v2574_v60 = vmul.f32 %v5943_v63, %v2572_v38  ;;  %v2586_v51 = vmul.f32 %v5958_v0, %v2585_v14  ;;  %v2587_v38 = vmul.f32 %v5943_v63, %v2585_v14 }
 0x3e0   : > { %8047 = vst [vmem:[#allocation279_spill] sm:$0xff] %v6105_v6 }
 0x3e3   : > { %2564 = vrot.lane.b32.xlu1 %v2560_v23, %s8041_s4  ;;  %2553 = vrot.lane.b32.xlu0 %v2548_v31, %s8041_s4  ;;  %v2598_v23 = vstv %s4302_s15  ;;  %s4305_s15 = sld [smem:[#allocation2 + $0xb0]] }
 0x3e4   : > { %2566 = vrot.lane.b32.xlu2 %v2561_v33, %s8041_s4 }
 0x3e5   : > { %v6111_v36 = vpop.permute.xlu1 %2291  ;;  %v6114_v62 = vpop.permute.xlu0 %2280 }
 0x3e6   : > { %8048 = vst [vmem:[#allocation280_spill] sm:$0xff] %v6111_v36  ;;  %v6117_v6 = vpop.permute.xlu2 %2356  ;;  %v2600_v36 = vmul.f32 %v5943_v63, %v2598_v23 }
 0x3e7   : > { %8049 = vst [vmem:[#allocation281_spill] sm:$0xff] %v6114_v62  ;;  %v2599_v62 = vmul.f32 %v5958_v0, %v2598_v23 }
 0x3e8   : > { %8050 = vst [vmem:[#allocation282_spill] sm:$0xff] %v6117_v6 }
 0x3eb   : > { %2579 = vrot.lane.b32.xlu1 %v2574_v60, %s8051_s27  ;;  %2577 = vrot.lane.b32.xlu0 %v2573_v18, %s8051_s27  ;;  %v2611_v60 = vstv %s4303_s29  ;;  %s4306_s29 = sld [smem:[#allocation2 + $0x130]] }
 0x3ec   : > { %2590 = vrot.lane.b32.xlu2 %v2586_v51, %s8051_s27  ;;  %v2612_v14 = vmul.f32 %v5958_v0, %v2611_v60 }
 0x3ed   : > { %v6123_v31 = vpop.permute.xlu1 %2306  ;;  %v6126_v33 = vpop.permute.xlu0 %2304 }
 0x3ee   : > { %8052 = vst [vmem:[#allocation283_spill] sm:$0xff] %v6123_v31  ;;  %v6129_v6 = vpop.permute.xlu2 %2371  ;;  %v2624_v31 = vstv %s4304_s23  ;;  %s4307_s23 = sld [smem:[#allocation2 + $0x1b0]] }
 0x3ef   : > { %8053 = vst [vmem:[#allocation284_spill] sm:$0xff] %v6126_v33  ;;  %v2613_v33 = vmul.f32 %v5943_v63, %v2611_v60  ;;  %v2625_v23 = vmul.f32 %v5958_v0, %v2624_v31  ;;  %v2626_v60 = vmul.f32 %v5943_v63, %v2624_v31 }
 0x3f0   : > { %8054 = vst [vmem:[#allocation285_spill] sm:$0xff] %v6129_v6 }
 0x3f3   : > { %2603 = vrot.lane.b32.xlu1 %v2599_v62, %s8051_s27  ;;  %2592 = vrot.lane.b32.xlu0 %v2587_v38, %s8051_s27  ;;  %v2637_v62 = vstv %s4305_s15  ;;  %s4308_s15 = sld [smem:[#allocation2 + $0x31]] }
 0x3f4   : > { %2605 = vrot.lane.b32.xlu2 %v2600_v36, %s8051_s27 }
 0x3f5   : > { %v6135_v18 = vpop.permute.xlu1 %2330  ;;  %v6138_v51 = vpop.permute.xlu0 %2319 }
 0x3f6   : > { %8055 = vst [vmem:[#allocation286_spill] sm:$0xff] %v6135_v18  ;;  %v6141_v6 = vpop.permute.xlu2 %2395  ;;  %v2638_v18 = vmul.f32 %v5958_v0, %v2637_v62 }
 0x3f7   : > { %8056 = vst [vmem:[#allocation287_spill] sm:$0xff] %v6138_v51 }
 0x3f8   : > { %8057 = vst [vmem:[#allocation288_spill] sm:$0xff] %v6141_v6  ;;  %v2639_v6 = vmul.f32 %v5943_v63, %v2637_v62 }
 0x3fb   : > { %2618 = vrot.lane.b32.xlu1 %v2613_v33, %s8051_s27  ;;  %2616 = vrot.lane.b32.xlu0 %v2612_v14, %s8051_s27  ;;  %v2650_v33 = vstv %s4306_s29  ;;  %s4309_s29 = sld [smem:[#allocation2 + $0xb1]] }
 0x3fc   : > { %2629 = vrot.lane.b32.xlu2 %v2625_v23, %s7747_s30  ;;  %v2651_v31 = vmul.f32 %v5958_v0, %v2650_v33 }
 0x3fd   : > { %v6147_v38 = vpop.permute.xlu1 %2345  ;;  %v6150_v36 = vpop.permute.xlu0 %2343 }
 0x3fe   : > { %8058 = vst [vmem:[#allocation289_spill] sm:$0xff] %v6147_v38  ;;  %v6153_v51 = vpop.permute.xlu2 %2410  ;;  %v2663_v38 = vstv %s4307_s23  ;;  %s4310_s23 = sld [smem:[#allocation2 + $0x131]] }
 0x3ff   : > { %8059 = vst [vmem:[#allocation290_spill] sm:$0xff] %v6150_v36  ;;  %v2652_v36 = vmul.f32 %v5943_v63, %v2650_v33  ;;  %v2664_v62 = vmul.f32 %v5958_v0, %v2663_v38  ;;  %v2665_v33 = vmul.f32 %v5943_v63, %v2663_v38 }
 0x400   : > { %8060 = vst [vmem:[#allocation291_spill] sm:$0xff] %v6153_v51 }
 0x403   : > { %2642 = vrot.lane.b32.xlu1 %v2638_v18, %s7747_s30  ;;  %2631 = vrot.lane.b32.xlu0 %v2626_v60, %s7747_s30  ;;  %v2676_v18 = vstv %s4308_s15  ;;  %s4311_s15 = sld [smem:[#allocation2 + $0x1b1]] }
 0x404   : > { %2644 = vrot.lane.b32.xlu2 %v2639_v6, %s7747_s30 }
 0x405   : > { %v6159_v14 = vpop.permute.xlu1 %2369  ;;  %v6162_v23 = vpop.permute.xlu0 %2358 }
 0x406   : > { %8061 = vst [vmem:[#allocation292_spill] sm:$0xff] %v6159_v14  ;;  %v6165_v51 = vpop.permute.xlu2 %2434  ;;  %v2678_v14 = vmul.f32 %v5943_v63, %v2676_v18 }
 0x407   : > { %8062 = vst [vmem:[#allocation293_spill] sm:$0xff] %v6162_v23  ;;  %v2677_v23 = vmul.f32 %v5958_v0, %v2676_v18  ;;  %v2702_v18 = vstv %s4310_s23  ;;  %s4319_s23 = sld [smem:[#allocation2 + $0xb3]] }
 0x408   : > { %8063 = vst [vmem:[#allocation294_spill] sm:$0xff] %v6165_v51 }
 0x40b   : > { %2657 = vrot.lane.b32.xlu1 %v2652_v36, %s7747_s30  ;;  %2655 = vrot.lane.b32.xlu0 %v2651_v31, %s7747_s30  ;;  %v2689_v36 = vstv %s4309_s29  ;;  %s4318_s29 = sld [smem:[#allocation2 + $0x33]] }
 0x40c   : > { %2668 = vrot.lane.b32.xlu2 %v2664_v62, %s7747_s30  ;;  %v2690_v38 = vmul.f32 %v5958_v0, %v2689_v36 }
 0x40d   : > { %v6171_v60 = vpop.permute.xlu1 %2384  ;;  %v6174_v6 = vpop.permute.xlu0 %2382 }
 0x40e   : > { %8064 = vst [vmem:[#allocation295_spill] sm:$0xff] %v6171_v60  ;;  %v6177_v51 = vpop.permute.xlu2 %2449 }
 0x40f   : > { %8065 = vst [vmem:[#allocation296_spill] sm:$0xff] %v6174_v6  ;;  %v2691_v6 = vmul.f32 %v5943_v63, %v2689_v36 }
 0x410   : > { %8066 = vst [vmem:[#allocation297_spill] sm:$0xff] %v6177_v51  ;;  %v2715_v51 = vstv %s4311_s15  ;;  %s4320_s15 = sld [smem:[#allocation2 + $0x133]] }
 0x413   : > { %2681 = vrot.lane.b32.xlu1 %v2677_v23, %s7745_s24  ;;  %2670 = vrot.lane.b32.xlu0 %v2665_v33, %s7747_s30  ;;  %v2703_v23 = vmul.f32 %v5958_v0, %v2702_v18  ;;  %s172_s30 = sld [smem:[#allocation2]] }
 0x414   : > { %2683 = vrot.lane.b32.xlu2 %v2678_v14, %s7745_s24 }
 0x415   : > { %v6183_v31 = vpop.permute.xlu1 %2408  ;;  %v6186_v62 = vpop.permute.xlu0 %2397 }
 0x416   : > { %8067 = vst [vmem:[#allocation298_spill] sm:$0xff] %v6183_v31  ;;  %v6189_v60 = vpop.permute.xlu2 %2473  ;;  %v2704_v31 = vmul.f32 %v5943_v63, %v2702_v18 }
 0x417   : > { %8068 = vst [vmem:[#allocation299_spill] sm:$0xff] %v6186_v62  ;;  %v6207_v62 = vld [vmem:[%s4730_s6 + $0x21] sm:$0xff] }
 0x418   : > { %8069 = vst [vmem:[#allocation300_spill] sm:$0xff] %v6189_v60  ;;  %v2716_v60 = vmul.f32 %v5958_v0, %v2715_v51 }
 0x41b   : > { %2696 = vrot.lane.b32.xlu1 %v2691_v6, %s7745_s24  ;;  %2694 = vrot.lane.b32.xlu0 %v2690_v38, %s7745_s24  ;;  %v2717_v6 = vmul.f32 %v5943_v63, %v2715_v51  ;;  %v2747_v38 = vstv %s4318_s29  ;;  %v2760_v51 = vstv %s4319_s23  ;;  %s4321_s29 = sld [smem:[#allocation2 + $0x1b3]] }
 0x41c   : > { %2707 = vrot.lane.b32.xlu2 %v2703_v23, %s7745_s24  ;;  %v2749_v18 = vmul.f32 %v6207_v62, %v2747_v38  ;;  %s4322_s23 = sld [smem:[#allocation2 + $0x34]] }
 0x41d   : > { %v6195_v14 = vpop.permute.xlu1 %2423  ;;  %v6198_v33 = vpop.permute.xlu0 %2421 }
 0x41e   : > { %8070 = vst [vmem:[#allocation301_spill] sm:$0xff] %v6195_v14  ;;  %v6201_v36 = vpop.permute.xlu2 %2488 }
 0x41f   : > { %8071 = vst [vmem:[#allocation302_spill] sm:$0xff] %v6198_v33  ;;  %v6213_v33 = vld [vmem:[%s4730_s6 + $0x20] sm:$0xff] }
 0x420   : > { %8072 = vst [vmem:[#allocation303_spill] sm:$0xff] %v6201_v36  ;;  %v2748_v63 = vmul.f32 %v6213_v33, %v2747_v38  ;;  %v2762_v38 = vmul.f32 %v6207_v62, %v2760_v51 }
 0x423   : > { %2720 = vrot.lane.b32.xlu1 %v2716_v60, %s7745_s24  ;;  %2709 = vrot.lane.b32.xlu0 %v2704_v31, %s7745_s24  ;;  %v2761_v60 = vmul.f32 %v6213_v33, %v2760_v51  ;;  %v2773_v31 = vstv %s4320_s15  ;;  %s4323_s15 = sld [smem:[#allocation2 + $0xb4]] }
 0x424   : > { %2722 = vrot.lane.b32.xlu2 %v2717_v6, %s7745_s24  ;;  %s4111_s24 = sld [smem:[#allocation2 + $0x80]] }
 0x425   : > { %v6210_v23 = vpop.permute.xlu1 %2447  ;;  %v6216_v0 = vpop.permute.xlu0 %2436 }
 0x426   : > { %8073 = vst [vmem:[#allocation304_spill] sm:$0xff] %v6210_v23  ;;  %v6219_v36 = vpop.permute.xlu2 %2512  ;;  %v2775_v23 = vmul.f32 %v6207_v62, %v2773_v31 }
 0x427   : > { %8074 = vst [vmem:[#allocation305_spill] sm:$0xff] %v6216_v0  ;;  %v2774_v0 = vmul.f32 %v6213_v33, %v2773_v31 }
 0x428   : > { %8075 = vst [vmem:[#allocation306_spill] sm:$0xff] %v6219_v36 }
 0x42b   : > { %2754 = vrot.lane.b32.xlu1 %v2749_v18, %s4626_s7  ;;  %2752 = vrot.lane.b32.xlu0 %v2748_v63, %s4626_s7  ;;  %v2786_v18 = vstv %s4321_s29  ;;  %s4324_s29 = sld [smem:[#allocation2 + $0x134]] }
 0x42c   : > { %2765 = vrot.lane.b32.xlu2 %v2761_v60, %s4626_s7  ;;  %v2787_v51 = vmul.f32 %v6213_v33, %v2786_v18 }
 0x42d   : > { %v6225_v14 = vpop.permute.xlu1 %2462  ;;  %v6228_v6 = vpop.permute.xlu0 %2460 }
 0x42e   : > { %8076 = vst [vmem:[#allocation307_spill] sm:$0xff] %v6225_v14  ;;  %v6231_v36 = vpop.permute.xlu2 %2527  ;;  %v2799_v14 = vstv %s4322_s23  ;;  %s4325_s23 = sld [smem:[#allocation2 + $0x1b4]] }
 0x42f   : > { %8077 = vst [vmem:[#allocation308_spill] sm:$0xff] %v6228_v6  ;;  %v2788_v6 = vmul.f32 %v6207_v62, %v2786_v18  ;;  %v2800_v31 = vmul.f32 %v6213_v33, %v2799_v14  ;;  %v2801_v18 = vmul.f32 %v6207_v62, %v2799_v14 }
 0x430   : > { %8078 = vst [vmem:[#allocation309_spill] sm:$0xff] %v6231_v36 }
 0x433   : > { %2778 = vrot.lane.b32.xlu1 %v2774_v0, %s4626_s7  ;;  %2767 = vrot.lane.b32.xlu0 %v2762_v38, %s4626_s7  ;;  %v2812_v0 = vstv %s4323_s15  ;;  %s4326_s15 = sld [smem:[#allocation2 + $0x35]] }
 0x434   : > { %2780 = vrot.lane.b32.xlu2 %v2775_v23, %s4626_s7 }
 0x435   : > { %v6237_v63 = vpop.permute.xlu1 %2486  ;;  %v6240_v60 = vpop.permute.xlu0 %2475 }
 0x436   : > { %8079 = vst [vmem:[#allocation310_spill] sm:$0xff] %v6237_v63  ;;  %v6243_v36 = vpop.permute.xlu2 %2551  ;;  %v2813_v63 = vmul.f32 %v6213_v33, %v2812_v0 }
 0x437   : > { %8080 = vst [vmem:[#allocation311_spill] sm:$0xff] %v6240_v60 }
 0x438   : > { %8081 = vst [vmem:[#allocation312_spill] sm:$0xff] %v6243_v36  ;;  %v2814_v36 = vmul.f32 %v6207_v62, %v2812_v0 }
 0x43b   : > { %2793 = vrot.lane.b32.xlu1 %v2788_v6, %s4626_s7  ;;  %2791 = vrot.lane.b32.xlu0 %v2787_v51, %s4626_s7  ;;  %v2825_v6 = vstv %s4324_s29  ;;  %s4327_s7 = sld [smem:[#allocation2 + $0xb5]] }
 0x43c   : > { %2804 = vrot.lane.b32.xlu2 %v2800_v31, %s4627_s20  ;;  %v2826_v14 = vmul.f32 %v6213_v33, %v2825_v6  ;;  %s4328_s29 = sld [smem:[#allocation2 + $0x135]] }
 0x43d   : > { %v6249_v38 = vpop.permute.xlu1 %2501  ;;  %v6252_v23 = vpop.permute.xlu0 %2499 }
 0x43e   : > { %8082 = vst [vmem:[#allocation313_spill] sm:$0xff] %v6249_v38  ;;  %v6255_v60 = vpop.permute.xlu2 %2566  ;;  %v2838_v38 = vstv %s4325_s23  ;;  %s8091_s23 = smov 125  }
 0x43f   : > { %8083 = vst [vmem:[#allocation314_spill] sm:$0xff] %v6252_v23  ;;  %v2827_v23 = vmul.f32 %v6207_v62, %v2825_v6  ;;  %v2839_v0 = vmul.f32 %v6213_v33, %v2838_v38  ;;  %v2840_v6 = vmul.f32 %v6207_v62, %v2838_v38 }
 0x440   : > { %8084 = vst [vmem:[#allocation315_spill] sm:$0xff] %v6255_v60 }
 0x443   : > { %2817 = vrot.lane.b32.xlu1 %v2813_v63, %s4627_s20  ;;  %2806 = vrot.lane.b32.xlu0 %v2801_v18, %s4627_s20  ;;  %v2851_v63 = vstv %s4326_s15  ;;  %s4329_s15 = sld [smem:[#allocation2 + $0x1b5]] }
 0x444   : > { %2819 = vrot.lane.b32.xlu2 %v2814_v36, %s4627_s20 }
 0x445   : > { %v6261_v51 = vpop.permute.xlu1 %2525  ;;  %v6264_v31 = vpop.permute.xlu0 %2514 }
 0x446   : > { %8085 = vst [vmem:[#allocation316_spill] sm:$0xff] %v6261_v51  ;;  %v6267_v60 = vpop.permute.xlu2 %2590  ;;  %v2853_v51 = vmul.f32 %v6207_v62, %v2851_v63 }
 0x447   : > { %8086 = vst [vmem:[#allocation317_spill] sm:$0xff] %v6264_v31  ;;  %v2852_v31 = vmul.f32 %v6213_v33, %v2851_v63 }
 0x448   : > { %8087 = vst [vmem:[#allocation318_spill] sm:$0xff] %v6267_v60 }
 0x44b   : > { %2832 = vrot.lane.b32.xlu1 %v2827_v23, %s4627_s20  ;;  %2830 = vrot.lane.b32.xlu0 %v2826_v14, %s4627_s20  ;;  %v2864_v23 = vstv %s4327_s7  ;;  %s4330_s7 = sld [smem:[#allocation2 + $0x36]] }
 0x44c   : > { %2843 = vrot.lane.b32.xlu2 %v2839_v0, %s4627_s20  ;;  %v2865_v38 = vmul.f32 %v6213_v33, %v2864_v23 }
 0x44d   : > { %v6273_v18 = vpop.permute.xlu1 %2540  ;;  %v6276_v36 = vpop.permute.xlu0 %2538 }
 0x44e   : > { %8088 = vst [vmem:[#allocation319_spill] sm:$0xff] %v6273_v18  ;;  %v6279_v60 = vpop.permute.xlu2 %2605 }
 0x44f   : > { %8089 = vst [vmem:[#allocation320_spill] sm:$0xff] %v6276_v36  ;;  %v2866_v36 = vmul.f32 %v6207_v62, %v2864_v23 }
 0x450   : > { %8090 = vst [vmem:[#allocation321_spill] sm:$0xff] %v6279_v60  ;;  %v2877_v60 = vstv %s4328_s29  ;;  %s4332_s29 = sld [smem:[#allocation2 + $0x136]] }
 0x451   : > { %v2878_v63 = vmul.f32 %v6213_v33, %v2877_v60  ;;  %v2879_v23 = vmul.f32 %v6207_v62, %v2877_v60 }
 0x453   : > { %2856 = vrot.lane.b32.xlu1 %v2852_v31, %s8091_s23  ;;  %2845 = vrot.lane.b32.xlu0 %v2840_v6, %s4627_s20  ;;  %v2890_v31 = vstv %s4329_s15  ;;  %s4331_s20 = sld [smem:[#allocation2 + $0xb6]]  ;;  %s8101_s15 = smov 124  }
 0x454   : > { %2858 = vrot.lane.b32.xlu2 %v2853_v51, %s8091_s23 }
 0x455   : > { %v6285_v14 = vpop.permute.xlu1 %2564  ;;  %v6288_v0 = vpop.permute.xlu0 %2553 }
 0x456   : > { %8092 = vst [vmem:[#allocation322_spill] sm:$0xff] %v6285_v14  ;;  %v6291_v18 = vpop.permute.xlu2 %2629  ;;  %v2891_v14 = vmul.f32 %v6213_v33, %v2890_v31 }
 0x457   : > { %8093 = vst [vmem:[#allocation323_spill] sm:$0xff] %v6288_v0  ;;  %v2892_v0 = vmul.f32 %v6207_v62, %v2890_v31 }
 0x458   : > { %8094 = vst [vmem:[#allocation324_spill] sm:$0xff] %v6291_v18 }
 0x45b   : > { %2871 = vrot.lane.b32.xlu1 %v2866_v36, %s8091_s23  ;;  %2869 = vrot.lane.b32.xlu0 %v2865_v38, %s8091_s23  ;;  %v2903_v36 = vstv %s4330_s7  ;;  %s4333_s7 = sld [smem:[#allocation2 + $0x1b6]] }
 0x45c   : > { %2882 = vrot.lane.b32.xlu2 %v2878_v63, %s8091_s23  ;;  %v2904_v60 = vmul.f32 %v6213_v33, %v2903_v36 }
 0x45d   : > { %v6297_v6 = vpop.permute.xlu1 %2579  ;;  %v6300_v51 = vpop.permute.xlu0 %2577 }
 0x45e   : > { %8095 = vst [vmem:[#allocation325_spill] sm:$0xff] %v6297_v6  ;;  %v6303_v18 = vpop.permute.xlu2 %2644  ;;  %v2916_v6 = vstv %s4331_s20  ;;  %s4335_s20 = sld [smem:[#allocation2 + $0xb7]] }
 0x45f   : > { %8096 = vst [vmem:[#allocation326_spill] sm:$0xff] %v6300_v51  ;;  %v2905_v51 = vmul.f32 %v6207_v62, %v2903_v36  ;;  %v2917_v31 = vmul.f32 %v6213_v33, %v2916_v6  ;;  %v2918_v36 = vmul.f32 %v6207_v62, %v2916_v6 }
 0x460   : > { %8097 = vst [vmem:[#allocation327_spill] sm:$0xff] %v6303_v18 }
 0x463   : > { %2895 = vrot.lane.b32.xlu1 %v2891_v14, %s8091_s23  ;;  %2884 = vrot.lane.b32.xlu0 %v2879_v23, %s8091_s23  ;;  %v2929_v14 = vstv %s4332_s29  ;;  %s4336_s29 = sld [smem:[#allocation2 + $0x137]] }
 0x464   : > { %2897 = vrot.lane.b32.xlu2 %v2892_v0, %s8091_s23  ;;  %s4334_s23 = sld [smem:[#allocation2 + $0x37]] }
 0x465   : > { %v6309_v38 = vpop.permute.xlu1 %2603  ;;  %v6312_v63 = vpop.permute.xlu0 %2592 }
 0x466   : > { %8098 = vst [vmem:[#allocation328_spill] sm:$0xff] %v6309_v38  ;;  %v6315_v18 = vpop.permute.xlu2 %2668  ;;  %v2931_v38 = vmul.f32 %v6207_v62, %v2929_v14 }
 0x467   : > { %8099 = vst [vmem:[#allocation329_spill] sm:$0xff] %v6312_v63  ;;  %v2930_v63 = vmul.f32 %v6213_v33, %v2929_v14 }
 0x468   : > { %8100 = vst [vmem:[#allocation330_spill] sm:$0xff] %v6315_v18 }
 0x46b   : > { %2910 = vrot.lane.b32.xlu1 %v2905_v51, %s8101_s15  ;;  %2908 = vrot.lane.b32.xlu0 %v2904_v60, %s8101_s15  ;;  %v2942_v51 = vstv %s4333_s7  ;;  %s8109_s7 = smov 112  }
 0x46c   : > { %2921 = vrot.lane.b32.xlu2 %v2917_v31, %s8101_s15  ;;  %v2943_v6 = vmul.f32 %v6213_v33, %v2942_v51 }
 0x46d   : > { %v6321_v23 = vpop.permute.xlu1 %2618  ;;  %v6324_v0 = vpop.permute.xlu0 %2616 }
 0x46e   : > { %8102 = vst [vmem:[#allocation331_spill] sm:$0xff] %v6321_v23  ;;  %v6327_v18 = vpop.permute.xlu2 %2683  ;;  %v2955_v23 = vstv %s4334_s23  ;;  %s4337_s23 = sld [smem:[#allocation2 + $0x1b7]] }
 0x46f   : > { %8103 = vst [vmem:[#allocation332_spill] sm:$0xff] %v6324_v0  ;;  %v2944_v0 = vmul.f32 %v6207_v62, %v2942_v51  ;;  %v2956_v14 = vmul.f32 %v6213_v33, %v2955_v23  ;;  %v2957_v51 = vmul.f32 %v6207_v62, %v2955_v23 }
 0x470   : > { %8104 = vst [vmem:[#allocation333_spill] sm:$0xff] %v6327_v18 }
 0x473   : > { %2934 = vrot.lane.b32.xlu1 %v2930_v63, %s8101_s15  ;;  %2923 = vrot.lane.b32.xlu0 %v2918_v36, %s8101_s15  ;;  %v2968_v63 = vstv %s4335_s20  ;;  %s4338_s20 = sld [smem:[#allocation2 + $0x38]] }
 0x474   : > { %2936 = vrot.lane.b32.xlu2 %v2931_v38, %s8101_s15 }
 0x475   : > { %v6333_v60 = vpop.permute.xlu1 %2642  ;;  %v6336_v31 = vpop.permute.xlu0 %2631 }
 0x476   : > { %8105 = vst [vmem:[#allocation334_spill] sm:$0xff] %v6333_v60  ;;  %v6339_v18 = vpop.permute.xlu2 %2707  ;;  %v2969_v60 = vmul.f32 %v6213_v33, %v2968_v63 }
 0x477   : > { %8106 = vst [vmem:[#allocation335_spill] sm:$0xff] %v6336_v31 }
 0x478   : > { %8107 = vst [vmem:[#allocation336_spill] sm:$0xff] %v6339_v18  ;;  %v2970_v18 = vmul.f32 %v6207_v62, %v2968_v63 }
 0x47b   : > { %2949 = vrot.lane.b32.xlu1 %v2944_v0, %s8101_s15  ;;  %2947 = vrot.lane.b32.xlu0 %v2943_v6, %s8101_s15  ;;  %v2981_v0 = vstv %s4336_s29  ;;  %s4339_s15 = sld [smem:[#allocation2 + $0xb8]] }
 0x47c   : > { %2960 = vrot.lane.b32.xlu2 %v2956_v14, %s8109_s7  ;;  %v2982_v23 = vmul.f32 %v6213_v33, %v2981_v0  ;;  %s4112_s29 = sld [smem:[#allocation2 + $0x100]] }
 0x47d   : > { %v6345_v36 = vpop.permute.xlu1 %2657  ;;  %v6348_v38 = vpop.permute.xlu0 %2655 }
 0x47e   : > { %8108 = vst [vmem:[#allocation337_spill] sm:$0xff] %v6345_v36  ;;  %v6351_v31 = vpop.permute.xlu2 %2722  ;;  %v2994_v36 = vstv %s4337_s23  ;;  %s6378_s23 = sld [smem:[#allocation2 + $0x138]] }
 0x47f   : > { %8110 = vst [vmem:[#allocation338_spill] sm:$0xff] %v6348_v38  ;;  %v2983_v38 = vmul.f32 %v6207_v62, %v2981_v0  ;;  %v2995_v63 = vmul.f32 %v6213_v33, %v2994_v36 }
 0x480   : > { %8111 = vst [vmem:[#allocation339_spill] sm:$0xff] %v6351_v31 }
 0x483   : > { %2973 = vrot.lane.b32.xlu1 %v2969_v60, %s8109_s7  ;;  %2962 = vrot.lane.b32.xlu0 %v2957_v51, %s8109_s7  ;;  %v3007_v60 = vstv %s4338_s20  ;;  %s4113_s20 = sld [smem:[#allocation2 + $0x180]] }
 0x484   : > { %2975 = vrot.lane.b32.xlu2 %v2970_v18, %s8109_s7  ;;  %v3033_v55 = vstv %s6378_s23  ;;  %s6609_s23 = sld [smem:[#allocation2 + $0x13a]] }
 0x485   : > { %v6357_v6 = vpop.permute.xlu1 %2681  ;;  %v6360_v14 = vpop.permute.xlu0 %2670 }
 0x486   : > { %8112 = vst [vmem:[#allocation340_spill] sm:$0xff] %v6357_v6  ;;  %v6363_v31 = vpop.permute.xlu2 %2765  ;;  %v2996_v6 = vmul.f32 %v6207_v62, %v2994_v36 }
 0x487   : > { %8113 = vst [vmem:[#allocation341_spill] sm:$0xff] %v6360_v14 }
 0x488   : > { %8114 = vst [vmem:[#allocation342_spill] sm:$0xff] %v6363_v31  ;;  %v3008_v31 = vmul.f32 %v6213_v33, %v3007_v60 }
 0x489   : > { %v185_v44 = vstv %s4113_s20  ;;  %s8179_s20 = smov 109  }
 0x48b   : > { %2988 = vrot.lane.b32.xlu1 %v2983_v38, %s8109_s7  ;;  %2986 = vrot.lane.b32.xlu0 %v2982_v23, %s8109_s7  ;;  %v3009_v38 = vmul.f32 %v6207_v62, %v3007_v60  ;;  %v3020_v23 = vstv %s4339_s15  ;;  %v177_v60 = vstv %s4111_s24  ;;  %s6504_s24 = sld [smem:[#allocation2 + $0x1b9]] }
 0x48c   : > { %2999 = vrot.lane.b32.xlu2 %v2995_v63, %s8109_s7  ;;  %v3022_v36 = vmul.f32 %v6207_v62, %v3020_v23  ;;  %s6540_s15 = sld [smem:[#allocation2 + $0x3a]] }
 0x48d   : > { %v6369_v51 = vpop.permute.xlu1 %2696  ;;  %v6372_v18 = vpop.permute.xlu0 %2694 }
 0x48e   : > { %8115 = vst [vmem:[#allocation343_spill] sm:$0xff] %v6369_v51  ;;  %v6375_v0 = vpop.permute.xlu2 %2780  ;;  %v181_v51 = vstv %s4112_s29  ;;  %s6560_s29 = sld [smem:[#allocation2 + $0xba]] }
 0x48f   : > { %8116 = vst [vmem:[#allocation344_spill] sm:$0xff] %v6372_v18 }
 0x490   : > { %8117 = vst [vmem:[#allocation345_spill] sm:$0xff] %v6375_v0  ;;  %v3021_v0 = vmul.f32 %v6213_v33, %v3020_v23  ;;  %v212_v23 = vsel %vm198_vm0, %v4833_v12, %v4845_v19 }
 0x493   : > { %3012 = vrot.lane.b32.xlu1 %v3008_v31, %s8118_s0  ;;  %3001 = vrot.lane.b32.xlu0 %v2996_v6, %s8109_s7  ;;  %v173_v31 = vstv %s172_s30  ;;  %v3034_v6 = vmul.f32 %v6213_v33, %v3033_v55  ;;  %s6399_s7 = sld [smem:[#allocation2 + $0x39]] }
 0x494   : > { %3014 = vrot.lane.b32.xlu2 %v3009_v38, %s8118_s0  ;;  %s6455_s30 = sld [smem:[#allocation2 + $0x139]] }
 0x495   : > { %v6385_v63 = vpop.permute.xlu1 %2720  ;;  %v6388_v18 = vpop.permute.xlu0 %2709 }
 0x496   : > { %8119 = vst [vmem:[#allocation346_spill] sm:$0xff] %v6385_v63  ;;  %v6391_v14 = vpop.permute.xlu2 %2804  ;;  %v4520_v63 = vld [vmem:[%s4730_s6] sm:$0xff] }
 0x497   : > { %8120 = vst [vmem:[#allocation347_spill] sm:$0xff] %v6388_v18  ;;  %v182_v39 = vmul.f32 %v4520_v63, %v181_v51  ;;  %v178_v38 = vmul.f32 %v4520_v63, %v177_v60  ;;  %v174_v18 = vmul.f32 %v4520_v63, %v173_v31  ;;  %v199_v51 = vsel %vm198_vm0, %v4836_v13, %v4848_v20 }
 0x498   : > { %8121 = vst [vmem:[#allocation348_spill] sm:$0xff] %v6391_v14  ;;  %v225_v14 = vsel %vm198_vm0, %v4811_v58, %v4819_v1  ;;  %v186_v10 = vmul.f32 %v4520_v63, %v185_v44  ;;  %v238_v60 = vsel %vm198_vm0, %v4860_v28, %v4857_v27  ;;  %v265_v58 = vsel %vm251_vm1, %v4869_v34, %v4839_v15 }
 0x499   : > { %v252_v1 = vsel %vm251_vm1, %v4827_v7, %v4872_v35  ;;  %v3047_v13 = vmul.f32 %v6213_v33, %v3046_v56  ;;  %v227_v19 = vadd.f32 %v225_v14, %v182_v39  ;;  %v214_v20 = vadd.f32 %v212_v23, %v178_v38 }
 0x49a   : > { %v201_v44 = vadd.f32 %v199_v51, %v174_v18  ;;  %v278_v27 = vsel %vm251_vm1, %v4884_v43, %v4881_v42  ;;  %v291_v15 = vsel %vm251_vm1, %v4851_v22, %v4896_v50  ;;  %v3035_v7 = vmul.f32 %v6207_v62, %v3033_v55 }
 0x49b   : > { %3027 = vrot.lane.b32.xlu1 %v3022_v36, %s8118_s0  ;;  %3025 = vrot.lane.b32.xlu0 %v3021_v0, %s8118_s0  ;;  %v240_v0 = vadd.f32 %v238_v60, %v186_v10  ;;  %v267_v34 = vadd.f32 %v265_v58, %v214_v20  ;;  %v305_v39 = vsel %vm304_vm2, %v4893_v49, %v4863_v30  ;;  %v3059_v49 = vstv %s6399_s7  ;;  %v8125_v58 = vld [vmem:[#allocation13_spill] sm:$0xff]  ;;  %s6645_s7 = sld [smem:[#allocation2 + $0x1ba]] }
 0x49c   : > { %3038 = vrot.lane.b32.xlu2 %v3034_v6, %s8118_s0  ;;  %v254_v35 = vadd.f32 %v252_v1, %v201_v44  ;;  %v3048_v42 = vmul.f32 %v6207_v62, %v3046_v56  ;;  %v280_v43 = vadd.f32 %v278_v27, %v227_v19  ;;  %v318_v10 = vsel %vm304_vm2, %v4908_v59, %v4905_v57  ;;  %v8126_v1 = vld [vmem:[#allocation14_spill] sm:$0xff]  ;;  %v8130_v19 = vld [vmem:[#allocation9_spill] sm:$0xff] }
 0x49d   : > { %v6411_v36 = vpop.permute.xlu1 %2754  ;;  %v6423_v12 = vpop.permute.xlu0 %2752  ;;  %v344_v22 = vsel %vm304_vm2, %v4917_v3, %v4887_v45  ;;  %v331_v50 = vsel %vm304_vm2, %v4875_v37, %v4920_v4  ;;  %v293_v55 = vadd.f32 %v291_v15, %v240_v0  ;;  %v358_v30 = vsel %vm357_vm3, %v4932_v17, %v4929_v16 }
 0x49e   : > { %v6429_v28 = vpop.permute.xlu2 %2819  ;;  %v307_v57 = vadd.f32 %v305_v39, %v254_v35  ;;  %v384_v45 = vsel %vm357_vm3, %v4941_v26, %v4911_v61  ;;  %v371_v37 = vsel %vm357_vm3, %v4899_v52, %v4944_v29  ;;  %v397_v59 = vsel %vm357_vm3, %v4956_v41, %v4953_v40  ;;  %v8133_v39 = vld [vmem:[#allocation15_spill] sm:$0xff] }
 0x49f   : > { %v320_v4 = vadd.f32 %v318_v10, %v267_v34  ;;  %v346_v16 = vadd.f32 %v344_v22, %v293_v55  ;;  %v333_v17 = vadd.f32 %v331_v50, %v280_v43  ;;  %v424_v61 = vsel %vm410_vm4, %v4965_v53, %v4935_v21  ;;  %v8132_v34 = vld [vmem:[#allocation20_spill] sm:$0xff]  ;;  %v8135_v10 = vld [vmem:[#allocation23_spill] sm:$0xff] }
 0x4a0   : > { %v360_v56 = vadd.f32 %v358_v30, %v307_v57  ;;  %v3061_v26 = vmul.f32 %v6207_v62, %v3059_v49  ;;  %v411_v14 = vsel %vm410_vm4, %v4923_v8, %v4968_v54  ;;  %v437_v63 = vsel %vm410_vm4, %v4980_v9, %v4977_v5  ;;  %v8122_v9 = vld [vmem:[#allocation11_spill] sm:$0xff]  ;;  %v8136_v22 = vld [vmem:[#allocation12_spill] sm:$0xff] }
 0x4a1   : > { %v386_v29 = vadd.f32 %v384_v45, %v333_v17  ;;  %v373_v40 = vadd.f32 %v371_v37, %v320_v4  ;;  %v399_v41 = vadd.f32 %v397_v59, %v346_v16  ;;  %v450_v21 = vsel %vm410_vm4, %v4947_v32, %v4992_v25  ;;  %v8123_v25 = vld [vmem:[#allocation8_spill] sm:$0xff]  ;;  %v8137_v37 = vld [vmem:[#allocation25_spill] sm:$0xff]  ;;  %v8138_v59 = vld [vmem:[#allocation26_spill] sm:$0xff] }
 0x4a2   : > { %v3060_v53 = vmul.f32 %v6213_v33, %v3059_v49  ;;  %v3072_v31 = vstv %s6435_s1  ;;  %v464_v38 = vsel %vm463_vm5, %v4989_v24, %v4959_v46  ;;  %v413_v54 = vadd.f32 %v411_v14, %v360_v56  ;;  %v8139_v56 = vld [vmem:[#allocation29_spill] sm:$0xff]  ;;  %s6665_s1 = sld [smem:[#allocation2 + $0x3b]] }
 0x4a3   : > { %3051 = vrot.lane.b32.xlu1 %v3047_v13, %s8118_s0  ;;  %3040 = vrot.lane.b32.xlu0 %v3035_v7, %s8118_s0  ;;  %v426_v6 = vadd.f32 %v424_v61, %v373_v40  ;;  %v3073_v8 = vmul.f32 %v6213_v33, %v3072_v31  ;;  %v477_v5 = vsel %vm463_vm5, %v5004_v48, %v5001_v47  ;;  %v3085_v24 = vstv %s6455_s30  ;;  %v8127_v48 = vld [vmem:[#allocation10_spill] sm:$0xff]  ;;  %v8128_v13 = vld [vmem:[#allocation16_spill] sm:$0xff]  ;;  %v8131_v7 = vld [vmem:[#allocation19_spill] sm:$0xff]  ;;  %s6714_s30 = sld [smem:[#allocation2 + $0xbb]] }
 0x4a4   : > { %3053 = vrot.lane.b32.xlu2 %v3048_v42, %s8118_s0  ;;  %v503_v32 = vsel %vm463_vm5, %v5013_v2, %v4983_v11  ;;  %v490_v23 = vsel %vm463_vm5, %v8123_v25, %v8122_v9  ;;  %s8124_s0 = smov 110   ;;  %v439_v51 = vadd.f32 %v437_v63, %v386_v29  ;;  %v452_v46 = vadd.f32 %v450_v21, %v399_v41  ;;  %v8129_v2 = vld [vmem:[#allocation17_spill] sm:$0xff]  ;;  %v8134_v42 = vld [vmem:[#allocation22_spill] sm:$0xff]  ;;  %v8142_v63 = vld [vmem:[#allocation28_spill] sm:$0xff] }
 0x4a5   : > { %v6467_v3 = vpop.permute.xlu1 %2778  ;;  %v6473_v52 = vpop.permute.xlu0 %2767  ;;  %v466_v60 = vadd.f32 %v464_v38, %v413_v54  ;;  %v517_v47 = vsel %vm516_vm6, %v8126_v1, %v8125_v58  ;;  %v543_v11 = vsel %vm516_vm6, %v8128_v13, %v8127_v48  ;;  %v530_v20 = vsel %vm516_vm6, %v8130_v19, %v8129_v2  ;;  %v8140_v61 = vld [vmem:[#allocation18_spill] sm:$0xff]  ;;  %v8141_v14 = vld [vmem:[#allocation21_spill] sm:$0xff]  ;;  %v8143_v38 = vld [vmem:[#allocation31_spill] sm:$0xff] }
 0x4a6   : > { %v6479_v18 = vpop.permute.xlu2 %2843  ;;  %v479_v27 = vadd.f32 %v477_v5, %v426_v6  ;;  %v505_v0 = vadd.f32 %v503_v32, %v452_v46  ;;  %v492_v15 = vadd.f32 %v490_v23, %v439_v51  ;;  %v556_v35 = vsel %vm516_vm6, %v8132_v34, %v8131_v7  ;;  %v8145_v5 = vld [vmem:[#allocation27_spill] sm:$0xff]  ;;  %v8146_v32 = vld [vmem:[#allocation34_spill] sm:$0xff]  ;;  %v8148_v25 = vld [vmem:[#allocation24_spill] sm:$0xff] }
 0x4a7   : > { %v583_v43 = vsel %vm569_vm7, %v8134_v42, %v8133_v39  ;;  %v570_v50 = vsel %vm569_vm7, %v8136_v22, %v8135_v10  ;;  %v3086_v30 = vmul.f32 %v6213_v33, %v3085_v24  ;;  %v519_v49 = vadd.f32 %v517_v47, %v466_v60  ;;  %v8149_v46 = vld [vmem:[#allocation37_spill] sm:$0xff]  ;;  %v8150_v60 = vld [vmem:[#allocation38_spill] sm:$0xff]  ;;  %v8152_v48 = vld [vmem:[#allocation40_spill] sm:$0xff] }
 0x4a8   : > { %v545_v57 = vadd.f32 %v543_v11, %v492_v15  ;;  %v532_v45 = vadd.f32 %v530_v20, %v479_v27  ;;  %v596_v4 = vsel %vm569_vm7, %v8138_v59, %v8137_v37  ;;  %v558_v17 = vadd.f32 %v556_v35, %v505_v0  ;;  %v8151_v47 = vld [vmem:[#allocation33_spill] sm:$0xff]  ;;  %v8154_v2 = vld [vmem:[#allocation30_spill] sm:$0xff]  ;;  %v8155_v20 = vld [vmem:[#allocation43_spill] sm:$0xff] }
 0x4a9   : > { %v3074_v29 = vmul.f32 %v6207_v62, %v3072_v31  ;;  %v572_v41 = vadd.f32 %v570_v50, %v519_v49  ;;  %v623_v21 = vsel %vm622_vm8, %v8142_v63, %v8141_v14  ;;  %v662_v9 = vsel %vm622_vm8, %v8146_v32, %v8145_v5  ;;  %v8147_v31 = vld [vmem:[#allocation35_spill] sm:$0xff]  ;;  %v8153_v11 = vld [vmem:[#allocation41_spill] sm:$0xff]  ;;  %v8156_v27 = vld [vmem:[#allocation44_spill] sm:$0xff] }
 0x4aa   : > { %v585_v40 = vadd.f32 %v583_v43, %v532_v45  ;;  %v598_v6 = vadd.f32 %v596_v4, %v545_v57  ;;  %v649_v23 = vsel %vm622_vm8, %v8148_v25, %v8147_v31  ;;  %v3098_v58 = vstv %s6504_s24  ;;  %v8157_v42 = vld [vmem:[#allocation39_spill] sm:$0xff]  ;;  %v8158_v43 = vld [vmem:[#allocation46_spill] sm:$0xff]  ;;  %v8160_v37 = vld [vmem:[#allocation36_spill] sm:$0xff]  ;;  %s6746_s24 = sld [smem:[#allocation2 + $0x99]] }
 0x4ab   : > { %3066 = vrot.lane.b32.xlu1 %v3061_v26, %s8124_s0  ;;  %3064 = vrot.lane.b32.xlu0 %v3060_v53, %s8124_s0  ;;  %v609_v26 = vsel %vm569_vm7, %v8140_v61, %v8139_v56  ;;  %v3087_v53 = vmul.f32 %v6207_v62, %v3085_v24  ;;  %v676_v24 = vsel %vm7759_vm9, %v8150_v60, %v8149_v46  ;;  %v8159_v45 = vld [vmem:[#allocation47_spill] sm:$0xff]  ;;  %v8162_v56 = vld [vmem:[#allocation50_spill] sm:$0xff]  ;;  %v3111_v14 = vstv %s6540_s15  ;;  %v8168_v5 = vld [vmem:[#allocation56_spill] sm:$0xff]  ;;  %s6751_s15 = sld [smem:[#allocation2 + $0x13b]] }
 0x4ac   : > { %3077 = vrot.lane.b32.xlu2 %v3073_v8, %s8124_s0  ;;  %v8144_v8 = vld [vmem:[#allocation32_spill] sm:$0xff]  ;;  %v611_v51 = vadd.f32 %v609_v26, %v558_v17  ;;  %v625_v1 = vadd.f32 %v623_v21, %v572_v41  ;;  %v702_v13 = vsel %vm7759_vm9, %v8152_v48, %v8151_v47  ;;  %v689_v19 = vsel %vm7759_vm9, %v8154_v2, %v8153_v11  ;;  %v8161_v17 = vld [vmem:[#allocation49_spill] sm:$0xff]  ;;  %v8170_v31 = vld [vmem:[#allocation58_spill] sm:$0xff] }
 0x4ad   : > { %v6516_v44 = vpop.permute.xlu1 %2793  ;;  %v6528_v55 = vpop.permute.xlu0 %2791  ;;  %v636_v54 = vsel %vm622_vm8, %v8144_v8, %v8143_v38  ;;  %v715_v0 = vsel %vm7759_vm9, %v8156_v27, %v8155_v20  ;;  %v651_v35 = vadd.f32 %v649_v23, %v598_v6  ;;  %v742_v10 = vsel %vm7757_vm10, %v8158_v43, %v8157_v42  ;;  %v8163_v26 = vld [vmem:[#allocation53_spill] sm:$0xff]  ;;  %v8171_v23 = vld [vmem:[#allocation59_spill] sm:$0xff]  ;;  %v8174_v48 = vld [vmem:[#allocation62_spill] sm:$0xff] }
 0x4ae   : > { %v6534_v16 = vpop.permute.xlu2 %2858  ;;  %v638_v7 = vadd.f32 %v636_v54, %v585_v40  ;;  %v664_v34 = vadd.f32 %v662_v9, %v611_v51  ;;  %v678_v39 = vadd.f32 %v676_v24, %v625_v1  ;;  %v3100_v50 = vmul.f32 %v6207_v62, %v3098_v58  ;;  %v8165_v21 = vld [vmem:[#allocation45_spill] sm:$0xff]  ;;  %v8167_v54 = vld [vmem:[#allocation55_spill] sm:$0xff]  ;;  %v8172_v51 = vld [vmem:[#allocation48_spill] sm:$0xff] }
 0x4af   : > { %v729_v59 = vsel %vm7757_vm10, %v8160_v37, %v8159_v45  ;;  %v755_v61 = vsel %vm7757_vm10, %v8162_v56, %v8161_v17  ;;  %v3099_v41 = vmul.f32 %v6213_v33, %v3098_v58  ;;  %v3112_v38 = vmul.f32 %v6213_v33, %v3111_v14  ;;  %v8169_v9 = vld [vmem:[#allocation51_spill] sm:$0xff]  ;;  %v8173_v47 = vld [vmem:[#allocation61_spill] sm:$0xff]  ;;  %v8176_v2 = vld [vmem:[#allocation54_spill] sm:$0xff] }
 0x4b0   : > { %v691_v49 = vadd.f32 %v689_v19, %v638_v7  ;;  %v717_v57 = vadd.f32 %v715_v0, %v664_v34  ;;  %v731_v8 = vadd.f32 %v729_v59, %v678_v39  ;;  %v795_v32 = vsel %vm7758_vm11, %v8168_v5, %v8167_v54  ;;  %v8175_v11 = vld [vmem:[#allocation65_spill] sm:$0xff]  ;;  %v8180_v42 = vld [vmem:[#allocation67_spill] sm:$0xff]  ;;  %v8181_v43 = vld [vmem:[#allocation68_spill] sm:$0xff] }
 0x4b1   : > { %v821_v25 = vsel %vm7758_vm11, %v8170_v31, %v8169_v9  ;;  %v808_v46 = vsel %vm7758_vm11, %v8172_v51, %v8171_v23  ;;  %v3124_v58 = vstv %s6560_s29  ;;  %v848_v19 = vsel %vm7760_vm12, %v8176_v2, %v8175_v11  ;;  %v8177_v34 = vld [vmem:[#allocation57_spill] sm:$0xff]  ;;  %v8184_v17 = vld [vmem:[#allocation71_spill] sm:$0xff]  ;;  %v8185_v56 = vld [vmem:[#allocation60_spill] sm:$0xff]  ;;  %s6763_s29 = sld [smem:[#allocation2 + $0x119]] }
 0x4b2   : > { %v744_v63 = vadd.f32 %v742_v10, %v691_v49  ;;  %v874_v10 = vsel %vm7760_vm12, %v8181_v43, %v8180_v42  ;;  %v3125_v45 = vmul.f32 %v6213_v33, %v3124_v58  ;;  %v8190_v5 = vld [vmem:[#allocation69_spill] sm:$0xff]  ;;  %v3126_v31 = vmul.f32 %v6207_v62, %v3124_v58  ;;  %v8192_v51 = vld [vmem:[#allocation79_spill] sm:$0xff]  ;;  %v8203_v42 = vld [vmem:[#allocation92_spill] sm:$0xff] }
 0x4b3   : > { %3090 = vrot.lane.b32.xlu1 %v3086_v30, %s8124_s0  ;;  %3079 = vrot.lane.b32.xlu0 %v3074_v29, %s8124_s0  ;;  %v704_v30 = vadd.f32 %v702_v13, %v651_v35  ;;  %v8164_v29 = vld [vmem:[#allocation42_spill] sm:$0xff]  ;;  %v835_v13 = vsel %vm7760_vm12, %v8174_v48, %v8173_v47  ;;  %v8178_v35 = vld [vmem:[#allocation64_spill] sm:$0xff]  ;;  %v8196_v48 = vld [vmem:[#allocation83_spill] sm:$0xff] }
 0x4b4   : > { %3092 = vrot.lane.b32.xlu2 %v3087_v53, %s8124_s0  ;;  %v768_v40 = vsel %vm7757_vm10, %v8164_v29, %v8163_v26  ;;  %v8166_v53 = vld [vmem:[#allocation52_spill] sm:$0xff]  ;;  %v797_v27 = vadd.f32 %v795_v32, %v744_v63  ;;  %v861_v39 = vsel %vm7760_vm12, %v8178_v35, %v8177_v34  ;;  %v8186_v26 = vld [vmem:[#allocation73_spill] sm:$0xff]  ;;  %v8187_v29 = vld [vmem:[#allocation74_spill] sm:$0xff] }
 0x4b5   : > { %v6572_v15 = vpop.permute.xlu1 %2817  ;;  %v6578_v22 = vpop.permute.xlu0 %2806  ;;  %v782_v6 = vsel %vm7758_vm11, %v8166_v53, %v8165_v21  ;;  %v757_v60 = vadd.f32 %v755_v61, %v704_v30  ;;  %v770_v24 = vadd.f32 %v768_v40, %v717_v57  ;;  %v8183_v30 = vld [vmem:[#allocation70_spill] sm:$0xff]  ;;  %v888_v61 = vsel %vm7749_vm13, %v8185_v56, %v8184_v17  ;;  %v8188_v21 = vld [vmem:[#allocation77_spill] sm:$0xff]  ;;  %v8191_v32 = vld [vmem:[#allocation76_spill] sm:$0xff] }
 0x4b6   : > { %v6584_v4 = vpop.permute.xlu2 %2882  ;;  %v784_v1 = vadd.f32 %v782_v6, %v731_v8  ;;  %v850_v59 = vadd.f32 %v848_v19, %v797_v27  ;;  %v914_v40 = vsel %vm7749_vm13, %v8187_v29, %v8186_v26  ;;  %v8189_v53 = vld [vmem:[#allocation66_spill] sm:$0xff]  ;;  %v941_v9 = vsel %vm7750_vm14, %v8191_v32, %v8190_v5  ;;  %v8198_v2 = vld [vmem:[#allocation85_spill] sm:$0xff]  ;;  %v8205_v56 = vld [vmem:[#allocation88_spill] sm:$0xff] }
 0x4b7   : > { %v823_v0 = vadd.f32 %v821_v25, %v770_v24  ;;  %v810_v7 = vadd.f32 %v808_v46, %v757_v60  ;;  %v927_v6 = vsel %vm7749_vm13, %v8189_v53, %v8188_v21  ;;  %v8193_v46 = vld [vmem:[#allocation80_spill] sm:$0xff]  ;;  %v8194_v24 = vld [vmem:[#allocation75_spill] sm:$0xff]  ;;  %v8199_v19 = vld [vmem:[#allocation86_spill] sm:$0xff]  ;;  %v3137_v27 = vstv %s6609_s23  ;;  %s8243_s23 = smov 108  }
 0x4b8   : > { %v837_v37 = vadd.f32 %v835_v13, %v784_v1  ;;  %v954_v60 = vsel %vm7750_vm14, %v8193_v46, %v8192_v51  ;;  %v8195_v1 = vld [vmem:[#allocation82_spill] sm:$0xff]  ;;  %v8197_v13 = vld [vmem:[#allocation72_spill] sm:$0xff]  ;;  %v994_v58 = vsel %vm7751_vm15, %v8199_v19, %v8198_v2  ;;  %v8204_v17 = vld [vmem:[#allocation81_spill] sm:$0xff] }
 0x4b9   : > { %v863_v63 = vadd.f32 %v861_v39, %v810_v7  ;;  %v876_v8 = vadd.f32 %v874_v10, %v823_v0  ;;  %v967_v11 = vsel %vm7750_vm14, %v8197_v13, %v8196_v48  ;;  %v8200_v7 = vld [vmem:[#allocation89_spill] sm:$0xff]  ;;  %v8201_v34 = vld [vmem:[#allocation78_spill] sm:$0xff]  ;;  %v8202_v39 = vld [vmem:[#allocation91_spill] sm:$0xff] }
 0x4ba   : > { %v890_v25 = vadd.f32 %v888_v61, %v837_v37  ;;  %v1007_v35 = vsel %vm7751_vm15, %v8201_v34, %v8200_v7  ;;  %v1033_v43 = vsel %vm7751_vm15, %v8203_v42, %v8202_v39  ;;  %v1020_v61 = vsel %vm7751_vm15, %v8205_v56, %v8204_v17  ;;  %v8212_v5 = vld [vmem:[#allocation90_spill] sm:$0xff]  ;;  %v8215_v46 = vld [vmem:[#allocation93_spill] sm:$0xff]  ;;  %v8217_v48 = vld [vmem:[#allocation103_spill] sm:$0xff] }
 0x4bb   : > { %3105 = vrot.lane.b32.xlu1 %v3100_v50, %s8124_s0  ;;  %3103 = vrot.lane.b32.xlu0 %v3099_v41, %s8124_s0  ;;  %v8182_v50 = vld [vmem:[#allocation63_spill] sm:$0xff]  ;;  %v916_v23 = vadd.f32 %v914_v40, %v863_v63  ;;  %v929_v47 = vadd.f32 %v927_v6, %v876_v8  ;;  %v8207_v63 = vld [vmem:[#allocation84_spill] sm:$0xff]  ;;  %vm7754_vm15 = vcmask 621568   ;;  %v8220_v19 = vld [vmem:[#allocation106_spill] sm:$0xff]  ;;  %v3163_v39 = vstv %s6665_s1  ;;  %s6719_s0 = sld [smem:[#allocation2 + $0x19]] }
 0x4bc   : > { %3116 = vrot.lane.b32.xlu2 %v3112_v38, %s8179_s20  ;;  %v901_v49 = vsel %vm7749_vm13, %v8183_v30, %v8182_v50  ;;  %v3113_v38 = vmul.f32 %v6207_v62, %v3111_v14  ;;  %v980_v14 = vsel %vm7750_vm14, %v8195_v1, %v8194_v24  ;;  %v943_v0 = vadd.f32 %v941_v9, %v890_v25  ;;  %v8206_v40 = vld [vmem:[#allocation95_spill] sm:$0xff]  ;;  %v8213_v25 = vld [vmem:[#allocation97_spill] sm:$0xff]  ;;  %v8218_v13 = vld [vmem:[#allocation104_spill] sm:$0xff]  ;;  %s6785_s1 = sld [smem:[#allocation2 + $0x199]] }
 0x4bd   : > { %v6618_v20 = vpop.permute.xlu1 %2832  ;;  %v6630_v57 = vpop.permute.xlu0 %2830  ;;  %v903_v54 = vadd.f32 %v901_v49, %v850_v59  ;;  %vm7752_vm13 = vcmask 637952   ;;  %v982_v30 = vadd.f32 %v980_v14, %v929_v47  ;;  %v969_v49 = vadd.f32 %v967_v11, %v916_v23  ;;  %v8209_v6 = vld [vmem:[#allocation87_spill] sm:$0xff]  ;;  %v8214_v23 = vld [vmem:[#allocation98_spill] sm:$0xff]  ;;  %v8222_v34 = vld [vmem:[#allocation96_spill] sm:$0xff] }
 0x4be   : > { %v6639_v41 = vpop.permute.xlu2 %2897  ;;  %vm7753_vm14 = vcmask 629760   ;;  %v3139_v59 = vmul.f32 %v6207_v62, %v3137_v27  ;;  %v1047_v21 = vsel %vm7752_vm13, %v8207_v63, %v8206_v40  ;;  %v3138_v9 = vmul.f32 %v6213_v33, %v3137_v27  ;;  %v8219_v2 = vld [vmem:[#allocation99_spill] sm:$0xff]  ;;  %v8225_v56 = vld [vmem:[#allocation105_spill] sm:$0xff]  ;;  %v8228_v40 = vld [vmem:[#allocation102_spill] sm:$0xff] }
 0x4bf   : > { %v956_v50 = vadd.f32 %v954_v60, %v903_v54  ;;  %v1035_v29 = vadd.f32 %v1033_v43, %v982_v30  ;;  %v8211_v54 = vld [vmem:[#allocation101_spill] sm:$0xff]  ;;  %v1073_v51 = vsel %vm7752_vm13, %v8214_v23, %v8213_v25  ;;  %v8216_v60 = vld [vmem:[#allocation100_spill] sm:$0xff]  ;;  %v1022_v14 = vadd.f32 %v1020_v61, %v969_v49  ;;  %v8221_v7 = vld [vmem:[#allocation107_spill] sm:$0xff] }
 0x4c0   : > { %v1086_v32 = vsel %vm7752_vm13, %v8212_v5, %v8211_v54  ;;  %v1100_v24 = vsel %vm7753_vm14, %v8216_v60, %v8215_v46  ;;  %v1113_v11 = vsel %vm7753_vm14, %v8218_v13, %v8217_v48  ;;  %v8224_v30 = vld [vmem:[#allocation110_spill] sm:$0xff]  ;;  %v8226_v61 = vld [vmem:[#allocation112_spill] sm:$0xff]  ;;  %v3164_v5 = vmul.f32 %v6213_v33, %v3163_v39 }
 0x4c1   : > { %v1009_v26 = vadd.f32 %v1007_v35, %v956_v50  ;;  %v1126_v35 = vsel %vm7753_vm14, %v8222_v34, %v8221_v7  ;;  %v1075_v42 = vadd.f32 %v1073_v51, %v1022_v14  ;;  %v8223_v50 = vld [vmem:[#allocation109_spill] sm:$0xff]  ;;  %v8232_v25 = vld [vmem:[#allocation118_spill] sm:$0xff]  ;;  %v8233_v51 = vld [vmem:[#allocation119_spill] sm:$0xff] }
 0x4c2   : > { %v1153_v49 = vsel %vm7754_vm15, %v8224_v30, %v8223_v50  ;;  %v8234_v46 = vld [vmem:[#allocation108_spill] sm:$0xff]  ;;  %v8240_v7 = vld [vmem:[#allocation114_spill] sm:$0xff]  ;;  %v8241_v30 = vld [vmem:[#allocation127_spill] sm:$0xff] }
 0x4c3   : > { %3129 = vrot.lane.b32.xlu1 %v3125_v45, %s8179_s20  ;;  %3118 = vrot.lane.b32.xlu0 %v3113_v38, %s8179_s20  ;;  %v996_v45 = vadd.f32 %v994_v58, %v943_v0  ;;  %v8210_v38 = vld [vmem:[#allocation94_spill] sm:$0xff]  ;;  %v1139_v58 = vsel %vm7753_vm14, %v8220_v19, %v8219_v2  ;;  %v1088_v0 = vadd.f32 %v1086_v32, %v1035_v29  ;;  %v8227_v29 = vld [vmem:[#allocation113_spill] sm:$0xff]  ;;  %vm7756_vm14 = vcmask 515072  }
 0x4c4   : > { %3131 = vrot.lane.b32.xlu2 %v3126_v31, %s8179_s20  ;;  %v1060_v8 = vsel %vm7752_vm13, %v8210_v38, %v8209_v6  ;;  %v3150_v31 = vstv %s6645_s7  ;;  %vm7755_vm13 = vcmask 523264   ;;  %v1166_v63 = vsel %vm7754_vm15, %v8228_v40, %v8227_v29  ;;  %v8229_v6 = vld [vmem:[#allocation115_spill] sm:$0xff]  ;;  %v8230_v38 = vld [vmem:[#allocation116_spill] sm:$0xff]  ;;  %v8237_v19 = vld [vmem:[#allocation117_spill] sm:$0xff]  ;;  %s6776_s7 = sld [smem:[#allocation2 + $0x1bb]] }
 0x4c5   : > { %v6674_v10 = vpop.permute.xlu1 %2856  ;;  %v6677_v37 = vpop.permute.xlu0 %2845  ;;  %v3151_v1 = vmul.f32 %v6213_v33, %v3150_v31  ;;  %v1049_v47 = vadd.f32 %v1047_v21, %v996_v45  ;;  %v1062_v27 = vadd.f32 %v1060_v8, %v1009_v26  ;;  %v1141_v17 = vadd.f32 %v1139_v58, %v1088_v0  ;;  %v8238_v58 = vld [vmem:[#allocation124_spill] sm:$0xff]  ;;  %v8239_v0 = vld [vmem:[#allocation125_spill] sm:$0xff]  ;;  %v8249_v40 = vld [vmem:[#allocation134_spill] sm:$0xff] }
 0x4c6   : > { %v6686_v53 = vpop.permute.xlu2 %2921  ;;  %v1179_v26 = vsel %vm7754_vm15, %v8226_v61, %v8225_v56  ;;  %v1128_v21 = vadd.f32 %v1126_v35, %v1075_v42  ;;  %v1192_v8 = vsel %vm7754_vm15, %v8230_v38, %v8229_v6  ;;  %v1206_v60 = vsel %vm7755_vm13, %v8234_v46, %v8233_v51  ;;  %v8246_v61 = vld [vmem:[#allocation131_spill] sm:$0xff] }
 0x4c7   : > { %8208 = vst [vmem:[#allocation11_spill] sm:$0xff] %v6686_v53  ;;  %v1102_v43 = vadd.f32 %v1100_v24, %v1049_v47  ;;  %v8235_v24 = vld [vmem:[#allocation121_spill] sm:$0xff]  ;;  %vm1311_vm15 = vcmask 506880   ;;  %v1194_v2 = vadd.f32 %v1192_v8, %v1141_v17  ;;  %v1245_v34 = vsel %vm7755_vm13, %v8240_v7, %v8239_v0  ;;  %v8245_v17 = vld [vmem:[#allocation130_spill] sm:$0xff] }
 0x4c8   : > { %v1181_v48 = vadd.f32 %v1179_v26, %v1128_v21  ;;  %v3165_v35 = vmul.f32 %v6207_v62, %v3163_v39  ;;  %v8247_v26 = vld [vmem:[#allocation120_spill] sm:$0xff]  ;;  %v8248_v39 = vld [vmem:[#allocation133_spill] sm:$0xff]  ;;  %v3176_v21 = vstv %s6714_s30  ;;  %v1464_v8 = vstv %s6719_s0  ;;  %s6850_s30 = sld [smem:[#allocation2 + $0xbc]] }
 0x4c9   : > { %v1155_v32 = vadd.f32 %v1153_v49, %v1102_v43  ;;  %v8242_v49 = vld [vmem:[#allocation128_spill] sm:$0xff]  ;;  %v1285_v29 = vsel %vm7756_vm14, %v8247_v26, %v8246_v61  ;;  %v1247_v38 = vadd.f32 %v1245_v34, %v1194_v2  ;;  %v1468_v34 = vstv %s6746_s24  ;;  %s6873_s0 = sld [smem:[#allocation2 + $0x13c]]  ;;  %s8308_s24 = smov 96  }
 0x4ca   : > { %v8255_v2 = vld [vmem:[#allocation132_spill] sm:$0xff] }
 0x4cb   : > { %3144 = vrot.lane.b32.xlu1 %v3139_v59, %s8179_s20  ;;  %3142 = vrot.lane.b32.xlu0 %v3138_v9, %s8179_s20  ;;  %v1115_v59 = vadd.f32 %v1113_v11, %v1062_v27  ;;  %v8231_v9 = vld [vmem:[#allocation111_spill] sm:$0xff]  ;;  %v3152_v11 = vmul.f32 %v6207_v62, %v3150_v31  ;;  %v1259_v27 = vsel %vm7756_vm14, %v8238_v58, %v8237_v19  ;;  %v4521_v58 = vld [vmem:[%s4730_s6 + $0x10] sm:$0xff] }
 0x4cc   : > { %3155 = vrot.lane.b32.xlu2 %v3151_v1, %s8179_s20  ;;  %v1219_v23 = vsel %vm7755_vm13, %v8232_v25, %v8231_v9  ;;  %v8236_v1 = vld [vmem:[#allocation122_spill] sm:$0xff]  ;;  %v1208_v43 = vadd.f32 %v1206_v60, %v1155_v32  ;;  %v1272_v31 = vsel %vm7756_vm14, %v8242_v49, %v8241_v30  ;;  %v8250_v9 = vld [vmem:[#allocation129_spill] sm:$0xff]  ;;  %v8251_v25 = vld [vmem:[#allocation136_spill] sm:$0xff] }
 0x4cd   : > { %v6722_v45 = vpop.permute.xlu1 %2871  ;;  %v6734_v54 = vpop.permute.xlu0 %2869  ;;  %v1232_v14 = vsel %vm7755_vm13, %v8236_v1, %v8235_v24  ;;  %v1168_v13 = vadd.f32 %v1166_v63, %v1115_v59  ;;  %v8244_v59 = vld [vmem:[#allocation123_spill] sm:$0xff]  ;;  %v1312_v63 = vsel %vm1311_vm15, %v8249_v40, %v8248_v39  ;;  %vm1364_vm13 = vcmask 498688   ;;  %v8260_v49 = vld [vmem:[#allocation142_spill] sm:$0xff]  ;;  %v8263_v39 = vld [vmem:[#allocation141_spill] sm:$0xff] }
 0x4ce   : > { %v6748_v47 = vpop.permute.xlu2 %2936  ;;  %v1234_v50 = vadd.f32 %v1232_v14, %v1181_v48  ;;  %v1298_v56 = vsel %vm7756_vm14, %v8245_v17, %v8244_v59  ;;  %v1261_v6 = vadd.f32 %v1259_v27, %v1208_v43  ;;  %v3178_v1 = vmul.f32 %v6207_v62, %v3176_v21  ;;  %v8252_v14 = vld [vmem:[#allocation137_spill] sm:$0xff]  ;;  %v8253_v48 = vld [vmem:[#allocation126_spill] sm:$0xff]  ;;  %v8258_v43 = vld [vmem:[#allocation140_spill] sm:$0xff] }
 0x4cf   : > { %v1221_v42 = vadd.f32 %v1219_v23, %v1168_v13  ;;  %v1338_v23 = vsel %vm1311_vm15, %v8251_v25, %v8250_v9  ;;  %v1300_v51 = vadd.f32 %v1298_v56, %v1247_v38  ;;  %v1325_v13 = vsel %vm1311_vm15, %v8253_v48, %v8252_v14  ;;  %v8259_v30 = vld [vmem:[#allocation135_spill] sm:$0xff]  ;;  %v8261_v59 = vld [vmem:[#allocation145_spill] sm:$0xff]  ;;  %v8262_v17 = vld [vmem:[#allocation146_spill] sm:$0xff] }
 0x4d0   : > { %v1287_v46 = vadd.f32 %v1285_v29, %v1234_v50  ;;  %v1314_v60 = vadd.f32 %v1312_v63, %v1261_v6  ;;  %vm1417_vm14 = vcmask 490496   ;;  %v1465_v27 = vmul.f32 %v4521_v58, %v1464_v8  ;;  %v8264_v40 = vld [vmem:[#allocation148_spill] sm:$0xff]  ;;  %v8265_v6 = vld [vmem:[#allocation149_spill] sm:$0xff]  ;;  %v8266_v38 = vld [vmem:[#allocation138_spill] sm:$0xff] }
 0x4d1   : > { %v1274_v32 = vadd.f32 %v1272_v31, %v1221_v42  ;;  %v3189_v62 = vstv %s6751_s15  ;;  %v8257_v42 = vld [vmem:[#allocation139_spill] sm:$0xff]  ;;  %v1378_v31 = vsel %vm1364_vm13, %v8260_v49, %v8259_v30  ;;  %v1391_v56 = vsel %vm1364_vm13, %v8262_v17, %v8261_v59  ;;  %v8268_v25 = vld [vmem:[#allocation152_spill] sm:$0xff]  ;;  %s6928_s15 = sld [smem:[#allocation2 + $0x1bc]] }
 0x4d2   : > { %v1340_v7 = vadd.f32 %v1338_v23, %v1287_v46  ;;  %v1351_v50 = vsel %vm1311_vm15, %v8258_v43, %v8257_v42  ;;  %v3190_v61 = vmul.f32 %v6213_v33, %v3189_v62  ;;  %v1418_v63 = vsel %vm1417_vm14, %v8264_v40, %v8263_v39  ;;  %v8267_v9 = vld [vmem:[#allocation151_spill] sm:$0xff]  ;;  %v8273_v43 = vld [vmem:[#allocation154_spill] sm:$0xff] }
 0x4d3   : > { %3168 = vrot.lane.b32.xlu1 %v3164_v5, %s8243_s23  ;;  %3157 = vrot.lane.b32.xlu0 %v3152_v11, %s8179_s20  ;;  %v8254_v11 = vld [vmem:[#allocation143_spill] sm:$0xff]  ;;  %v1327_v26 = vadd.f32 %v1325_v13, %v1274_v32  ;;  %v1404_v8 = vsel %vm1364_vm13, %v8266_v38, %v8265_v6  ;;  %v1431_v23 = vsel %vm1417_vm14, %v8268_v25, %v8267_v9  ;;  %s6828_s20 = sld [smem:[#allocation2 + $0x3c]]  ;;  %v8277_v39 = vld [vmem:[#allocation158_spill] sm:$0xff]  ;;  %v8280_v25 = vld [vmem:[#allocation153_spill] sm:$0xff] }
 0x4d4   : > { %3170 = vrot.lane.b32.xlu2 %v3165_v35, %s8243_s23  ;;  %v1365_v19 = vsel %vm1364_vm13, %v8255_v2, %v8254_v11  ;;  %v3177_v35 = vmul.f32 %v6213_v33, %v3176_v21  ;;  %v1472_v21 = vstv %s6763_s29  ;;  %v8269_v46 = vld [vmem:[#allocation155_spill] sm:$0xff]  ;;  %v8270_v33 = vld [vmem:[#allocation144_spill] sm:$0xff]  ;;  %v1353_v14 = vadd.f32 %v1351_v50, %v1300_v51  ;;  %s6961_s29 = sld [smem:[#allocation2 + $0x3d]] }
 0x4d5   : > { %v6780_v5 = vpop.permute.xlu1 %2895  ;;  %v6788_v24 = vpop.permute.xlu0 %2884  ;;  %v1367_v29 = vadd.f32 %v1365_v19, %v1314_v60  ;;  %v1444_v32 = vsel %vm1417_vm14, %v8270_v33, %v8269_v46  ;;  %v3202_v60 = vstv %s6776_s7  ;;  %v1380_v48 = vadd.f32 %v1378_v31, %v1327_v26  ;;  %v8272_v42 = vld [vmem:[#allocation147_spill] sm:$0xff]  ;;  %v6847_v26 = vld [vmem:[%s4730_s6 + $0x21] sm:$0xff]  ;;  %s7042_s7 = sld [smem:[#allocation2 + $0x13d]] }
 0x4d6   : > { %v6798_v0 = vpop.permute.xlu2 %2960  ;;  %v1393_v13 = vadd.f32 %v1391_v56, %v1340_v7  ;;  %v1476_v19 = vstv %s6785_s1  ;;  %v1457_v30 = vsel %vm1417_vm14, %v8273_v43, %v8272_v42  ;;  %v1473_v49 = vmul.f32 %v4521_v58, %v1472_v21  ;;  %v6841_v7 = vld [vmem:[%s4730_s6 + $0x20] sm:$0xff]  ;;  %v8279_v21 = vld [vmem:[#allocation150_spill] sm:$0xff]  ;;  %s8381_s1 = smov 95  }
 0x4d7   : > { %8256 = vst [vmem:[#allocation8_spill] sm:$0xff] %v6798_v0  ;;  %v1420_v2 = vadd.f32 %v1418_v63, %v1367_v29  ;;  %v1406_v59 = vadd.f32 %v1404_v8, %v1353_v14  ;;  %v1433_v17 = vadd.f32 %v1431_v23, %v1380_v48  ;;  %v1477_v31 = vmul.f32 %v4521_v58, %v1476_v19  ;;  %v8278_v63 = vld [vmem:[#allocation161_spill] sm:$0xff]  ;;  %v8281_v23 = vld [vmem:[#allocation160_spill] sm:$0xff]  ;;  %v8284_v14 = vld [vmem:[#allocation159_spill] sm:$0xff] }
 0x4d8   : > { %v1446_v51 = vadd.f32 %v1444_v32, %v1393_v13  ;;  %v3191_v29 = vmul.f32 %v6847_v26, %v3189_v62  ;;  %v1502_v6 = vsel %vm198_vm0, %v8279_v21, %v8278_v63  ;;  %v3204_v38 = vmul.f32 %v6847_v26, %v3202_v60  ;;  %v8282_v62 = vld [vmem:[#allocation163_spill] sm:$0xff]  ;;  %v8283_v33 = vld [vmem:[#allocation164_spill] sm:$0xff]  ;;  %v8285_v48 = vld [vmem:[#allocation166_spill] sm:$0xff] }
 0x4d9   : > { %v1459_v56 = vadd.f32 %v1457_v30, %v1406_v59  ;;  %v1466_v8 = vadd.f32 %v1465_v27, %v1420_v2  ;;  %v1515_v46 = vsel %vm198_vm0, %v8281_v23, %v8280_v25  ;;  %v1528_v32 = vsel %vm198_vm0, %v8283_v33, %v8282_v62  ;;  %v8286_v19 = vld [vmem:[#allocation167_spill] sm:$0xff]  ;;  %v8287_v42 = vld [vmem:[#allocation156_spill] sm:$0xff]  ;;  %v8288_v30 = vld [vmem:[#allocation169_spill] sm:$0xff] }
 0x4da   : > { %v1474_v9 = vadd.f32 %v1473_v49, %v1446_v51  ;;  %v1554_v13 = vsel %vm251_vm1, %v8285_v48, %v8284_v14  ;;  %v1541_v27 = vsel %vm251_vm1, %v8287_v42, %v8286_v19  ;;  %v8289_v49 = vld [vmem:[#allocation170_spill] sm:$0xff]  ;;  %v8292_v63 = vld [vmem:[#allocation173_spill] sm:$0xff]  ;;  %v8295_v25 = vld [vmem:[#allocation176_spill] sm:$0xff] }
 0x4db   : > { %3183 = vrot.lane.b32.xlu1 %v3178_v1, %s8243_s23  ;;  %v1469_v1 = vmul.f32 %v4521_v58, %v1468_v34  ;;  %3181 = vrot.lane.b32.xlu0 %v3177_v35, %s8243_s23  ;;  %v3203_v34 = vmul.f32 %v6841_v7, %v3202_v60  ;;  %v3215_v60 = vstv %s6828_s20  ;;  %v1567_v59 = vsel %vm251_vm1, %v8289_v49, %v8288_v30  ;;  %v8293_v21 = vld [vmem:[#allocation162_spill] sm:$0xff]  ;;  %v8297_v62 = vld [vmem:[#allocation168_spill] sm:$0xff]  ;;  %v8298_v14 = vld [vmem:[#allocation181_spill] sm:$0xff]  ;;  %s7075_s20 = sld [smem:[#allocation2 + $0x1bd]] }
 0x4dc   : > { %3194 = vrot.lane.b32.xlu2 %v3190_v61, %s8243_s23  ;;  %v8276_v61 = vld [vmem:[#allocation157_spill] sm:$0xff]  ;;  %v1517_v51 = vadd.f32 %v1515_v46, %v1474_v9  ;;  %v8294_v9 = vld [vmem:[#allocation175_spill] sm:$0xff]  ;;  %v8299_v48 = vld [vmem:[#allocation182_spill] sm:$0xff]  ;;  %v3216_v42 = vmul.f32 %v6841_v7, %v3215_v60 }
 0x4dd   : > { %v6831_v11 = vpop.permute.xlu1 %2910  ;;  %v6838_v50 = vpop.permute.xlu0 %2908  ;;  %v1489_v40 = vsel %vm198_vm0, %v8277_v39, %v8276_v61  ;;  %v1470_v58 = vadd.f32 %v1469_v1, %v1433_v17  ;;  %v1478_v1 = vadd.f32 %v1477_v31, %v1459_v56  ;;  %v8291_v61 = vld [vmem:[#allocation172_spill] sm:$0xff]  ;;  %v1580_v31 = vsel %vm251_vm1, %v8293_v21, %v8292_v63  ;;  %v8296_v46 = vld [vmem:[#allocation179_spill] sm:$0xff]  ;;  %v8302_v30 = vld [vmem:[#allocation177_spill] sm:$0xff] }
 0x4de   : > { %8271 = vst [vmem:[#allocation13_spill] sm:$0xff] %v6831_v11  ;;  %v6844_v35 = vpop.permute.xlu2 %2975  ;;  %v1491_v2 = vadd.f32 %v1489_v40, %v1466_v8  ;;  %v1606_v23 = vsel %vm304_vm2, %v8295_v25, %v8294_v9  ;;  %v1619_v33 = vsel %vm304_vm2, %v8297_v62, %v8296_v46  ;;  %v8303_v49 = vld [vmem:[#allocation184_spill] sm:$0xff]  ;;  %v8309_v9 = vld [vmem:[#allocation187_spill] sm:$0xff] }
 0x4df   : > { %8274 = vst [vmem:[#allocation14_spill] sm:$0xff] %v6838_v50  ;;  %v1504_v43 = vadd.f32 %v1502_v6, %v1470_v58  ;;  %v1530_v56 = vadd.f32 %v1528_v32, %v1478_v1  ;;  %v1569_v58 = vadd.f32 %v1567_v59, %v1517_v51  ;;  %v8300_v1 = vld [vmem:[#allocation171_spill] sm:$0xff]  ;;  %v1671_v59 = vsel %vm357_vm3, %v8303_v49, %v8302_v30  ;;  %v8304_v51 = vld [vmem:[#allocation185_spill] sm:$0xff]  ;;  %v8310_v25 = vld [vmem:[#allocation188_spill] sm:$0xff] }
 0x4e0   : > { %8275 = vst [vmem:[#allocation10_spill] sm:$0xff] %v6844_v35  ;;  %v1543_v6 = vadd.f32 %v1541_v27, %v1491_v2  ;;  %v3228_v27 = vstv %s6850_s30  ;;  %v8301_v2 = vld [vmem:[#allocation178_spill] sm:$0xff]  ;;  %v1684_v46 = vsel %vm357_vm3, %v8310_v25, %v8309_v9  ;;  %v8311_v62 = vld [vmem:[#allocation183_spill] sm:$0xff]  ;;  %v8320_v25 = vld [vmem:[#allocation200_spill] sm:$0xff]  ;;  %s7101_s30 = sld [smem:[#allocation2 + $0x3e]] }
 0x4e1   : > { %v1556_v40 = vadd.f32 %v1554_v13, %v1504_v43  ;;  %v1582_v19 = vadd.f32 %v1580_v31, %v1530_v56  ;;  %v1632_v43 = vsel %vm304_vm2, %v8301_v2, %v8300_v1  ;;  %v3229_v63 = vmul.f32 %v6841_v7, %v3228_v27  ;;  %v8306_v56 = vld [vmem:[#allocation191_spill] sm:$0xff]  ;;  %v8313_v1 = vld [vmem:[#allocation193_spill] sm:$0xff]  ;;  %v8314_v2 = vld [vmem:[#allocation194_spill] sm:$0xff] }
 0x4e2   : > { %v1621_v21 = vadd.f32 %v1619_v33, %v1569_v58  ;;  %v3241_v58 = vstv %s6873_s0  ;;  %v8319_v9 = vld [vmem:[#allocation199_spill] sm:$0xff]  ;;  %s7141_s0 = sld [smem:[#allocation2 + $0x132]]  ;;  %v8444_v50 = vld [vmem:[#allocation282_spill] sm:$0xff]  ;;  %v8446_v11 = vld [vmem:[#allocation312_spill] sm:$0xff] }
 0x4e3   : > { %3207 = vrot.lane.b32.xlu1 %v3203_v34, %s8243_s23  ;;  %3196 = vrot.lane.b32.xlu0 %v3191_v29, %s8243_s23  ;;  %v8290_v34 = vld [vmem:[#allocation165_spill] sm:$0xff]  ;;  %v3217_v29 = vmul.f32 %v6847_v26, %v3215_v60  ;;  %v8307_v60 = vld [vmem:[#allocation180_spill] sm:$0xff] }
 0x4e4   : > { %v1593_v39 = vsel %vm304_vm2, %v8291_v61, %v8290_v34  ;;  %3209 = vrot.lane.b32.xlu2 %v3204_v38, %s8243_s23  ;;  %v1645_v38 = vsel %vm357_vm3, %v8299_v48, %v8298_v14  ;;  %v8305_v34 = vld [vmem:[#allocation174_spill] sm:$0xff]  ;;  %v1673_v33 = vadd.f32 %v1671_v59, %v1621_v21  ;;  %s6987_s23 = sld [smem:[#allocation2 + $0xbd]] }
 0x4e5   : > { %v6879_v17 = vpop.permute.xlu1 %2934  ;;  %v6888_v8 = vpop.permute.xlu0 %2923  ;;  %v1595_v13 = vadd.f32 %v1593_v39, %v1543_v6  ;;  %v1658_v61 = vsel %vm357_vm3, %v8305_v34, %v8304_v51  ;;  %v1608_v39 = vadd.f32 %v1606_v23, %v1556_v40  ;;  %v1697_v6 = vsel %vm410_vm4, %v8307_v60, %v8306_v56  ;;  %v8312_v14 = vld [vmem:[#allocation190_spill] sm:$0xff]  ;;  %v8317_v34 = vld [vmem:[#allocation197_spill] sm:$0xff] }
 0x4e6   : > { %v6900_v32 = vpop.permute.xlu2 %2999  ;;  %v1710_v48 = vsel %vm410_vm4, %v8312_v14, %v8311_v62  ;;  %v1723_v40 = vsel %vm410_vm4, %v8314_v2, %v8313_v1  ;;  %v1634_v23 = vadd.f32 %v1632_v43, %v1582_v19  ;;  %v8318_v56 = vld [vmem:[#allocation186_spill] sm:$0xff]  ;;  %v1762_v62 = vsel %vm463_vm5, %v8320_v25, %v8319_v9  ;;  %v8321_v19 = vld [vmem:[#allocation203_spill] sm:$0xff]  ;;  %v8322_v43 = vld [vmem:[#allocation192_spill] sm:$0xff] }
 0x4e7   : > { %v1647_v31 = vadd.f32 %v1645_v38, %v1595_v13  ;;  %v1660_v38 = vadd.f32 %v1658_v61, %v1608_v39  ;;  %v8315_v13 = vld [vmem:[#allocation189_spill] sm:$0xff]  ;;  %v1736_v60 = vsel %vm410_vm4, %v8318_v56, %v8317_v34  ;;  %v1775_v59 = vsel %vm463_vm5, %v8322_v43, %v8321_v19  ;;  %v8323_v14 = vld [vmem:[#allocation195_spill] sm:$0xff]  ;;  %v8324_v1 = vld [vmem:[#allocation202_spill] sm:$0xff] }
 0x4e8   : > { %v1686_v61 = vadd.f32 %v1684_v46, %v1634_v23  ;;  %v1788_v2 = vsel %vm463_vm5, %v8324_v1, %v8323_v14  ;;  %v8327_v56 = vld [vmem:[#allocation201_spill] sm:$0xff]  ;;  %v8328_v9 = vld [vmem:[#allocation208_spill] sm:$0xff]  ;;  %v8332_v25 = vld [vmem:[#allocation215_spill] sm:$0xff] }
 0x4e9   : > { %v1699_v51 = vadd.f32 %v1697_v6, %v1647_v31  ;;  %v1712_v39 = vadd.f32 %v1710_v48, %v1660_v38  ;;  %v3242_v31 = vmul.f32 %v6841_v7, %v3241_v58  ;;  %v8330_v38 = vld [vmem:[#allocation209_spill] sm:$0xff]  ;;  %v8333_v19 = vld [vmem:[#allocation204_spill] sm:$0xff]  ;;  %v8335_v1 = vld [vmem:[#allocation218_spill] sm:$0xff] }
 0x4ea   : > { %v1738_v48 = vadd.f32 %v1736_v60, %v1686_v61  ;;  %v1853_v43 = vsel %vm569_vm7, %v8333_v19, %v8332_v25  ;;  %v8334_v14 = vld [vmem:[#allocation217_spill] sm:$0xff]  ;;  %v3243_v60 = vmul.f32 %v6847_v26, %v3241_v58  ;;  %v8342_v19 = vld [vmem:[#allocation227_spill] sm:$0xff] }
 0x4eb   : > { %3222 = vrot.lane.b32.xlu1 %v3217_v29, %s8308_s24  ;;  %v8316_v29 = vld [vmem:[#allocation196_spill] sm:$0xff]  ;;  %3220 = vrot.lane.b32.xlu0 %v3216_v42, %s8308_s24  ;;  %v1725_v42 = vadd.f32 %v1723_v40, %v1673_v33  ;;  %v1764_v40 = vadd.f32 %v1762_v62, %v1712_v39  ;;  %v3230_v33 = vmul.f32 %v6847_v26, %v3228_v27  ;;  %v8336_v27 = vld [vmem:[#allocation211_spill] sm:$0xff] }
 0x4ec   : > { %v1749_v30 = vsel %vm463_vm5, %v8316_v29, %v8315_v13  ;;  %3233 = vrot.lane.b32.xlu2 %v3229_v63, %s8308_s24  ;;  %v8325_v13 = vld [vmem:[#allocation205_spill] sm:$0xff]  ;;  %v8326_v29 = vld [vmem:[#allocation206_spill] sm:$0xff]  ;;  %v1827_v63 = vsel %vm516_vm6, %v8328_v9, %v8327_v56  ;;  %v1790_v62 = vadd.f32 %v1788_v2, %v1738_v48  ;;  %v8337_v39 = vld [vmem:[#allocation212_spill] sm:$0xff] }
 0x4ed   : > { %v6934_v49 = vpop.permute.xlu1 %2949  ;;  %v6946_v21 = vpop.permute.xlu0 %2947  ;;  %v1751_v6 = vadd.f32 %v1749_v30, %v1699_v51  ;;  %v1801_v34 = vsel %vm516_vm6, %v8326_v29, %v8325_v13  ;;  %v1777_v23 = vadd.f32 %v1775_v59, %v1725_v42  ;;  %v8331_v30 = vld [vmem:[#allocation198_spill] sm:$0xff]  ;;  %v1879_v13 = vsel %vm569_vm7, %v8335_v1, %v8334_v14  ;;  %v8338_v29 = vld [vmem:[#allocation207_spill] sm:$0xff]  ;;  %v8343_v14 = vld [vmem:[#allocation216_spill] sm:$0xff] }
 0x4ee   : > { %v6958_v46 = vpop.permute.xlu2 %3014  ;;  %v1814_v51 = vsel %vm516_vm6, %v8331_v30, %v8330_v38  ;;  %v1840_v42 = vsel %vm516_vm6, %v8337_v39, %v8336_v27  ;;  %v8339_v56 = vld [vmem:[#allocation214_spill] sm:$0xff]  ;;  %v8340_v38 = vld [vmem:[#allocation213_spill] sm:$0xff]  ;;  %v8341_v30 = vld [vmem:[#allocation220_spill] sm:$0xff]  ;;  %v1931_v58 = vsel %vm622_vm8, %v8343_v14, %v8342_v19 }
 0x4ef   : > { %8329 = vst [vmem:[#allocation16_spill] sm:$0xff] %v6958_v46  ;;  %v1803_v59 = vadd.f32 %v1801_v34, %v1751_v6  ;;  %v1829_v61 = vadd.f32 %v1827_v63, %v1777_v23  ;;  %v1866_v9 = vsel %vm569_vm7, %v8339_v56, %v8338_v29  ;;  %v1905_v25 = vsel %vm622_vm8, %v8341_v30, %v8340_v38  ;;  %v8344_v48 = vld [vmem:[#allocation221_spill] sm:$0xff]  ;;  %v8347_v39 = vld [vmem:[#allocation223_spill] sm:$0xff]  ;;  %v8348_v29 = vld [vmem:[#allocation224_spill] sm:$0xff] }
 0x4f0   : > { %v3254_v6 = vstv %s6928_s15  ;;  %v1816_v2 = vadd.f32 %v1814_v51, %v1764_v40  ;;  %v1842_v27 = vadd.f32 %v1840_v42, %v1790_v62  ;;  %v1918_v56 = vsel %vm622_vm8, %v8348_v29, %v8347_v39  ;;  %v8349_v38 = vld [vmem:[#allocation225_spill] sm:$0xff]  ;;  %v8350_v30 = vld [vmem:[#allocation232_spill] sm:$0xff]  ;;  %v8352_v62 = vld [vmem:[#allocation219_spill] sm:$0xff]  ;;  %s7191_s15 = sld [smem:[#allocation2 + $0x13e]] }
 0x4f1   : > { %v1855_v34 = vadd.f32 %v1853_v43, %v1803_v59  ;;  %v1881_v63 = vadd.f32 %v1879_v13, %v1829_v61  ;;  %v1983_v40 = vsel %vm7759_vm9, %v8350_v30, %v8349_v38  ;;  %v8353_v42 = vld [vmem:[#allocation226_spill] sm:$0xff]  ;;  %v8354_v14 = vld [vmem:[#allocation229_spill] sm:$0xff]  ;;  %v8360_v38 = vld [vmem:[#allocation235_spill] sm:$0xff] }
 0x4f2   : > { %v1868_v51 = vadd.f32 %v1866_v9, %v1816_v2  ;;  %v1944_v19 = vsel %vm622_vm8, %v8353_v42, %v8352_v62  ;;  %v8356_v39 = vld [vmem:[#allocation241_spill] sm:$0xff]  ;;  %v8357_v29 = vld [vmem:[#allocation242_spill] sm:$0xff]  ;;  %v3255_v2 = vmul.f32 %v6841_v7, %v3254_v6  ;;  %v8361_v30 = vld [vmem:[#allocation236_spill] sm:$0xff] }
 0x4f3   : > { %3246 = vrot.lane.b32.xlu1 %v3242_v31, %s8308_s24  ;;  %v8345_v31 = vld [vmem:[#allocation210_spill] sm:$0xff]  ;;  %3235 = vrot.lane.b32.xlu0 %v3230_v33, %s8308_s24  ;;  %v1907_v43 = vadd.f32 %v1905_v25, %v1855_v34  ;;  %v1933_v13 = vadd.f32 %v1931_v58, %v1881_v63  ;;  %v3256_v33 = vmul.f32 %v6847_v26, %v3254_v6  ;;  %v3267_v34 = vstv %s6961_s29  ;;  %v8358_v63 = vld [vmem:[#allocation233_spill] sm:$0xff]  ;;  %v8362_v42 = vld [vmem:[#allocation251_spill] sm:$0xff]  ;;  %s7199_s29 = sld [smem:[#allocation2 + $0x32]] }
 0x4f4   : > { %v1892_v23 = vsel %vm569_vm7, %v8345_v31, %v8344_v48  ;;  %3248 = vrot.lane.b32.xlu2 %v3243_v60, %s8308_s24  ;;  %v8355_v48 = vld [vmem:[#allocation230_spill] sm:$0xff]  ;;  %v2035_v60 = vsel %vm7757_vm10, %v8357_v29, %v8356_v39  ;;  %v1920_v25 = vadd.f32 %v1918_v56, %v1868_v51  ;;  %v1996_v62 = vsel %vm7759_vm9, %v8361_v30, %v8360_v38  ;;  %v8368_v38 = vld [vmem:[#allocation245_spill] sm:$0xff] }
 0x4f5   : > { %v6993_v1 = vpop.permute.xlu1 %2973  ;;  %v7002_v59 = vpop.permute.xlu0 %2962  ;;  %v1894_v61 = vadd.f32 %v1892_v23, %v1842_v27  ;;  %v1957_v31 = vsel %vm7759_vm9, %v8355_v48, %v8354_v14  ;;  %v1985_v58 = vadd.f32 %v1983_v40, %v1933_v13  ;;  %v8359_v23 = vld [vmem:[#allocation222_spill] sm:$0xff]  ;;  %v8363_v14 = vld [vmem:[#allocation240_spill] sm:$0xff]  ;;  %v3268_v39 = vmul.f32 %v6841_v7, %v3267_v34  ;;  %v8364_v40 = vld [vmem:[#allocation239_spill] sm:$0xff] }
 0x4f6   : > { %8346 = vst [vmem:[#allocation17_spill] sm:$0xff] %v6993_v1  ;;  %v7014_v9 = vpop.permute.xlu2 %3038  ;;  %v1970_v27 = vsel %vm7759_vm9, %v8359_v23, %v8358_v63  ;;  %v2087_v48 = vsel %vm7758_vm11, %v8363_v14, %v8362_v42  ;;  %v1959_v51 = vadd.f32 %v1957_v31, %v1907_v43  ;;  %v8365_v13 = vld [vmem:[#allocation228_spill] sm:$0xff]  ;;  %v8366_v63 = vld [vmem:[#allocation231_spill] sm:$0xff]  ;;  %v8367_v23 = vld [vmem:[#allocation238_spill] sm:$0xff]  ;;  %v3280_v43 = vstv %s6987_s23  ;;  %s7206_s23 = sld [smem:[#allocation2 + $0x1b2]] }
 0x4f7   : > { %8351 = vst [vmem:[#allocation9_spill] sm:$0xff] %v7002_v59  ;;  %v1946_v56 = vadd.f32 %v1944_v19, %v1894_v61  ;;  %v2009_v6 = vsel %vm7757_vm10, %v8365_v13, %v8364_v40  ;;  %v2037_v29 = vadd.f32 %v2035_v60, %v1985_v58  ;;  %v2022_v46 = vsel %vm7757_vm10, %v8367_v23, %v8366_v63  ;;  %v8369_v30 = vld [vmem:[#allocation234_spill] sm:$0xff]  ;;  %v8370_v42 = vld [vmem:[#allocation249_spill] sm:$0xff]  ;;  %v8371_v14 = vld [vmem:[#allocation256_spill] sm:$0xff] }
 0x4f8   : > { %v2048_v0 = vsel %vm7757_vm10, %v8369_v30, %v8368_v38  ;;  %v2139_v61 = vsel %vm7760_vm12, %v8371_v14, %v8370_v42  ;;  %v1972_v19 = vadd.f32 %v1970_v27, %v1920_v25  ;;  %v8372_v60 = vld [vmem:[#allocation237_spill] sm:$0xff]  ;;  %v8373_v58 = vld [vmem:[#allocation244_spill] sm:$0xff]  ;;  %v2011_v63 = vadd.f32 %v2009_v6, %v1959_v51  ;;  %v8374_v23 = vld [vmem:[#allocation247_spill] sm:$0xff] }
 0x4f9   : > { %v1998_v31 = vadd.f32 %v1996_v62, %v1946_v56  ;;  %v2089_v40 = vadd.f32 %v2087_v48, %v2037_v29  ;;  %v8375_v38 = vld [vmem:[#allocation248_spill] sm:$0xff]  ;;  %v8376_v42 = vld [vmem:[#allocation243_spill] sm:$0xff]  ;;  %v8377_v14 = vld [vmem:[#allocation250_spill] sm:$0xff]  ;;  %vm8380_vm10 = vcmask 752640   ;;  %v3281_v51 = vmul.f32 %v6841_v7, %v3280_v43 }
 0x4fa   : > { %v2074_v30 = vsel %vm7758_vm11, %v8375_v38, %v8374_v23  ;;  %v2100_v59 = vsel %vm7758_vm11, %v8377_v14, %v8376_v42  ;;  %v8378_v25 = vld [vmem:[#allocation265_spill] sm:$0xff]  ;;  %v8379_v27 = vld [vmem:[#allocation266_spill] sm:$0xff]  ;;  %v2024_v48 = vadd.f32 %v2022_v46, %v1972_v19  ;;  %v8386_v1 = vld [vmem:[#allocation275_spill] sm:$0xff] }
 0x4fb   : > { %3261 = vrot.lane.b32.xlu1 %v3256_v33, %s8308_s24  ;;  %v2061_v33 = vsel %vm7758_vm11, %v8373_v58, %v8372_v60  ;;  %3259 = vrot.lane.b32.xlu0 %v3255_v2, %s8308_s24  ;;  %v2191_v62 = vsel %vm8380_vm10, %v8379_v27, %v8378_v25  ;;  %v2050_v56 = vadd.f32 %v2048_v0, %v1998_v31  ;;  %v8382_v60 = vld [vmem:[#allocation253_spill] sm:$0xff]  ;;  %v8383_v58 = vld [vmem:[#allocation254_spill] sm:$0xff]  ;;  %v8387_v25 = vld [vmem:[#allocation264_spill] sm:$0xff]  ;;  %vm8388_vm10 = vcmask 654336   ;;  %s7158_s24 = sld [smem:[#allocation2 + $0xbe]] }
 0x4fc   : > { %3272 = vrot.lane.b32.xlu2 %v3268_v39, %s8381_s1  ;;  %v2141_v2 = vadd.f32 %v2139_v61, %v2089_v40  ;;  %v2063_v6 = vadd.f32 %v2061_v33, %v2011_v63  ;;  %v2113_v23 = vsel %vm7760_vm12, %v8383_v58, %v8382_v60  ;;  %v8384_v38 = vld [vmem:[#allocation257_spill] sm:$0xff]  ;;  %v8385_v42 = vld [vmem:[#allocation246_spill] sm:$0xff]  ;;  %v2243_v39 = vsel %vm8388_vm10, %v8387_v25, %v8386_v1  ;;  %v8389_v33 = vld [vmem:[#allocation259_spill] sm:$0xff] }
 0x4fd   : > { %v7048_v13 = vpop.permute.xlu1 %2988  ;;  %v7060_v29 = vpop.permute.xlu0 %2986  ;;  %v2126_v14 = vsel %vm7760_vm12, %v8385_v42, %v8384_v38  ;;  %v2076_v0 = vadd.f32 %v2074_v30, %v2024_v48  ;;  %v2102_v61 = vadd.f32 %v2100_v59, %v2050_v56  ;;  %v3269_v31 = vmul.f32 %v6847_v26, %v3267_v34  ;;  %v8390_v40 = vld [vmem:[#allocation260_spill] sm:$0xff]  ;;  %v8391_v27 = vld [vmem:[#allocation263_spill] sm:$0xff]  ;;  %v8394_v38 = vld [vmem:[#allocation273_spill] sm:$0xff] }
 0x4fe   : > { %v7072_v46 = vpop.permute.xlu2 %3053  ;;  %v2193_v19 = vadd.f32 %v2191_v62, %v2141_v2  ;;  %v2152_v63 = vsel %vm7760_vm12, %v8390_v40, %v8389_v33  ;;  %v8392_v60 = vld [vmem:[#allocation252_spill] sm:$0xff]  ;;  %vm8393_vm11 = vcmask 752640   ;;  %vm8396_vm10 = vcmask 646144   ;;  %v8397_v48 = vld [vmem:[#allocation255_spill] sm:$0xff]  ;;  %v8398_v34 = vld [vmem:[#allocation262_spill] sm:$0xff] }
 0x4ff   : > { %v2165_v58 = vsel %vm8393_vm11, %v8392_v60, %v8391_v27  ;;  %v8395_v1 = vld [vmem:[#allocation280_spill] sm:$0xff]  ;;  %v3282_v59 = vmul.f32 %v6847_v26, %v3280_v43  ;;  %v2115_v30 = vadd.f32 %v2113_v23, %v2063_v6  ;;  %v2128_v62 = vadd.f32 %v2126_v14, %v2076_v0  ;;  %vm8399_vm9 = vmmov %vm8393_vm11  ;;  %v8400_v25 = vld [vmem:[#allocation261_spill] sm:$0xff] }
 0x500   : > { %v2295_v42 = vsel %vm8396_vm10, %v8395_v1, %v8394_v38  ;;  %v2178_v56 = vsel %vm8399_vm9, %v8398_v34, %v8397_v48  ;;  %v2245_v2 = vadd.f32 %v2243_v39, %v2193_v19  ;;  %v8401_v33 = vld [vmem:[#allocation268_spill] sm:$0xff]  ;;  %vm8402_vm12 = vcmask 654336   ;;  %v8403_v27 = vld [vmem:[#allocation269_spill] sm:$0xff]  ;;  %v8404_v60 = vld [vmem:[#allocation258_spill] sm:$0xff] }
 0x501   : > { %v2217_v40 = vsel %vm8402_vm12, %v8401_v33, %v8400_v25  ;;  %vm8405_vm11 = vmmov %vm8399_vm9  ;;  %v8406_v38 = vld [vmem:[#allocation289_spill] sm:$0xff]  ;;  %v8407_v1 = vld [vmem:[#allocation290_spill] sm:$0xff]  ;;  %vm8408_vm10 = vcmask 637952   ;;  %v3293_v6 = vstv %s7042_s7  ;;  %v2154_v23 = vadd.f32 %v2152_v63, %v2102_v61  ;;  %s8475_s7 = smov 94  }
 0x502   : > { %v2204_v35 = vsel %vm8405_vm11, %v8404_v60, %v8403_v27  ;;  %v2347_v43 = vsel %vm8408_vm10, %v8407_v1, %v8406_v38  ;;  %v2167_v14 = vadd.f32 %v2165_v58, %v2115_v30  ;;  %v8409_v39 = vld [vmem:[#allocation271_spill] sm:$0xff]  ;;  %v8410_v0 = vld [vmem:[#allocation272_spill] sm:$0xff]  ;;  %vm8411_vm9 = vmmov %vm8402_vm12  ;;  %v2297_v19 = vadd.f32 %v2295_v42, %v2245_v2 }
 0x503   : > { %3285 = vrot.lane.b32.xlu1 %v3281_v51, %s8381_s1  ;;  %v2230_v51 = vsel %vm8411_vm9, %v8410_v0, %v8409_v39  ;;  %3274 = vrot.lane.b32.xlu0 %v3269_v31, %s8381_s1  ;;  %v2180_v34 = vadd.f32 %v2178_v56, %v2128_v62  ;;  %v8413_v25 = vld [vmem:[#allocation267_spill] sm:$0xff]  ;;  %v8414_v33 = vld [vmem:[#allocation274_spill] sm:$0xff]  ;;  %vm8415_vm12 = vmmov %vm8411_vm9  ;;  %vm8418_vm11 = vcmask 629760   ;;  %v2206_v58 = vadd.f32 %v2204_v35, %v2154_v23 }
 0x504   : > { %v2256_v27 = vsel %vm8415_vm12, %v8414_v33, %v8413_v25  ;;  %v8416_v60 = vld [vmem:[#allocation299_spill] sm:$0xff]  ;;  %v8417_v38 = vld [vmem:[#allocation288_spill] sm:$0xff]  ;;  %3287 = vrot.lane.b32.xlu2 %v3282_v59, %s8381_s1  ;;  %v2219_v63 = vadd.f32 %v2217_v40, %v2167_v14  ;;  %v2349_v30 = vadd.f32 %v2347_v43, %v2297_v19  ;;  %v3295_v31 = vmul.f32 %v6847_v26, %v3293_v6  ;;  %v8419_v62 = vld [vmem:[#allocation277_spill] sm:$0xff] }
 0x505   : > { %v7107_v48 = vpop.permute.xlu1 %3012  ;;  %v2399_v61 = vsel %vm8418_vm11, %v8417_v38, %v8416_v60  ;;  %v7116_v42 = vpop.permute.xlu0 %3001  ;;  %v2232_v2 = vadd.f32 %v2230_v51, %v2180_v34  ;;  %v8420_v56 = vld [vmem:[#allocation278_spill] sm:$0xff]  ;;  %vm8421_vm10 = vcmask 646144   ;;  %v8422_v39 = vld [vmem:[#allocation281_spill] sm:$0xff]  ;;  %v8426_v60 = vld [vmem:[#allocation304_spill] sm:$0xff]  ;;  %vm8427_vm12 = vcmask 621568  }
 0x506   : > { %8412 = vst [vmem:[#allocation19_spill] sm:$0xff] %v7107_v48  ;;  %v2269_v1 = vsel %vm8421_vm10, %v8420_v56, %v8419_v62  ;;  %v8423_v0 = vld [vmem:[#allocation270_spill] sm:$0xff]  ;;  %vm8424_vm9 = vmmov %vm8421_vm10  ;;  %v8425_v33 = vld [vmem:[#allocation297_spill] sm:$0xff]  ;;  %v7128_v40 = vpop.permute.xlu2 %3077  ;;  %v2258_v35 = vadd.f32 %v2256_v27, %v2206_v58  ;;  %v2401_v43 = vadd.f32 %v2399_v61, %v2349_v30  ;;  %v3294_v23 = vmul.f32 %v6841_v7, %v3293_v6 }
 0x507   : > { %v2282_v25 = vsel %vm8424_vm9, %v8423_v0, %v8422_v39  ;;  %v2451_v59 = vsel %vm8427_vm12, %v8426_v60, %v8425_v33  ;;  %v3306_v14 = vstv %s7075_s20  ;;  %v8428_v51 = vld [vmem:[#allocation283_spill] sm:$0xff]  ;;  %v8429_v19 = vld [vmem:[#allocation284_spill] sm:$0xff]  ;;  %vm8430_vm11 = vmmov %vm8424_vm9  ;;  %vm8433_vm10 = vcmask 637952   ;;  %s7216_s20 = sld [smem:[#allocation2 + $0x1be]] }
 0x508   : > { %v2308_v34 = vsel %vm8430_vm11, %v8429_v19, %v8428_v51  ;;  %v8431_v38 = vld [vmem:[#allocation287_spill] sm:$0xff]  ;;  %v8432_v62 = vld [vmem:[#allocation276_spill] sm:$0xff]  ;;  %v8434_v39 = vld [vmem:[#allocation313_spill] sm:$0xff]  ;;  %vm8436_vm9 = vcmask 523264   ;;  %v3307_v27 = vmul.f32 %v6841_v7, %v3306_v14  ;;  %v2271_v61 = vadd.f32 %v2269_v1, %v2219_v63 }
 0x509   : > { %v2321_v56 = vsel %vm8433_vm10, %v8432_v62, %v8431_v38  ;;  %v8435_v0 = vld [vmem:[#allocation314_spill] sm:$0xff]  ;;  %v2284_v58 = vadd.f32 %v2282_v25, %v2232_v2  ;;  %v8437_v6 = vld [vmem:[#allocation279_spill] sm:$0xff]  ;;  %vm8439_vm12 = vmmov %vm8433_vm10  ;;  %v2453_v48 = vadd.f32 %v2451_v59, %v2401_v43  ;;  %vm8442_vm11 = vcmask 629760  }
 0x50a   : > { %v2503_v33 = vsel %vm8436_vm9, %v8435_v0, %v8434_v39  ;;  %v8438_v30 = vld [vmem:[#allocation286_spill] sm:$0xff]  ;;  %v8440_v51 = vld [vmem:[#allocation285_spill] sm:$0xff]  ;;  %v8441_v19 = vld [vmem:[#allocation292_spill] sm:$0xff]  ;;  %vm8447_vm9 = vcmask 515072   ;;  %v3319_v2 = vstv %s7101_s30  ;;  %v2310_v1 = vadd.f32 %v2308_v34, %v2258_v35  ;;  %s7226_s30 = sld [smem:[#allocation2 + $0xb2]] }
 0x50b   : > { %v2334_v60 = vsel %vm8439_vm12, %v8438_v30, %v8437_v6  ;;  %3300 = vrot.lane.b32.xlu1 %v3295_v31, %s8381_s1  ;;  %v2373_v38 = vsel %vm8442_vm11, %v8441_v19, %v8440_v51  ;;  %v8443_v62 = vld [vmem:[#allocation293_spill] sm:$0xff]  ;;  %v8445_v0 = vld [vmem:[#allocation323_spill] sm:$0xff]  ;;  %v2323_v25 = vadd.f32 %v2321_v56, %v2271_v61  ;;  %v8449_v43 = vld [vmem:[#allocation296_spill] sm:$0xff]  ;;  %v2505_v6 = vadd.f32 %v2503_v33, %v2453_v48 }
 0x50c   : > { %v2360_v39 = vsel %vm8433_vm10, %v8444_v50, %v8443_v62  ;;  %v2555_v63 = vsel %vm8447_vm9, %v8446_v11, %v8445_v0  ;;  %v8448_v59 = vld [vmem:[#allocation295_spill] sm:$0xff]  ;;  %vm8450_vm12 = vmmov %vm8442_vm11  ;;  %3298 = vrot.lane.b32.xlu0 %v3294_v23, %s8381_s1  ;;  %v2336_v51 = vadd.f32 %v2334_v60, %v2284_v58  ;;  %v8452_v19 = vld [vmem:[#allocation298_spill] sm:$0xff]  ;;  %3311 = vrot.lane.b32.xlu2 %v3307_v27, %s8381_s1  ;;  %vm8458_vm10 = vcmask 621568  }
 0x50d   : > { %v2386_v31 = vsel %vm8450_vm12, %v8449_v43, %v8448_v59  ;;  %v7164_v30 = vpop.permute.xlu1 %3027  ;;  %v8451_v50 = vld [vmem:[#allocation291_spill] sm:$0xff]  ;;  %v8453_v11 = vld [vmem:[#allocation321_spill] sm:$0xff]  ;;  %v8454_v0 = vld [vmem:[#allocation328_spill] sm:$0xff]  ;;  %v2375_v35 = vadd.f32 %v2373_v38, %v2323_v25  ;;  %v2362_v34 = vadd.f32 %v2360_v39, %v2310_v1  ;;  %v2557_v56 = vadd.f32 %v2555_v63, %v2505_v6  ;;  %v7173_v48 = vpop.permute.xlu0 %3025 }
 0x50e   : > { %v2412_v62 = vsel %vm8442_vm11, %v8452_v19, %v8451_v50  ;;  %v2607_v53 = vsel %vm1311_vm15, %v8454_v0, %v8453_v11  ;;  %8455 = vst [vmem:[#allocation20_spill] sm:$0xff] %v7173_v48  ;;  %v3320_v23 = vmul.f32 %v6841_v7, %v3319_v2  ;;  %v2388_v33 = vadd.f32 %v2386_v31, %v2336_v51  ;;  %v8456_v61 = vld [vmem:[#allocation301_spill] sm:$0xff]  ;;  %v8457_v58 = vld [vmem:[#allocation302_spill] sm:$0xff]  ;;  %vm8461_vm9 = vmmov %vm8458_vm10  ;;  %v7185_v38 = vpop.permute.xlu2 %3092 }
 0x50f   : > { %v2425_v60 = vsel %vm8458_vm10, %v8457_v58, %v8456_v61  ;;  %v8459_v59 = vld [vmem:[#allocation305_spill] sm:$0xff]  ;;  %v8460_v43 = vld [vmem:[#allocation294_spill] sm:$0xff]  ;;  %v2414_v39 = vadd.f32 %v2412_v62, %v2362_v34  ;;  %v8464_v63 = vld [vmem:[#allocation307_spill] sm:$0xff]  ;;  %v2609_v31 = vadd.f32 %v2607_v53, %v2557_v56  ;;  %v3308_v6 = vmul.f32 %v6847_v26, %v3306_v14 }
 0x510   : > { %v2438_v50 = vsel %vm8461_vm9, %v8460_v43, %v8459_v59  ;;  %v8462_v19 = vld [vmem:[#allocation337_spill] sm:$0xff]  ;;  %v8463_v11 = vld [vmem:[#allocation338_spill] sm:$0xff]  ;;  %v8465_v1 = vld [vmem:[#allocation308_spill] sm:$0xff]  ;;  %vm8469_vm11 = vcmask 523264   ;;  %v2739_v62 = vstv %s7141_s0  ;;  %v3321_v34 = vmul.f32 %v6847_v26, %v3319_v2  ;;  %s7299_s0 = sld [smem:[#allocation2 + $0xbf]] }
 0x511   : > { %v2659_v27 = vsel %vm1364_vm13, %v8463_v11, %v8462_v19  ;;  %vm8466_vm12 = vmmov %vm8461_vm9  ;;  %v8467_v51 = vld [vmem:[#allocation311_spill] sm:$0xff]  ;;  %v8468_v0 = vld [vmem:[#allocation300_spill] sm:$0xff]  ;;  %v2427_v19 = vadd.f32 %v2425_v60, %v2375_v35  ;;  %v2440_v53 = vadd.f32 %v2438_v50, %v2388_v33  ;;  %vm8478_vm9 = vcmask 515072  }
 0x512   : > { %v2464_v25 = vsel %vm8466_vm12, %v8465_v1, %v8464_v63  ;;  %v2477_v61 = vsel %vm8469_vm11, %v8468_v0, %v8467_v51  ;;  %v8470_v58 = vld [vmem:[#allocation347_spill] sm:$0xff]  ;;  %v8471_v59 = vld [vmem:[#allocation336_spill] sm:$0xff]  ;;  %v8473_v14 = vld [vmem:[#allocation310_spill] sm:$0xff]  ;;  %v2661_v63 = vadd.f32 %v2659_v27, %v2609_v31  ;;  %v3332_v35 = vstv %s7158_s24  ;;  %s7313_s24 = sld [smem:[#allocation2 + $0x13f]] }
 0x513   : > { %v2711_v43 = vsel %vm1417_vm14, %v8471_v59, %v8470_v58  ;;  %v8472_v56 = vld [vmem:[#allocation303_spill] sm:$0xff]  ;;  %vm8474_vm10 = vmmov %vm8469_vm11  ;;  %3324 = vrot.lane.b32.xlu1 %v3320_v23, %s8475_s7  ;;  %v2466_v1 = vadd.f32 %v2464_v25, %v2414_v39  ;;  %v8476_v51 = vld [vmem:[#allocation309_spill] sm:$0xff]  ;;  %v2479_v33 = vadd.f32 %v2477_v61, %v2427_v19  ;;  %v2740_v23 = vmul.f32 %v6841_v7, %v2739_v62 }
 0x514   : > { %v2490_v11 = vsel %vm8474_vm10, %v8473_v14, %v8472_v56  ;;  %v8477_v0 = vld [vmem:[#allocation316_spill] sm:$0xff]  ;;  %v8479_v59 = vld [vmem:[#allocation317_spill] sm:$0xff]  ;;  %v8480_v48 = vld [vmem:[#allocation306_spill] sm:$0xff]  ;;  %v2713_v31 = vadd.f32 %v2711_v43, %v2661_v63  ;;  %3313 = vrot.lane.b32.xlu0 %v3308_v6, %s8381_s1  ;;  %3326 = vrot.lane.b32.xlu2 %v3321_v34, %s8475_s7  ;;  %v3334_v6 = vmul.f32 %v6847_v26, %v3332_v35  ;;  %s7267_s1 = sld [smem:[#allocation2 + $0x3f]] }
 0x515   : > { %v2529_v58 = vsel %vm8478_vm9, %v8477_v0, %v8476_v51  ;;  %vm8481_vm12 = vmmov %vm8474_vm10  ;;  %v8482_v60 = vld [vmem:[#allocation319_spill] sm:$0xff]  ;;  %v8483_v50 = vld [vmem:[#allocation320_spill] sm:$0xff]  ;;  %v3052_v39 = vpop.permute.xlu1 %3051  ;;  %v2492_v25 = vadd.f32 %v2490_v11, %v2440_v53  ;;  %v3041_v62 = vpop.permute.xlu0 %3040 }
 0x516   : > { %v2516_v2 = vsel %vm8481_vm12, %v8480_v48, %v8479_v59  ;;  %vm8484_vm11 = vmmov %vm8478_vm9  ;;  %v8485_v56 = vld [vmem:[#allocation315_spill] sm:$0xff]  ;;  %v8486_v14 = vld [vmem:[#allocation322_spill] sm:$0xff]  ;;  %v7230_v48 = vsel %vm463_vm5, %v3052_v39, %v7072_v46  ;;  %v2531_v61 = vadd.f32 %v2529_v58, %v2479_v33  ;;  %v7243_v34 = vpop.permute.xlu2 %3116  ;;  %v2741_v58 = vadd.f32 %v2740_v23, %v2713_v31 }
 0x517   : > { %v2542_v27 = vsel %vm8484_vm11, %v8483_v50, %v8482_v60  ;;  %vm8487_vm10 = vmmov %vm8478_vm9  ;;  %v2518_v43 = vadd.f32 %v2516_v2, %v2466_v1  ;;  %v8488_v53 = vld [vmem:[#allocation325_spill] sm:$0xff]  ;;  %v8489_v11 = vld [vmem:[#allocation326_spill] sm:$0xff]  ;;  %v3333_v2 = vmul.f32 %v6841_v7, %v3332_v35  ;;  %v3345_v33 = vstv %s7191_s15  ;;  %s7361_s15 = sld [smem:[#allocation2 + $0x1bf]] }
 0x518   : > { %v2568_v51 = vsel %vm8487_vm10, %v8486_v14, %v8485_v56  ;;  %v2544_v19 = vadd.f32 %v2542_v27, %v2492_v25  ;;  %v2581_v63 = vsel %vm1311_vm15, %v8489_v11, %v8488_v53  ;;  %v8490_v0 = vld [vmem:[#allocation331_spill] sm:$0xff]  ;;  %v8491_v59 = vld [vmem:[#allocation332_spill] sm:$0xff]  ;;  %v8492_v50 = vld [vmem:[#allocation345_spill] sm:$0xff]  ;;  %v3346_v11 = vmul.f32 %v6841_v7, %v3345_v33 }
 0x519   : > { %v2620_v60 = vsel %vm1311_vm15, %v8491_v59, %v8490_v0  ;;  %v2782_v46 = vsel %vm198_vm0, %v6467_v3, %v8492_v50  ;;  %v2570_v1 = vadd.f32 %v2568_v51, %v2518_v43  ;;  %v8493_v27 = vld [vmem:[#allocation329_spill] sm:$0xff]  ;;  %v8494_v39 = vld [vmem:[#allocation318_spill] sm:$0xff]  ;;  %v2834_v3 = vsel %vm251_vm1, %v6630_v57, %v6618_v20  ;;  %v8497_v23 = vld [vmem:[#allocation339_spill] sm:$0xff] }
 0x51a   : > { %v2594_v25 = vsel %vm1311_vm15, %v8494_v39, %v8493_v27  ;;  %v8495_v56 = vld [vmem:[#allocation341_spill] sm:$0xff]  ;;  %v8496_v14 = vld [vmem:[#allocation330_spill] sm:$0xff]  ;;  %v2583_v51 = vadd.f32 %v2581_v63, %v2531_v61  ;;  %v2784_v31 = vadd.f32 %v2782_v46, %v2741_v58  ;;  %v2743_v35 = vstv %s7206_s23  ;;  %v8499_v57 = vld [vmem:[#allocation335_spill] sm:$0xff]  ;;  %s4371_s23 = sld [smem:[#allocation2 + $0xc0]] }
 0x51b   : > { %v2672_v53 = vsel %vm1364_vm13, %v8496_v14, %v8495_v56  ;;  %v2622_v43 = vadd.f32 %v2620_v60, %v2570_v1  ;;  %3339 = vrot.lane.b32.xlu1 %v3334_v6, %s8475_s7  ;;  %v8498_v0 = vld [vmem:[#allocation346_spill] sm:$0xff]  ;;  %v2731_v50 = vstv %s7199_s29  ;;  %v2886_v27 = vsel %vm304_vm2, %v6584_v4, %v6788_v24  ;;  %v8500_v61 = vld [vmem:[#allocation324_spill] sm:$0xff]  ;;  %v8501_v1 = vld [vmem:[#allocation327_spill] sm:$0xff]  ;;  %s7381_s29 = sld [smem:[#allocation2 + $0x40]] }
 0x51c   : > { %v2724_v59 = vsel %vm1417_vm14, %v8498_v0, %v8497_v23  ;;  %v3358_v39 = vstv %s7216_s20  ;;  %v2596_v20 = vadd.f32 %v2594_v25, %v2544_v19  ;;  %v2633_v63 = vsel %vm1364_vm13, %v8500_v61, %v8499_v57  ;;  %3337 = vrot.lane.b32.xlu0 %v3333_v2, %s8475_s7  ;;  %v8502_v58 = vld [vmem:[#allocation334_spill] sm:$0xff]  ;;  %3350 = vrot.lane.b32.xlu2 %v3346_v11, %s8475_s7  ;;  %v8503_v19 = vld [vmem:[#allocation333_spill] sm:$0xff]  ;;  %v8504_v25 = vld [vmem:[#allocation340_spill] sm:$0xff]  ;;  %s4373_s20 = sld [smem:[#allocation2 + $0x1c0]] }
 0x51d   : > { %v2674_v60 = vadd.f32 %v2672_v53, %v2622_v43  ;;  %v2836_v46 = vadd.f32 %v2834_v3, %v2784_v31  ;;  %v3067_v6 = vpop.permute.xlu1 %3066  ;;  %v2646_v56 = vsel %vm1364_vm13, %v8502_v58, %v8501_v1  ;;  %v2735_v14 = vstv %s7226_s30  ;;  %v3065_v43 = vpop.permute.xlu0 %3064  ;;  %v8505_v0 = vld [vmem:[#allocation343_spill] sm:$0xff]  ;;  %v8506_v57 = vld [vmem:[#allocation344_spill] sm:$0xff]  ;;  %s4375_s30 = sld [smem:[#allocation2 + $0xc1]] }
 0x51e   : > { %v2744_v4 = vmul.f32 %v6841_v7, %v2743_v35  ;;  %v2938_v24 = vsel %vm357_vm3, %v6879_v17, %v6748_v47  ;;  %v2685_v53 = vsel %vm1417_vm14, %v8504_v25, %v8503_v19  ;;  %v3359_v31 = vmul.f32 %v6841_v7, %v3358_v39  ;;  %v7295_v11 = vpop.permute.xlu2 %3131 }
 0x51f   : > { %v2726_v3 = vadd.f32 %v2724_v59, %v2674_v60  ;;  %v2888_v2 = vadd.f32 %v2886_v27, %v2836_v46  ;;  %v2635_v23 = vadd.f32 %v2633_v63, %v2583_v51  ;;  %v2698_v35 = vsel %vm1417_vm14, %v8506_v57, %v8505_v0 }
 0x520   : > { %v2990_v47 = vsel %vm410_vm4, %v7060_v29, %v7048_v13  ;;  %v7293_v17 = vsel %vm516_vm6, %v3065_v43, %v3067_v6  ;;  %v2648_v59 = vadd.f32 %v2646_v56, %v2596_v20  ;;  %v2732_v27 = vmul.f32 %v6841_v7, %v2731_v50 }
 0x521   : > { %v2940_v61 = vadd.f32 %v2938_v24, %v2888_v2  ;;  %v3347_v51 = vmul.f32 %v6847_v26, %v3345_v33  ;;  %v2687_v63 = vadd.f32 %v2685_v53, %v2635_v23  ;;  %v2795_v60 = vsel %vm198_vm0, %v6528_v55, %v6516_v44 }
 0x522   : > { %v3042_v13 = vsel %vm463_vm5, %v7014_v9, %v3041_v62  ;;  %v3360_v29 = vmul.f32 %v6847_v26, %v3358_v39  ;;  %v2700_v46 = vadd.f32 %v2698_v35, %v2648_v59  ;;  %v2736_v20 = vmul.f32 %v6841_v7, %v2735_v14  ;;  %v8507_v39 = vld [vmem:[#allocation342_spill] sm:$0xff]  ;;  %v8510_v35 = vld [vmem:[#allocation13_spill] sm:$0xff] }
 0x523   : > { %v2745_v6 = vadd.f32 %v2744_v4, %v2726_v3  ;;  %v2992_v50 = vadd.f32 %v2990_v47, %v2940_v61  ;;  %3363 = vrot.lane.b32.xlu1 %v3359_v31, %s8475_s7  ;;  %v2847_v33 = vsel %vm251_vm1, %v6479_v18, %v6677_v37  ;;  %v3371_v1 = vstv %s7267_s1  ;;  %v8511_v47 = vld [vmem:[#allocation14_spill] sm:$0xff]  ;;  %v8513_v61 = vld [vmem:[#allocation17_spill] sm:$0xff]  ;;  %s4376_s1 = sld [smem:[#allocation2 + $0x141]] }
 0x524   : > { %3352 = vrot.lane.b32.xlu0 %v3347_v51, %s8475_s7  ;;  %v2733_v62 = vadd.f32 %v2732_v27, %v2687_v63  ;;  %v2769_v58 = vsel %vm198_vm0, %v8507_v39, %v6473_v52  ;;  %v2899_v56 = vsel %vm304_vm2, %v6780_v5, %v6639_v41  ;;  %3365 = vrot.lane.b32.xlu2 %v3360_v29, %s8475_s7  ;;  %v3384_v43 = vstv %s7299_s0  ;;  %v8512_v27 = vld [vmem:[#allocation10_spill] sm:$0xff]  ;;  %v8515_v29 = vld [vmem:[#allocation8_spill] sm:$0xff]  ;;  %s4372_s7 = sld [smem:[#allocation2 + $0x140]] }
 0x525   : > { %v2797_v44 = vadd.f32 %v2795_v60, %v2745_v6  ;;  %v3044_v55 = vadd.f32 %v3042_v13, %v2992_v50  ;;  %v3091_v9 = vpop.permute.xlu1 %3090  ;;  %v2737_v37 = vadd.f32 %v2736_v20, %v2700_v46  ;;  %v3080_v24 = vpop.permute.xlu0 %3079  ;;  %v3373_v19 = vmul.f32 %v6847_v26, %v3371_v1  ;;  %v8514_v13 = vld [vmem:[#allocation9_spill] sm:$0xff]  ;;  %v8516_v20 = vld [vmem:[#allocation20_spill] sm:$0xff]  ;;  %s4377_s0 = sld [smem:[#allocation2 + $0x1c1]] }
 0x526   : > { %v3094_v18 = vsel %vm516_vm6, %v3091_v9, %v7185_v38  ;;  %v2756_v52 = vsel %vm198_vm0, %v6423_v12, %v6411_v36  ;;  %v2821_v41 = vsel %vm251_vm1, %v6572_v15, %v6429_v28  ;;  %v2951_v5 = vsel %vm357_vm3, %v6946_v21, %v6934_v49  ;;  %v7339_v25 = vpop.permute.xlu2 %3155  ;;  %v8508_v36 = vld [vmem:[#allocation348_spill] sm:$0xff] }
 0x527   : > { %v2849_v14 = vadd.f32 %v2847_v33, %v2797_v44  ;;  %v7325_v4 = vadd.f32 %v3094_v18, %v3044_v55  ;;  %v3081_v38 = vsel %vm516_vm6, %v7128_v40, %v3080_v24  ;;  %v2771_v53 = vadd.f32 %v2769_v58, %v2737_v37  ;;  %v8517_v9 = vld [vmem:[#allocation16_spill] sm:$0xff] }
 0x528   : > { %v3372_v2 = vmul.f32 %v6841_v7, %v3371_v1  ;;  %v2808_v12 = vsel %vm251_vm1, %v8508_v36, %v6578_v22  ;;  %v2873_v28 = vsel %vm304_vm2, %v6734_v54, %v6722_v45  ;;  %v3003_v15 = vsel %vm410_vm4, %v6900_v32, %v7116_v42  ;;  %v8509_v22 = vld [vmem:[#allocation11_spill] sm:$0xff] }
 0x529   : > { %v2901_v3 = vadd.f32 %v2899_v56, %v2849_v14  ;;  %v3385_v49 = vmul.f32 %v6841_v7, %v3384_v43  ;;  %v2758_v21 = vadd.f32 %v2756_v52, %v2733_v62  ;;  %v2823_v40 = vadd.f32 %v2821_v41, %v2771_v53  ;;  %v8518_v62 = vld [vmem:[#allocation19_spill] sm:$0xff] }
 0x52a   : > { %v2860_v23 = vsel %vm304_vm2, %v6674_v10, %v6534_v16  ;;  %v2925_v0 = vsel %vm357_vm3, %v8509_v22, %v6888_v8  ;;  %v3397_v45 = vstv %s7313_s24  ;;  %v2912_v59 = vsel %vm357_vm3, %v8511_v47, %v8510_v35  ;;  %s4379_s24 = sld [smem:[#allocation2 + $0xc2]] }
 0x52b   : > { %v2953_v31 = vadd.f32 %v2951_v5, %v2901_v3  ;;  %3378 = vrot.lane.b32.xlu1 %v3373_v19, %s7970_s16  ;;  %v2810_v54 = vadd.f32 %v2808_v12, %v2758_v21  ;;  %v2875_v32 = vadd.f32 %v2873_v28, %v2823_v40  ;;  %v2977_v16 = vsel %vm410_vm4, %v8513_v61, %v8512_v27 }
 0x52c   : > { %3376 = vrot.lane.b32.xlu0 %v3372_v2, %s7970_s16  ;;  %3389 = vrot.lane.b32.xlu2 %v3385_v49, %s7970_s16  ;;  %v3398_v60 = vmul.f32 %v6841_v7, %v3397_v45  ;;  %v2964_v46 = vsel %vm410_vm4, %v8515_v29, %v8514_v13  ;;  %v3029_v6 = vsel %vm463_vm5, %v8516_v20, %v7164_v30  ;;  %v3410_v30 = vstv %s7361_s15  ;;  %s4380_s15 = sld [smem:[#allocation2 + $0x142]] }
 0x52d   : > { %v3005_v42 = vadd.f32 %v3003_v15, %v2953_v31  ;;  %v3106_v57 = vpop.permute.xlu1 %3105  ;;  %v2862_v10 = vadd.f32 %v2860_v23, %v2810_v54  ;;  %v2927_v8 = vadd.f32 %v2925_v0, %v2875_v32  ;;  %v3104_v63 = vpop.permute.xlu0 %3103  ;;  %v3016_v39 = vsel %vm463_vm5, %v8518_v62, %v8517_v9 }
 0x52e   : > { %v3107_v50 = vsel %vm516_vm6, %v3104_v63, %v3106_v57  ;;  %v3171_v33 = vpop.permute.xlu2 %3170  ;;  %v3399_v58 = vmul.f32 %v6847_v26, %v3397_v45  ;;  %v3412_v53 = vmul.f32 %v6847_v26, %v3410_v30  ;;  %v3423_v36 = vstv %s7381_s29  ;;  %s4381_s29 = sld [smem:[#allocation2 + $0x1c2]] }
 0x52f   : > { %v3057_v51 = vadd.f32 %v7230_v48, %v3005_v42  ;;  %v2914_v1 = vadd.f32 %v2912_v59, %v2862_v10  ;;  %v2979_v44 = vadd.f32 %v2977_v16, %v2927_v8  ;;  %v3386_v48 = vmul.f32 %v6847_v26, %v3384_v43 }
 0x530   : > { %v3424_v12 = vmul.f32 %v6841_v7, %v3423_v36  ;;  %v3425_v40 = vmul.f32 %v6847_v26, %v3423_v36  ;;  %v3449_v23 = vstv %s4372_s7  ;;  %v3462_v47 = vstv %s4373_s20  ;;  %s4384_s7 = sld [smem:[#allocation2 + $0x143]] }
 0x531   : > { %v3109_v55 = vadd.f32 %v3107_v50, %v3057_v51  ;;  %v2966_v56 = vadd.f32 %v2964_v46, %v2914_v1  ;;  %v3031_v18 = vadd.f32 %v3029_v6, %v2979_v44  ;;  %v3450_v35 = vmul.f32 %v6841_v7, %v3449_v23  ;;  %s4386_s20 = sld [smem:[#allocation2 + $0x44]] }
 0x532   : > { %v3463_v59 = vmul.f32 %v6841_v7, %v3462_v47  ;;  %v3464_v63 = vmul.f32 %v6847_v26, %v3462_v47  ;;  %v3488_v13 = vstv %s4375_s30  ;;  %v3514_v62 = vstv %s4377_s0  ;;  %s4389_s30 = sld [smem:[#allocation2 + $0x1c4]] }
 0x533   : > { %3402 = vrot.lane.b32.xlu1 %v3398_v60, %s7970_s16  ;;  %v3018_v37 = vadd.f32 %v3016_v39, %v2966_v56  ;;  %v3083_v14 = vadd.f32 %v3081_v38, %v3031_v18  ;;  %v3411_v38 = vmul.f32 %v6841_v7, %v3410_v30  ;;  %v3490_v50 = vmul.f32 %v6847_v26, %v3488_v13  ;;  %s4392_s0 = sld [smem:[#allocation2 + $0x145]] }
 0x534   : > { %3391 = vrot.lane.b32.xlu0 %v3386_v48, %s7970_s16  ;;  %3404 = vrot.lane.b32.xlu2 %v3399_v58, %s7970_s16  ;;  %v3501_v48 = vstv %s4376_s1  ;;  %v3515_v56 = vmul.f32 %v6841_v7, %v3514_v62  ;;  %vm8519_vm0 = vcmask 785408   ;;  %vm8523_vm4 = vcmask 777216   ;;  %s4391_s1 = sld [smem:[#allocation2 + $0xc5]] }
 0x535   : > { %v3130_v24 = vpop.permute.xlu1 %3129  ;;  %v3070_v52 = vadd.f32 %v7293_v17, %v3018_v37  ;;  %v3119_v5 = vpop.permute.xlu0 %3118  ;;  %v3502_v9 = vmul.f32 %v6841_v7, %v3501_v48  ;;  %vm8520_vm1 = vmmov %vm8519_vm0  ;;  %vm8531_vm10 = vcmask 760832  }
 0x536   : > { %v3133_v19 = vsel %vm569_vm7, %v3130_v24, %v7295_v11  ;;  %v3120_v3 = vsel %vm569_vm7, %v7243_v34, %v3119_v5  ;;  %v3195_v2 = vpop.permute.xlu2 %3194  ;;  %v3436_v11 = vstv %s4371_s23  ;;  %v3516_v24 = vmul.f32 %v6847_v26, %v3514_v62  ;;  %vm8521_vm2 = vmmov %vm8519_vm0  ;;  %s4383_s23 = sld [smem:[#allocation2 + $0xc3]] }
 0x537   : > { %v3135_v41 = vadd.f32 %v3133_v19, %v3083_v14  ;;  %v3122_v43 = vadd.f32 %v3120_v3, %v3070_v52  ;;  %v3437_v15 = vmul.f32 %v6841_v7, %v3436_v11  ;;  %v3438_v31 = vmul.f32 %v6847_v26, %v3436_v11  ;;  %vm8522_vm3 = vmmov %vm8519_vm0 }
 0x538   : > { %v3503_v14 = vmul.f32 %v6847_v26, %v3501_v48  ;;  %vm8524_vm5 = vmmov %vm8523_vm4 }
 0x539   : > { %vm8525_vm6 = vmmov %vm8523_vm4 }
 0x53b   : > { %3417 = vrot.lane.b32.xlu1 %v3412_v53, %s7970_s16 }
 0x53c   : > { %3415 = vrot.lane.b32.xlu0 %v3411_v38, %s7970_s16  ;;  %3428 = vrot.lane.b32.xlu2 %v3424_v12, %s7978_s3  ;;  %s4374_s16 = sld [smem:[#allocation2 + $0x41]]  ;;  %v3540_v12 = vstv %s4379_s24 }
 0x53d   : > { %v3145_v17 = vpop.permute.xlu1 %3144  ;;  %v3143_v28 = vpop.permute.xlu0 %3142  ;;  %v3541_v11 = vmul.f32 %v6841_v7, %v3540_v12  ;;  %s4395_s24 = sld [smem:[#allocation2 + $0xc6]] }
 0x53e   : > { %v3146_v34 = vsel %vm569_vm7, %v3143_v28, %v3145_v17  ;;  %v3210_v49 = vpop.permute.xlu2 %3209  ;;  %v3553_v17 = vstv %s4380_s15  ;;  %s4396_s15 = sld [smem:[#allocation2 + $0x146]] }
 0x53f   : > { %v3148_v21 = vadd.f32 %v3146_v34, %v7325_v4  ;;  %v3451_v4 = vmul.f32 %v6847_v26, %v3449_v23  ;;  %v3554_v34 = vmul.f32 %v6841_v7, %v3553_v17  ;;  %v3555_v23 = vmul.f32 %v6847_v26, %v3553_v17 }
 0x542   : > { %v3475_v27 = vstv %s4374_s16  ;;  %s4388_s16 = sld [smem:[#allocation2 + $0x144]] }
 0x543   : > { %3441 = vrot.lane.b32.xlu1 %v3437_v15, %s7978_s3  ;;  %v3476_v10 = vmul.f32 %v6841_v7, %v3475_v27  ;;  %v3477_v60 = vmul.f32 %v6847_v26, %v3475_v27 }
 0x544   : > { %3430 = vrot.lane.b32.xlu0 %v3425_v40, %s7978_s3  ;;  %3443 = vrot.lane.b32.xlu2 %v3438_v31, %s7978_s3  ;;  %v3542_v31 = vmul.f32 %v6847_v26, %v3540_v12 }
 0x545   : > { %v3169_v22 = vpop.permute.xlu1 %3168  ;;  %v3158_v54 = vpop.permute.xlu0 %3157 }
 0x546   : > { %v3172_v0 = vsel %vm622_vm8, %v3169_v22, %v3171_v33  ;;  %v3159_v32 = vsel %vm569_vm7, %v7339_v25, %v3158_v54  ;;  %v3234_v42 = vpop.permute.xlu2 %3233  ;;  %v3566_v22 = vstv %s4381_s29  ;;  %vm8526_vm7 = vcmask 769024   ;;  %s4397_s29 = sld [smem:[#allocation2 + $0x1c6]] }
 0x547   : > { %v3174_v45 = vadd.f32 %v3172_v0, %v3122_v43  ;;  %v3161_v57 = vadd.f32 %v3159_v32, %v3109_v55  ;;  %v3489_v55 = vmul.f32 %v6841_v7, %v3488_v13  ;;  %vm8528_vm9 = vmmov %vm8526_vm7 }
 0x548   : > { %vm8529_vm12 = vmmov %vm8526_vm7 }
 0x549   : > { %vm8530_vm11 = vmmov %vm8526_vm7 }
 0x54b   : > { %3456 = vrot.lane.b32.xlu1 %v3451_v4, %s7978_s3  ;;  %v7461_v4 = vld [vmem:[%s4730_s6 + $0x21] sm:$0xff] }
 0x54c   : > { %3454 = vrot.lane.b32.xlu0 %v3450_v35, %s7978_s3  ;;  %3467 = vrot.lane.b32.xlu2 %v3463_v59, %s7978_s3  ;;  %v3568_v32 = vmul.f32 %v7461_v4, %v3566_v22  ;;  %v7466_v35 = vld [vmem:[%s4730_s6 + $0x20] sm:$0xff]  ;;  %s4385_s6 = sld [smem:[#allocation2 + $0x1c3]] }
 0x54d   : > { %v3184_v61 = vpop.permute.xlu1 %3183  ;;  %v3182_v16 = vpop.permute.xlu0 %3181  ;;  %v3567_v47 = vmul.f32 %v7466_v35, %v3566_v22 }
 0x54e   : > { %v3185_v25 = vsel %vm622_vm8, %v3182_v16, %v3184_v61  ;;  %v3249_v8 = vpop.permute.xlu2 %3248  ;;  %v3592_v61 = vstv %s4383_s23  ;;  %s4400_s23 = sld [smem:[#allocation2 + $0x147]] }
 0x54f   : > { %v3187_v51 = vadd.f32 %v3185_v25, %v3135_v41  ;;  %v3593_v25 = vmul.f32 %v7466_v35, %v3592_v61  ;;  %v3594_v13 = vmul.f32 %v7461_v4, %v3592_v61 }
 0x553   : > { %3480 = vrot.lane.b32.xlu1 %v3476_v10, %s7987_s26 }
 0x554   : > { %3469 = vrot.lane.b32.xlu0 %v3464_v63, %s7978_s3  ;;  %3482 = vrot.lane.b32.xlu2 %v3477_v60, %s7987_s26  ;;  %s4378_s3 = sld [smem:[#allocation2 + $0x42]] }
 0x555   : > { %v3208_v29 = vpop.permute.xlu1 %3207  ;;  %v3197_v6 = vpop.permute.xlu0 %3196 }
 0x556   : > { %v3211_v46 = vsel %vm622_vm8, %v3208_v29, %v3210_v49  ;;  %v3198_v33 = vsel %vm622_vm8, %v3195_v2, %v3197_v6  ;;  %v3273_v1 = vpop.permute.xlu2 %3272  ;;  %v3605_v29 = vstv %s4384_s7  ;;  %vm8527_vm8 = vmmov %vm8523_vm4  ;;  %s4401_s7 = sld [smem:[#allocation2 + $0x1c7]] }
 0x557   : > { %v3213_v20 = vadd.f32 %v3211_v46, %v3161_v57  ;;  %v3200_v44 = vadd.f32 %v3198_v33, %v3148_v21  ;;  %v3607_v33 = vmul.f32 %v7461_v4, %v3605_v29  ;;  %v3606_v48 = vmul.f32 %v7466_v35, %v3605_v29 }
 0x55a   : > { %v3527_v19 = vstv %s4378_s3  ;;  %s4393_s3 = sld [smem:[#allocation2 + $0x1c5]] }
 0x55b   : > { %3495 = vrot.lane.b32.xlu1 %v3490_v50, %s7987_s26  ;;  %v3529_v3 = vmul.f32 %v6847_v26, %v3527_v19  ;;  %v3528_v36 = vmul.f32 %v6841_v7, %v3527_v19 }
 0x55c   : > { %3493 = vrot.lane.b32.xlu0 %v3489_v55, %s7987_s26  ;;  %3506 = vrot.lane.b32.xlu2 %v3502_v9, %s7987_s26  ;;  %v3618_v9 = vstv %s4385_s6  ;;  %s4403_s6 = sld [smem:[#allocation2 + $0xc8]] }
 0x55d   : > { %v3223_v39 = vpop.permute.xlu1 %3222  ;;  %v3221_v58 = vpop.permute.xlu0 %3220  ;;  %v3619_v62 = vmul.f32 %v7466_v35, %v3618_v9 }
 0x55e   : > { %v3224_v18 = vsel %vm8519_vm0, %v3221_v58, %v3223_v39  ;;  %v3288_v30 = vpop.permute.xlu2 %3287  ;;  %v3631_v39 = vstv %s4386_s20  ;;  %vm8532_vm0 = vmmov %vm8531_vm10  ;;  %s4404_s20 = sld [smem:[#allocation2 + $0x148]] }
 0x55f   : > { %v3226_v37 = vadd.f32 %v3224_v18, %v3174_v45  ;;  %v3632_v18 = vmul.f32 %v7466_v35, %v3631_v39  ;;  %v3633_v19 = vmul.f32 %v7461_v4, %v3631_v39 }
 0x563   : > { %3519 = vrot.lane.b32.xlu1 %v3515_v56, %s7987_s26 }
 0x564   : > { %3508 = vrot.lane.b32.xlu0 %v3503_v14, %s7987_s26  ;;  %3521 = vrot.lane.b32.xlu2 %v3516_v24, %s7987_s26  ;;  %s7453_s26 = sld [smem:[#allocation2 + $0x43]]  ;;  %v3620_v24 = vmul.f32 %v7461_v4, %v3618_v9 }
 0x565   : > { %v3247_v52 = vpop.permute.xlu1 %3246  ;;  %v3236_v53 = vpop.permute.xlu0 %3235 }
 0x566   : > { %v3250_v41 = vsel %vm8520_vm1, %v3247_v52, %v3249_v8  ;;  %v3237_v2 = vsel %vm8521_vm2, %v3234_v42, %v3236_v53  ;;  %v3312_v43 = vpop.permute.xlu2 %3311  ;;  %vm8533_vm1 = vmmov %vm8532_vm0 }
 0x567   : > { %v3252_v5 = vadd.f32 %v3250_v41, %v3200_v44  ;;  %v3239_v38 = vadd.f32 %v3237_v2, %v3187_v51  ;;  %vm8534_vm2 = vmmov %vm8532_vm0 }
 0x56a   : > { %v3579_v59 = vstv %s7453_s26  ;;  %s4398_s26 = sld [smem:[#allocation2 + $0x47]] }
 0x56b   : > { %3534 = vrot.lane.b32.xlu1 %v3529_v3, %s7997_s5  ;;  %v3580_v27 = vmul.f32 %v7466_v35, %v3579_v59  ;;  %v3581_v60 = vmul.f32 %v7461_v4, %v3579_v59 }
 0x56c   : > { %3532 = vrot.lane.b32.xlu0 %v3528_v36, %s7997_s5  ;;  %3545 = vrot.lane.b32.xlu2 %v3541_v11, %s7997_s5  ;;  %v3657_v11 = vstv %s4388_s16  ;;  %s4407_s16 = sld [smem:[#allocation2 + $0xc9]] }
 0x56d   : > { %v3262_v28 = vpop.permute.xlu1 %3261  ;;  %v3260_v15 = vpop.permute.xlu0 %3259  ;;  %v3658_v17 = vmul.f32 %v7466_v35, %v3657_v11 }
 0x56e   : > { %v3263_v49 = vsel %vm8522_vm3, %v3260_v15, %v3262_v28  ;;  %v3327_v21 = vpop.permute.xlu2 %3326  ;;  %v3670_v28 = vstv %s4389_s30  ;;  %vm8535_vm3 = vcmask 752640   ;;  %s4408_s30 = sld [smem:[#allocation2 + $0x149]] }
 0x56f   : > { %v3265_v40 = vadd.f32 %v3263_v49, %v3213_v20  ;;  %v3671_v49 = vmul.f32 %v7466_v35, %v3670_v28  ;;  %v3672_v22 = vmul.f32 %v7461_v4, %v3670_v28 }
 0x573   : > { %3558 = vrot.lane.b32.xlu1 %v3554_v34, %s7997_s5 }
 0x574   : > { %3547 = vrot.lane.b32.xlu0 %v3542_v31, %s7997_s5  ;;  %3560 = vrot.lane.b32.xlu2 %v3555_v23, %s7997_s5  ;;  %v3659_v23 = vmul.f32 %v7461_v4, %v3657_v11 }
 0x575   : > { %v3286_v7 = vpop.permute.xlu1 %3285  ;;  %v3275_v54 = vpop.permute.xlu0 %3274 }
 0x576   : > { %v3289_v0 = vsel %vm8523_vm4, %v3286_v7, %v3288_v30  ;;  %v3276_v26 = vsel %vm8524_vm5, %v3273_v1, %v3275_v54  ;;  %v3351_v42 = vpop.permute.xlu2 %3350  ;;  %vm8536_vm4 = vmmov %vm8535_vm3 }
 0x577   : > { %v3291_v45 = vadd.f32 %v3289_v0, %v3239_v38  ;;  %v3278_v57 = vadd.f32 %v3276_v26, %v3226_v37  ;;  %vm8537_vm5 = vmmov %vm8535_vm3 }
 0x57b   : > { %3573 = vrot.lane.b32.xlu1 %v3568_v32, %s7997_s5 }
 0x57c   : > { %3571 = vrot.lane.b32.xlu0 %v3567_v47, %s7997_s5  ;;  %3584 = vrot.lane.b32.xlu2 %v3580_v27, %s8005_s25  ;;  %s4387_s5 = sld [smem:[#allocation2 + $0xc4]]  ;;  %v3696_v27 = vstv %s4391_s1 }
 0x57d   : > { %v3301_v16 = vpop.permute.xlu1 %3300  ;;  %v3697_v61 = vmul.f32 %v7466_v35, %v3696_v27  ;;  %s4409_s1 = sld [smem:[#allocation2 + $0x1c9]] }
 0x57e   : > { %v3299_v10 = vpop.permute.xlu0 %3298  ;;  %v3366_v51 = vpop.permute.xlu2 %3365 }
 0x57f   : > { %v3302_v8 = vsel %vm8525_vm6, %v3299_v10, %v3301_v16  ;;  %v3709_v16 = vstv %s4392_s0  ;;  %vm8538_vm6 = vcmask 654336   ;;  %s4410_s0 = sld [smem:[#allocation2 + $0x4a]] }
 0x580   : > { %v3304_v63 = vadd.f32 %v3302_v8, %v3252_v5  ;;  %v3710_v8 = vmul.f32 %v7466_v35, %v3709_v16  ;;  %v3711_v29 = vmul.f32 %v7461_v4, %v3709_v16 }
 0x582   : > { %v3644_v52 = vstv %s4387_s5  ;;  %s4405_s5 = sld [smem:[#allocation2 + $0x1c8]] }
 0x583   : > { %3597 = vrot.lane.b32.xlu1 %v3593_v25, %s8005_s25  ;;  %v3646_v2 = vmul.f32 %v7461_v4, %v3644_v52  ;;  %v3645_v12 = vmul.f32 %v7466_v35, %v3644_v52 }
 0x584   : > { %3586 = vrot.lane.b32.xlu0 %v3581_v60, %s8005_s25  ;;  %3599 = vrot.lane.b32.xlu2 %v3594_v13, %s8005_s25  ;;  %v3698_v13 = vmul.f32 %v7461_v4, %v3696_v27 }
 0x585   : > { %v3325_v46 = vpop.permute.xlu1 %3324 }
 0x586   : > { %v3328_v20 = vsel %vm8526_vm7, %v3325_v46, %v3327_v21  ;;  %v3314_v50 = vpop.permute.xlu0 %3313  ;;  %v3390_v44 = vpop.permute.xlu2 %3389  ;;  %v3722_v46 = vstv %s4393_s3  ;;  %vm8539_vm7 = vmmov %vm8535_vm3  ;;  %s4412_s3 = sld [smem:[#allocation2 + $0x14a]] }
 0x587   : > { %v3330_v6 = vadd.f32 %v3328_v20, %v3278_v57  ;;  %v3315_v1 = vsel %vm8527_vm8, %v3312_v43, %v3314_v50  ;;  %v3723_v9 = vmul.f32 %v7466_v35, %v3722_v46  ;;  %vm8540_vm8 = vmmov %vm8538_vm6 }
 0x588   : > { %v3317_v55 = vadd.f32 %v3315_v1, %v3265_v40  ;;  %v3724_v1 = vmul.f32 %v7461_v4, %v3722_v46 }
 0x58b   : > { %3612 = vrot.lane.b32.xlu1 %v3607_v33, %s8005_s25 }
 0x58c   : > { %3610 = vrot.lane.b32.xlu0 %v3606_v48, %s8005_s25  ;;  %3623 = vrot.lane.b32.xlu2 %v3619_v62, %s8005_s25 }
 0x58d   : > { %v3340_v58 = vpop.permute.xlu1 %3339 }
 0x58e   : > { %v3338_v56 = vpop.permute.xlu0 %3337  ;;  %v3405_v37 = vpop.permute.xlu2 %3404 }
 0x58f   : > { %v3341_v30 = vsel %vm8528_vm9, %v3338_v56, %v3340_v58  ;;  %v3748_v58 = vstv %s4395_s24  ;;  %vm8541_vm9 = vmmov %vm8538_vm6  ;;  %s4413_s24 = sld [smem:[#allocation2 + $0x1ca]] }
 0x590   : > { %v3343_v14 = vadd.f32 %v3341_v30, %v3291_v45  ;;  %v3749_v30 = vmul.f32 %v7466_v35, %v3748_v58  ;;  %v3750_v52 = vmul.f32 %v7461_v4, %v3748_v58 }
 0x593   : > { %3636 = vrot.lane.b32.xlu1 %v3632_v18, %s8014_s8 }
 0x594   : > { %3625 = vrot.lane.b32.xlu0 %v3620_v24, %s8005_s25  ;;  %3638 = vrot.lane.b32.xlu2 %v3633_v19, %s8014_s8  ;;  %s4390_s25 = sld [smem:[#allocation2 + $0x45]] }
 0x595   : > { %v3364_v41 = vpop.permute.xlu1 %3363 }
 0x596   : > { %v3367_v5 = vsel %vm8529_vm12, %v3364_v41, %v3366_v51  ;;  %v3353_v3 = vpop.permute.xlu0 %3352  ;;  %v3429_v38 = vpop.permute.xlu2 %3428  ;;  %v3761_v41 = vstv %s4396_s15  ;;  %vm8542_vm12 = vmmov %vm8538_vm6  ;;  %s162_s15 = sand.u32 1, %s4607_s10  }
 0x597   : > { %v3369_v53 = vadd.f32 %v3367_v5, %v3317_v55  ;;  %v3354_v43 = vsel %vm8530_vm11, %v3351_v42, %v3353_v3  ;;  %v3762_v11 = vmul.f32 %v7466_v35, %v3761_v41  ;;  %vm8543_vm11 = vcmask 646144  }
 0x598   : > { %v3356_v36 = vadd.f32 %v3354_v43, %v3304_v63  ;;  %v3763_v43 = vmul.f32 %v7461_v4, %v3761_v41 }
 0x59a   : > { %v3683_v7 = vstv %s4390_s25  ;;  %s8549_s25 = smov 61  }
 0x59b   : > { %3651 = vrot.lane.b32.xlu1 %v3646_v2, %s8014_s8  ;;  %v3685_v26 = vmul.f32 %v7461_v4, %v3683_v7  ;;  %v3684_v59 = vmul.f32 %v7466_v35, %v3683_v7 }
 0x59c   : > { %3649 = vrot.lane.b32.xlu0 %v3645_v12, %s8014_s8  ;;  %3662 = vrot.lane.b32.xlu2 %v3658_v17, %s8014_s8  ;;  %v3774_v17 = vstv %s4397_s29  ;;  %s4109_s29 = sshll.u32 %s162_s15, 5 }
 0x59d   : > { %v3379_v15 = vpop.permute.xlu1 %3378  ;;  %v3775_v28 = vmul.f32 %v7466_v35, %v3774_v17 }
 0x59e   : > { %v3377_v34 = vpop.permute.xlu0 %3376  ;;  %v3444_v40 = vpop.permute.xlu2 %3443 }
 0x59f   : > { %v3380_v21 = vsel %vm8531_vm10, %v3377_v34, %v3379_v15  ;;  %v3787_v15 = vstv %s4398_s26  ;;  %vm8544_vm10 = vmmov %vm8543_vm11  ;;  %s7647_s26 = scalar_lea.vmem [#allocation5], %s4109_s29 }
 0x5a0   : > { %v3382_v31 = vadd.f32 %v3380_v21, %v3330_v6  ;;  %v3788_v21 = vmul.f32 %v7466_v35, %v3787_v15  ;;  %v3789_v7 = vmul.f32 %v7461_v4, %v3787_v15 }
 0x5a3   : > { %3675 = vrot.lane.b32.xlu1 %v3671_v49, %s8014_s8 }
 0x5a4   : > { %3664 = vrot.lane.b32.xlu0 %v3659_v23, %s8014_s8  ;;  %3677 = vrot.lane.b32.xlu2 %v3672_v22, %s8014_s8  ;;  %s4394_s8 = sld [smem:[#allocation2 + $0x46]]  ;;  %v3776_v22 = vmul.f32 %v7461_v4, %v3774_v17 }
 0x5a5   : > { %v3403_v0 = vpop.permute.xlu1 %3402 }
 0x5a6   : > { %v3406_v45 = vsel %vm8532_vm0, %v3403_v0, %v3405_v37  ;;  %v3392_v32 = vpop.permute.xlu0 %3391  ;;  %v3468_v57 = vpop.permute.xlu2 %3467  ;;  %vm8545_vm0 = vmmov %vm8544_vm10 }
 0x5a7   : > { %v3408_v54 = vadd.f32 %v3406_v45, %v3356_v36  ;;  %v3393_v42 = vsel %vm8533_vm1, %v3390_v44, %v3392_v32  ;;  %vm8546_vm1 = vmmov %vm8545_vm0 }
 0x5a8   : > { %v3395_v47 = vadd.f32 %v3393_v42, %v3343_v14 }
 0x5aa   : > { %v3735_v62 = vstv %s4394_s8  ;;  %s8554_s8 = smov 60  }
 0x5ab   : > { %3690 = vrot.lane.b32.xlu1 %v3685_v26, %s8024_s28  ;;  %v3736_v39 = vmul.f32 %v7466_v35, %v3735_v62  ;;  %v3737_v19 = vmul.f32 %v7461_v4, %v3735_v62 }
 0x5ac   : > { %3688 = vrot.lane.b32.xlu0 %v3684_v59, %s8024_s28  ;;  %3701 = vrot.lane.b32.xlu2 %v3697_v61, %s8024_s28  ;;  %v3813_v61 = vstv %s4400_s23 }
 0x5ad   : > { %v3418_v10 = vpop.permute.xlu1 %3417  ;;  %v3814_v16 = vmul.f32 %v7466_v35, %v3813_v61 }
 0x5ae   : > { %v3416_v25 = vpop.permute.xlu0 %3415  ;;  %v3483_v63 = vpop.permute.xlu2 %3482 }
 0x5af   : > { %v3419_v51 = vsel %vm8534_vm2, %v3416_v25, %v3418_v10  ;;  %v3826_v10 = vstv %s4401_s7  ;;  %vm8547_vm2 = vcmask 637952  }
 0x5b0   : > { %v3421_v60 = vadd.f32 %v3419_v51, %v3369_v53  ;;  %v3827_v51 = vmul.f32 %v7466_v35, %v3826_v10  ;;  %v3828_v46 = vmul.f32 %v7461_v4, %v3826_v10 }
 0x5b3   : > { %3714 = vrot.lane.b32.xlu1 %v3710_v8, %s8024_s28 }
 0x5b4   : > { %3703 = vrot.lane.b32.xlu0 %v3698_v13, %s8024_s28  ;;  %3716 = vrot.lane.b32.xlu2 %v3711_v29, %s8024_s28  ;;  %v3815_v29 = vmul.f32 %v7461_v4, %v3813_v61 }
 0x5b5   : > { %v3442_v20 = vpop.permute.xlu1 %3441 }
 0x5b6   : > { %v3445_v6 = vsel %vm8535_vm3, %v3442_v20, %v3444_v40  ;;  %v3431_v33 = vpop.permute.xlu0 %3430  ;;  %v3507_v55 = vpop.permute.xlu2 %3506  ;;  %vm8548_vm3 = vmmov %vm8547_vm2 }
 0x5b7   : > { %v3447_v50 = vadd.f32 %v3445_v6, %v3395_v47  ;;  %v3432_v44 = vsel %vm8536_vm4, %v3429_v38, %v3431_v33  ;;  %vm8550_vm4 = vmmov %vm8547_vm2 }
 0x5b8   : > { %v3434_v48 = vadd.f32 %v3432_v44, %v3382_v31 }
 0x5bb   : > { %3729 = vrot.lane.b32.xlu1 %v3724_v1, %s8024_s28 }
 0x5bc   : > { %3727 = vrot.lane.b32.xlu0 %v3723_v9, %s8024_s28  ;;  %3740 = vrot.lane.b32.xlu2 %v3736_v39, %s8032_s18  ;;  %s4399_s28 = sld [smem:[#allocation2 + $0xc7]]  ;;  %v3852_v39 = vstv %s4403_s6 }
 0x5bd   : > { %v3457_v56 = vpop.permute.xlu1 %3456  ;;  %v3853_v58 = vmul.f32 %v7466_v35, %v3852_v39 }
 0x5be   : > { %v3455_v18 = vpop.permute.xlu0 %3454  ;;  %v3522_v14 = vpop.permute.xlu2 %3521 }
 0x5bf   : > { %v3458_v37 = vsel %vm8537_vm5, %v3455_v18, %v3457_v56  ;;  %v3865_v56 = vstv %s4404_s20  ;;  %vm8551_vm5 = vcmask 629760   ;;  %s4002_s20 = scalar_lea.sflag [#allocation3], %s162_s15 }
 0x5c0   : > { %v3460_v24 = vadd.f32 %v3458_v37, %v3408_v54  ;;  %v3866_v37 = vmul.f32 %v7466_v35, %v3865_v56  ;;  %v3867_v41 = vmul.f32 %v7461_v4, %v3865_v56 }
 0x5c2   : > { %v3800_v0 = vstv %s4399_s28  ;;  %s4422_s28 = sshll.u32 %s4615_s12, 5  ;;  %s4015_s12 = sshll.u32 %s7647_s26, 4  ;;  %s4016_s12 = int_to_ptr.vmem [resolvable:$true] %s4015_s12 }
 0x5c3   : > { %3753 = vrot.lane.b32.xlu1 %v3749_v30, %s8032_s18  ;;  %v3802_v42 = vmul.f32 %v7461_v4, %v3800_v0  ;;  %v3801_v27 = vmul.f32 %v7466_v35, %v3800_v0 }
 0x5c4   : > { %3742 = vrot.lane.b32.xlu0 %v3737_v19, %s8032_s18  ;;  %3755 = vrot.lane.b32.xlu2 %v3750_v52, %s8032_s18  ;;  %v3854_v52 = vmul.f32 %v7461_v4, %v3852_v39 }
 0x5c5   : > { %v3481_v5 = vpop.permute.xlu1 %3480 }
 0x5c6   : > { %v3484_v53 = vsel %vm8538_vm6, %v3481_v5, %v3483_v63  ;;  %v3470_v2 = vpop.permute.xlu0 %3469  ;;  %v3546_v36 = vpop.permute.xlu2 %3545  ;;  %v3878_v5 = vstv %s4405_s5  ;;  %vm8552_vm6 = vmmov %vm8547_vm2 }
 0x5c7   : > { %v3486_v3 = vadd.f32 %v3484_v53, %v3434_v48  ;;  %v3471_v38 = vsel %vm8539_vm7, %v3468_v57, %v3470_v2  ;;  %v3879_v17 = vmul.f32 %v7466_v35, %v3878_v5  ;;  %vm8553_vm7 = vmmov %vm8551_vm5 }
 0x5c8   : > { %v3473_v12 = vadd.f32 %v3471_v38, %v3421_v60  ;;  %v3880_v38 = vmul.f32 %v7461_v4, %v3878_v5 }
 0x5cb   : > { %3768 = vrot.lane.b32.xlu1 %v3763_v43, %s8032_s18 }
 0x5cc   : > { %3766 = vrot.lane.b32.xlu0 %v3762_v11, %s8032_s18  ;;  %3779 = vrot.lane.b32.xlu2 %v3775_v28, %s8032_s18 }
 0x5cd   : > { %v3496_v34 = vpop.permute.xlu1 %3495 }
 0x5ce   : > { %v3494_v49 = vpop.permute.xlu0 %3493  ;;  %v3561_v31 = vpop.permute.xlu2 %3560 }
 0x5cf   : > { %v3497_v40 = vsel %vm8540_vm8, %v3494_v49, %v3496_v34  ;;  %v3904_v34 = vstv %s4407_s16  ;;  %vm8555_vm8 = vmmov %vm8551_vm5 }
 0x5d0   : > { %v3499_v23 = vadd.f32 %v3497_v40, %v3447_v50  ;;  %v3905_v40 = vmul.f32 %v7466_v35, %v3904_v34  ;;  %v3906_v0 = vmul.f32 %v7461_v4, %v3904_v34 }
 0x5d3   : > { %3792 = vrot.lane.b32.xlu1 %v3788_v21, %s8041_s4 }
 0x5d4   : > { %3781 = vrot.lane.b32.xlu0 %v3776_v22, %s8032_s18  ;;  %3794 = vrot.lane.b32.xlu2 %v3789_v7, %s8041_s4  ;;  %s4402_s18 = sld [smem:[#allocation2 + $0x48]] }
 0x5d5   : > { %v3520_v45 = vpop.permute.xlu1 %3519 }
 0x5d6   : > { %v3523_v54 = vsel %vm8541_vm9, %v3520_v45, %v3522_v14  ;;  %v3509_v26 = vpop.permute.xlu0 %3508  ;;  %v3585_v47 = vpop.permute.xlu2 %3584  ;;  %v3917_v45 = vstv %s4408_s30  ;;  %vm8556_vm9 = vmmov %vm8551_vm5 }
 0x5d7   : > { %v3525_v32 = vadd.f32 %v3523_v54, %v3473_v12  ;;  %v3510_v57 = vsel %vm8542_vm12, %v3507_v55, %v3509_v26  ;;  %v3918_v61 = vmul.f32 %v7466_v35, %v3917_v45  ;;  %vm8557_vm12 = vcmask 621568  }
 0x5d8   : > { %v3512_v59 = vadd.f32 %v3510_v57, %v3460_v24  ;;  %v3919_v57 = vmul.f32 %v7461_v4, %v3917_v45 }
 0x5da   : > { %v3839_v20 = vstv %s4402_s18  ;;  %s4014_s18 = scalar_lea.hbm %s7704_s2, %s4422_s28 }
 0x5db   : > { %3807 = vrot.lane.b32.xlu1 %v3802_v42, %s8041_s4  ;;  %v3841_v44 = vmul.f32 %v7461_v4, %v3839_v20  ;;  %v3840_v62 = vmul.f32 %v7466_v35, %v3839_v20  ;;  %s4017_s6 = sshll.u32 %s4014_s18, 4  ;;  %s4018_s6 = int_to_ptr.hbm [resolvable:$true] %s4017_s6 }
 0x5dc   : > { %3805 = vrot.lane.b32.xlu0 %v3801_v27, %s8041_s4  ;;  %3818 = vrot.lane.b32.xlu2 %v3814_v16, %s8041_s4  ;;  %v3930_v16 = vstv %s4409_s1  ;;  %s4555_s5 = sshra.s32 %s4018_s6, 4  ;;  %s4556_s5 = int_to_ptr.hbm [resolvable:$true] %s4555_s5 }
 0x5dd   : > { %v3535_v25 = vpop.permute.xlu1 %3534  ;;  %v3931_v10 = vmul.f32 %v7466_v35, %v3930_v16  ;;  %p4562_p5 = scmp.lt.s32.totalorder %s4556_s5, %s7704_s2 }
 0x5de   : > { %v3533_v8 = vpop.permute.xlu0 %3532  ;;  %v3600_v60 = vpop.permute.xlu2 %3599 }
 0x5df   : > { %v3536_v63 = vsel %vm8543_vm11, %v3533_v8, %v3535_v25  ;;  %v3943_v25 = vstv %s4410_s0  ;;  %vm8558_vm11 = vmmov %vm8557_vm12 }
 0x5e0   : > { %v3538_v13 = vadd.f32 %v3536_v63, %v3486_v3  ;;  %v3944_v63 = vmul.f32 %v7466_v35, %v3943_v25  ;;  %v3945_v20 = vmul.f32 %v7461_v4, %v3943_v25 }
 0x5e3   : > { %3831 = vrot.lane.b32.xlu1 %v3827_v51, %s8041_s4 }
 0x5e4   : > { %3820 = vrot.lane.b32.xlu0 %v3815_v29, %s8041_s4  ;;  %3833 = vrot.lane.b32.xlu2 %v3828_v46, %s8041_s4  ;;  %s4406_s4 = sld [smem:[#allocation2 + $0x49]]  ;;  %v3932_v46 = vmul.f32 %v7461_v4, %v3930_v16 }
 0x5e5   : > { %v3559_v6 = vpop.permute.xlu1 %3558 }
 0x5e6   : > { %v3562_v50 = vsel %vm8544_vm10, %v3559_v6, %v3561_v31  ;;  %v3548_v1 = vpop.permute.xlu0 %3547  ;;  %v3624_v48 = vpop.permute.xlu2 %3623  ;;  %vm8559_vm10 = vmmov %vm8558_vm11 }
 0x5e7   : > { %v3564_v33 = vadd.f32 %v3562_v50, %v3512_v59  ;;  %v3549_v55 = vsel %vm8545_vm0, %v3546_v36, %v3548_v1  ;;  %vm8560_vm0 = vmmov %vm8559_vm10 }
 0x5e8   : > { %v3551_v9 = vadd.f32 %v3549_v55, %v3499_v23 }
 0x5ea   : > { %v3891_v28 = vstv %s4406_s4  ;;  %s4557_s4 = scalar_lea.hbm %s4556_s5, 32 }
 0x5eb   : > { %3846 = vrot.lane.b32.xlu1 %v3841_v44, %s8051_s27  ;;  %v3892_v15 = vmul.f32 %v7466_v35, %v3891_v28  ;;  %v3893_v7 = vmul.f32 %v7461_v4, %v3891_v28  ;;  %p4558_p1 = scmp.ne.s32.totalorder %s4556_s5, %s4557_s4 }
 0x5ec   : > { %3844 = vrot.lane.b32.xlu0 %v3840_v62, %s8051_s27  ;;  %3857 = vrot.lane.b32.xlu2 %v3853_v58, %s8051_s27  ;;  %v3969_v58 = vstv %s4412_s3 }
 0x5ed   : > { %v3574_v18 = vpop.permute.xlu1 %3573  ;;  %v3970_v56 = vmul.f32 %v7466_v35, %v3969_v58  ;;  %p4559_p2 = pnand %p4558_p1, %p4707_p4 }
 0x5ee   : > { %v3572_v30 = vpop.permute.xlu0 %3571  ;;  %v3639_v24 = vpop.permute.xlu2 %3638 }
 0x5ef   : > { %v3575_v14 = vsel %vm8546_vm1, %v3572_v30, %v3574_v18  ;;  %v3982_v18 = vstv %s4413_s24  ;;  %vm8561_vm1 = vcmask 523264   ;;  %p4560_p3 = pneg %p4559_p2 }
 0x5f0   : > { %v3577_v19 = vadd.f32 %v3575_v14, %v3525_v32  ;;  %v3983_v14 = vmul.f32 %v7466_v35, %v3982_v18  ;;  %v3984_v5 = vmul.f32 %v7461_v4, %v3982_v18 }
 0x5f3   : > { %3870 = vrot.lane.b32.xlu1 %v3866_v37, %s8051_s27 }
 0x5f4   : > { %3859 = vrot.lane.b32.xlu0 %v3854_v52, %s8051_s27  ;;  %3872 = vrot.lane.b32.xlu2 %v3867_v41, %s8051_s27  ;;  %v3971_v41 = vmul.f32 %v7461_v4, %v3969_v58 }
 0x5f5   : > { %v3598_v53 = vpop.permute.xlu1 %3597 }
 0x5f6   : > { %v3601_v3 = vsel %vm8547_vm2, %v3598_v53, %v3600_v60  ;;  %v3587_v43 = vpop.permute.xlu0 %3586  ;;  %v3663_v12 = vpop.permute.xlu2 %3662  ;;  %vm8562_vm2 = vmmov %vm8561_vm1 }
 0x5f7   : > { %v3603_v2 = vadd.f32 %v3601_v3, %v3551_v9  ;;  %v3588_v36 = vsel %vm8548_vm3, %v3585_v47, %v3587_v43  ;;  %vm8563_vm3 = vmmov %vm8561_vm1 }
 0x5f8   : > { %v3590_v11 = vadd.f32 %v3588_v36, %v3538_v13 }
 0x5fb   : > { %3885 = vrot.lane.b32.xlu1 %v3880_v38, %s8051_s27 }
 0x5fc   : > { %3883 = vrot.lane.b32.xlu0 %v3879_v17, %s8051_s27  ;;  %3896 = vrot.lane.b32.xlu2 %v3892_v15, %s8549_s25  ;;  %s4411_s27 = sld [smem:[#allocation2 + $0xca]] }
 0x5fd   : > { %v3613_v49 = vpop.permute.xlu1 %3612 }
 0x5fe   : > { %v3611_v21 = vpop.permute.xlu0 %3610  ;;  %v3678_v23 = vpop.permute.xlu2 %3677 }
 0x5ff   : > { %v3614_v31 = vsel %vm8550_vm4, %v3611_v21, %v3613_v49  ;;  %vm8564_vm4 = vmmov %vm8561_vm1 }
 0x600   : > { %v3616_v22 = vadd.f32 %v3614_v31, %v3564_v33 }
 0x602   : > { %v3956_v6 = vstv %s4411_s27 }
 0x603   : > { %3909 = vrot.lane.b32.xlu1 %v3905_v40, %s8549_s25  ;;  %v3958_v55 = vmul.f32 %v7461_v4, %v3956_v6  ;;  %v3957_v39 = vmul.f32 %v7466_v35, %v3956_v6 }
 0x604   : > { %3898 = vrot.lane.b32.xlu0 %v3893_v7, %s8549_s25  ;;  %3911 = vrot.lane.b32.xlu2 %v3906_v0, %s8549_s25 }
 0x605   : > { %v3637_v54 = vpop.permute.xlu1 %3636 }
 0x606   : > { %v3640_v32 = vsel %vm8551_vm5, %v3637_v54, %v3639_v24  ;;  %v3626_v42 = vpop.permute.xlu0 %3625  ;;  %v3702_v59 = vpop.permute.xlu2 %3701  ;;  %vm8565_vm5 = vcmask 515072  }
 0x607   : > { %v3642_v26 = vadd.f32 %v3640_v32, %v3590_v11  ;;  %v3627_v47 = vsel %vm8552_vm6, %v3624_v48, %v3626_v42  ;;  %vm8566_vm6 = vmmov %vm8565_vm5 }
 0x608   : > { %v3629_v27 = vadd.f32 %v3627_v47, %v3577_v19 }
 0x60b   : > { %3924 = vrot.lane.b32.xlu1 %v3919_v57, %s8549_s25 }
 0x60c   : > { %3922 = vrot.lane.b32.xlu0 %v3918_v61, %s8549_s25  ;;  %3935 = vrot.lane.b32.xlu2 %v3931_v10, %s8549_s25 }
 0x60d   : > { %v3652_v8 = vpop.permute.xlu1 %3651 }
 0x60e   : > { %v3650_v51 = vpop.permute.xlu0 %3649  ;;  %v3717_v13 = vpop.permute.xlu2 %3716 }
 0x60f   : > { %v3653_v60 = vsel %vm8553_vm7, %v3650_v51, %v3652_v8  ;;  %vm8567_vm7 = vmmov %vm8565_vm5 }
 0x610   : > { %v3655_v29 = vadd.f32 %v3653_v60, %v3603_v2 }
 0x613   : > { %3948 = vrot.lane.b32.xlu1 %v3944_v63, %s8554_s8 }
 0x614   : > { %3937 = vrot.lane.b32.xlu0 %v3932_v46, %s8549_s25  ;;  %3950 = vrot.lane.b32.xlu2 %v3945_v20, %s8554_s8  ;;  %s4561_s25 = scalar_lea.hbm %s7704_s2, 64 }
 0x615   : > { %v3676_v50 = vpop.permute.xlu1 %3675  ;;  %p4563_p6 = scmp.lt.s32.totalorder %s4561_s25, %s4557_s4 }
 0x616   : > { %v3679_v33 = vsel %vm8555_vm8, %v3676_v50, %v3678_v23  ;;  %v3665_v44 = vpop.permute.xlu0 %3664  ;;  %v3741_v9 = vpop.permute.xlu2 %3740  ;;  %vm8568_vm8 = vmmov %vm8565_vm5 }
 0x617   : > { %v3681_v1 = vadd.f32 %v3679_v33, %v3629_v27  ;;  %v3666_v48 = vsel %vm8556_vm9, %v3663_v12, %v3665_v44  ;;  %p4564_p7 = por %p4563_p6, %p4562_p5 }
 0x618   : > { %v3668_v62 = vadd.f32 %v3666_v48, %v3616_v22 }
 0x619   : > { %p4565_p9 = pnand %p4564_p7, %p4560_p3 }
 0x61b   : > { %3963 = vrot.lane.b32.xlu1 %v3958_v55, %s8554_s8 }
 0x61c   : > { %3961 = vrot.lane.b32.xlu0 %v3957_v39, %s8554_s8  ;;  %3974 = vrot.lane.b32.xlu2 %v3970_v56, %s8554_s8 }
 0x61d   : > { %v3691_v30 = vpop.permute.xlu1 %3690 }
 0x61e   : > { %v3689_v37 = vpop.permute.xlu0 %3688  ;;  %v3756_v19 = vpop.permute.xlu2 %3755 }
 0x61f   : > { %v3692_v24 = vsel %vm8557_vm12, %v3689_v37, %v3691_v30 }
 0x620   : > { %v3694_v52 = vadd.f32 %v3692_v24, %v3642_v26 }
 0x623   : > { %3987 = vrot.lane.b32.xlu1 %v3983_v14, %s8554_s8 }
 0x624   : > { %3976 = vrot.lane.b32.xlu0 %v3971_v41, %s8554_s8  ;;  %3989 = vrot.lane.b32.xlu2 %v3984_v5, %s8554_s8 }
 0x625   : > { %v3715_v53 = vpop.permute.xlu1 %3714 }
 0x626   : > { %v3718_v3 = vsel %vm8558_vm11, %v3715_v53, %v3717_v13  ;;  %v3704_v43 = vpop.permute.xlu0 %3703  ;;  %v3780_v38 = vpop.permute.xlu2 %3779 }
 0x627   : > { %v3720_v2 = vadd.f32 %v3718_v3, %v3668_v62  ;;  %v3705_v35 = vsel %vm8559_vm10, %v3702_v59, %v3704_v43 }
 0x628   : > { %v3707_v36 = vadd.f32 %v3705_v35, %v3655_v29 }
 0x62d   : > { %v3730_v12 = vpop.permute.xlu1 %3729 }
 0x62e   : > { %v3728_v11 = vpop.permute.xlu0 %3727  ;;  %v3795_v4 = vpop.permute.xlu2 %3794 }
 0x62f   : > { %v3731_v17 = vsel %vm8560_vm0, %v3728_v11, %v3730_v12 }
 0x630   : > { %v3733_v28 = vadd.f32 %v3731_v17, %v3681_v1 }
 0x635   : > { %v3754_v15 = vpop.permute.xlu1 %3753 }
 0x636   : > { %v3757_v34 = vsel %vm8561_vm1, %v3754_v15, %v3756_v19  ;;  %v3743_v21 = vpop.permute.xlu0 %3742  ;;  %v3819_v23 = vpop.permute.xlu2 %3818 }
 0x637   : > { %v3759_v49 = vadd.f32 %v3757_v34, %v3707_v36  ;;  %v3744_v40 = vsel %vm8562_vm2, %v3741_v9, %v3743_v21 }
 0x638   : > { %v3746_v31 = vadd.f32 %v3744_v40, %v3694_v52 }
 0x63d   : > { %v3769_v22 = vpop.permute.xlu1 %3768 }
 0x63e   : > { %v3767_v7 = vpop.permute.xlu0 %3766  ;;  %v3834_v54 = vpop.permute.xlu2 %3833 }
 0x63f   : > { %v3770_v0 = vsel %vm8563_vm3, %v3767_v7, %v3769_v22 }
 0x640   : > { %v3772_v45 = vadd.f32 %v3770_v0, %v3720_v2 }
 0x645   : > { %v3793_v32 = vpop.permute.xlu1 %3792 }
 0x646   : > { %v3782_v26 = vpop.permute.xlu0 %3781  ;;  %v3858_v59 = vpop.permute.xlu2 %3857  ;;  %v3796_v55 = vsel %vm8566_vm6, %v3793_v32, %v3795_v4 }
 0x647   : > { %v3783_v42 = vsel %vm8564_vm4, %v3780_v38, %v3782_v26  ;;  %v3798_v39 = vadd.f32 %v3796_v55, %v3746_v31 }
 0x648   : > { %v3785_v57 = vadd.f32 %v3783_v42, %v3733_v28 }
 0x64d   : > { %v3808_v47 = vpop.permute.xlu1 %3807 }
 0x64e   : > { %v3806_v27 = vpop.permute.xlu0 %3805  ;;  %v3873_v10 = vpop.permute.xlu2 %3872 }
 0x64f   : > { %v3809_v19 = vsel %vm8567_vm7, %v3806_v27, %v3808_v47 }
 0x650   : > { %v3811_v5 = vadd.f32 %v3809_v19, %v3759_v49 }
 0x655   : > { %v3832_v61 = vpop.permute.xlu1 %3831 }
 0x656   : > { %v3821_v16 = vpop.permute.xlu0 %3820  ;;  %v3897_v60 = vpop.permute.xlu2 %3896  ;;  %v3835_v43 = vsel %vm8568_vm8, %v3832_v61, %v3834_v54 }
 0x657   : > { %v3822_v25 = vsel %vm8565_vm5, %v3819_v23, %v3821_v16  ;;  %v3837_v11 = vadd.f32 %v3835_v43, %v3785_v57 }
 0x658   : > { %v3824_v8 = vadd.f32 %v3822_v25, %v3772_v45 }
 0x65d   : > { %v3847_v51 = vpop.permute.xlu1 %3846 }
 0x65e   : > { %v3845_v63 = vpop.permute.xlu0 %3844  ;;  %v3912_v46 = vpop.permute.xlu2 %3911 }
 0x65f   : > { %v3848_v62 = vsel %vm1311_vm15, %v3845_v63, %v3847_v51 }
 0x660   : > { %v3850_v56 = vadd.f32 %v3848_v62, %v3798_v39 }
 0x665   : > { %v3871_v13 = vpop.permute.xlu1 %3870 }
 0x666   : > { %v3860_v29 = vpop.permute.xlu0 %3859  ;;  %v3936_v33 = vpop.permute.xlu2 %3935  ;;  %v3874_v4 = vsel %vm1311_vm15, %v3871_v13, %v3873_v10 }
 0x667   : > { %v3861_v41 = vsel %vm1311_vm15, %v3858_v59, %v3860_v29  ;;  %v3876_v21 = vadd.f32 %v3874_v4, %v3824_v8 }
 0x668   : > { %v3863_v3 = vadd.f32 %v3861_v41, %v3811_v5 }
 0x66d   : > { %v3886_v20 = vpop.permute.xlu1 %3885 }
 0x66e   : > { %v3884_v6 = vpop.permute.xlu0 %3883  ;;  %v3951_v9 = vpop.permute.xlu2 %3950 }
 0x66f   : > { %v3887_v36 = vsel %vm1311_vm15, %v3884_v6, %v3886_v20 }
 0x670   : > { %v3889_v15 = vadd.f32 %v3887_v36, %v3837_v11 }
 0x675   : > { %v3910_v50 = vpop.permute.xlu1 %3909 }
 0x676   : > { %v3899_v1 = vpop.permute.xlu0 %3898  ;;  %v3975_v52 = vpop.permute.xlu2 %3974  ;;  %v3913_v53 = vsel %vm1364_vm13, %v3910_v50, %v3912_v46 }
 0x677   : > { %v3900_v58 = vsel %vm1364_vm13, %v3897_v60, %v3899_v1  ;;  %v3915_v35 = vadd.f32 %v3913_v53, %v3863_v3 }
 0x678   : > { %v3902_v18 = vadd.f32 %v3900_v58, %v3850_v56 }
 0x67d   : > { %v3925_v44 = vpop.permute.xlu1 %3924 }
 0x67e   : > { %v3923_v48 = vpop.permute.xlu0 %3922  ;;  %v3990_v34 = vpop.permute.xlu2 %3989 }
 0x67f   : > { %v3926_v49 = vsel %vm1364_vm13, %v3923_v48, %v3925_v44 }
 0x680   : > { %v3928_v22 = vadd.f32 %v3926_v49, %v3876_v21 }
 0x685   : > { %v3949_v30 = vpop.permute.xlu1 %3948 }
 0x686   : > { %v3952_v37 = vsel %vm1417_vm14, %v3949_v30, %v3951_v9  ;;  %v3938_v24 = vpop.permute.xlu0 %3937 }
 0x687   : > { %v3954_v14 = vadd.f32 %v3952_v37, %v3902_v18  ;;  %v3939_v28 = vsel %vm1364_vm13, %v3936_v33, %v3938_v24 }
 0x688   : > { %v3941_v40 = vadd.f32 %v3939_v28, %v3889_v15 }
 0x689   : > { %3994 = vst [vmem:[%s7647_s26] sm:$0xff] %v3954_v14 }
 0x68d   : > { %v3964_v2 = vpop.permute.xlu1 %3963 }
 0x68e   : > { %v3962_v38 = vpop.permute.xlu0 %3961 }
 0x68f   : > { %v3965_v12 = vsel %vm1417_vm14, %v3962_v38, %v3964_v2 }
 0x690   : > { %v3967_v17 = vadd.f32 %v3965_v12, %v3915_v35 }
 0x692   : > { %4414 = vst [vmem:[%s7647_s26 + $0x8] sm:$0xff] %v3967_v17 }
 0x695   : > { %v3988_v31 = vpop.permute.xlu1 %3987 }
 0x696   : > { %v3991_v23 = vsel %vm1417_vm14, %v3988_v31, %v3990_v34  ;;  %v3977_v0 = vpop.permute.xlu0 %3976 }
 0x697   : > { %v3993_v7 = vadd.f32 %v3991_v23, %v3941_v40  ;;  %v3978_v45 = vsel %vm1417_vm14, %v3975_v52, %v3977_v0 }
 0x698   : > { %v3980_v54 = vadd.f32 %v3978_v45, %v3928_v22 }
 0x699   : > { %4416 = vst [vmem:[%s7647_s26 + $0x18] sm:$0xff] %v3993_v7 }
 0x69a   : > { %4415 = vst [vmem:[%s7647_s26 + $0x10] sm:$0xff] %v3980_v54 }
 0x69b   : > { %4568 = shalt.err (!%p4565_p9)
}
 0x69c   : > { %s4650_s27 = smov 128   ;;  %s4651_s3 = smov 8  }
 0x69d   : > { %4428 = dma.vmem_to_hbm [thread:$0]  (%p4707_p4), %s4016_s12, 512, %s4018_s6, %s4002_s20, %s4650_s27, %s4650_s27, %s4651_s3  }
 0x69e PF: > { %p4440_p10 = scmp.ge.s32.totalorder %s4623_s14, 2  ;;  %s4032_s8 = sand.u32 1, %s4603_s9  }
 0x69f   : > { %s4033_s24 = scalar_lea.sflag [#allocation3], %s4032_s8 }
 0x6a0   : > { %p4435_p11 = pnand %p4440_p10, %p4714_p8 }
 0x6a2   : > { %p4436_p12 = pneg %p4435_p11 }
 0x6a4   : > { %4598 = dma.done.wait (%p4436_p12), %s4033_s24, 512  }
 0x6a5   : > { %4600 = vsyncadd (%p4436_p12), %s4033_s24, 4294966784  ;;  %s16_s14 = sadd.s32 1, %s4623_s14   ;;  %s8569_s9 = smov %s4607_s10 }
 0x6a6   : > { %p13_p13 = scmp.ge.s32.totalorder %s16_s14, 4   ;;  %s8570_s10 = smov %s4611_s11 }
 0x6a7   : > { %s8571_s11 = smov %s4720_s22  ;;  %s8572_s12 = smov %s4619_s13 }
 0x6a8   : > { %s8573_s13 = smov %s8575_s17  ;;  %15 = sbr.rel (!%p13_p13) target bundleno = 8 (0x8), region = 73 }
 0x6ad   :  { %4039 = vsyncpa [#allocation3], 1 }
 0x6ae   :  { %4041 = vsyncpa [#allocation3 + $0x1], 1 }
 0x6af   :  { %4042 = vsyncpa [#allocation4], 1 }
 0x6b0   :  { %4044 = vsyncpa [#allocation4 + $0x1], 1 }

</bundles_post_ra>
